<compile_context>
chip_gen: v7x
topology: tpu7x:2x2x1
jax: 0.10.0
libtpu: 0.0.40
codegen_flags: <defaults>
</compile_context>

<pallas_src>
import functools

import jax
import jax.numpy as jnp
import numpy as np
from jax import lax
from jax.experimental import pallas as pl
from jax.experimental.pallas import tpu as pltpu


def _round_up(x, m):
    return ((x + m - 1) // m) * m


def _chip_budget():
    """Return (vmem_limit_bytes, pixel-tile target) chosen per TPU generation."""
    try:
        cap = int(pltpu.get_tpu_info().vmem_capacity_bytes)
    except Exception:
        cap = 64 * 1024 * 1024
    if cap >= 96 * 1024 * 1024:                      # v5e / v6e: 128 MiB VMEM
        return min(96 * 1024 * 1024, (cap * 3) // 4), 512
    return min(40 * 1024 * 1024, (cap * 5) // 8), 256  # v7x: 64 MiB physical


# ----------------------------- Pallas kernels ------------------------------ #

def _fused_conv_kernel(lhs_ref, wd_ref, wu_ref, o_ref):
    # LeakyReLU(0.2) -> down conv (one merged K=16*Cin matmul) -> ReLU -> up conv.
    # Transposed layout (features x pixels): lhs (K16p, tm), wd (inner, K16p),
    # wu (16*Cp, inner), out (16*Cp, tm).  Activations in f32, bf16 MXU operands,
    # f32 accumulation, bf16 output store.
    p = lhs_ref[...].astype(jnp.float32)
    p = jnp.where(p >= 0.0, p, 0.2 * p).astype(jnp.bfloat16)        # LeakyReLU(0.2)
    d = jnp.dot(wd_ref[...], p, preferred_element_type=jnp.float32)  # (inner, tm)
    d = jnp.maximum(d, 0.0).astype(jnp.bfloat16)                     # ReLU
    o_ref[...] = jnp.dot(wu_ref[...], d,
                         preferred_element_type=jnp.float32).astype(o_ref.dtype)


def _col2im_stats_kernel(cols_ref, y_ref, s_ref, q_ref, acc_ref):
    # Fused col2im (overlap-add of the 16 ConvTranspose taps) + BN statistics.
    #   cols_ref: (16*Cp, 1, Ho, Wo) bf16, tap rows ordered (dh, dw, ph, pw, ch)
    #   y_ref:    (1, Cp, H, W) f32  -- this image's up-conv output, NCHW layout
    #   s_ref/q_ref: (1, Cp, 1) f32  -- per-image per-channel sum / sum of squares
    #   acc_ref:  (4*Cp, Ho+1, Wo+1) f32 scratch, rows ordered (ph, pw, ch)
    c16, _, ho, wo = cols_ref.shape
    grp = c16 // 4
    cp = grp // 4
    wfull = 2 * wo
    v = cols_ref[:, 0].astype(jnp.float32)                   # (16*Cp, Ho, Wo)

    # Overlap-add of the 4 (dh, dw) tap groups into the padded parity grid.
    acc_ref[...] = jnp.zeros(acc_ref.shape, acc_ref.dtype)
    for dh in range(2):
        for dw in range(2):
            g0 = (2 * dh + dw) * grp
            acc_ref[:, dh:dh + ho, dw:dw + wo] = (
                acc_ref[:, dh:dh + ho, dw:dw + wo] + v[g0:g0 + grp])

    ssum = jnp.zeros((cp, 1), jnp.float32)
    ssq = jnp.zeros((cp, 1), jnp.float32)
    col_blocks = []
    for tp in range(2):                                      # output-column parity
        row_planes = []
        for sp in range(2):                                  # output-row parity
            ph, pw = 1 - sp, 1 - tp
            c0 = (2 * ph + pw) * cp
            plane = acc_ref[c0:c0 + cp, sp:sp + ho, tp:tp + wo]   # (Cp, Ho, Wo)
            ssum = ssum + jnp.sum(jnp.sum(plane, axis=2), axis=1, keepdims=True)
            ssq = ssq + jnp.sum(jnp.sum(plane * plane, axis=2), axis=1,
                                keepdims=True)
            row_planes.append(plane)
        # interleave the two row parities -> (Cp, H, Wo)
        col_blocks.append(
            jnp.stack(row_planes, axis=2).reshape(cp, 2 * ho, wo))
    # interleave the two column parities -> (Cp, H, W), already NCHW
    y_ref[0] = jnp.stack(col_blocks, axis=-1).reshape(cp, 2 * ho, wfull)
    s_ref[0] = ssum
    q_ref[0] = ssq


def _bn_concat_kernel(x_ref, y_ref, a_ref, b_ref, o_ref):
    # Fused BatchNorm normalize + skip concat: x and the normalized y are written
    # straight into the channel-offset halves of the NCHW output (lane dim = H*W).
    cin = x_ref.shape[1]
    cout = o_ref.shape[1] - cin
    o_ref[0, :cin, :] = x_ref[0].astype(o_ref.dtype)
    yn = y_ref[0] * a_ref[...] + b_ref[...]                  # (Cp, HW)*(Cp,1)+(Cp,1)
    o_ref[0, cin:, :] = yn[:cout, :].astype(o_ref.dtype)


# ----------------------------- pallas_call glue ----------------------------- #

def _fused_down_up(lhs_t, wd_t, wu_t, tile_m, vmem_limit):
    k16p, mp = lhs_t.shape
    inner = wd_t.shape[0]
    n_up = wu_t.shape[0]
    cost = pl.CostEstimate(
        flops=2 * mp * inner * (k16p + n_up),
        transcendentals=0,
        bytes_accessed=2 * (k16p * mp + inner * k16p + n_up * inner + n_up * mp))
    return pl.pallas_call(
        _fused_conv_kernel,
        out_shape=jax.ShapeDtypeStruct((n_up, mp), jnp.bfloat16),
        grid_spec=pltpu.PrefetchScalarGridSpec(
            num_scalar_prefetch=0,
            grid=(mp // tile_m,),
            in_specs=[
                pl.BlockSpec((k16p, tile_m), lambda i: (0, i)),
                # constant-index weight blocks: fetched once, VMEM resident
                pl.BlockSpec((inner, k16p), lambda i: (0, 0)),
                pl.BlockSpec((n_up, inner), lambda i: (0, 0)),
            ],
            out_specs=pl.BlockSpec((n_up, tile_m), lambda i: (0, i)),
        ),
        compiler_params=pltpu.CompilerParams(
            dimension_semantics=("parallel",),
            vmem_limit_bytes=vmem_limit),
        cost_estimate=cost,
    )(lhs_t, wd_t, wu_t)


def _col2im_bn_stats(cols_t, n_img, ho, wo, vmem_limit):
    c16 = cols_t.shape[0]
    cp = c16 // 16
    return pl.pallas_call(
        _col2im_stats_kernel,
        out_shape=(
            jax.ShapeDtypeStruct((n_img, cp, 2 * ho, 2 * wo), jnp.float32),
            jax.ShapeDtypeStruct((n_img, cp, 1), jnp.float32),
            jax.ShapeDtypeStruct((n_img, cp, 1), jnp.float32),
        ),
        grid_spec=pltpu.PrefetchScalarGridSpec(
            num_scalar_prefetch=0,
            grid=(n_img,),
            in_specs=[pl.BlockSpec((c16, 1, ho, wo), lambda n: (0, n, 0, 0))],
            out_specs=[
                pl.BlockSpec((1, cp, 2 * ho, 2 * wo), lambda n: (n, 0, 0, 0)),
                pl.BlockSpec((1, cp, 1), lambda n: (n, 0, 0)),
                pl.BlockSpec((1, cp, 1), lambda n: (n, 0, 0)),
            ],
            scratch_shapes=[pltpu.VMEM((4 * cp, ho + 1, wo + 1), jnp.float32)],
        ),
        compiler_params=pltpu.CompilerParams(
            dimension_semantics=("parallel",),
            vmem_limit_bytes=vmem_limit),
    )(cols_t)


def _bn_concat(x_flat, y_flat, scale, shift, cout, vmem_limit):
    n_img, cin, hw = x_flat.shape
    cp = y_flat.shape[1]
    return pl.pallas_call(
        _bn_concat_kernel,
        out_shape=jax.ShapeDtypeStruct((n_img, cin + cout, hw), jnp.float32),
        grid_spec=pltpu.PrefetchScalarGridSpec(
            num_scalar_prefetch=0,
            grid=(n_img,),
            in_specs=[
                pl.BlockSpec((1, cin, hw), lambda n: (n, 0, 0)),
                pl.BlockSpec((1, cp, hw), lambda n: (n, 0, 0)),
                pl.BlockSpec((cp, 1), lambda n: (0, 0)),
                pl.BlockSpec((cp, 1), lambda n: (0, 0)),
            ],
            out_specs=pl.BlockSpec((1, cin + cout, hw), lambda n: (n, 0, 0)),
        ),
        compiler_params=pltpu.CompilerParams(
            dimension_semantics=("parallel",),
            vmem_limit_bytes=vmem_limit),
    )(x_flat, y_flat, scale, shift)


# ------------------------------ forward pass ------------------------------- #

def unet_innermost_forward(x_nchw, params):
    w_down = params["w_down"]   # (inner_nc, input_nc, 4, 4)  Conv2d weight
    w_up = params["w_up"]       # (inner_nc, outer_nc, 4, 4)  ConvTranspose2d weight
    gamma, beta = params["bn_gamma"], params["bn_beta"]

    n_img, cin, h, w = x_nchw.shape
    assert h % 2 == 0 and w % 2 == 0
    inner = w_down.shape[0]
    cout = w_up.shape[1]
    ho, wo = h // 2, w // 2
    m = n_img * ho * wo
    hw = h * w

    vmem_limit, tile_target = _chip_budget()

    # ---- NHWC + pad(1) + space-to-depth(2) + single merged im2col operand ----
    k16 = 16 * cin
    k16p = _round_up(k16, 128)
    xh = jnp.transpose(x_nchw, (0, 2, 3, 1))
    xp = jnp.pad(xh, ((0, 0), (1, 1), (1, 1), (0, 0)))
    xs = xp.reshape(n_img, ho + 1, 2, wo + 1, 2, cin)
    xs = xs.transpose(0, 1, 3, 2, 4, 5).reshape(n_img, ho + 1, wo + 1, 4 * cin)
    cells = [xs[:, ch:ch + ho, cw:cw + wo, :] for ch in range(2) for cw in range(2)]
    lhs = jnp.concatenate(cells, axis=-1).reshape(m, k16)
    # (perf note: a halo-block BlockSpec over xs would avoid this ~4x duplication)

    tile_m = min(tile_target, _round_up(m, 8))
    mp = _round_up(m, tile_m)
    lhs_t = jnp.pad(jnp.transpose(lhs, (1, 0)),
                    ((0, k16p - k16), (0, mp - m))).astype(jnp.bfloat16)

    # ---- weight packing (merged down-conv matmul, channel-padded up conv) ----
    cp = _round_up(cout, 8)                       # 16*cp is a multiple of 128
    # down: (co, ci, kh=2*ch+dh, kw=2*cw+dw) -> K rows (ch, cw, dh, dw, ci), then T
    wd = w_down.reshape(inner, cin, 2, 2, 2, 2)
    wd = wd.transpose(2, 4, 3, 5, 1, 0).reshape(k16, inner)
    wd_t = jnp.transpose(jnp.pad(wd, ((0, k16p - k16), (0, 0))),
                         (1, 0)).astype(jnp.bfloat16)              # (inner, k16p)
    # up: (ci, co, kh=2*dh+ph, kw=2*dw+pw) -> tap rows (dh, dw, ph, pw, co), then T
    wu = jnp.pad(w_up, ((0, 0), (0, cp - cout), (0, 0), (0, 0)))
    wu = wu.reshape(inner, cp, 2, 2, 2, 2).transpose(0, 2, 4, 3, 5, 1)
    wu_t = jnp.transpose(wu.reshape(inner, 16 * cp),
                         (1, 0)).astype(jnp.bfloat16)              # (16*cp, inner)

    # ---- kernel A: LeakyReLU -> down conv -> ReLU -> up conv (per-tap rows) ----
    cols_t = _fused_down_up(lhs_t, wd_t, wu_t, tile_m, vmem_limit)  # (16*cp, mp) bf16
    if mp != m:
        cols_t = cols_t[:, :m]
    cols_t = cols_t.reshape(16 * cp, n_img, ho, wo)

    # ---- kernel B: col2im + BN batch statistics (cols read exactly once) ----
    y_img, bsum, bsq = _col2im_bn_stats(cols_t, n_img, ho, wo, vmem_limit)

    # ---- BN scale/shift from per-image partial sums (training-mode batch stats) ----
    cnt = float(n_img * h * w)
    s_tot = jnp.sum(bsum, axis=0)[:, 0]                       # (cp,)
    q_tot = jnp.sum(bsq, axis=0)[:, 0]
    mean = s_tot / cnt
    var = jnp.maximum(q_tot / cnt - mean * mean, 0.0)         # clamp one-pass variance
    inv = lax.rsqrt(var + 1e-5)
    gamma_p = jnp.pad(gamma, (0, cp - cout))
    beta_p = jnp.pad(beta, (0, cp - cout))
    scale = (gamma_p * inv).reshape(cp, 1).astype(jnp.float32)
    shift = (beta_p - mean * gamma_p * inv).reshape(cp, 1).astype(jnp.float32)

    # ---- kernel C: BN normalize + skip concat, written straight into NCHW ----
    x_flat = x_nchw.reshape(n_img, cin, hw)
    y_flat = y_img.reshape(n_img, cp, hw)
    out = _bn_concat(x_flat, y_flat, scale, shift, cout, vmem_limit)
    return out.reshape(n_img, cin + cout, h, w)


# ------------------------------ JAX reference ------------------------------ #

def reference_forward(x_nchw, params):
    w_down, w_up = params["w_down"], params["w_up"]
    gamma, beta = params["bn_gamma"], params["bn_beta"]
    hx = jnp.where(x_nchw >= 0, x_nchw, 0.2 * x_nchw)
    d = lax.conv_general_dilated(hx, w_down, (2, 2), ((1, 1), (1, 1)),
                                 dimension_numbers=('NCHW', 'OIHW', 'NCHW'))
    u = jnp.maximum(d, 0.0)
    # ConvTranspose2d(s=2, p=1, k=4) == dilated conv with flipped kernel, pad k-1-p=2
    w_eq = jnp.transpose(jnp.flip(w_up, axis=(2, 3)), (1, 0, 2, 3))
    y = lax.conv_general_dilated(u, w_eq, (1, 1), ((2, 2), (2, 2)),
                                 lhs_dilation=(2, 2),
                                 dimension_numbers=('NCHW', 'OIHW', 'NCHW'))
    mean = jnp.mean(y, axis=(0, 2, 3), keepdims=True)
    var = jnp.mean((y - mean) ** 2, axis=(0, 2, 3), keepdims=True)
    yn = (y - mean) * lax.rsqrt(var + 1e-5) * gamma.reshape(1, -1, 1, 1) \
        + beta.reshape(1, -1, 1, 1)
    return jnp.concatenate([x_nchw, yn], axis=1)


# ---------------------------------- main ----------------------------------- #

if __name__ == "__main__":
    key = jax.random.PRNGKey(0)
    k1, k2, k3 = jax.random.split(key, 3)

    N, outer_nc, inner_nc, H, W = 2, 4, 8, 16, 16
    input_nc = outer_nc  # input_nc=None -> outer_nc in the PyTorch module

    x = jax.random.normal(k1, (N, input_nc, H, W), jnp.float32)
    params = {
        # Conv2d(input_nc, inner_nc, 4, 2, 1, bias=False)  (BatchNorm -> use_bias=False)
        "w_down": 0.02 * jax.random.normal(k2, (inner_nc, input_nc, 4, 4), jnp.float32),
        # ConvTranspose2d(inner_nc, outer_nc, 4, 2, 1, bias=False)
        "w_up": 0.02 * jax.random.normal(k3, (inner_nc, outer_nc, 4, 4), jnp.float32),
        # BatchNorm2d(outer_nc) default affine init
        "bn_gamma": jnp.ones((outer_nc,), jnp.float32),
        "bn_beta": jnp.zeros((outer_nc,), jnp.float32),
    }

    fwd = jax.jit(functools.partial(unet_innermost_forward, params=params))
    out = jax.block_until_ready(fwd(x))

    ref = reference_forward(x, params)
    # tolerance covers bf16 MXU operands + bf16 storage of the up-conv taps
    np.testing.assert_allclose(np.asarray(out), np.asarray(ref), atol=2e-2, rtol=2e-2)
    assert out.shape == (N, input_nc + outer_nc, H, W)

    print("KERNEL_OK")
</pallas_src>

<mosaic_0001>
module attributes {stable_mosaic.version = 11 : i64} {
  func.func @_fused_conv_kernel(%arg0: i32, %arg1: memref<128x128xbf16, #tpu.memory_space<vmem>>, %arg2: memref<8x128xbf16, #tpu.memory_space<vmem>>, %arg3: memref<128x8xbf16, #tpu.memory_space<vmem>>, %arg4: memref<128x128xbf16, #tpu.memory_space<vmem>>) attributes {dimension_semantics = [#tpu.dimension_semantics<parallel>], iteration_bounds = array<i64: 1>, scalar_prefetch = 0 : i64, scratch_operands = 0 : i64, tpu.core_type = #tpu.core_type<tc>, window_params = [{transform_indices = @transform_0, window_bounds = array<i64: 128, 128>}, {pipeline_mode = #tpu.pipeline_mode<synchronous>, transform_indices = @transform_1, window_bounds = array<i64: 8, 128>}, {pipeline_mode = #tpu.pipeline_mode<synchronous>, transform_indices = @transform_2, window_bounds = array<i64: 128, 8>}, {transform_indices = @transform_3, window_bounds = array<i64: 128, 128>}]} {
    %c0 = arith.constant 0 : index
    %c0_0 = arith.constant 0 : index
    %0 = vector.load %arg1[%c0, %c0_0] : memref<128x128xbf16, #tpu.memory_space<vmem>>, vector<128x128xbf16>
    %1 = arith.extf %0 : vector<128x128xbf16> to vector<128x128xf32>
    %cst = arith.constant 0.000000e+00 : f32
    %2 = vector.broadcast %cst : f32 to vector<128x128xf32>
    %3 = arith.cmpf oge, %1, %2 : vector<128x128xf32>
    %cst_1 = arith.constant 2.000000e-01 : f32
    %4 = vector.broadcast %cst_1 : f32 to vector<128x128xf32>
    %5 = arith.mulf %4, %1 : vector<128x128xf32>
    %6 = arith.select %3, %1, %5 : vector<128x128xi1>, vector<128x128xf32>
    %7 = arith.truncf %6 : vector<128x128xf32> to vector<128x128xbf16>
    %c0_2 = arith.constant 0 : index
    %c0_3 = arith.constant 0 : index
    %8 = vector.load %arg2[%c0_2, %c0_3] : memref<8x128xbf16, #tpu.memory_space<vmem>>, vector<8x128xbf16>
    %cst_4 = arith.constant dense<0.000000e+00> : vector<8x128xf32>
    %9 = tpu.matmul %8, %7, %cst_4 {dimension_numbers = #tpu.dot_dimension_numbers<[1], [0], [0], [1], [0, 0, 1, 1], [], []>} : vector<8x128xbf16>, vector<128x128xbf16>, vector<8x128xf32> -> vector<8x128xf32>
    %cst_5 = arith.constant 0.000000e+00 : f32
    %10 = vector.broadcast %cst_5 : f32 to vector<8x128xf32>
    %11 = arith.maximumf %9, %10 : vector<8x128xf32>
    %12 = arith.truncf %11 : vector<8x128xf32> to vector<8x128xbf16>
    %c0_6 = arith.constant 0 : index
    %c0_7 = arith.constant 0 : index
    %13 = vector.load %arg3[%c0_6, %c0_7] : memref<128x8xbf16, #tpu.memory_space<vmem>>, vector<128x8xbf16>
    %cst_8 = arith.constant dense<0.000000e+00> : vector<128x128xf32>
    %14 = tpu.matmul %13, %12, %cst_8 {dimension_numbers = #tpu.dot_dimension_numbers<[1], [0], [0], [1], [0, 0, 1, 1], [], []>} : vector<128x8xbf16>, vector<8x128xbf16>, vector<128x128xf32> -> vector<128x128xf32>
    %15 = arith.truncf %14 : vector<128x128xf32> to vector<128x128xbf16>
    %c0_9 = arith.constant 0 : index
    %c0_10 = arith.constant 0 : index
    %16 = vector.load %arg4[%c0_9, %c0_10] : memref<128x128xbf16, #tpu.memory_space<vmem>>, vector<128x128xbf16>
    tpu.vector_store %arg4[%c0_9, %c0_10], %15 {strides = array<i32>} : memref<128x128xbf16, #tpu.memory_space<vmem>>, vector<128x128xbf16>,
    return
  }
  func.func @transform_0(%arg0: i32) -> (i32, i32) {
    %c0_i32 = arith.constant 0 : i32
    %c0_i32_0 = arith.constant 0 : i32
    return %c0_i32, %arg0 : i32, i32
  }
  func.func @transform_1(%arg0: i32) -> (i32, i32) {
    %c0_i32 = arith.constant 0 : i32
    %c0_i32_0 = arith.constant 0 : i32
    %c0_i32_1 = arith.constant 0 : i32
    return %c0_i32, %c0_i32_0 : i32, i32
  }
  func.func @transform_2(%arg0: i32) -> (i32, i32) {
    %c0_i32 = arith.constant 0 : i32
    %c0_i32_0 = arith.constant 0 : i32
    %c0_i32_1 = arith.constant 0 : i32
    return %c0_i32, %c0_i32_0 : i32, i32
  }
  func.func @transform_3(%arg0: i32) -> (i32, i32) {
    %c0_i32 = arith.constant 0 : i32
    %c0_i32_0 = arith.constant 0 : i32
    return %c0_i32, %arg0 : i32, i32
  }
}

module attributes {stable_mosaic.version = 11 : i64} {
  func.func @_col2im_stats_kernel(%arg0: i32, %arg1: memref<128x1x8x8xbf16, #tpu.memory_space<vmem>>, %arg2: memref<1x8x16x16xf32, #tpu.memory_space<vmem>>, %arg3: memref<1x8x1xf32, #tpu.memory_space<vmem>>, %arg4: memref<1x8x1xf32, #tpu.memory_space<vmem>>, %arg5: memref<32x9x9xf32, #tpu.memory_space<vmem>>) attributes {dimension_semantics = [#tpu.dimension_semantics<parallel>], iteration_bounds = array<i64: 2>, scalar_prefetch = 0 : i64, scratch_operands = 1 : i64, tpu.core_type = #tpu.core_type<tc>, window_params = [{transform_indices = @transform_0, window_bounds = array<i64: 128, 1, 8, 8>}, {transform_indices = @transform_1, window_bounds = array<i64: 1, 8, 16, 16>}, {transform_indices = @transform_2, window_bounds = array<i64: 1, 8, 1>}, {transform_indices = @transform_3, window_bounds = array<i64: 1, 8, 1>}]} {
    %c0 = arith.constant 0 : index
    %c0_0 = arith.constant 0 : index
    %c0_1 = arith.constant 0 : index
    %c0_2 = arith.constant 0 : index
    %0 = vector.load %arg1[%c0, %c0_0, %c0_1, %c0_2] : memref<128x1x8x8xbf16, #tpu.memory_space<vmem>>, vector<128x1x8x8xbf16>
    %1 = vector.shape_cast %0 : vector<128x1x8x8xbf16> to vector<128x8x8xbf16>
    %2 = arith.extf %1 : vector<128x8x8xbf16> to vector<128x8x8xf32>
    %cst = arith.constant 0.000000e+00 : f32
    %3 = vector.broadcast %cst : f32 to vector<32x9x9xf32>
    %c0_3 = arith.constant 0 : index
    %c0_4 = arith.constant 0 : index
    %c0_5 = arith.constant 0 : index
    %4 = vector.load %arg5[%c0_3, %c0_4, %c0_5] : memref<32x9x9xf32, #tpu.memory_space<vmem>>, vector<32x9x9xf32>
    tpu.vector_store %arg5[%c0_3, %c0_4, %c0_5], %3 {strides = array<i32>} : memref<32x9x9xf32, #tpu.memory_space<vmem>>, vector<32x9x9xf32>,
    %c0_6 = arith.constant 0 : index
    %c0_7 = arith.constant 0 : index
    %c0_8 = arith.constant 0 : index
    %5 = vector.load %arg5[%c0_6, %c0_7, %c0_8] : memref<32x9x9xf32, #tpu.memory_space<vmem>>, vector<32x8x8xf32>
    %6 = vector.extract_strided_slice %2 {offsets = [0, 0, 0], sizes = [32, 8, 8], strides = [1, 1, 1]} : vector<128x8x8xf32> to vector<32x8x8xf32>
    %7 = arith.addf %5, %6 : vector<32x8x8xf32>
    %c0_9 = arith.constant 0 : index
    %c0_10 = arith.constant 0 : index
    %c0_11 = arith.constant 0 : index
    %8 = vector.load %arg5[%c0_9, %c0_10, %c0_11] : memref<32x9x9xf32, #tpu.memory_space<vmem>>, vector<32x8x8xf32>
    tpu.vector_store %arg5[%c0_9, %c0_10, %c0_11], %7 {strides = array<i32>} : memref<32x9x9xf32, #tpu.memory_space<vmem>>, vector<32x8x8xf32>,
    %c0_12 = arith.constant 0 : index
    %c0_13 = arith.constant 0 : index
    %c1 = arith.constant 1 : index
    %9 = vector.load %arg5[%c0_12, %c0_13, %c1] : memref<32x9x9xf32, #tpu.memory_space<vmem>>, vector<32x8x8xf32>
    %10 = vector.extract_strided_slice %2 {offsets = [32, 0, 0], sizes = [32, 8, 8], strides = [1, 1, 1]} : vector<128x8x8xf32> to vector<32x8x8xf32>
    %11 = arith.addf %9, %10 : vector<32x8x8xf32>
    %c0_14 = arith.constant 0 : index
    %c0_15 = arith.constant 0 : index
    %c1_16 = arith.constant 1 : index
    %12 = vector.load %arg5[%c0_14, %c0_15, %c1_16] : memref<32x9x9xf32, #tpu.memory_space<vmem>>, vector<32x8x8xf32>
    tpu.vector_store %arg5[%c0_14, %c0_15, %c1_16], %11 {strides = array<i32>} : memref<32x9x9xf32, #tpu.memory_space<vmem>>, vector<32x8x8xf32>,
    %c0_17 = arith.constant 0 : index
    %c1_18 = arith.constant 1 : index
    %c0_19 = arith.constant 0 : index
    %13 = vector.load %arg5[%c0_17, %c1_18, %c0_19] : memref<32x9x9xf32, #tpu.memory_space<vmem>>, vector<32x8x8xf32>
    %14 = vector.extract_strided_slice %2 {offsets = [64, 0, 0], sizes = [32, 8, 8], strides = [1, 1, 1]} : vector<128x8x8xf32> to vector<32x8x8xf32>
    %15 = arith.addf %13, %14 : vector<32x8x8xf32>
    %c0_20 = arith.constant 0 : index
    %c1_21 = arith.constant 1 : index
    %c0_22 = arith.constant 0 : index
    %16 = vector.load %arg5[%c0_20, %c1_21, %c0_22] : memref<32x9x9xf32, #tpu.memory_space<vmem>>, vector<32x8x8xf32>
    tpu.vector_store %arg5[%c0_20, %c1_21, %c0_22], %15 {strides = array<i32>} : memref<32x9x9xf32, #tpu.memory_space<vmem>>, vector<32x8x8xf32>,
    %c0_23 = arith.constant 0 : index
    %c1_24 = arith.constant 1 : index
    %c1_25 = arith.constant 1 : index
    %17 = vector.load %arg5[%c0_23, %c1_24, %c1_25] : memref<32x9x9xf32, #tpu.memory_space<vmem>>, vector<32x8x8xf32>
    %18 = vector.extract_strided_slice %2 {offsets = [96, 0, 0], sizes = [32, 8, 8], strides = [1, 1, 1]} : vector<128x8x8xf32> to vector<32x8x8xf32>
    %19 = arith.addf %17, %18 : vector<32x8x8xf32>
    %c0_26 = arith.constant 0 : index
    %c1_27 = arith.constant 1 : index
    %c1_28 = arith.constant 1 : index
    %20 = vector.load %arg5[%c0_26, %c1_27, %c1_28] : memref<32x9x9xf32, #tpu.memory_space<vmem>>, vector<32x8x8xf32>
    tpu.vector_store %arg5[%c0_26, %c1_27, %c1_28], %19 {strides = array<i32>} : memref<32x9x9xf32, #tpu.memory_space<vmem>>, vector<32x8x8xf32>,
    %cst_29 = arith.constant 0.000000e+00 : f32
    %21 = vector.broadcast %cst_29 : f32 to vector<8x1xf32>
    %cst_30 = arith.constant 0.000000e+00 : f32
    %22 = vector.broadcast %cst_30 : f32 to vector<8x1xf32>
    %c24 = arith.constant 24 : index
    %c0_31 = arith.constant 0 : index
    %c0_32 = arith.constant 0 : index
    %23 = vector.load %arg5[%c24, %c0_31, %c0_32] : memref<32x9x9xf32, #tpu.memory_space<vmem>>, vector<8x8x8xf32>
    %cst_33 = arith.constant dense<0.000000e+00> : vector<8x8xf32>
    %24 = vector.multi_reduction <add>, %23, %cst_33 [2] : vector<8x8x8xf32> to vector<8x8xf32>
    %cst_34 = arith.constant dense<0.000000e+00> : vector<8xf32>
    %25 = vector.multi_reduction <add>, %24, %cst_34 [1] : vector<8x8xf32> to vector<8xf32>
    %26 = vector.shape_cast %25 : vector<8xf32> to vector<8x1xf32>
    %27 = arith.addf %21, %26 : vector<8x1xf32>
    %28 = arith.mulf %23, %23 : vector<8x8x8xf32>
    %cst_35 = arith.constant dense<0.000000e+00> : vector<8x8xf32>
    %29 = vector.multi_reduction <add>, %28, %cst_35 [2] : vector<8x8x8xf32> to vector<8x8xf32>
    %cst_36 = arith.constant dense<0.000000e+00> : vector<8xf32>
    %30 = vector.multi_reduction <add>, %29, %cst_36 [1] : vector<8x8xf32> to vector<8xf32>
    %31 = vector.shape_cast %30 : vector<8xf32> to vector<8x1xf32>
    %32 = arith.addf %22, %31 : vector<8x1xf32>
    %c8 = arith.constant 8 : index
    %c1_37 = arith.constant 1 : index
    %c0_38 = arith.constant 0 : index
    %33 = vector.load %arg5[%c8, %c1_37, %c0_38] : memref<32x9x9xf32, #tpu.memory_space<vmem>>, vector<8x8x8xf32>
    %cst_39 = arith.constant dense<0.000000e+00> : vector<8x8xf32>
    %34 = vector.multi_reduction <add>, %33, %cst_39 [2] : vector<8x8x8xf32> to vector<8x8xf32>
    %cst_40 = arith.constant dense<0.000000e+00> : vector<8xf32>
    %35 = vector.multi_reduction <add>, %34, %cst_40 [1] : vector<8x8xf32> to vector<8xf32>
    %36 = vector.shape_cast %35 : vector<8xf32> to vector<8x1xf32>
    %37 = arith.addf %27, %36 : vector<8x1xf32>
    %38 = arith.mulf %33, %33 : vector<8x8x8xf32>
    %cst_41 = arith.constant dense<0.000000e+00> : vector<8x8xf32>
    %39 = vector.multi_reduction <add>, %38, %cst_41 [2] : vector<8x8x8xf32> to vector<8x8xf32>
    %cst_42 = arith.constant dense<0.000000e+00> : vector<8xf32>
    %40 = vector.multi_reduction <add>, %39, %cst_42 [1] : vector<8x8xf32> to vector<8xf32>
    %41 = vector.shape_cast %40 : vector<8xf32> to vector<8x1xf32>
    %42 = arith.addf %32, %41 : vector<8x1xf32>
    %43 = vector.shape_cast %23 : vector<8x8x8xf32> to vector<8x8x1x8xf32>
    %44 = vector.shape_cast %33 : vector<8x8x8xf32> to vector<8x8x1x8xf32>
    %45 = tpu.concatenate %43, %44 in 2 : vector<8x8x1x8xf32>, vector<8x8x1x8xf32> -> vector<8x8x2x8xf32>
    %46 = vector.shape_cast %45 : vector<8x8x2x8xf32> to vector<8x16x8xf32>
    %c16 = arith.constant 16 : index
    %c0_43 = arith.constant 0 : index
    %c1_44 = arith.constant 1 : index
    %47 = vector.load %arg5[%c16, %c0_43, %c1_44] : memref<32x9x9xf32, #tpu.memory_space<vmem>>, vector<8x8x8xf32>
    %cst_45 = arith.constant dense<0.000000e+00> : vector<8x8xf32>
    %48 = vector.multi_reduction <add>, %47, %cst_45 [2] : vector<8x8x8xf32> to vector<8x8xf32>
    %cst_46 = arith.constant dense<0.000000e+00> : vector<8xf32>
    %49 = vector.multi_reduction <add>, %48, %cst_46 [1] : vector<8x8xf32> to vector<8xf32>
    %50 = vector.shape_cast %49 : vector<8xf32> to vector<8x1xf32>
    %51 = arith.addf %37, %50 : vector<8x1xf32>
    %52 = arith.mulf %47, %47 : vector<8x8x8xf32>
    %cst_47 = arith.constant dense<0.000000e+00> : vector<8x8xf32>
    %53 = vector.multi_reduction <add>, %52, %cst_47 [2] : vector<8x8x8xf32> to vector<8x8xf32>
    %cst_48 = arith.constant dense<0.000000e+00> : vector<8xf32>
    %54 = vector.multi_reduction <add>, %53, %cst_48 [1] : vector<8x8xf32> to vector<8xf32>
    %55 = vector.shape_cast %54 : vector<8xf32> to vector<8x1xf32>
    %56 = arith.addf %42, %55 : vector<8x1xf32>
    %c0_49 = arith.constant 0 : index
    %c1_50 = arith.constant 1 : index
    %c1_51 = arith.constant 1 : index
    %57 = vector.load %arg5[%c0_49, %c1_50, %c1_51] : memref<32x9x9xf32, #tpu.memory_space<vmem>>, vector<8x8x8xf32>
    %cst_52 = arith.constant dense<0.000000e+00> : vector<8x8xf32>
    %58 = vector.multi_reduction <add>, %57, %cst_52 [2] : vector<8x8x8xf32> to vector<8x8xf32>
    %cst_53 = arith.constant dense<0.000000e+00> : vector<8xf32>
    %59 = vector.multi_reduction <add>, %58, %cst_53 [1] : vector<8x8xf32> to vector<8xf32>
    %60 = vector.shape_cast %59 : vector<8xf32> to vector<8x1xf32>
    %61 = arith.addf %51, %60 : vector<8x1xf32>
    %62 = arith.mulf %57, %57 : vector<8x8x8xf32>
    %cst_54 = arith.constant dense<0.000000e+00> : vector<8x8xf32>
    %63 = vector.multi_reduction <add>, %62, %cst_54 [2] : vector<8x8x8xf32> to vector<8x8xf32>
    %cst_55 = arith.constant dense<0.000000e+00> : vector<8xf32>
    %64 = vector.multi_reduction <add>, %63, %cst_55 [1] : vector<8x8xf32> to vector<8xf32>
    %65 = vector.shape_cast %64 : vector<8xf32> to vector<8x1xf32>
    %66 = arith.addf %56, %65 : vector<8x1xf32>
    %67 = vector.shape_cast %47 : vector<8x8x8xf32> to vector<8x8x1x8xf32>
    %68 = vector.shape_cast %57 : vector<8x8x8xf32> to vector<8x8x1x8xf32>
    %69 = tpu.concatenate %67, %68 in 2 : vector<8x8x1x8xf32>, vector<8x8x1x8xf32> -> vector<8x8x2x8xf32>
    %70 = vector.shape_cast %69 : vector<8x8x2x8xf32> to vector<8x16x8xf32>
    %71 = vector.shape_cast %46 : vector<8x16x8xf32> to vector<8x16x8x1xf32>
    %72 = vector.shape_cast %70 : vector<8x16x8xf32> to vector<8x16x8x1xf32>
    %73 = tpu.concatenate %71, %72 in 3 : vector<8x16x8x1xf32>, vector<8x16x8x1xf32> -> vector<8x16x8x2xf32>
    %74 = vector.shape_cast %73 : vector<8x16x8x2xf32> to vector<8x16x16xf32>
    %c0_56 = arith.constant 0 : index
    %c0_57 = arith.constant 0 : index
    %c0_58 = arith.constant 0 : index
    %c0_59 = arith.constant 0 : index
    %75 = vector.load %arg2[%c0_56, %c0_57, %c0_58, %c0_59] : memref<1x8x16x16xf32, #tpu.memory_space<vmem>>, vector<1x8x16x16xf32>
    %76 = vector.shape_cast %75 : vector<1x8x16x16xf32> to vector<8x16x16xf32>
    %77 = vector.shape_cast %74 : vector<8x16x16xf32> to vector<1x8x16x16xf32>
    tpu.vector_store %arg2[%c0_56, %c0_57, %c0_58, %c0_59], %77 {strides = array<i32>} : memref<1x8x16x16xf32, #tpu.memory_space<vmem>>, vector<1x8x16x16xf32>,
    %c0_60 = arith.constant 0 : index
    %c0_61 = arith.constant 0 : index
    %c0_62 = arith.constant 0 : index
    %78 = vector.load %arg3[%c0_60, %c0_61, %c0_62] : memref<1x8x1xf32, #tpu.memory_space<vmem>>, vector<1x8x1xf32>
    %79 = vector.shape_cast %78 : vector<1x8x1xf32> to vector<8x1xf32>
    %80 = vector.shape_cast %61 : vector<8x1xf32> to vector<1x8x1xf32>
    tpu.vector_store %arg3[%c0_60, %c0_61, %c0_62], %80 {strides = array<i32>} : memref<1x8x1xf32, #tpu.memory_space<vmem>>, vector<1x8x1xf32>,
    %c0_63 = arith.constant 0 : index
    %c0_64 = arith.constant 0 : index
    %c0_65 = arith.constant 0 : index
    %81 = vector.load %arg4[%c0_63, %c0_64, %c0_65] : memref<1x8x1xf32, #tpu.memory_space<vmem>>, vector<1x8x1xf32>
    %82 = vector.shape_cast %81 : vector<1x8x1xf32> to vector<8x1xf32>
    %83 = vector.shape_cast %66 : vector<8x1xf32> to vector<1x8x1xf32>
    tpu.vector_store %arg4[%c0_63, %c0_64, %c0_65], %83 {strides = array<i32>} : memref<1x8x1xf32, #tpu.memory_space<vmem>>, vector<1x8x1xf32>,
    return
  }
  func.func @transform_0(%arg0: i32) -> (i32, i32, i32, i32) {
    %c0_i32 = arith.constant 0 : i32
    %c0_i32_0 = arith.constant 0 : i32
    %c0_i32_1 = arith.constant 0 : i32
    %c0_i32_2 = arith.constant 0 : i32
    return %c0_i32, %arg0, %c0_i32_0, %c0_i32_1 : i32, i32, i32, i32
  }
  func.func @transform_1(%arg0: i32) -> (i32, i32, i32, i32) {
    %c0_i32 = arith.constant 0 : i32
    %c0_i32_0 = arith.constant 0 : i32
    %c0_i32_1 = arith.constant 0 : i32
    %c0_i32_2 = arith.constant 0 : i32
    return %arg0, %c0_i32, %c0_i32_0, %c0_i32_1 : i32, i32, i32, i32
  }
  func.func @transform_2(%arg0: i32) -> (i32, i32, i32) {
    %c0_i32 = arith.constant 0 : i32
    %c0_i32_0 = arith.constant 0 : i32
    %c0_i32_1 = arith.constant 0 : i32
    return %arg0, %c0_i32, %c0_i32_0 : i32, i32, i32
  }
  func.func @transform_3(%arg0: i32) -> (i32, i32, i32) {
    %c0_i32 = arith.constant 0 : i32
    %c0_i32_0 = arith.constant 0 : i32
    %c0_i32_1 = arith.constant 0 : i32
    return %arg0, %c0_i32, %c0_i32_0 : i32, i32, i32
  }
}

module attributes {stable_mosaic.version = 11 : i64} {
  func.func @_bn_concat_kernel(%arg0: i32, %arg1: memref<1x4x256xf32, #tpu.memory_space<vmem>>, %arg2: memref<1x8x256xf32, #tpu.memory_space<vmem>>, %arg3: memref<8x1xf32, #tpu.memory_space<vmem>>, %arg4: memref<8x1xf32, #tpu.memory_space<vmem>>, %arg5: memref<1x8x256xf32, #tpu.memory_space<vmem>>) attributes {dimension_semantics = [#tpu.dimension_semantics<parallel>], iteration_bounds = array<i64: 2>, scalar_prefetch = 0 : i64, scratch_operands = 0 : i64, tpu.core_type = #tpu.core_type<tc>, window_params = [{transform_indices = @transform_0, window_bounds = array<i64: 1, 4, 256>}, {transform_indices = @transform_1, window_bounds = array<i64: 1, 8, 256>}, {pipeline_mode = #tpu.pipeline_mode<synchronous>, transform_indices = @transform_2, window_bounds = array<i64: 8, 1>}, {pipeline_mode = #tpu.pipeline_mode<synchronous>, transform_indices = @transform_3, window_bounds = array<i64: 8, 1>}, {transform_indices = @transform_4, window_bounds = array<i64: 1, 8, 256>}]} {
    %c0 = arith.constant 0 : index
    %c0_0 = arith.constant 0 : index
    %c0_1 = arith.constant 0 : index
    %0 = vector.load %arg1[%c0, %c0_0, %c0_1] : memref<1x4x256xf32, #tpu.memory_space<vmem>>, vector<1x4x256xf32>
    %1 = vector.shape_cast %0 : vector<1x4x256xf32> to vector<4x256xf32>
    %c0_2 = arith.constant 0 : index
    %c0_3 = arith.constant 0 : index
    %c0_4 = arith.constant 0 : index
    %2 = vector.load %arg5[%c0_2, %c0_3, %c0_4] : memref<1x8x256xf32, #tpu.memory_space<vmem>>, vector<1x4x256xf32>
    %3 = vector.shape_cast %2 : vector<1x4x256xf32> to vector<4x256xf32>
    %4 = vector.shape_cast %1 : vector<4x256xf32> to vector<1x4x256xf32>
    tpu.vector_store %arg5[%c0_2, %c0_3, %c0_4], %4 {strides = array<i32>} : memref<1x8x256xf32, #tpu.memory_space<vmem>>, vector<1x4x256xf32>,
    %c0_5 = arith.constant 0 : index
    %c0_6 = arith.constant 0 : index
    %c0_7 = arith.constant 0 : index
    %5 = vector.load %arg2[%c0_5, %c0_6, %c0_7] : memref<1x8x256xf32, #tpu.memory_space<vmem>>, vector<1x8x256xf32>
    %6 = vector.shape_cast %5 : vector<1x8x256xf32> to vector<8x256xf32>
    %c0_8 = arith.constant 0 : index
    %c0_9 = arith.constant 0 : index
    %7 = vector.load %arg3[%c0_8, %c0_9] : memref<8x1xf32, #tpu.memory_space<vmem>>, vector<8x1xf32>
    %8 = vector.broadcast %7 : vector<8x1xf32> to vector<8x256xf32>
    %9 = arith.mulf %6, %8 : vector<8x256xf32>
    %c0_10 = arith.constant 0 : index
    %c0_11 = arith.constant 0 : index
    %10 = vector.load %arg4[%c0_10, %c0_11] : memref<8x1xf32, #tpu.memory_space<vmem>>, vector<8x1xf32>
    %11 = vector.broadcast %10 : vector<8x1xf32> to vector<8x256xf32>
    %12 = arith.addf %9, %11 : vector<8x256xf32>
    %13 = vector.extract_strided_slice %12 {offsets = [0, 0], sizes = [4, 256], strides = [1, 1]} : vector<8x256xf32> to vector<4x256xf32>
    %c0_12 = arith.constant 0 : index
    %c4 = arith.constant 4 : index
    %c0_13 = arith.constant 0 : index
    %14 = vector.load %arg5[%c0_12, %c4, %c0_13] : memref<1x8x256xf32, #tpu.memory_space<vmem>>, vector<1x4x256xf32>
    %15 = vector.shape_cast %14 : vector<1x4x256xf32> to vector<4x256xf32>
    %16 = vector.shape_cast %13 : vector<4x256xf32> to vector<1x4x256xf32>
    tpu.vector_store %arg5[%c0_12, %c4, %c0_13], %16 {strides = array<i32>} : memref<1x8x256xf32, #tpu.memory_space<vmem>>, vector<1x4x256xf32>,
    return
  }
  func.func @transform_0(%arg0: i32) -> (i32, i32, i32) {
    %c0_i32 = arith.constant 0 : i32
    %c0_i32_0 = arith.constant 0 : i32
    %c0_i32_1 = arith.constant 0 : i32
    return %arg0, %c0_i32, %c0_i32_0 : i32, i32, i32
  }
  func.func @transform_1(%arg0: i32) -> (i32, i32, i32) {
    %c0_i32 = arith.constant 0 : i32
    %c0_i32_0 = arith.constant 0 : i32
    %c0_i32_1 = arith.constant 0 : i32
    return %arg0, %c0_i32, %c0_i32_0 : i32, i32, i32
  }
  func.func @transform_2(%arg0: i32) -> (i32, i32) {
    %c0_i32 = arith.constant 0 : i32
    %c0_i32_0 = arith.constant 0 : i32
    %c0_i32_1 = arith.constant 0 : i32
    return %c0_i32, %c0_i32_0 : i32, i32
  }
  func.func @transform_3(%arg0: i32) -> (i32, i32) {
    %c0_i32 = arith.constant 0 : i32
    %c0_i32_0 = arith.constant 0 : i32
    %c0_i32_1 = arith.constant 0 : i32
    return %c0_i32, %c0_i32_0 : i32, i32
  }
  func.func @transform_4(%arg0: i32) -> (i32, i32, i32) {
    %c0_i32 = arith.constant 0 : i32
    %c0_i32_0 = arith.constant 0 : i32
    %c0_i32_1 = arith.constant 0 : i32
    return %arg0, %c0_i32, %c0_i32_0 : i32, i32, i32
  }
}

</mosaic_0001>

<bundles_post_ra>
// kernel: unet_innermost_forward.3
= control target key start
LH: loop header
LB: loop body
LE: loop exit
PB: predicated region body
PF: predicated region fallthrough
CT: control target
= control target key end

     0   :  { %v613_v0 = vmov 0.0   ;;  %vm614_vm0 = vmmov 0   ;;  %s729_s0 = inlined_call_operand.vmem [shape: bf16[128,128], index: 0, kind: input, shape index: {}]   ;;  %s730_s1 = inlined_call_operand.vmem [shape: bf16[8,128], index: 1, kind: input, shape index: {}]   ;;  %s731_s2 = inlined_call_operand.vmem [shape: bf16[128,8], index: 2, kind: input, shape index: {}]   ;;  %s732_s3 = inlined_call_operand.vmem [shape: bf16[128,128], index: 3, kind: output, shape index: {}]  }
   0x1   :  { %564 = vmatprep.subr.bf16.mxu0 %v613_v0  ;;  %v461_v1 = vld [vmem:[%s729_s0] sm:$0xff]   ;;  %v532_v2 = vld [vmem:[%s729_s0 + $0x8] sm:$0xff]   ;;  %v533_v3 = vld [vmem:[%s729_s0 + $0x10] sm:$0xff]   ;;  %580 = vmatprep.mubr.msk.bf16.mxu0 %vm614_vm0, %v613_v0 }
   0x2   :  { %v462_v4 = vunpack.c.l.bf16 %v461_v1  ;;  %v463_v5 = vunpack.c.h.bf16 %v461_v1  ;;  %v466_v6 = vunpack.c.l.bf16 %v532_v2  ;;  %v467_v7 = vunpack.c.h.bf16 %v532_v2  ;;  %v534_v8 = vld [vmem:[%s729_s0 + $0x18] sm:$0xff]   ;;  %v535_v23 = vld [vmem:[%s729_s0 + $0x20] sm:$0xff]   ;;  %v536_v26 = vld [vmem:[%s729_s0 + $0x28] sm:$0xff]  }
   0x3   :  { %v470_v9 = vunpack.c.l.bf16 %v533_v3  ;;  %v471_v10 = vunpack.c.h.bf16 %v533_v3  ;;  %v474_v11 = vunpack.c.l.bf16 %v534_v8  ;;  %v475_v12 = vunpack.c.h.bf16 %v534_v8  ;;  %v537_v40 = vld [vmem:[%s729_s0 + $0x30] sm:$0xff]   ;;  %v538_v48 = vld [vmem:[%s729_s0 + $0x38] sm:$0xff]   ;;  %v103_v2 = vld [vmem:[%s730_s1] sm:$0xf] }
   0x4   :  { %vm47_vm1 = vcmp.ge.f32.partialorder %v462_v4, 0.0  ;;  %vm48_vm2 = vcmp.ge.f32.partialorder %v463_v5, 0.0  ;;  %v63_v13 = vmul.f32 0.2, %v462_v4  ;;  %v64_v14 = vmul.f32 0.2, %v463_v5 }
   0x5   :  { %vm49_vm3 = vcmp.ge.f32.partialorder %v466_v6, 0.0  ;;  %vm50_vm4 = vcmp.ge.f32.partialorder %v467_v7, 0.0  ;;  %v65_v15 = vmul.f32 0.2, %v466_v6  ;;  %v66_v16 = vmul.f32 0.2, %v467_v7 }
   0x6   :  { %v79_v17 = vsel %vm47_vm1, %v462_v4, %v63_v13  ;;  %v80_v18 = vsel %vm48_vm2, %v463_v5, %v64_v14  ;;  %vm51_vm5 = vcmp.ge.f32.partialorder %v470_v9, 0.0  ;;  %vm52_vm6 = vcmp.ge.f32.partialorder %v471_v10, 0.0  ;;  %v605_v3 = vld [vmem:[%s731_s2] sm:$0xff]   ;;  %v610_v14 = vld [vmem:[%s731_s2 + $0x28] sm:$0xff]  }
   0x7   :  { %v95_v19 = vpack.c.bf16 %v80_v18, %v79_v17  ;;  %v81_v20 = vsel %vm49_vm3, %v466_v6, %v65_v15  ;;  %v82_v21 = vsel %vm50_vm4, %v467_v7, %v66_v16  ;;  %v67_v22 = vmul.f32 0.2, %v470_v9  ;;  %v609_v13 = vld [vmem:[%s731_s2 + $0x20] sm:$0xff]   ;;  %v611_v15 = vld [vmem:[%s731_s2 + $0x30] sm:$0xff]   ;;  %v612_v16 = vld [vmem:[%s731_s2 + $0x38] sm:$0xff]  }
   0x8   :  { %v96_v24 = vpack.c.bf16 %v82_v21, %v81_v20  ;;  %v68_v25 = vmul.f32 0.2, %v471_v10  ;;  %vm53_vm7 = vcmp.ge.f32.partialorder %v474_v11, 0.0  ;;  %vm54_vm8 = vcmp.ge.f32.partialorder %v475_v12, 0.0 }
   0x9   :  { %565 = vmatpush3.bf16.msra.mxu0 %v95_v19  ;;  %v69_v27 = vmul.f32 0.2, %v474_v11  ;;  %v70_v28 = vmul.f32 0.2, %v475_v12  ;;  %v83_v29 = vsel %vm51_vm5, %v470_v9, %v67_v22  ;;  %v478_v31 = vunpack.c.l.bf16 %v535_v23 }
   0xa   :  { %566 = vmatprep.subr.bf16.mxu0 %v613_v0  ;;  %v84_v30 = vsel %vm52_vm6, %v471_v10, %v68_v25  ;;  %v479_v32 = vunpack.c.h.bf16 %v535_v23  ;;  %v482_v33 = vunpack.c.l.bf16 %v536_v26  ;;  %v483_v37 = vunpack.c.h.bf16 %v536_v26  ;;  %v606_v10 = vld [vmem:[%s731_s2 + $0x8] sm:$0xff]  }
   0xb   :  { %v97_v34 = vpack.c.bf16 %v84_v30, %v83_v29  ;;  %v85_v35 = vsel %vm53_vm7, %v474_v11, %v69_v27  ;;  %v86_v36 = vsel %vm54_vm8, %v475_v12, %v70_v28  ;;  %v71_v38 = vmul.f32 0.2, %v478_v31  ;;  %v607_v11 = vld [vmem:[%s731_s2 + $0x10] sm:$0xff]   ;;  %v608_v12 = vld [vmem:[%s731_s2 + $0x18] sm:$0xff]  }
   0xc   :  { %v72_v39 = vmul.f32 0.2, %v479_v32  ;;  %vm55_vm9 = vcmp.ge.f32.partialorder %v478_v31, 0.0  ;;  %vm56_vm10 = vcmp.ge.f32.partialorder %v479_v32, 0.0  ;;  %v98_v41 = vpack.c.bf16 %v86_v36, %v85_v35 }
   0xd   :  { %567 = vmatpush3.bf16.msra.mxu0 %v96_v24  ;;  %vm57_vm11 = vcmp.ge.f32.partialorder %v482_v33, 0.0  ;;  %vm58_vm12 = vcmp.ge.f32.partialorder %v483_v37, 0.0  ;;  %v73_v42 = vmul.f32 0.2, %v482_v33  ;;  %v74_v43 = vmul.f32 0.2, %v483_v37 }
   0xe   :  { %568 = vmatprep.subr.bf16.mxu0 %v613_v0  ;;  %v87_v44 = vsel %vm55_vm9, %v478_v31, %v71_v38  ;;  %v88_v45 = vsel %vm56_vm10, %v479_v32, %v72_v39  ;;  %v486_v46 = vunpack.c.l.bf16 %v537_v40  ;;  %v487_v47 = vunpack.c.h.bf16 %v537_v40 }
   0xf   :  { %v99_v49 = vpack.c.bf16 %v88_v45, %v87_v44  ;;  %v89_v50 = vsel %vm57_vm11, %v482_v33, %v73_v42  ;;  %v90_v51 = vsel %vm58_vm12, %v483_v37, %v74_v43  ;;  %v490_v54 = vunpack.c.l.bf16 %v538_v48 }
  0x10   :  { %v75_v52 = vmul.f32 0.2, %v486_v46  ;;  %v76_v53 = vmul.f32 0.2, %v487_v47  ;;  %v491_v55 = vunpack.c.h.bf16 %v538_v48  ;;  %vm59_vm13 = vcmp.ge.f32.partialorder %v486_v46, 0.0 }
  0x11   :  { %569 = vmatpush3.bf16.msra.mxu0 %v97_v34  ;;  %vm60_vm14 = vcmp.ge.f32.partialorder %v487_v47, 0.0  ;;  %v100_v56 = vpack.c.bf16 %v90_v51, %v89_v50  ;;  %v77_v59 = vmul.f32 0.2, %v490_v54  ;;  %vm61_vm15 = vcmp.ge.f32.partialorder %v490_v54, 0.0 }
  0x12   :  { %570 = vmatprep.subr.bf16.mxu0 %v613_v0  ;;  %v91_v57 = vsel %vm59_vm13, %v486_v46, %v75_v52  ;;  %v92_v58 = vsel %vm60_vm14, %v487_v47, %v76_v53  ;;  %v78_v60 = vmul.f32 0.2, %v491_v55  ;;  %vm62_vm0 = vcmp.ge.f32.partialorder %v491_v55, 0.0 }
  0x13   :  { %v101_v61 = vpack.c.bf16 %v92_v58, %v91_v57  ;;  %v93_v62 = vsel %vm61_vm15, %v490_v54, %v77_v59  ;;  %vm202_vm1 = vcmask 64512   ;;  %vm227_vm2 = vcmask 1043456  }
  0x14   :  { %v94_v63 = vsel %vm62_vm0, %v491_v55, %v78_v60  ;;  %586 = vmatprep.mubr.msk.bf16.mxu1 %vm202_vm1, %v605_v3 }
  0x15   :  { %571 = vmatpush3.bf16.msra.mxu0 %v98_v41  ;;  %v102_v1 = vpack.c.bf16 %v94_v63, %v93_v62 }
  0x16   :  { %572 = vmatprep.subr.bf16.mxu0 %v613_v0 }
  0x19   :  { %573 = vmatpush3.bf16.msra.mxu0 %v99_v49 }
  0x1a   :  { %574 = vmatprep.subr.bf16.mxu0 %v613_v0 }
  0x1d   :  { %575 = vmatpush3.bf16.msra.mxu0 %v100_v56 }
  0x1e   :  { %576 = vmatprep.subr.bf16.mxu0 %v613_v0 }
  0x21   :  { %577 = vmatpush3.bf16.msra.mxu0 %v101_v61 }
  0x22   :  { %578 = vmatprep.subr.bf16.mxu0 %v613_v0 }
  0x25   :  { %579 = vmatpush3.bf16.msra.mxu0 %v102_v1 }
  0x28   :  { %581 = vmatmul.mubr.bf16.vlgmr.msra.gmra.mrb[0].mxu0 %v103_v2 }
  0xfb   :  { %v138_v4 = vpop.f32.mrb[0].mxu0 }
  0xfc   :  { %v144_v5 = vmax.f32 %v138_v4, 0.0  ;;  %v582_v6 = vpop.f32.mrb[1].mxu0 }
  0xfd   :  { %v141_v7 = vpop.f32.mrb[2].mxu0 }
  0xfe   :  { %v145_v8 = vpack.c.bf16 %v144_v5, %v144_v5  ;;  %v583_v0 = vpop.f32.mrb[3].mxu0 }
 0x100   :  { %602 = vmatprep.subr.msk.bf16.mxu1 %vm227_vm2, %v145_v8  ;;  %v229_v9 = vsel %vm227_vm2, %v145_v8, 0 }
 0x101   :  { %585 = vmatpush3.bf16.msra.mxu1 %v229_v9 }
 0x104   :  { %587 = vmatmul.mubr.msk.bf16.vlgmr.msra.gmra.mrb[0].mxu1 %vm202_vm1, %v606_v10 }
 0x105   :  { %590 = vmatprep.mubr.msk.bf16.mxu1 %vm202_vm1, %v607_v11 }
 0x10c   :  { %591 = vmatmul.mubr.msk.bf16.gmra.mrb[4].mxu1 %vm202_vm1, %v608_v12 }
 0x10d   :  { %594 = vmatprep.mubr.msk.bf16.mxu1 %vm202_vm1, %v609_v13 }
 0x114   :  { %595 = vmatmul.mubr.msk.bf16.gmra.mrb[8].mxu1 %vm202_vm1, %v610_v14 }
 0x115   :  { %598 = vmatprep.mubr.msk.bf16.mxu1 %vm202_vm1, %v611_v15 }
 0x11c   :  { %599 = vmatmul.mubr.msk.bf16.gmra.mrb[12].mxu1 %vm202_vm1, %v612_v16 }
 0x1d7   :  { %v588_v17 = vpop.f32.mrb[0].mxu1 }
 0x1d8   :  { %v265_v18 = vpop.f32.mrb[1].mxu1 }
 0x1d9   :  { %v589_v19 = vpop.f32.mrb[2].mxu1 }
 0x1da   :  { %v500_v20 = vpack.c.bf16 %v589_v19, %v588_v17  ;;  %v268_v21 = vpop.f32.mrb[3].mxu1 }
 0x1db   :  { %v495_v22 = vpack.c.bf16 %v268_v21, %v265_v18 }
 0x1dc   :  { %539 = vst [vmem:[%s732_s3 + $0x8] sm:$0xff] %v500_v20  }
 0x1dd   :  { %496 = vst [vmem:[%s732_s3] sm:$0xff] %v495_v22  }
 0x1df   :  { %v592_v23 = vpop.f32.mrb[4].mxu1 }
 0x1e0   :  { %v281_v24 = vpop.f32.mrb[5].mxu1 }
 0x1e1   :  { %v593_v25 = vpop.f32.mrb[6].mxu1 }
 0x1e2   :  { %v510_v26 = vpack.c.bf16 %v593_v25, %v592_v23  ;;  %v284_v27 = vpop.f32.mrb[7].mxu1 }
 0x1e3   :  { %v505_v28 = vpack.c.bf16 %v284_v27, %v281_v24 }
 0x1e4   :  { %541 = vst [vmem:[%s732_s3 + $0x18] sm:$0xff] %v510_v26  }
 0x1e5   :  { %540 = vst [vmem:[%s732_s3 + $0x10] sm:$0xff] %v505_v28  }
 0x1e7   :  { %v596_v29 = vpop.f32.mrb[8].mxu1 }
 0x1e8   :  { %v297_v30 = vpop.f32.mrb[9].mxu1 }
 0x1e9   :  { %v597_v31 = vpop.f32.mrb[10].mxu1 }
 0x1ea   :  { %v520_v32 = vpack.c.bf16 %v597_v31, %v596_v29  ;;  %v300_v33 = vpop.f32.mrb[11].mxu1 }
 0x1eb   :  { %v515_v34 = vpack.c.bf16 %v300_v33, %v297_v30 }
 0x1ec   :  { %543 = vst [vmem:[%s732_s3 + $0x28] sm:$0xff] %v520_v32  }
 0x1ed   :  { %542 = vst [vmem:[%s732_s3 + $0x20] sm:$0xff] %v515_v34  }
 0x1ef   :  { %v600_v35 = vpop.f32.mrb[12].mxu1 }
 0x1f0   :  { %v313_v36 = vpop.f32.mrb[13].mxu1 }
 0x1f1   :  { %v601_v37 = vpop.f32.mrb[14].mxu1 }
 0x1f2   :  { %v530_v38 = vpack.c.bf16 %v601_v37, %v600_v35  ;;  %v316_v39 = vpop.f32.mrb[15].mxu1 }
 0x1f3   :  { %v525_v40 = vpack.c.bf16 %v316_v39, %v313_v36 }
 0x1f4   :  { %545 = vst [vmem:[%s732_s3 + $0x38] sm:$0xff] %v530_v38  }
 0x1f5   :  { %544 = vst [vmem:[%s732_s3 + $0x30] sm:$0xff] %v525_v40  }

// kernel: unet_innermost_forward.5
= control target key start
LH: loop header
LB: loop body
LE: loop exit
PB: predicated region body
PF: predicated region fallthrough
CT: control target
= control target key end

     0   :  { %s378_s15 = smov 0   ;;  %s404_s0 = inlined_call_operand.vmem [shape: f32[2,4,256], index: 0, kind: input, shape index: {}]   ;;  %s405_s1 = inlined_call_operand.vmem [shape: f32[2,8,256], index: 1, kind: input, shape index: {}]   ;;  %s406_s2 = inlined_call_operand.vmem [shape: f32[8,1], index: 2, kind: input, shape index: {}]   ;;  %s407_s3 = inlined_call_operand.vmem [shape: f32[8,1], index: 3, kind: input, shape index: {}]   ;;  %s408_s4 = inlined_call_operand.vmem [shape: f32[2,8,256], index: 4, kind: output, shape index: {}]  }
   0x1 LB: > { %s317_s16 = sadd.s32 4294967295, %s350_s15   ;;  %p321_p0 = scmp.ge.s32.totalorder %s350_s15, 1  ;;  %s350_s15 = sphi %s378_s15, %s14_s15  }
   0x2   : > { %p172_p1 = scmp.lt.s32.totalorder %s350_s15, 3 }
   0x4   : > { %p173_p2 = pnand %p321_p0, %p172_p1 }
   0x5   : > { %v226_v0 = vld [vmem:[%s406_s2] sm:$0xff] (!%p173_p2)  ;;  %p203_p3 = scmp.lt.s32.totalorder (!%p173_p2), %s317_s16, 1  ;;  %v352_v1 = vmov (!%p173_p2), 0  }
   0x6   : > { %176 = sbr.rel (%p173_p2) target bundleno = 144 (0x90), region = 36  ;;  %342 = vset.pattern.permute.xlu0 (!%p173_p2), %v352_v1  ;;  %v234_v2 = vld [vmem:[%s407_s3] sm:$0xff] (!%p173_p2) }
   0x7   : > { %229 = vperm.xlu0 (!%p173_p2), %342, %v226_v0  }
   0xb   : > { %237 = vperm.xlu0 (!%p173_p2), %342, %v234_v2  }
   0xd   : > { %s410_s16 = smov (!%p203_p3, %s317_s16), 1 }
   0xe   : > { %s330_s21 = sshll.u32 %s410_s16, 3  ;;  %s331_s25 = sshll.u32 %s410_s16, 4 }
   0xf   : > { %s207_s24 = scalar_lea.vmem %s404_s0, %s330_s21  ;;  %s217_s28 = scalar_lea.vmem %s408_s4, %s331_s25 }
  0x10   : > { %v218_v3 = vld [vmem:[%s207_s24] sm:$0xff]  ;;  %s212_s5 = scalar_lea.vmem %s405_s1, %s331_s25 }
  0x11   : > { %v220_v4 = vcombine.high %v218_v3, %v218_v3  ;;  %222 = vst [vmem:[%s217_s28] sm:$0xf] %v218_v3  ;;  %v224_v6 = vld [vmem:[%s212_s5] sm:$0xff]  ;;  %v225_v7 = vld [vmem:[%s212_s5 + $0x8] sm:$0xff] }
  0x13   : > { %223 = vst [vmem:[%s217_s28 + $0x8] sm:$0xf] %v220_v4 }
  0x86   : > { %v230_v5 = vpop.permute.xlu0 %229 }
  0x87   : > { %v232_v8 = vmul.f32 %v230_v5, %v224_v6  ;;  %v233_v9 = vmul.f32 %v230_v5, %v225_v7 }
  0x8a   : > { %v238_v10 = vpop.permute.xlu0 %237 }
  0x8b   : > { %v240_v11 = vadd.f32 %v238_v10, %v232_v8  ;;  %v241_v12 = vadd.f32 %v238_v10, %v233_v9 }
  0x8d   : > { %v244_v13 = vrot.slane %v240_v11, 4  ;;  %v245_v14 = vrot.slane %v241_v12, 4 }
  0x8f   : > { %248 = vst [vmem:[%s217_s28] sm:$0xf0] %v244_v13  ;;  %249 = vst [vmem:[%s217_s28 + $0x8] sm:$0xf0] %v245_v14 }
  0x90 PF: > { %s14_s15 = sadd.s32 1, %s350_s15  }
  0x91   : > { %p11_p4 = scmp.ge.s32.totalorder %s14_s15, 4  }
  0x93   :  { %13 = sbr.rel (!%p11_p4) target bundleno = 1 (0x1), region = 69 }

// kernel: unet_innermost_forward.4
= control target key start
LH: loop header
LB: loop body
LE: loop exit
PB: predicated region body
PF: predicated region fallthrough
CT: control target
= control target key end

     0   :  { %s10629_s12 = smov 0   ;;  %s10631_s13 = smov 0   ;;  %s16245_s0 = inlined_call_operand.vmem [shape: bf16[128,2,8,8], index: 0, kind: input, shape index: {}]   ;;  %s16246_s1 = inlined_call_operand.vmem [shape: f32[2,8,16,16], index: 1, kind: output, shape index: {0}]   ;;  %s16247_s2 = inlined_call_operand.vmem [shape: f32[2,8,1], index: 2, kind: output, shape index: {1}]   ;;  %s16248_s3 = inlined_call_operand.vmem [shape: f32[2,8,1], index: 3, kind: output, shape index: {2}]  }
   0x1   :  { %s10633_s14 = smov 0  }
   0x2 LB: > { %s9931_s15 = sadd.s32 4294967295, %s10594_s14   ;;  %s10646_s16 = sadd.s32 1, %s10594_s14   ;;  %s10594_s14 = sphi %s10633_s14, %s17600_s14   ;;  %s10590_s13 = sphi %s10631_s13, %s17599_s13   ;;  %s10586_s12 = sphi %s10629_s12, %s17598_s12  }
   0x3   : > { %s18_s17 = ssub.s32 %s10594_s14, %s10646_s16  ;;  %s21_s18 = sadd.s32 1, %s10590_s13 }
   0x4   : > { %p19_p0 = scmp.eq.s32.totalorder %s18_s17, 0  ;;  %p28_p1 = scmp.ne.s32.totalorder %s10590_s13, %s10586_s12 }
   0x5   : > { %p29_p2 = scmp.eq.s32.totalorder %s10594_s14, 0  ;;  %p9934_p4 = scmp.ge.s32.totalorder %s10594_s14, 2 }
   0x6   : > { %s10655_s19 = scalar_select %p19_p0, %s10590_s13, %s21_s18  }
   0x7   : > { %p30_p3 = por %p29_p2, %p28_p1  ;;  %132 = sbr.rel (%p9934_p4) target bundleno = 103 (0x67), region = 16 }
   0xe   : > { %135 = sbr.rel (!%p30_p3) target bundleno = 103 (0x67), region = 20  ;;  %s137_s20 = sand.u32 (%p30_p3), 1, %s10590_s13  }
   0xf   : > { %s9936_s21 = sshll.u32 (%p30_p3), %s10594_s14, 2  ;;  %s9935_s22 = sshll.u32 (%p30_p3), %s137_s20, 9 }
  0x10   : > { %s10663_s25 = scalar_lea.vmem (%p30_p3), %s16245_s0, %s9936_s21  ;;  %s10667_s26 = scalar_lea.vmem (%p30_p3), [#allocation3], %s9935_s22 }
  0x11   : > { %v157_v0 = vld [vmem:[%s10663_s25] sm:$0xf] (%p30_p3)  ;;  %v159_v1 = vld [vmem:[%s10663_s25 + $0x8] sm:$0xf] (%p30_p3)  ;;  %v161_v2 = vld [vmem:[%s10663_s25 + $0x10] sm:$0xf] (%p30_p3) }
  0x12   : > { %158 = vst [vmem:[%s10667_s26] sm:$0xf] (%p30_p3), %v157_v0  ;;  %160 = vst [vmem:[%s10667_s26 + $0x4] sm:$0xf] (%p30_p3), %v159_v1  ;;  %v163_v3 = vld [vmem:[%s10663_s25 + $0x18] sm:$0xf] (%p30_p3) }
  0x13   : > { %v165_v4 = vld [vmem:[%s10663_s25 + $0x20] sm:$0xf] (%p30_p3)  ;;  %162 = vst [vmem:[%s10667_s26 + $0x8] sm:$0xf] (%p30_p3), %v161_v2  ;;  %164 = vst [vmem:[%s10667_s26 + $0xc] sm:$0xf] (%p30_p3), %v163_v3 }
  0x14   : > { %166 = vst [vmem:[%s10667_s26 + $0x10] sm:$0xf] (%p30_p3), %v165_v4  ;;  %v167_v5 = vld [vmem:[%s10663_s25 + $0x28] sm:$0xf] (%p30_p3)  ;;  %v169_v6 = vld [vmem:[%s10663_s25 + $0x30] sm:$0xf] (%p30_p3) }
  0x15   : > { %v171_v7 = vld [vmem:[%s10663_s25 + $0x38] sm:$0xf]  ;;  %168 = vst [vmem:[%s10667_s26 + $0x14] sm:$0xf] %v167_v5  ;;  %170 = vst [vmem:[%s10667_s26 + $0x18] sm:$0xf] %v169_v6 }
  0x16   : > { %172 = vst [vmem:[%s10667_s26 + $0x1c] sm:$0xf] %v171_v7  ;;  %v173_v8 = vld [vmem:[%s10663_s25 + $0x40] sm:$0xf]  ;;  %v175_v9 = vld [vmem:[%s10663_s25 + $0x48] sm:$0xf] }
  0x17   : > { %v177_v10 = vld [vmem:[%s10663_s25 + $0x50] sm:$0xf]  ;;  %174 = vst [vmem:[%s10667_s26 + $0x20] sm:$0xf] %v173_v8  ;;  %176 = vst [vmem:[%s10667_s26 + $0x24] sm:$0xf] %v175_v9 }
  0x18   : > { %178 = vst [vmem:[%s10667_s26 + $0x28] sm:$0xf] %v177_v10  ;;  %v179_v11 = vld [vmem:[%s10663_s25 + $0x58] sm:$0xf]  ;;  %v181_v12 = vld [vmem:[%s10663_s25 + $0x60] sm:$0xf] }
  0x19   : > { %v183_v13 = vld [vmem:[%s10663_s25 + $0x68] sm:$0xf]  ;;  %180 = vst [vmem:[%s10667_s26 + $0x2c] sm:$0xf] %v179_v11  ;;  %182 = vst [vmem:[%s10667_s26 + $0x30] sm:$0xf] %v181_v12 }
  0x1a   : > { %184 = vst [vmem:[%s10667_s26 + $0x34] sm:$0xf] %v183_v13  ;;  %v185_v14 = vld [vmem:[%s10663_s25 + $0x70] sm:$0xf]  ;;  %v187_v15 = vld [vmem:[%s10663_s25 + $0x78] sm:$0xf] }
  0x1b   : > { %v189_v16 = vld [vmem:[%s10663_s25 + $0x80] sm:$0xf]  ;;  %186 = vst [vmem:[%s10667_s26 + $0x38] sm:$0xf] %v185_v14  ;;  %188 = vst [vmem:[%s10667_s26 + $0x3c] sm:$0xf] %v187_v15 }
  0x1c   : > { %190 = vst [vmem:[%s10667_s26 + $0x40] sm:$0xf] %v189_v16  ;;  %v191_v17 = vld [vmem:[%s10663_s25 + $0x88] sm:$0xf]  ;;  %v193_v18 = vld [vmem:[%s10663_s25 + $0x90] sm:$0xf] }
  0x1d   : > { %v195_v19 = vld [vmem:[%s10663_s25 + $0x98] sm:$0xf]  ;;  %192 = vst [vmem:[%s10667_s26 + $0x44] sm:$0xf] %v191_v17  ;;  %194 = vst [vmem:[%s10667_s26 + $0x48] sm:$0xf] %v193_v18 }
  0x1e   : > { %196 = vst [vmem:[%s10667_s26 + $0x4c] sm:$0xf] %v195_v19  ;;  %v197_v20 = vld [vmem:[%s10663_s25 + $0xa0] sm:$0xf]  ;;  %v199_v21 = vld [vmem:[%s10663_s25 + $0xa8] sm:$0xf] }
  0x1f   : > { %v201_v22 = vld [vmem:[%s10663_s25 + $0xb0] sm:$0xf]  ;;  %198 = vst [vmem:[%s10667_s26 + $0x50] sm:$0xf] %v197_v20  ;;  %200 = vst [vmem:[%s10667_s26 + $0x54] sm:$0xf] %v199_v21 }
  0x20   : > { %202 = vst [vmem:[%s10667_s26 + $0x58] sm:$0xf] %v201_v22  ;;  %v203_v23 = vld [vmem:[%s10663_s25 + $0xb8] sm:$0xf]  ;;  %v205_v24 = vld [vmem:[%s10663_s25 + $0xc0] sm:$0xf] }
  0x21   : > { %v207_v25 = vld [vmem:[%s10663_s25 + $0xc8] sm:$0xf]  ;;  %204 = vst [vmem:[%s10667_s26 + $0x5c] sm:$0xf] %v203_v23  ;;  %206 = vst [vmem:[%s10667_s26 + $0x60] sm:$0xf] %v205_v24 }
  0x22   : > { %208 = vst [vmem:[%s10667_s26 + $0x64] sm:$0xf] %v207_v25  ;;  %v209_v26 = vld [vmem:[%s10663_s25 + $0xd0] sm:$0xf]  ;;  %v211_v27 = vld [vmem:[%s10663_s25 + $0xd8] sm:$0xf] }
  0x23   : > { %v213_v28 = vld [vmem:[%s10663_s25 + $0xe0] sm:$0xf]  ;;  %210 = vst [vmem:[%s10667_s26 + $0x68] sm:$0xf] %v209_v26  ;;  %212 = vst [vmem:[%s10667_s26 + $0x6c] sm:$0xf] %v211_v27 }
  0x24   : > { %214 = vst [vmem:[%s10667_s26 + $0x70] sm:$0xf] %v213_v28  ;;  %v215_v29 = vld [vmem:[%s10663_s25 + $0xe8] sm:$0xf]  ;;  %v217_v30 = vld [vmem:[%s10663_s25 + $0xf0] sm:$0xf] }
  0x25   : > { %v219_v31 = vld [vmem:[%s10663_s25 + $0xf8] sm:$0xf]  ;;  %216 = vst [vmem:[%s10667_s26 + $0x74] sm:$0xf] %v215_v29  ;;  %218 = vst [vmem:[%s10667_s26 + $0x78] sm:$0xf] %v217_v30 }
  0x26   : > { %220 = vst [vmem:[%s10667_s26 + $0x7c] sm:$0xf] %v219_v31  ;;  %v221_v32 = vld [vmem:[%s10663_s25 + $0x100] sm:$0xf]  ;;  %v223_v33 = vld [vmem:[%s10663_s25 + $0x108] sm:$0xf] }
  0x27   : > { %v225_v34 = vld [vmem:[%s10663_s25 + $0x110] sm:$0xf]  ;;  %222 = vst [vmem:[%s10667_s26 + $0x80] sm:$0xf] %v221_v32  ;;  %224 = vst [vmem:[%s10667_s26 + $0x84] sm:$0xf] %v223_v33 }
  0x28   : > { %226 = vst [vmem:[%s10667_s26 + $0x88] sm:$0xf] %v225_v34  ;;  %v227_v35 = vld [vmem:[%s10663_s25 + $0x118] sm:$0xf]  ;;  %v229_v36 = vld [vmem:[%s10663_s25 + $0x120] sm:$0xf] }
  0x29   : > { %v231_v37 = vld [vmem:[%s10663_s25 + $0x128] sm:$0xf]  ;;  %228 = vst [vmem:[%s10667_s26 + $0x8c] sm:$0xf] %v227_v35  ;;  %230 = vst [vmem:[%s10667_s26 + $0x90] sm:$0xf] %v229_v36 }
  0x2a   : > { %232 = vst [vmem:[%s10667_s26 + $0x94] sm:$0xf] %v231_v37  ;;  %v233_v38 = vld [vmem:[%s10663_s25 + $0x130] sm:$0xf]  ;;  %v235_v39 = vld [vmem:[%s10663_s25 + $0x138] sm:$0xf] }
  0x2b   : > { %v237_v40 = vld [vmem:[%s10663_s25 + $0x140] sm:$0xf]  ;;  %234 = vst [vmem:[%s10667_s26 + $0x98] sm:$0xf] %v233_v38  ;;  %236 = vst [vmem:[%s10667_s26 + $0x9c] sm:$0xf] %v235_v39 }
  0x2c   : > { %238 = vst [vmem:[%s10667_s26 + $0xa0] sm:$0xf] %v237_v40  ;;  %v239_v41 = vld [vmem:[%s10663_s25 + $0x148] sm:$0xf]  ;;  %v241_v42 = vld [vmem:[%s10663_s25 + $0x150] sm:$0xf] }
  0x2d   : > { %v243_v43 = vld [vmem:[%s10663_s25 + $0x158] sm:$0xf]  ;;  %240 = vst [vmem:[%s10667_s26 + $0xa4] sm:$0xf] %v239_v41  ;;  %242 = vst [vmem:[%s10667_s26 + $0xa8] sm:$0xf] %v241_v42 }
  0x2e   : > { %244 = vst [vmem:[%s10667_s26 + $0xac] sm:$0xf] %v243_v43  ;;  %v245_v44 = vld [vmem:[%s10663_s25 + $0x160] sm:$0xf]  ;;  %v247_v45 = vld [vmem:[%s10663_s25 + $0x168] sm:$0xf] }
  0x2f   : > { %v249_v46 = vld [vmem:[%s10663_s25 + $0x170] sm:$0xf]  ;;  %246 = vst [vmem:[%s10667_s26 + $0xb0] sm:$0xf] %v245_v44  ;;  %248 = vst [vmem:[%s10667_s26 + $0xb4] sm:$0xf] %v247_v45 }
  0x30   : > { %250 = vst [vmem:[%s10667_s26 + $0xb8] sm:$0xf] %v249_v46  ;;  %v251_v47 = vld [vmem:[%s10663_s25 + $0x178] sm:$0xf]  ;;  %v253_v48 = vld [vmem:[%s10663_s25 + $0x180] sm:$0xf] }
  0x31   : > { %v255_v49 = vld [vmem:[%s10663_s25 + $0x188] sm:$0xf]  ;;  %252 = vst [vmem:[%s10667_s26 + $0xbc] sm:$0xf] %v251_v47  ;;  %254 = vst [vmem:[%s10667_s26 + $0xc0] sm:$0xf] %v253_v48 }
  0x32   : > { %256 = vst [vmem:[%s10667_s26 + $0xc4] sm:$0xf] %v255_v49  ;;  %v257_v50 = vld [vmem:[%s10663_s25 + $0x190] sm:$0xf]  ;;  %v259_v51 = vld [vmem:[%s10663_s25 + $0x198] sm:$0xf] }
  0x33   : > { %v261_v52 = vld [vmem:[%s10663_s25 + $0x1a0] sm:$0xf]  ;;  %258 = vst [vmem:[%s10667_s26 + $0xc8] sm:$0xf] %v257_v50  ;;  %260 = vst [vmem:[%s10667_s26 + $0xcc] sm:$0xf] %v259_v51 }
  0x34   : > { %262 = vst [vmem:[%s10667_s26 + $0xd0] sm:$0xf] %v261_v52  ;;  %v263_v53 = vld [vmem:[%s10663_s25 + $0x1a8] sm:$0xf]  ;;  %v265_v54 = vld [vmem:[%s10663_s25 + $0x1b0] sm:$0xf] }
  0x35   : > { %v267_v55 = vld [vmem:[%s10663_s25 + $0x1b8] sm:$0xf]  ;;  %264 = vst [vmem:[%s10667_s26 + $0xd4] sm:$0xf] %v263_v53  ;;  %266 = vst [vmem:[%s10667_s26 + $0xd8] sm:$0xf] %v265_v54 }
  0x36   : > { %268 = vst [vmem:[%s10667_s26 + $0xdc] sm:$0xf] %v267_v55  ;;  %v269_v56 = vld [vmem:[%s10663_s25 + $0x1c0] sm:$0xf]  ;;  %v271_v57 = vld [vmem:[%s10663_s25 + $0x1c8] sm:$0xf] }
  0x37   : > { %v273_v58 = vld [vmem:[%s10663_s25 + $0x1d0] sm:$0xf]  ;;  %270 = vst [vmem:[%s10667_s26 + $0xe0] sm:$0xf] %v269_v56  ;;  %272 = vst [vmem:[%s10667_s26 + $0xe4] sm:$0xf] %v271_v57 }
  0x38   : > { %274 = vst [vmem:[%s10667_s26 + $0xe8] sm:$0xf] %v273_v58  ;;  %v275_v59 = vld [vmem:[%s10663_s25 + $0x1d8] sm:$0xf]  ;;  %v277_v60 = vld [vmem:[%s10663_s25 + $0x1e0] sm:$0xf] }
  0x39   : > { %v279_v61 = vld [vmem:[%s10663_s25 + $0x1e8] sm:$0xf]  ;;  %276 = vst [vmem:[%s10667_s26 + $0xec] sm:$0xf] %v275_v59  ;;  %278 = vst [vmem:[%s10667_s26 + $0xf0] sm:$0xf] %v277_v60 }
  0x3a   : > { %280 = vst [vmem:[%s10667_s26 + $0xf4] sm:$0xf] %v279_v61  ;;  %v281_v62 = vld [vmem:[%s10663_s25 + $0x1f0] sm:$0xf]  ;;  %v283_v63 = vld [vmem:[%s10663_s25 + $0x1f8] sm:$0xf] }
  0x3b   : > { %v285_v0 = vld [vmem:[%s10663_s25 + $0x200] sm:$0xf]  ;;  %282 = vst [vmem:[%s10667_s26 + $0xf8] sm:$0xf] %v281_v62  ;;  %284 = vst [vmem:[%s10667_s26 + $0xfc] sm:$0xf] %v283_v63 }
  0x3c   : > { %286 = vst [vmem:[%s10667_s26 + $0x100] sm:$0xf] %v285_v0  ;;  %v287_v1 = vld [vmem:[%s10663_s25 + $0x208] sm:$0xf]  ;;  %v289_v2 = vld [vmem:[%s10663_s25 + $0x210] sm:$0xf] }
  0x3d   : > { %v291_v3 = vld [vmem:[%s10663_s25 + $0x218] sm:$0xf]  ;;  %288 = vst [vmem:[%s10667_s26 + $0x104] sm:$0xf] %v287_v1  ;;  %290 = vst [vmem:[%s10667_s26 + $0x108] sm:$0xf] %v289_v2 }
  0x3e   : > { %292 = vst [vmem:[%s10667_s26 + $0x10c] sm:$0xf] %v291_v3  ;;  %v293_v4 = vld [vmem:[%s10663_s25 + $0x220] sm:$0xf]  ;;  %v295_v5 = vld [vmem:[%s10663_s25 + $0x228] sm:$0xf] }
  0x3f   : > { %v297_v6 = vld [vmem:[%s10663_s25 + $0x230] sm:$0xf]  ;;  %294 = vst [vmem:[%s10667_s26 + $0x110] sm:$0xf] %v293_v4  ;;  %296 = vst [vmem:[%s10667_s26 + $0x114] sm:$0xf] %v295_v5 }
  0x40   : > { %298 = vst [vmem:[%s10667_s26 + $0x118] sm:$0xf] %v297_v6  ;;  %v299_v7 = vld [vmem:[%s10663_s25 + $0x238] sm:$0xf]  ;;  %v301_v8 = vld [vmem:[%s10663_s25 + $0x240] sm:$0xf] }
  0x41   : > { %v303_v9 = vld [vmem:[%s10663_s25 + $0x248] sm:$0xf]  ;;  %300 = vst [vmem:[%s10667_s26 + $0x11c] sm:$0xf] %v299_v7  ;;  %302 = vst [vmem:[%s10667_s26 + $0x120] sm:$0xf] %v301_v8 }
  0x42   : > { %304 = vst [vmem:[%s10667_s26 + $0x124] sm:$0xf] %v303_v9  ;;  %v305_v10 = vld [vmem:[%s10663_s25 + $0x250] sm:$0xf]  ;;  %v307_v11 = vld [vmem:[%s10663_s25 + $0x258] sm:$0xf] }
  0x43   : > { %v309_v12 = vld [vmem:[%s10663_s25 + $0x260] sm:$0xf]  ;;  %306 = vst [vmem:[%s10667_s26 + $0x128] sm:$0xf] %v305_v10  ;;  %308 = vst [vmem:[%s10667_s26 + $0x12c] sm:$0xf] %v307_v11 }
  0x44   : > { %310 = vst [vmem:[%s10667_s26 + $0x130] sm:$0xf] %v309_v12  ;;  %v311_v13 = vld [vmem:[%s10663_s25 + $0x268] sm:$0xf]  ;;  %v313_v14 = vld [vmem:[%s10663_s25 + $0x270] sm:$0xf] }
  0x45   : > { %v315_v15 = vld [vmem:[%s10663_s25 + $0x278] sm:$0xf]  ;;  %312 = vst [vmem:[%s10667_s26 + $0x134] sm:$0xf] %v311_v13  ;;  %314 = vst [vmem:[%s10667_s26 + $0x138] sm:$0xf] %v313_v14 }
  0x46   : > { %316 = vst [vmem:[%s10667_s26 + $0x13c] sm:$0xf] %v315_v15  ;;  %v317_v16 = vld [vmem:[%s10663_s25 + $0x280] sm:$0xf]  ;;  %v319_v17 = vld [vmem:[%s10663_s25 + $0x288] sm:$0xf] }
  0x47   : > { %v321_v18 = vld [vmem:[%s10663_s25 + $0x290] sm:$0xf]  ;;  %318 = vst [vmem:[%s10667_s26 + $0x140] sm:$0xf] %v317_v16  ;;  %320 = vst [vmem:[%s10667_s26 + $0x144] sm:$0xf] %v319_v17 }
  0x48   : > { %322 = vst [vmem:[%s10667_s26 + $0x148] sm:$0xf] %v321_v18  ;;  %v323_v19 = vld [vmem:[%s10663_s25 + $0x298] sm:$0xf]  ;;  %v325_v20 = vld [vmem:[%s10663_s25 + $0x2a0] sm:$0xf] }
  0x49   : > { %v327_v21 = vld [vmem:[%s10663_s25 + $0x2a8] sm:$0xf]  ;;  %324 = vst [vmem:[%s10667_s26 + $0x14c] sm:$0xf] %v323_v19  ;;  %326 = vst [vmem:[%s10667_s26 + $0x150] sm:$0xf] %v325_v20 }
  0x4a   : > { %328 = vst [vmem:[%s10667_s26 + $0x154] sm:$0xf] %v327_v21  ;;  %v329_v22 = vld [vmem:[%s10663_s25 + $0x2b0] sm:$0xf]  ;;  %v331_v23 = vld [vmem:[%s10663_s25 + $0x2b8] sm:$0xf] }
  0x4b   : > { %v333_v24 = vld [vmem:[%s10663_s25 + $0x2c0] sm:$0xf]  ;;  %330 = vst [vmem:[%s10667_s26 + $0x158] sm:$0xf] %v329_v22  ;;  %332 = vst [vmem:[%s10667_s26 + $0x15c] sm:$0xf] %v331_v23 }
  0x4c   : > { %334 = vst [vmem:[%s10667_s26 + $0x160] sm:$0xf] %v333_v24  ;;  %v335_v25 = vld [vmem:[%s10663_s25 + $0x2c8] sm:$0xf]  ;;  %v337_v26 = vld [vmem:[%s10663_s25 + $0x2d0] sm:$0xf] }
  0x4d   : > { %v339_v27 = vld [vmem:[%s10663_s25 + $0x2d8] sm:$0xf]  ;;  %336 = vst [vmem:[%s10667_s26 + $0x164] sm:$0xf] %v335_v25  ;;  %338 = vst [vmem:[%s10667_s26 + $0x168] sm:$0xf] %v337_v26 }
  0x4e   : > { %340 = vst [vmem:[%s10667_s26 + $0x16c] sm:$0xf] %v339_v27  ;;  %v341_v28 = vld [vmem:[%s10663_s25 + $0x2e0] sm:$0xf]  ;;  %v343_v29 = vld [vmem:[%s10663_s25 + $0x2e8] sm:$0xf] }
  0x4f   : > { %v345_v30 = vld [vmem:[%s10663_s25 + $0x2f0] sm:$0xf]  ;;  %342 = vst [vmem:[%s10667_s26 + $0x170] sm:$0xf] %v341_v28  ;;  %344 = vst [vmem:[%s10667_s26 + $0x174] sm:$0xf] %v343_v29 }
  0x50   : > { %346 = vst [vmem:[%s10667_s26 + $0x178] sm:$0xf] %v345_v30  ;;  %v347_v31 = vld [vmem:[%s10663_s25 + $0x2f8] sm:$0xf]  ;;  %v349_v32 = vld [vmem:[%s10663_s25 + $0x300] sm:$0xf] }
  0x51   : > { %v351_v33 = vld [vmem:[%s10663_s25 + $0x308] sm:$0xf]  ;;  %348 = vst [vmem:[%s10667_s26 + $0x17c] sm:$0xf] %v347_v31  ;;  %350 = vst [vmem:[%s10667_s26 + $0x180] sm:$0xf] %v349_v32 }
  0x52   : > { %352 = vst [vmem:[%s10667_s26 + $0x184] sm:$0xf] %v351_v33  ;;  %v353_v34 = vld [vmem:[%s10663_s25 + $0x310] sm:$0xf]  ;;  %v355_v35 = vld [vmem:[%s10663_s25 + $0x318] sm:$0xf] }
  0x53   : > { %v357_v36 = vld [vmem:[%s10663_s25 + $0x320] sm:$0xf]  ;;  %354 = vst [vmem:[%s10667_s26 + $0x188] sm:$0xf] %v353_v34  ;;  %356 = vst [vmem:[%s10667_s26 + $0x18c] sm:$0xf] %v355_v35 }
  0x54   : > { %358 = vst [vmem:[%s10667_s26 + $0x190] sm:$0xf] %v357_v36  ;;  %v359_v37 = vld [vmem:[%s10663_s25 + $0x328] sm:$0xf]  ;;  %v361_v38 = vld [vmem:[%s10663_s25 + $0x330] sm:$0xf] }
  0x55   : > { %v363_v39 = vld [vmem:[%s10663_s25 + $0x338] sm:$0xf]  ;;  %360 = vst [vmem:[%s10667_s26 + $0x194] sm:$0xf] %v359_v37  ;;  %362 = vst [vmem:[%s10667_s26 + $0x198] sm:$0xf] %v361_v38 }
  0x56   : > { %364 = vst [vmem:[%s10667_s26 + $0x19c] sm:$0xf] %v363_v39  ;;  %v365_v40 = vld [vmem:[%s10663_s25 + $0x340] sm:$0xf]  ;;  %v367_v41 = vld [vmem:[%s10663_s25 + $0x348] sm:$0xf] }
  0x57   : > { %v369_v42 = vld [vmem:[%s10663_s25 + $0x350] sm:$0xf]  ;;  %366 = vst [vmem:[%s10667_s26 + $0x1a0] sm:$0xf] %v365_v40  ;;  %368 = vst [vmem:[%s10667_s26 + $0x1a4] sm:$0xf] %v367_v41 }
  0x58   : > { %370 = vst [vmem:[%s10667_s26 + $0x1a8] sm:$0xf] %v369_v42  ;;  %v371_v43 = vld [vmem:[%s10663_s25 + $0x358] sm:$0xf]  ;;  %v373_v44 = vld [vmem:[%s10663_s25 + $0x360] sm:$0xf] }
  0x59   : > { %v375_v45 = vld [vmem:[%s10663_s25 + $0x368] sm:$0xf]  ;;  %372 = vst [vmem:[%s10667_s26 + $0x1ac] sm:$0xf] %v371_v43  ;;  %374 = vst [vmem:[%s10667_s26 + $0x1b0] sm:$0xf] %v373_v44 }
  0x5a   : > { %376 = vst [vmem:[%s10667_s26 + $0x1b4] sm:$0xf] %v375_v45  ;;  %v377_v46 = vld [vmem:[%s10663_s25 + $0x370] sm:$0xf]  ;;  %v379_v47 = vld [vmem:[%s10663_s25 + $0x378] sm:$0xf] }
  0x5b   : > { %v381_v48 = vld [vmem:[%s10663_s25 + $0x380] sm:$0xf]  ;;  %378 = vst [vmem:[%s10667_s26 + $0x1b8] sm:$0xf] %v377_v46  ;;  %380 = vst [vmem:[%s10667_s26 + $0x1bc] sm:$0xf] %v379_v47 }
  0x5c   : > { %382 = vst [vmem:[%s10667_s26 + $0x1c0] sm:$0xf] %v381_v48  ;;  %v383_v49 = vld [vmem:[%s10663_s25 + $0x388] sm:$0xf]  ;;  %v385_v50 = vld [vmem:[%s10663_s25 + $0x390] sm:$0xf] }
  0x5d   : > { %v387_v51 = vld [vmem:[%s10663_s25 + $0x398] sm:$0xf]  ;;  %384 = vst [vmem:[%s10667_s26 + $0x1c4] sm:$0xf] %v383_v49  ;;  %386 = vst [vmem:[%s10667_s26 + $0x1c8] sm:$0xf] %v385_v50 }
  0x5e   : > { %388 = vst [vmem:[%s10667_s26 + $0x1cc] sm:$0xf] %v387_v51  ;;  %v389_v52 = vld [vmem:[%s10663_s25 + $0x3a0] sm:$0xf]  ;;  %v391_v53 = vld [vmem:[%s10663_s25 + $0x3a8] sm:$0xf] }
  0x5f   : > { %v393_v54 = vld [vmem:[%s10663_s25 + $0x3b0] sm:$0xf]  ;;  %390 = vst [vmem:[%s10667_s26 + $0x1d0] sm:$0xf] %v389_v52  ;;  %392 = vst [vmem:[%s10667_s26 + $0x1d4] sm:$0xf] %v391_v53 }
  0x60   : > { %394 = vst [vmem:[%s10667_s26 + $0x1d8] sm:$0xf] %v393_v54  ;;  %v395_v55 = vld [vmem:[%s10663_s25 + $0x3b8] sm:$0xf]  ;;  %v397_v56 = vld [vmem:[%s10663_s25 + $0x3c0] sm:$0xf] }
  0x61   : > { %v399_v57 = vld [vmem:[%s10663_s25 + $0x3c8] sm:$0xf]  ;;  %396 = vst [vmem:[%s10667_s26 + $0x1dc] sm:$0xf] %v395_v55  ;;  %398 = vst [vmem:[%s10667_s26 + $0x1e0] sm:$0xf] %v397_v56 }
  0x62   : > { %400 = vst [vmem:[%s10667_s26 + $0x1e4] sm:$0xf] %v399_v57  ;;  %v401_v58 = vld [vmem:[%s10663_s25 + $0x3d0] sm:$0xf]  ;;  %v403_v59 = vld [vmem:[%s10663_s25 + $0x3d8] sm:$0xf] }
  0x63   : > { %v405_v60 = vld [vmem:[%s10663_s25 + $0x3e0] sm:$0xf]  ;;  %402 = vst [vmem:[%s10667_s26 + $0x1e8] sm:$0xf] %v401_v58  ;;  %404 = vst [vmem:[%s10667_s26 + $0x1ec] sm:$0xf] %v403_v59 }
  0x64   : > { %406 = vst [vmem:[%s10667_s26 + $0x1f0] sm:$0xf] %v405_v60  ;;  %v407_v61 = vld [vmem:[%s10663_s25 + $0x3e8] sm:$0xf]  ;;  %v409_v62 = vld [vmem:[%s10663_s25 + $0x3f0] sm:$0xf] }
  0x65   : > { %v411_v63 = vld [vmem:[%s10663_s25 + $0x3f8] sm:$0xf]  ;;  %408 = vst [vmem:[%s10667_s26 + $0x1f4] sm:$0xf] %v407_v61  ;;  %410 = vst [vmem:[%s10667_s26 + $0x1f8] sm:$0xf] %v409_v62 }
  0x66   : > { %412 = vst [vmem:[%s10667_s26 + $0x1fc] sm:$0xf] %v411_v63 }
  0x67 PF: > { %p9937_p5 = scmp.ge.s32.totalorder %s10594_s14, 1  ;;  %p690_p6 = scmp.lt.s32.totalorder %s10594_s14, 3 }
  0x69   : > { %p691_p7 = pnand %p9937_p5, %p690_p6 }
  0x6b   : > { %694 = sbr.rel (%p691_p7) target bundleno = 2129 (0x851), region = 61 }
  0x72   : > { %s697_s27 = sand.u32 1, %s10586_s12   ;;  %vm997_vm0 = vcmask 72704   ;;  %v10596_v0 = vmov 0.0   ;;  %vm999_vm1 = vcmask 65536   ;;  %s10597_s30 = smov 1   ;;  %vm1127_vm2 = vcmask 64512  }
  0x73   : > { %s10926_s28 = sshll.u32 %s697_s27, 9  ;;  %1007 = vst.msk [vmem:[#allocation2 + $0x40] sm:$0xff] %vm997_vm0, %v10596_v0  ;;  %1009 = vst.msk [vmem:[#allocation2 + $0x50] sm:$0xff] %vm997_vm0, %v10596_v0  ;;  %vm1352_vm3 = vcmask 72712   ;;  %vm3236_vm4 = vcmask 1040384   ;;  %s10599_s4 = smov 127  }
  0x74   : > { %998 = vst.msk [vmem:[#allocation2] sm:$0xff] %vm997_vm0, %v10596_v0  ;;  %1001 = vst.msk [vmem:[#allocation2 + $0x10] sm:$0xff] %vm997_vm0, %v10596_v0  ;;  %s11057_s29 = scalar_lea.vmem [#allocation3], %s10926_s28  ;;  %vm1780_vm5 = vcmask 1041409   ;;  %vm1782_vm6 = vcmask 1042434   ;;  %vm1784_vm7 = vcmask 1043459  }
  0x75   : > { %1003 = vst.msk [vmem:[#allocation2 + $0x20] sm:$0xff] %vm997_vm0, %v10596_v0  ;;  %1005 = vst.msk [vmem:[#allocation2 + $0x30] sm:$0xff] %vm997_vm0, %v10596_v0  ;;  %v10219_v1 = vld [vmem:[%s11057_s29 + $0x90] sm:$0xff]   ;;  %v10217_v2 = vld [vmem:[%s11057_s29 + $0x80] sm:$0xff]   ;;  %vm1786_vm8 = vcmask 1044484   ;;  %vm1788_vm9 = vcmask 1045509  }
  0x76   : > { %1011 = vst.msk [vmem:[#allocation2 + $0x60] sm:$0xff] %vm997_vm0, %v10596_v0  ;;  %1013 = vst.msk [vmem:[#allocation2 + $0x70] sm:$0xff] %vm997_vm0, %v10596_v0  ;;  %v10220_v3 = vld [vmem:[%s11057_s29 + $0x98] sm:$0xff]   ;;  %v10020_v4 = vunpack.c.l.bf16 %v10219_v1  ;;  %v10021_v5 = vunpack.c.h.bf16 %v10219_v1  ;;  %v10012_v6 = vunpack.c.l.bf16 %v10217_v2  ;;  %v10013_v7 = vunpack.c.h.bf16 %v10217_v2  ;;  %v10218_v8 = vld [vmem:[%s11057_s29 + $0x88] sm:$0xff]   ;;  %p728_p8 = scmp.lt.s32.totalorder %s9931_s15, 1  ;;  %s10602_s12 = smov 2  }
  0x77   : > { %1015 = vst.msk [vmem:[#allocation2 + $0x80] sm:$0xff] %vm997_vm0, %v10596_v0  ;;  %1017 = vst.msk [vmem:[#allocation2 + $0x90] sm:$0xff] %vm997_vm0, %v10596_v0  ;;  %v10222_v9 = vld [vmem:[%s11057_s29 + $0xa8] sm:$0xff]   ;;  %v10024_v10 = vunpack.c.l.bf16 %v10220_v3  ;;  %v10025_v11 = vunpack.c.h.bf16 %v10220_v3  ;;  %v10016_v12 = vunpack.c.l.bf16 %v10218_v8  ;;  %v10017_v13 = vunpack.c.h.bf16 %v10218_v8  ;;  %v10221_v14 = vld [vmem:[%s11057_s29 + $0xa0] sm:$0xff]   ;;  %s10603_s14 = smov 4   ;;  %s10604_s17 = smov 6  }
  0x78   : > { %1019 = vst.msk [vmem:[#allocation2 + $0xa0] sm:$0xff] %vm997_vm0, %v10596_v0  ;;  %1021 = vst.msk [vmem:[#allocation2 + $0xb0] sm:$0xff] %vm997_vm0, %v10596_v0  ;;  %v10312_v15 = vpack.i.bf16 %v10021_v5, %v10020_v4  ;;  %v10302_v16 = vpack.i.bf16 %v10013_v7, %v10012_v6  ;;  %v10032_v17 = vunpack.c.l.bf16 %v10222_v9  ;;  %v10033_v18 = vunpack.c.h.bf16 %v10222_v9  ;;  %v10224_v23 = vld [vmem:[%s11057_s29 + $0xb8] sm:$0xff]   ;;  %v10223_v24 = vld [vmem:[%s11057_s29 + $0xb0] sm:$0xff]   ;;  %s17602_s15 = smov (!%p728_p8, %s9931_s15), 1  ;;  %s10605_s18 = smov 8  }
  0x79   : > { %1023 = vst.msk [vmem:[#allocation2 + $0xc0] sm:$0xff] %vm997_vm0, %v10596_v0  ;;  %1025 = vst.msk [vmem:[#allocation2 + $0xd0] sm:$0xff] %vm997_vm0, %v10596_v0  ;;  %v10317_v19 = vpack.i.bf16 %v10025_v11, %v10024_v10  ;;  %v10307_v20 = vpack.i.bf16 %v10017_v13, %v10016_v12  ;;  %v10028_v21 = vunpack.c.l.bf16 %v10221_v14  ;;  %v10029_v22 = vunpack.c.h.bf16 %v10221_v14  ;;  %v10226_v27 = vld [vmem:[%s11057_s29 + $0xc8] sm:$0xff]   ;;  %v10225_v32 = vld [vmem:[%s11057_s29 + $0xc0] sm:$0xff]   ;;  %s9941_s5 = sshll.u32 %s17602_s15, 3  ;;  %s10606_s20 = smov 10  }
  0x7a   : > { %1027 = vst.msk [vmem:[#allocation2 + $0xe0] sm:$0xff] %vm997_vm0, %v10596_v0  ;;  %1029 = vst.msk [vmem:[#allocation2 + $0xf0] sm:$0xff] %vm997_vm0, %v10596_v0  ;;  %10313 = vrot.lane.b32.xlu1 %v10312_v15, %s10597_s30  ;;  %10303 = vrot.lane.b32.xlu0 %v10302_v16, %s10597_s30  ;;  %v10327_v25 = vpack.i.bf16 %v10033_v18, %v10032_v17  ;;  %v10040_v26 = vunpack.c.l.bf16 %v10224_v23  ;;  %v10041_v29 = vunpack.c.h.bf16 %v10224_v23  ;;  %v10036_v30 = vunpack.c.l.bf16 %v10223_v24  ;;  %v10228_v37 = vld [vmem:[%s11057_s29 + $0xd8] sm:$0xff]   ;;  %v10227_v38 = vld [vmem:[%s11057_s29 + $0xd0] sm:$0xff]   ;;  %s736_s8 = scalar_lea.vmem %s16247_s2, %s9941_s5  ;;  %s740_s11 = scalar_lea.vmem %s16248_s3, %s9941_s5 }
  0x7b   : > { %1031 = vst.msk [vmem:[#allocation2 + $0x100] sm:$0xff] %vm997_vm0, %v10596_v0  ;;  %1033 = vst.msk [vmem:[#allocation2 + $0x110] sm:$0xff] %vm997_vm0, %v10596_v0  ;;  %v10322_v28 = vpack.i.bf16 %v10029_v22, %v10028_v21  ;;  %v10037_v31 = vunpack.c.h.bf16 %v10223_v24  ;;  %v10048_v33 = vunpack.c.l.bf16 %v10226_v27  ;;  %v10049_v34 = vunpack.c.h.bf16 %v10226_v27  ;;  %v10230_v41 = vld [vmem:[%s11057_s29 + $0xe8] sm:$0xff]   ;;  %v10229_v42 = vld [vmem:[%s11057_s29 + $0xe0] sm:$0xff]   ;;  %s10607_s21 = smov 12   ;;  %s10608_s22 = smov 14  }
  0x7c   : > { %1035 = vst.msk [vmem:[#allocation2 + $0x120] sm:$0xff] %vm997_vm0, %v10596_v0  ;;  %1037 = vst.msk [vmem:[#allocation2 + $0x130] sm:$0xff] %vm997_vm0, %v10596_v0  ;;  %v10044_v35 = vunpack.c.l.bf16 %v10225_v32  ;;  %v10045_v36 = vunpack.c.h.bf16 %v10225_v32  ;;  %v10337_v39 = vpack.i.bf16 %v10041_v29, %v10040_v26  ;;  %v10232_v43 = vld [vmem:[%s11057_s29 + $0xf8] sm:$0xff]   ;;  %v10056_v45 = vunpack.c.l.bf16 %v10228_v37  ;;  %v10231_v48 = vld [vmem:[%s11057_s29 + $0xf0] sm:$0xff]   ;;  %s9945_s23 = sshll.u32 %s17602_s15, 7 }
  0x7d   : > { %1039 = vst.msk [vmem:[#allocation2 + $0x140] sm:$0xff] %vm997_vm0, %v10596_v0  ;;  %1041 = vst.msk [vmem:[#allocation2 + $0x150] sm:$0xff] %vm997_vm0, %v10596_v0  ;;  %v10332_v40 = vpack.i.bf16 %v10037_v31, %v10036_v30  ;;  %v10347_v44 = vpack.i.bf16 %v10049_v34, %v10048_v33  ;;  %v10057_v46 = vunpack.c.h.bf16 %v10228_v37  ;;  %v10052_v47 = vunpack.c.l.bf16 %v10227_v38  ;;  %v10250_v49 = vld [vmem:[%s11057_s29 + $0x188] sm:$0xff]   ;;  %v10249_v54 = vld [vmem:[%s11057_s29 + $0x180] sm:$0xff]   ;;  %s16119_s26 = scalar_lea.vmem %s16246_s1, %s9945_s23 }
  0x7e   : > { %1043 = vst.msk [vmem:[#allocation2 + $0x160] sm:$0xff] %vm997_vm0, %v10596_v0  ;;  %1045 = vst.msk [vmem:[#allocation2 + $0x170] sm:$0xff] %vm997_vm0, %v10596_v0  ;;  %10318 = vrot.lane.b32.xlu1 %v10317_v19, %s10597_s30  ;;  %10308 = vrot.lane.b32.xlu0 %v10307_v20, %s10597_s30  ;;  %v10342_v50 = vpack.i.bf16 %v10045_v36, %v10044_v35  ;;  %v10053_v51 = vunpack.c.h.bf16 %v10227_v38  ;;  %v10064_v52 = vunpack.c.l.bf16 %v10230_v41  ;;  %v10065_v53 = vunpack.c.h.bf16 %v10230_v41  ;;  %v10252_v55 = vld [vmem:[%s11057_s29 + $0x198] sm:$0xff]   ;;  %v10251_v4 = vld [vmem:[%s11057_s29 + $0x190] sm:$0xff]  }
  0x7f   : > { %1047 = vst.msk [vmem:[#allocation2 + $0x180] sm:$0xff] %vm997_vm0, %v10596_v0  ;;  %1049 = vst.msk [vmem:[#allocation2 + $0x190] sm:$0xff] %vm997_vm0, %v10596_v0  ;;  %v10060_v56 = vunpack.c.l.bf16 %v10229_v42  ;;  %v10061_v57 = vunpack.c.h.bf16 %v10229_v42  ;;  %v10072_v58 = vunpack.c.l.bf16 %v10232_v43  ;;  %v10073_v59 = vunpack.c.h.bf16 %v10232_v43  ;;  %v11088_v7 = vld [vmem:[%s11057_s29 + $0x1a8] sm:$0xff]   ;;  %v11095_v11 = vld [vmem:[%s11057_s29 + $0x1a0] sm:$0xff]  }
  0x80   : > { %1051 = vst.msk [vmem:[#allocation2 + $0x1a0] sm:$0xff] %vm997_vm0, %v10596_v0  ;;  %1053 = vst.msk [vmem:[#allocation2 + $0x1b0] sm:$0xff] %vm997_vm0, %v10596_v0  ;;  %v10068_v60 = vunpack.c.l.bf16 %v10231_v48  ;;  %v10069_v61 = vunpack.c.h.bf16 %v10231_v48  ;;  %v10144_v62 = vunpack.c.l.bf16 %v10250_v49  ;;  %v10145_v63 = vunpack.c.h.bf16 %v10250_v49  ;;  %v10203_v12 = vld [vmem:[%s11057_s29 + $0x10] sm:$0xff]   ;;  %v11103_v17 = vld [vmem:[%s11057_s29 + $0x1b8] sm:$0xff]  }
  0x81   : > { %1055 = vst.msk [vmem:[#allocation2 + $0x1c0] sm:$0xff] %vm997_vm0, %v10596_v0  ;;  %1057 = vst.msk [vmem:[#allocation2 + $0x1d0] sm:$0xff] %vm997_vm0, %v10596_v0  ;;  %v10141_v1 = vunpack.c.h.bf16 %v10249_v54  ;;  %v10152_v2 = vunpack.c.l.bf16 %v10252_v55  ;;  %v10153_v3 = vunpack.c.h.bf16 %v10252_v55  ;;  %v10357_v5 = vpack.i.bf16 %v10057_v46, %v10056_v45  ;;  %v9947_v18 = vld [vmem:[%s11057_s29] sm:$0xff]   ;;  %v10204_v19 = vld [vmem:[%s11057_s29 + $0x18] sm:$0xff]  }
  0x82   : > { %1059 = vst.msk [vmem:[#allocation2 + $0x1e0] sm:$0xff] %vm997_vm0, %v10596_v0  ;;  %1061 = vst.msk [vmem:[#allocation2 + $0x1f0] sm:$0xff] %vm997_vm0, %v10596_v0  ;;  %10328 = vrot.lane.b32.xlu1 %v10327_v25, %s10597_s30  ;;  %10323 = vrot.lane.b32.xlu0 %v10322_v28, %s10597_s30  ;;  %v10352_v6 = vpack.i.bf16 %v10053_v51, %v10052_v47  ;;  %v10367_v8 = vpack.i.bf16 %v10065_v53, %v10064_v52  ;;  %v10148_v15 = vunpack.c.l.bf16 %v10251_v4  ;;  %v1067_v24 = vld [vmem:[#allocation2 + $0x40] sm:$0xff]  ;;  %v1068_v25 = vld [vmem:[#allocation2 + $0x50] sm:$0xff]  ;;  %vm1790_vm10 = vcmask 1046534  }
  0x83   : > { %1004 = vst.msk [vmem:[#allocation2 + $0x28] sm:$0x1] %vm999_vm1, %v10596_v0  ;;  %1006 = vst.msk [vmem:[#allocation2 + $0x38] sm:$0x1] %vm999_vm1, %v10596_v0  ;;  %v10362_v9 = vpack.i.bf16 %v10061_v57, %v10060_v56  ;;  %v11092_v10 = vpack.i.bf16 %v10073_v59, %v10072_v58  ;;  %v11098_v13 = vpack.i.bf16 %v10069_v61, %v10068_v60  ;;  %v10149_v16 = vunpack.c.h.bf16 %v10251_v4  ;;  %v1063_v26 = vld [vmem:[#allocation2] sm:$0xff]  ;;  %v1064_v31 = vld [vmem:[#allocation2 + $0x10] sm:$0xff] }
  0x84   : > { %1000 = vst.msk [vmem:[#allocation2 + $0x8] sm:$0x1] %vm999_vm1, %v10596_v0  ;;  %1002 = vst.msk [vmem:[#allocation2 + $0x18] sm:$0x1] %vm999_vm1, %v10596_v0  ;;  %v11100_v14 = vpack.i.bf16 %v10145_v63, %v10144_v62  ;;  %v11109_v21 = vpack.i.bf16 %v10153_v3, %v10152_v2  ;;  %v10160_v22 = vunpack.c.l.bf16 %v11088_v7  ;;  %v10161_v23 = vunpack.c.h.bf16 %v11088_v7  ;;  %v1069_v32 = vld [vmem:[#allocation2 + $0x60] sm:$0xff]  ;;  %v10202_v33 = vld [vmem:[%s11057_s29 + $0x8] sm:$0xff]  }
  0x85   : > { %1008 = vst.msk [vmem:[#allocation2 + $0x48] sm:$0x1] %vm999_vm1, %v10596_v0  ;;  %1010 = vst.msk [vmem:[#allocation2 + $0x58] sm:$0x1] %vm999_vm1, %v10596_v0  ;;  %v10156_v27 = vunpack.c.l.bf16 %v11095_v11  ;;  %v10157_v28 = vunpack.c.h.bf16 %v11095_v11  ;;  %v9956_v29 = vunpack.c.l.bf16 %v10203_v12  ;;  %v9957_v30 = vunpack.c.h.bf16 %v10203_v12  ;;  %v1070_v37 = vld [vmem:[#allocation2 + $0x70] sm:$0xff]  ;;  %v10205_v46 = vld [vmem:[%s11057_s29 + $0x20] sm:$0xff]  }
  0x86   : > { %1012 = vst.msk [vmem:[#allocation2 + $0x68] sm:$0x1] %vm999_vm1, %v10596_v0  ;;  %1014 = vst.msk [vmem:[#allocation2 + $0x78] sm:$0x1] %vm999_vm1, %v10596_v0  ;;  %10338 = vrot.lane.b32.xlu1 %v10337_v39, %s10597_s30  ;;  %10333 = vrot.lane.b32.xlu0 %v10332_v40, %s10597_s30  ;;  %v10168_v34 = vunpack.c.l.bf16 %v11103_v17  ;;  %v9948_v35 = vunpack.c.l.bf16 %v9947_v18  ;;  %v9949_v36 = vunpack.c.h.bf16 %v9947_v18  ;;  %v9960_v38 = vunpack.c.l.bf16 %v10204_v19  ;;  %v1065_v39 = vld [vmem:[#allocation2 + $0x20] sm:$0xff]  ;;  %v10206_v40 = vld [vmem:[%s11057_s29 + $0x28] sm:$0xff]  }
  0x87   : > { %1016 = vst.msk [vmem:[#allocation2 + $0x88] sm:$0x1] %vm999_vm1, %v10596_v0  ;;  %1018 = vst.msk [vmem:[#allocation2 + $0x98] sm:$0x1] %vm999_vm1, %v10596_v0  ;;  %v11120_v41 = vpack.i.bf16 %v10149_v16, %v10148_v15  ;;  %v1099_v42 = vadd.f32 %v9956_v29, %v1067_v24  ;;  %v1100_v43 = vadd.f32 %v9957_v30, %v1068_v25  ;;  %v1066_v45 = vld [vmem:[#allocation2 + $0x30] sm:$0xff]  ;;  %v10208_v47 = vld [vmem:[%s11057_s29 + $0x38] sm:$0xff]   ;;  %v9952_v51 = vunpack.c.l.bf16 %v10202_v33 }
  0x88   : > { %1020 = vst.msk [vmem:[#allocation2 + $0xa8] sm:$0x1] %vm999_vm1, %v10596_v0  ;;  %1022 = vst.msk [vmem:[#allocation2 + $0xb8] sm:$0x1] %vm999_vm1, %v10596_v0  ;;  %v1095_v48 = vadd.f32 %v9948_v35, %v1063_v26  ;;  %v1096_v49 = vadd.f32 %v9949_v36, %v1064_v31  ;;  %v1073_v52 = vld [vmem:[#allocation2 + $0xa0] sm:$0xff]  ;;  %v1074_v53 = vld [vmem:[#allocation2 + $0xb0] sm:$0xff]  ;;  %v9953_v56 = vunpack.c.h.bf16 %v10202_v33  ;;  %v9968_v57 = vunpack.c.l.bf16 %v10206_v40 }
  0x89   : > { %1024 = vst.msk [vmem:[#allocation2 + $0xc8] sm:$0x1] %vm999_vm1, %v10596_v0  ;;  %1026 = vst.msk [vmem:[#allocation2 + $0xd8] sm:$0x1] %vm999_vm1, %v10596_v0  ;;  %v9969_v58 = vunpack.c.h.bf16 %v10206_v40  ;;  %v1072_v59 = vld [vmem:[#allocation2 + $0x90] sm:$0xff]  ;;  %v1077_v60 = vld [vmem:[#allocation2 + $0xe0] sm:$0xff]  ;;  %v1097_v62 = vadd.f32 %v9952_v51, %v1065_v39  ;;  %v9964_v63 = vunpack.c.l.bf16 %v10205_v46  ;;  %v9976_v2 = vunpack.c.l.bf16 %v10208_v47 }
  0x8a   : > { %1028 = vst.msk [vmem:[#allocation2 + $0xe8] sm:$0x1] %vm999_vm1, %v10596_v0  ;;  %1030 = vst.msk [vmem:[#allocation2 + $0xf8] sm:$0x1] %vm999_vm1, %v10596_v0  ;;  %10348 = vrot.lane.b32.xlu1 %v10347_v44, %s10597_s30  ;;  %10343 = vrot.lane.b32.xlu0 %v10342_v50, %s10597_s30  ;;  %v9961_v44 = vunpack.c.h.bf16 %v10204_v19  ;;  %v1101_v50 = vadd.f32 %v9960_v38, %v1069_v32  ;;  %v10207_v61 = vld [vmem:[%s11057_s29 + $0x30] sm:$0xff]   ;;  %v1075_v3 = vld [vmem:[#allocation2 + $0xc0] sm:$0xff]  ;;  %v10402_v7 = vpack.i.bf16 %v10157_v28, %v10156_v27 }
  0x8b   : > { %1032 = vst.msk [vmem:[#allocation2 + $0x108] sm:$0x1] %vm999_vm1, %v10596_v0  ;;  %1034 = vst.msk [vmem:[#allocation2 + $0x118] sm:$0x1] %vm999_vm1, %v10596_v0  ;;  %v10210_v4 = vld [vmem:[%s11057_s29 + $0x48] sm:$0xff]   ;;  %v1076_v12 = vld [vmem:[#allocation2 + $0xd0] sm:$0xff]  ;;  %v1109_v24 = vadd.f32 %v9976_v2, %v1077_v60  ;;  %v9972_v25 = vunpack.c.l.bf16 %v10207_v61  ;;  %v9973_v32 = vunpack.c.h.bf16 %v10207_v61 }
  0x8c   : > { %1036 = vst.msk [vmem:[#allocation2 + $0x128] sm:$0x1] %vm999_vm1, %v10596_v0  ;;  %1038 = vst.msk [vmem:[#allocation2 + $0x138] sm:$0x1] %vm999_vm1, %v10596_v0  ;;  %v1102_v55 = vadd.f32 %v9961_v44, %v1070_v37  ;;  %v10209_v15 = vld [vmem:[%s11057_s29 + $0x40] sm:$0xff]   ;;  %v10212_v16 = vld [vmem:[%s11057_s29 + $0x58] sm:$0xff]   ;;  %v9984_v33 = vunpack.c.l.bf16 %v10210_v4  ;;  %v9985_v35 = vunpack.c.h.bf16 %v10210_v4 }
  0x8d   : > { %1040 = vst.msk [vmem:[#allocation2 + $0x148] sm:$0x1] %vm999_vm1, %v10596_v0  ;;  %1042 = vst.msk [vmem:[#allocation2 + $0x158] sm:$0x1] %vm999_vm1, %v10596_v0  ;;  %v1081_v26 = vld [vmem:[#allocation2 + $0x120] sm:$0xff]  ;;  %v1082_v29 = vld [vmem:[#allocation2 + $0x130] sm:$0xff]  ;;  %v1107_v39 = vadd.f32 %v9972_v25, %v1075_v3  ;;  %v9980_v40 = vunpack.c.l.bf16 %v10209_v15  ;;  %v9992_v44 = vunpack.c.l.bf16 %v10212_v16 }
  0x8e   : > { %1044 = vst.msk [vmem:[#allocation2 + $0x168] sm:$0x1] %vm999_vm1, %v10596_v0  ;;  %1046 = vst.msk [vmem:[#allocation2 + $0x178] sm:$0x1] %vm999_vm1, %v10596_v0  ;;  %10358 = vrot.lane.b32.xlu1 %v10357_v5, %s10597_s30  ;;  %10353 = vrot.lane.b32.xlu0 %v10352_v6, %s10597_s30  ;;  %v1098_v5 = vadd.f32 %v9953_v56, %v1066_v45  ;;  %v1105_v6 = vadd.f32 %v9968_v57, %v1073_v52  ;;  %v1079_v30 = vld [vmem:[#allocation2 + $0x100] sm:$0xff]  ;;  %v1080_v36 = vld [vmem:[#allocation2 + $0x110] sm:$0xff] }
  0x8f   : > { %1048 = vst.msk [vmem:[#allocation2 + $0x188] sm:$0x1] %vm999_vm1, %v10596_v0  ;;  %1050 = vst.msk [vmem:[#allocation2 + $0x198] sm:$0x1] %vm999_vm1, %v10596_v0  ;;  %v1085_v37 = vld [vmem:[#allocation2 + $0x160] sm:$0xff]  ;;  %v10211_v38 = vld [vmem:[%s11057_s29 + $0x50] sm:$0xff]   ;;  %v1111_v52 = vadd.f32 %v9980_v40, %v1079_v30 }
  0x90   : > { %1052 = vst.msk [vmem:[#allocation2 + $0x1a8] sm:$0x1] %vm999_vm1, %v10596_v0  ;;  %1054 = vst.msk [vmem:[#allocation2 + $0x1b8] sm:$0x1] %vm999_vm1, %v10596_v0  ;;  %v1083_v45 = vld [vmem:[#allocation2 + $0x140] sm:$0xff]  ;;  %v10216_v51 = vld [vmem:[%s11057_s29 + $0x78] sm:$0xff]   ;;  %v9989_v60 = vunpack.c.h.bf16 %v10211_v38 }
  0x91   : > { %1056 = vst.msk [vmem:[#allocation2 + $0x1c8] sm:$0x1] %vm999_vm1, %v10596_v0  ;;  %1058 = vst.msk [vmem:[#allocation2 + $0x1d8] sm:$0x1] %vm999_vm1, %v10596_v0  ;;  %v1089_v56 = vld [vmem:[#allocation2 + $0x1a0] sm:$0xff]  ;;  %v1090_v57 = vld [vmem:[#allocation2 + $0x1b0] sm:$0xff] }
  0x92   : > { %1060 = vst.msk [vmem:[#allocation2 + $0x1e8] sm:$0x1] %vm999_vm1, %v10596_v0  ;;  %1062 = vst.msk [vmem:[#allocation2 + $0x1f8] sm:$0x1] %vm999_vm1, %v10596_v0  ;;  %v10140_v0 = vunpack.c.l.bf16 %v10249_v54  ;;  %v1071_v54 = vld [vmem:[#allocation2 + $0x80] sm:$0xff]  ;;  %10368 = vrot.lane.b32.xlu1 %v10367_v8, %s10597_s30  ;;  %10363 = vrot.lane.b32.xlu0 %v10362_v9, %s10597_s30  ;;  %v1106_v8 = vadd.f32 %v9969_v58, %v1074_v53  ;;  %v9977_v9 = vunpack.c.h.bf16 %v10208_v47  ;;  %vm1792_vm11 = vcmask 1047559  }
  0x93   : > { %1132 = vst.msk [vmem:[#allocation2 + $0x40] sm:$0xff] %vm1127_vm2, %v1099_v42  ;;  %1133 = vst.msk [vmem:[#allocation2 + $0x50] sm:$0xff] %vm1127_vm2, %v1100_v43  ;;  %v1103_v18 = vadd.f32 %v9964_v63, %v1071_v54  ;;  %v9981_v42 = vunpack.c.h.bf16 %v10209_v15  ;;  %v1086_v43 = vld [vmem:[#allocation2 + $0x170] sm:$0xff]  ;;  %v1113_v47 = vadd.f32 %v9984_v33, %v1081_v26  ;;  %v1117_v54 = vadd.f32 %v9992_v44, %v1085_v37  ;;  %v1087_v58 = vld [vmem:[#allocation2 + $0x180] sm:$0xff] }
  0x94   : > { %v11107_v20 = vpack.i.bf16 %v10141_v1, %v10140_v0  ;;  %1128 = vst.msk [vmem:[#allocation2] sm:$0xff] %vm1127_vm2, %v1095_v48  ;;  %1129 = vst.msk [vmem:[#allocation2 + $0x10] sm:$0xff] %vm1127_vm2, %v1096_v49  ;;  %v9965_v0 = vunpack.c.h.bf16 %v10205_v46  ;;  %v1078_v1 = vld [vmem:[#allocation2 + $0xf0] sm:$0xff]  ;;  %v10214_v46 = vld [vmem:[%s11057_s29 + $0x68] sm:$0xff]   ;;  %v9993_v48 = vunpack.c.h.bf16 %v10212_v16  ;;  %v10009_v15 = vunpack.c.h.bf16 %v10216_v51 }
  0x95   : > { %1134 = vst.msk [vmem:[#allocation2 + $0x60] sm:$0xff] %vm1127_vm2, %v1101_v50  ;;  %1135 = vst.msk [vmem:[#allocation2 + $0x70] sm:$0xff] %vm1127_vm2, %v1102_v55  ;;  %v1110_v31 = vadd.f32 %v9977_v9, %v1078_v1  ;;  %v1084_v49 = vld [vmem:[#allocation2 + $0x150] sm:$0xff]  ;;  %v10213_v50 = vld [vmem:[%s11057_s29 + $0x60] sm:$0xff]   ;;  %v1112_v53 = vadd.f32 %v9981_v42, %v1080_v36  ;;  %v9988_v55 = vunpack.c.l.bf16 %v10211_v38  ;;  %v10000_v61 = vunpack.c.l.bf16 %v10214_v46 }
  0x96   : > { %1130 = vst.msk [vmem:[#allocation2 + $0x20] sm:$0xff] %vm1127_vm2, %v1097_v62  ;;  %v1104_v19 = vadd.f32 %v9965_v0, %v1072_v59  ;;  %1131 = vst.msk [vmem:[#allocation2 + $0x30] sm:$0xff] %vm1127_vm2, %v1098_v5  ;;  %10378 = vrot.lane.b32.xlu1 %v11092_v10, %s10597_s30  ;;  %10373 = vrot.lane.b32.xlu0 %v11098_v13, %s10597_s30  ;;  %v1108_v10 = vadd.f32 %v9973_v32, %v1076_v12  ;;  %v10001_v62 = vunpack.c.h.bf16 %v10214_v46  ;;  %v1088_v63 = vld [vmem:[#allocation2 + $0x190] sm:$0xff]  ;;  %v1093_v0 = vld [vmem:[#allocation2 + $0x1e0] sm:$0xff]  ;;  %vm6918_vm12 = vcmask 7168  }
  0x97   : > { %1138 = vst.msk [vmem:[#allocation2 + $0xa0] sm:$0xff] %vm1127_vm2, %v1105_v6  ;;  %1139 = vst.msk [vmem:[#allocation2 + $0xb0] sm:$0xff] %vm1127_vm2, %v1106_v8  ;;  %v1114_v13 = vadd.f32 %v9985_v35, %v1082_v29  ;;  %v1118_v59 = vadd.f32 %v9993_v48, %v1086_v43  ;;  %v10215_v1 = vld [vmem:[%s11057_s29 + $0x70] sm:$0xff]   ;;  %v1115_v2 = vadd.f32 %v9988_v55, %v1083_v45  ;;  %v9996_v3 = vunpack.c.l.bf16 %v10213_v50  ;;  %v1091_v16 = vld [vmem:[#allocation2 + $0x1c0] sm:$0xff] }
  0x98   : > { %1136 = vst.msk [vmem:[#allocation2 + $0x80] sm:$0xff] %vm1127_vm2, %v1103_v18  ;;  %1137 = vst.msk [vmem:[#allocation2 + $0x90] sm:$0xff] %vm1127_vm2, %v1104_v19  ;;  %v9997_v4 = vunpack.c.h.bf16 %v10213_v50  ;;  %v1094_v5 = vld [vmem:[#allocation2 + $0x1f0] sm:$0xff]  ;;  %v10008_v6 = vunpack.c.l.bf16 %v10216_v51  ;;  %v1116_v9 = vadd.f32 %v9989_v60, %v1084_v49  ;;  %v1121_v12 = vadd.f32 %v10000_v61, %v1089_v56  ;;  %v10258_v32 = vld [vmem:[%s11057_s29 + $0x1c8] sm:$0xff]  }
  0x99   : > { %1142 = vst.msk [vmem:[#allocation2 + $0xe0] sm:$0xff] %vm1127_vm2, %v1109_v24  ;;  %1143 = vst.msk [vmem:[#allocation2 + $0xf0] sm:$0xff] %vm1127_vm2, %v1110_v31  ;;  %v10255_v8 = vld [vmem:[%s11057_s29 + $0x1b0] sm:$0xff]   ;;  %v10004_v25 = vunpack.c.l.bf16 %v10215_v1  ;;  %v10407_v26 = vpack.i.bf16 %v10161_v23, %v10160_v22  ;;  %v10169_v29 = vunpack.c.h.bf16 %v11103_v17  ;;  %v1126_v30 = vadd.f32 %v10009_v15, %v1094_v5  ;;  %v10257_v33 = vld [vmem:[%s11057_s29 + $0x1c0] sm:$0xff]  }
  0x9a   : > { %1140 = vst.msk [vmem:[#allocation2 + $0xc0] sm:$0xff] %vm1127_vm2, %v1107_v39  ;;  %1141 = vst.msk [vmem:[#allocation2 + $0xd0] sm:$0xff] %vm1127_vm2, %v1108_v10  ;;  %10388 = vrot.lane.b32.xlu1 %v11100_v14, %s10597_s30  ;;  %10383 = vrot.lane.b32.xlu0 %v11107_v20, %s10597_s30  ;;  %v1122_v14 = vadd.f32 %v10001_v62, %v1090_v57  ;;  %v1119_v20 = vadd.f32 %v9996_v3, %v1087_v58  ;;  %v1092_v24 = vld [vmem:[#allocation2 + $0x1d0] sm:$0xff]  ;;  %v10005_v31 = vunpack.c.h.bf16 %v10215_v1  ;;  %v10260_v38 = vld [vmem:[%s11057_s29 + $0x1d8] sm:$0xff]   ;;  %vm9671_vm13 = vcmask 15360  }
  0x9b   : > { %1146 = vst.msk [vmem:[#allocation2 + $0x120] sm:$0xff] %vm1127_vm2, %v1113_v47  ;;  %1147 = vst.msk [vmem:[#allocation2 + $0x130] sm:$0xff] %vm1127_vm2, %v1114_v13  ;;  %v1120_v18 = vadd.f32 %v9997_v4, %v1088_v63  ;;  %v1125_v19 = vadd.f32 %v10008_v6, %v1093_v0  ;;  %v10164_v22 = vunpack.c.l.bf16 %v10255_v8  ;;  %v10165_v23 = vunpack.c.h.bf16 %v10255_v8  ;;  %v10259_v39 = vld [vmem:[%s11057_s29 + $0x1d0] sm:$0xff]   ;;  %v10262_v17 = vld [vmem:[%s11057_s29 + $0x1e8] sm:$0xff]  }
  0x9c   : > { %1144 = vst.msk [vmem:[#allocation2 + $0x100] sm:$0xff] %vm1127_vm2, %v1111_v52  ;;  %1145 = vst.msk [vmem:[#allocation2 + $0x110] sm:$0xff] %vm1127_vm2, %v1112_v53  ;;  %v10176_v11 = vunpack.c.l.bf16 %v10258_v32  ;;  %v10177_v27 = vunpack.c.h.bf16 %v10258_v32  ;;  %v10417_v28 = vpack.i.bf16 %v10169_v29, %v10168_v34  ;;  %v10172_v36 = vunpack.c.l.bf16 %v10257_v33  ;;  %v10261_v10 = vld [vmem:[%s11057_s29 + $0x1e0] sm:$0xff]   ;;  %v10264_v51 = vld [vmem:[%s11057_s29 + $0x1f8] sm:$0xff]  }
  0x9d   : > { %1150 = vst.msk [vmem:[#allocation2 + $0x160] sm:$0xff] %vm1127_vm2, %v1117_v54  ;;  %1151 = vst.msk [vmem:[#allocation2 + $0x170] sm:$0xff] %vm1127_vm2, %v1118_v59  ;;  %v10412_v35 = vpack.i.bf16 %v10165_v23, %v10164_v22  ;;  %v10173_v37 = vunpack.c.h.bf16 %v10257_v33  ;;  %v10184_v42 = vunpack.c.l.bf16 %v10260_v38  ;;  %v10185_v44 = vunpack.c.h.bf16 %v10260_v38  ;;  %v10263_v52 = vld [vmem:[%s11057_s29 + $0x1f0] sm:$0xff]   ;;  %v1164_v61 = vld [vmem:[#allocation2 + $0x40] sm:$0xff] }
  0x9e   : > { %1148 = vst.msk [vmem:[#allocation2 + $0x140] sm:$0xff] %vm1127_vm2, %v1115_v2  ;;  %1149 = vst.msk [vmem:[#allocation2 + $0x150] sm:$0xff] %vm1127_vm2, %v1116_v9  ;;  %10398 = vrot.lane.b32.xlu1 %v11109_v21, %s10597_s30  ;;  %10393 = vrot.lane.b32.xlu0 %v11120_v41, %s10597_s30  ;;  %v1123_v21 = vadd.f32 %v10004_v25, %v1091_v16  ;;  %v1124_v41 = vadd.f32 %v10005_v31, %v1092_v24  ;;  %v10180_v45 = vunpack.c.l.bf16 %v10259_v39  ;;  %v1165_v63 = vld [vmem:[#allocation2 + $0x50] sm:$0xff]  ;;  %v1160_v1 = vld [vmem:[#allocation2] sm:$0xff]  ;;  %vm9688_vm14 = vcmask 31744  }
  0x9f   : > { %1154 = vst.msk [vmem:[#allocation2 + $0x1a0] sm:$0xff] %vm1127_vm2, %v1121_v12  ;;  %1155 = vst.msk [vmem:[#allocation2 + $0x1b0] sm:$0xff] %vm1127_vm2, %v1122_v14  ;;  %v10427_v40 = vpack.i.bf16 %v10177_v27, %v10176_v11  ;;  %v10422_v43 = vpack.i.bf16 %v10173_v37, %v10172_v36  ;;  %v10181_v46 = vunpack.c.h.bf16 %v10259_v39  ;;  %v10192_v34 = vunpack.c.l.bf16 %v10262_v17  ;;  %v1161_v2 = vld [vmem:[#allocation2 + $0x10] sm:$0xff]  ;;  %v1166_v8 = vld [vmem:[#allocation2 + $0x60] sm:$0xff] }
  0xa0   : > { %1152 = vst.msk [vmem:[#allocation2 + $0x180] sm:$0xff] %vm1127_vm2, %v1119_v20  ;;  %1153 = vst.msk [vmem:[#allocation2 + $0x190] sm:$0xff] %vm1127_vm2, %v1120_v18  ;;  %v10193_v47 = vunpack.c.h.bf16 %v10262_v17  ;;  %v10437_v13 = vpack.i.bf16 %v10185_v44, %v10184_v42  ;;  %v10188_v49 = vunpack.c.l.bf16 %v10261_v10  ;;  %v10189_v50 = vunpack.c.h.bf16 %v10261_v10  ;;  %v1167_v12 = vld [vmem:[#allocation2 + $0x70] sm:$0xff]  ;;  %v1162_v15 = vld [vmem:[#allocation2 + $0x20] sm:$0xff] }
  0xa1   : > { %1158 = vst.msk [vmem:[#allocation2 + $0x1e0] sm:$0xff] %vm1127_vm2, %v1125_v19  ;;  %1159 = vst.msk [vmem:[#allocation2 + $0x1f0] sm:$0xff] %vm1127_vm2, %v1126_v30  ;;  %v10432_v48 = vpack.i.bf16 %v10181_v46, %v10180_v45  ;;  %v10200_v54 = vunpack.c.l.bf16 %v10264_v51  ;;  %v10201_v56 = vunpack.c.h.bf16 %v10264_v51  ;;  %v10196_v57 = vunpack.c.l.bf16 %v10263_v52  ;;  %v1163_v16 = vld [vmem:[#allocation2 + $0x30] sm:$0xff]  ;;  %v1170_v25 = vld [vmem:[#allocation2 + $0xa0] sm:$0xff] }
  0xa2   : > { %1156 = vst.msk [vmem:[#allocation2 + $0x1c0] sm:$0xff] %vm1127_vm2, %v1123_v21  ;;  %1157 = vst.msk [vmem:[#allocation2 + $0x1d0] sm:$0xff] %vm1127_vm2, %v1124_v41  ;;  %10408 = vrot.lane.b32.xlu1 %v10407_v26, %s10597_s30  ;;  %10403 = vrot.lane.b32.xlu0 %v10402_v7, %s10597_s30  ;;  %v10447_v53 = vpack.i.bf16 %v10193_v47, %v10192_v34  ;;  %v10442_v55 = vpack.i.bf16 %v10189_v50, %v10188_v49  ;;  %v10197_v58 = vunpack.c.h.bf16 %v10263_v52  ;;  %v10233_v26 = vld [vmem:[%s11057_s29 + $0x100] sm:$0xff]   ;;  %v10235_v29 = vld [vmem:[%s11057_s29 + $0x110] sm:$0xff]   ;;  %vm9705_vm15 = vcmask 48128  }
  0xa3   : > { %v10457_v59 = vpack.i.bf16 %v10201_v56, %v10200_v54  ;;  %v1171_v31 = vld [vmem:[#allocation2 + $0xb0] sm:$0xff]  ;;  %v1168_v22 = vld [vmem:[#allocation2 + $0x80] sm:$0xff]  ;;  %v11222_v32 = vld [vmem:[%s11057_s29 + $0x108] sm:$0xff]   ;;  %v10076_v41 = vunpack.c.l.bf16 %v10233_v26  ;;  %v10077_v11 = vunpack.c.h.bf16 %v10233_v26  ;;  %v10084_v27 = vunpack.c.l.bf16 %v10235_v29 }
  0xa4   : > { %v10452_v60 = vpack.i.bf16 %v10197_v58, %v10196_v57  ;;  %v1169_v23 = vld [vmem:[#allocation2 + $0x90] sm:$0xff]  ;;  %v11225_v21 = vld [vmem:[%s11057_s29 + $0x118] sm:$0xff]   ;;  %v1174_v33 = vld [vmem:[#allocation2 + $0xe0] sm:$0xff]  ;;  %v10080_v45 = vunpack.c.l.bf16 %v11222_v32  ;;  %v10081_v46 = vunpack.c.h.bf16 %v11222_v32  ;;  %vm9738_vm0 = vcmask 80896  }
  0xa5   : > { %v1175_v39 = vld [vmem:[#allocation2 + $0xf0] sm:$0xff]  ;;  %v10088_v34 = vunpack.c.l.bf16 %v11225_v21  ;;  %v10089_v47 = vunpack.c.h.bf16 %v11225_v21  ;;  %v11236_v49 = vld [vmem:[%s11057_s29 + $0x128] sm:$0xff]   ;;  %v11239_v50 = vld [vmem:[%s11057_s29 + $0x120] sm:$0xff]   ;;  %vm9755_vm1 = vcmask 97280  }
  0xa6   : > { %10418 = vrot.lane.b32.xlu1 %v10417_v28, %s10597_s30  ;;  %10413 = vrot.lane.b32.xlu0 %v10412_v35, %s10597_s30  ;;  %v10085_v28 = vunpack.c.h.bf16 %v10235_v29  ;;  %v1173_v42 = vld [vmem:[#allocation2 + $0xd0] sm:$0xff]  ;;  %v1178_v51 = vld [vmem:[#allocation2 + $0x120] sm:$0xff] }
  0xaa   : > { %10428 = vrot.lane.b32.xlu1 %v10427_v40, %s10597_s30  ;;  %10423 = vrot.lane.b32.xlu0 %v10422_v43, %s10597_s30  ;;  %v1172_v40 = vld [vmem:[#allocation2 + $0xc0] sm:$0xff] }
  0xae   : > { %10438 = vrot.lane.b32.xlu1 %v10437_v13, %s10597_s30  ;;  %10433 = vrot.lane.b32.xlu0 %v10432_v48, %s10597_s30 }
  0xb2   : > { %10448 = vrot.lane.b32.xlu1 %v10447_v53, %s10597_s30  ;;  %10443 = vrot.lane.b32.xlu0 %v10442_v55, %s10597_s30 }
  0xb6   : > { %10458 = vrot.lane.b32.xlu1 %v10457_v59, %s10597_s30  ;;  %10453 = vrot.lane.b32.xlu0 %v10452_v60, %s10597_s30  ;;  %v1179_v60 = vld [vmem:[#allocation2 + $0x130] sm:$0xff] }
  0xec   : > { %v10314_v62 = vpop.permute.xlu1 %10313  ;;  %v10304_v0 = vpop.permute.xlu0 %10303 }
  0xed   : > { %v10508_v3 = vadd.low.f32.bf16 %v1164_v61, %v10314_v62  ;;  %v10509_v4 = vadd.high.f32.bf16 %v1165_v63, %v10314_v62  ;;  %v10510_v5 = vadd.low.f32.bf16 %v1160_v1, %v10304_v0  ;;  %v10511_v6 = vadd.high.f32.bf16 %v1161_v2, %v10304_v0  ;;  %v1176_v61 = vld [vmem:[#allocation2 + $0x100] sm:$0xff]  ;;  %v1177_v62 = vld [vmem:[#allocation2 + $0x110] sm:$0xff] }
  0xef   : > { %1357 = vst.msk [vmem:[#allocation2 + $0x40] sm:$0xff] %vm1352_vm3, %v10508_v3  ;;  %1358 = vst.msk [vmem:[#allocation2 + $0x50] sm:$0xff] %vm1352_vm3, %v10509_v4  ;;  %v10096_v4 = vunpack.c.l.bf16 %v11236_v49 }
  0xf0   : > { %v10319_v9 = vpop.permute.xlu1 %10318  ;;  %v10309_v14 = vpop.permute.xlu0 %10308  ;;  %1353 = vst.msk [vmem:[#allocation2] sm:$0xff] %vm1352_vm3, %v10510_v5  ;;  %1354 = vst.msk [vmem:[#allocation2 + $0x10] sm:$0xff] %vm1352_vm3, %v10511_v6  ;;  %v10097_v5 = vunpack.c.h.bf16 %v11236_v49  ;;  %v10092_v6 = vunpack.c.l.bf16 %v11239_v50  ;;  %v1185_v49 = vld [vmem:[#allocation2 + $0x190] sm:$0xff] }
  0xf1   : > { %v10512_v20 = vadd.low.f32.bf16 %v1166_v8, %v10319_v9  ;;  %v10513_v18 = vadd.high.f32.bf16 %v1167_v12, %v10319_v9  ;;  %v10514_v19 = vadd.low.f32.bf16 %v1162_v15, %v10309_v14  ;;  %v10515_v24 = vadd.high.f32.bf16 %v1163_v16, %v10309_v14  ;;  %v11254_v12 = vld [vmem:[%s11057_s29 + $0x138] sm:$0xff]   ;;  %v11257_v14 = vld [vmem:[%s11057_s29 + $0x130] sm:$0xff]   ;;  %v1182_v15 = vld [vmem:[#allocation2 + $0x160] sm:$0xff] }
  0xf2   : > { %v10093_v8 = vunpack.c.h.bf16 %v11239_v50 }
  0xf3   : > { %1359 = vst.msk [vmem:[#allocation2 + $0x60] sm:$0xff] %vm1352_vm3, %v10512_v20  ;;  %1360 = vst.msk [vmem:[#allocation2 + $0x70] sm:$0xff] %vm1352_vm3, %v10513_v18 }
  0xf4   : > { %v10329_v30 = vpop.permute.xlu1 %10328  ;;  %v10324_v7 = vpop.permute.xlu0 %10323  ;;  %1355 = vst.msk [vmem:[#allocation2 + $0x20] sm:$0xff] %vm1352_vm3, %v10514_v19  ;;  %1356 = vst.msk [vmem:[#allocation2 + $0x30] sm:$0xff] %vm1352_vm3, %v10515_v24 }
  0xf5   : > { %v10516_v35 = vadd.low.f32.bf16 %v1170_v25, %v10329_v30  ;;  %v10517_v36 = vadd.high.f32.bf16 %v1171_v31, %v10329_v30  ;;  %v10518_v37 = vadd.low.f32.bf16 %v1168_v22, %v10324_v7  ;;  %v10519_v38 = vadd.high.f32.bf16 %v1169_v23, %v10324_v7  ;;  %v1183_v30 = vld [vmem:[#allocation2 + $0x170] sm:$0xff]  ;;  %v1180_v31 = vld [vmem:[#allocation2 + $0x140] sm:$0xff] }
  0xf6   : > { %v1389_v13 = vld [vmem:[#allocation2 + $0x41] sm:$0xff]  ;;  %v1390_v48 = vld [vmem:[#allocation2 + $0x51] sm:$0xff] }
  0xf7   : > { %v1385_v17 = vld [vmem:[#allocation2 + $0x1] sm:$0xff]  ;;  %v1386_v10 = vld [vmem:[#allocation2 + $0x11] sm:$0xff]  ;;  %1363 = vst.msk [vmem:[#allocation2 + $0xa0] sm:$0xff] %vm1352_vm3, %v10516_v35  ;;  %1364 = vst.msk [vmem:[#allocation2 + $0xb0] sm:$0xff] %vm1352_vm3, %v10517_v36  ;;  %v1421_v54 = vadd.f32 %v10084_v27, %v1389_v13  ;;  %v1422_v55 = vadd.f32 %v10085_v28, %v1390_v48  ;;  %v10100_v27 = vunpack.c.l.bf16 %v11257_v14  ;;  %v10101_v28 = vunpack.c.h.bf16 %v11257_v14 }
  0xf8   : > { %v10339_v43 = vpop.permute.xlu1 %10338  ;;  %v10334_v44 = vpop.permute.xlu0 %10333  ;;  %1361 = vst.msk [vmem:[#allocation2 + $0x80] sm:$0xff] %vm1352_vm3, %v10518_v37  ;;  %1362 = vst.msk [vmem:[#allocation2 + $0x90] sm:$0xff] %vm1352_vm3, %v10519_v38  ;;  %v1417_v52 = vadd.f32 %v10076_v41, %v1385_v17  ;;  %v1418_v53 = vadd.f32 %v10077_v11, %v1386_v10  ;;  %v1181_v7 = vld [vmem:[#allocation2 + $0x150] sm:$0xff]  ;;  %v10104_v41 = vunpack.c.l.bf16 %v11254_v12  ;;  %v10105_v11 = vunpack.c.h.bf16 %v11254_v12  ;;  %v11272_v36 = vld [vmem:[%s11057_s29 + $0x148] sm:$0xff]  }
  0xf9   : > { %v10520_v56 = vadd.low.f32.bf16 %v1174_v33, %v10339_v43  ;;  %v10521_v57 = vadd.high.f32.bf16 %v1175_v39, %v10339_v43  ;;  %v10522_v58 = vadd.low.f32.bf16 %v1172_v40, %v10334_v44  ;;  %v10523_v59 = vadd.high.f32.bf16 %v1173_v42, %v10334_v44  ;;  %1453 = vst.msk [vmem:[#allocation2 + $0x41] sm:$0xff] %vm1127_vm2, %v1421_v54  ;;  %v11275_v37 = vld [vmem:[%s11057_s29 + $0x140] sm:$0xff]   ;;  %v1187_v10 = vld [vmem:[#allocation2 + $0x1b0] sm:$0xff] }
  0xfa   : > { %1449 = vst.msk [vmem:[#allocation2 + $0x1] sm:$0xff] %vm1127_vm2, %v1417_v52  ;;  %1450 = vst.msk [vmem:[#allocation2 + $0x11] sm:$0xff] %vm1127_vm2, %v1418_v53  ;;  %v1391_v3 = vld [vmem:[#allocation2 + $0x61] sm:$0xff]  ;;  %v1392_v9 = vld [vmem:[#allocation2 + $0x71] sm:$0xff]  ;;  %v10112_v52 = vunpack.c.l.bf16 %v11272_v36  ;;  %v10113_v53 = vunpack.c.h.bf16 %v11272_v36  ;;  %v10108_v54 = vunpack.c.l.bf16 %v11275_v37 }
  0xfb   : > { %v1387_v1 = vld [vmem:[#allocation2 + $0x21] sm:$0xff]  ;;  %v1388_v2 = vld [vmem:[#allocation2 + $0x31] sm:$0xff]  ;;  %1454 = vst.msk [vmem:[#allocation2 + $0x51] sm:$0xff] %vm1127_vm2, %v1422_v55  ;;  %v1423_v18 = vadd.f32 %v10088_v34, %v1391_v3  ;;  %v1424_v19 = vadd.f32 %v10089_v47, %v1392_v9  ;;  %v10109_v55 = vunpack.c.h.bf16 %v11275_v37 }
  0xfc   : > { %v10349_v63 = vpop.permute.xlu1 %10348  ;;  %v10344_v0 = vpop.permute.xlu0 %10343  ;;  %1367 = vst.msk [vmem:[#allocation2 + $0xe0] sm:$0xff] %vm1352_vm3, %v10520_v56  ;;  %1368 = vst.msk [vmem:[#allocation2 + $0xf0] sm:$0xff] %vm1352_vm3, %v10521_v57  ;;  %v1419_v16 = vadd.f32 %v10080_v45, %v1387_v1  ;;  %v1420_v20 = vadd.f32 %v10081_v46, %v1388_v2  ;;  %v1186_v17 = vld [vmem:[#allocation2 + $0x1a0] sm:$0xff]  ;;  %v11278_v47 = vld [vmem:[%s11057_s29 + $0x158] sm:$0xff]  }
  0xfd   : > { %1365 = vst.msk [vmem:[#allocation2 + $0xc0] sm:$0xff] %vm1352_vm3, %v10522_v58  ;;  %1366 = vst.msk [vmem:[#allocation2 + $0xd0] sm:$0xff] %vm1352_vm3, %v10523_v59  ;;  %v10524_v24 = vadd.low.f32.bf16 %v1178_v51, %v10349_v63  ;;  %v10525_v25 = vadd.high.f32.bf16 %v1179_v60, %v10349_v63  ;;  %v10526_v26 = vadd.low.f32.bf16 %v1176_v61, %v10344_v0  ;;  %v1184_v34 = vld [vmem:[#allocation2 + $0x180] sm:$0xff]  ;;  %v11293_v58 = vld [vmem:[%s11057_s29 + $0x150] sm:$0xff]  }
  0xfe   : > { %v10527_v29 = vadd.high.f32.bf16 %v1177_v62, %v10344_v0  ;;  %1451 = vst.msk [vmem:[#allocation2 + $0x21] sm:$0xff] %vm1127_vm2, %v1419_v16  ;;  %1452 = vst.msk [vmem:[#allocation2 + $0x31] sm:$0xff] %vm1127_vm2, %v1420_v20  ;;  %v1395_v32 = vld [vmem:[#allocation2 + $0xa1] sm:$0xff]  ;;  %v1396_v21 = vld [vmem:[#allocation2 + $0xb1] sm:$0xff]  ;;  %v10120_v16 = vunpack.c.l.bf16 %v11278_v47  ;;  %v10121_v20 = vunpack.c.h.bf16 %v11278_v47 }
  0xff   : > { %1455 = vst.msk [vmem:[#allocation2 + $0x61] sm:$0xff] %vm1127_vm2, %v1423_v18  ;;  %1456 = vst.msk [vmem:[#allocation2 + $0x71] sm:$0xff] %vm1127_vm2, %v1424_v19  ;;  %v1393_v33 = vld [vmem:[#allocation2 + $0x81] sm:$0xff]  ;;  %v1394_v35 = vld [vmem:[#allocation2 + $0x91] sm:$0xff]  ;;  %v1427_v38 = vadd.f32 %v10096_v4, %v1395_v32  ;;  %v1428_v39 = vadd.f32 %v10097_v5, %v1396_v21  ;;  %v10116_v18 = vunpack.c.l.bf16 %v11293_v58  ;;  %v10117_v19 = vunpack.c.h.bf16 %v11293_v58 }
 0x100   : > { %v10359_v22 = vpop.permute.xlu1 %10358  ;;  %v10354_v23 = vpop.permute.xlu0 %10353  ;;  %1371 = vst.msk [vmem:[#allocation2 + $0x120] sm:$0xff] %vm1352_vm3, %v10524_v24  ;;  %1372 = vst.msk [vmem:[#allocation2 + $0x130] sm:$0xff] %vm1352_vm3, %v10525_v25  ;;  %v1425_v40 = vadd.f32 %v10092_v6, %v1393_v33  ;;  %v1426_v42 = vadd.f32 %v10093_v8, %v1394_v35  ;;  %v1190_v3 = vld [vmem:[#allocation2 + $0x1e0] sm:$0xff]  ;;  %v1191_v4 = vld [vmem:[#allocation2 + $0x1f0] sm:$0xff] }
 0x101   : > { %1369 = vst.msk [vmem:[#allocation2 + $0x100] sm:$0xff] %vm1352_vm3, %v10526_v26  ;;  %1370 = vst.msk [vmem:[#allocation2 + $0x110] sm:$0xff] %vm1352_vm3, %v10527_v29  ;;  %v10528_v43 = vadd.low.f32.bf16 %v1182_v15, %v10359_v22  ;;  %v10529_v44 = vadd.high.f32.bf16 %v1183_v30, %v10359_v22  ;;  %v10530_v45 = vadd.low.f32.bf16 %v1180_v31, %v10354_v23  ;;  %v1188_v5 = vld [vmem:[#allocation2 + $0x1c0] sm:$0xff]  ;;  %v11296_v6 = vld [vmem:[%s11057_s29 + $0x168] sm:$0xff]  }
 0x102   : > { %v10531_v46 = vadd.high.f32.bf16 %v1181_v7, %v10354_v23  ;;  %1459 = vst.msk [vmem:[#allocation2 + $0xa1] sm:$0xff] %vm1127_vm2, %v1427_v38  ;;  %1460 = vst.msk [vmem:[#allocation2 + $0xb1] sm:$0xff] %vm1127_vm2, %v1428_v39  ;;  %v1189_v12 = vld [vmem:[#allocation2 + $0x1d0] sm:$0xff]  ;;  %v11311_v26 = vld [vmem:[%s11057_s29 + $0x160] sm:$0xff]   ;;  %v10128_v35 = vunpack.c.l.bf16 %v11296_v6  ;;  %v10129_v36 = vunpack.c.h.bf16 %v11296_v6 }
 0x103   : > { %1457 = vst.msk [vmem:[#allocation2 + $0x81] sm:$0xff] %vm1127_vm2, %v1425_v40  ;;  %1458 = vst.msk [vmem:[#allocation2 + $0x91] sm:$0xff] %vm1127_vm2, %v1426_v42  ;;  %v1399_v50 = vld [vmem:[#allocation2 + $0xe1] sm:$0xff]  ;;  %v1400_v51 = vld [vmem:[#allocation2 + $0xf1] sm:$0xff]  ;;  %v10124_v37 = vunpack.c.l.bf16 %v11311_v26  ;;  %v10125_v38 = vunpack.c.h.bf16 %v11311_v26 }
 0x104   : > { %v10369_v13 = vpop.permute.xlu1 %10368  ;;  %v10364_v48 = vpop.permute.xlu0 %10363  ;;  %1375 = vst.msk [vmem:[#allocation2 + $0x160] sm:$0xff] %vm1352_vm3, %v10528_v43  ;;  %1376 = vst.msk [vmem:[#allocation2 + $0x170] sm:$0xff] %vm1352_vm3, %v10529_v44  ;;  %v1397_v56 = vld [vmem:[#allocation2 + $0xc1] sm:$0xff]  ;;  %v1398_v57 = vld [vmem:[#allocation2 + $0xd1] sm:$0xff]  ;;  %v1431_v59 = vadd.f32 %v10104_v41, %v1399_v50  ;;  %v1432_v60 = vadd.f32 %v10105_v11, %v1400_v51 }
 0x105   : > { %1373 = vst.msk [vmem:[#allocation2 + $0x140] sm:$0xff] %vm1352_vm3, %v10530_v45  ;;  %1374 = vst.msk [vmem:[#allocation2 + $0x150] sm:$0xff] %vm1352_vm3, %v10531_v46  ;;  %v1429_v61 = vadd.f32 %v10100_v27, %v1397_v56  ;;  %v1430_v62 = vadd.f32 %v10101_v28, %v1398_v57  ;;  %v10532_v63 = vadd.low.f32.bf16 %v1186_v17, %v10369_v13  ;;  %v11314_v33 = vld [vmem:[%s11057_s29 + $0x170] sm:$0xff]   ;;  %v11325_v39 = vld [vmem:[%s11057_s29 + $0x178] sm:$0xff]  }
 0x106   : > { %v10533_v0 = vadd.high.f32.bf16 %v1187_v10, %v10369_v13  ;;  %v10534_v1 = vadd.low.f32.bf16 %v1184_v34, %v10364_v48  ;;  %v10535_v2 = vadd.high.f32.bf16 %v1185_v49, %v10364_v48  ;;  %1463 = vst.msk [vmem:[#allocation2 + $0xe1] sm:$0xff] %vm1127_vm2, %v1431_v59  ;;  %1464 = vst.msk [vmem:[#allocation2 + $0xf1] sm:$0xff] %vm1127_vm2, %v1432_v60  ;;  %v1481_v40 = vld [vmem:[#allocation2 + $0x1] sm:$0xff]  ;;  %v1484_v45 = vld [vmem:[#allocation2 + $0x31] sm:$0xff]  ;;  %v10137_v56 = vunpack.c.h.bf16 %v11325_v39 }
 0x107   : > { %1461 = vst.msk [vmem:[#allocation2 + $0xc1] sm:$0xff] %vm1127_vm2, %v1429_v61  ;;  %1462 = vst.msk [vmem:[#allocation2 + $0xd1] sm:$0xff] %vm1127_vm2, %v1430_v62  ;;  %v1403_v14 = vld [vmem:[#allocation2 + $0x121] sm:$0xff]  ;;  %v1404_v15 = vld [vmem:[#allocation2 + $0x131] sm:$0xff]  ;;  %v10132_v57 = vunpack.c.l.bf16 %v11314_v33  ;;  %v10133_v58 = vunpack.c.h.bf16 %v11314_v33 }
 0x108   : > { %v10379_v8 = vpop.permute.xlu1 %10378  ;;  %v10374_v9 = vpop.permute.xlu0 %10373  ;;  %1379 = vst.msk [vmem:[#allocation2 + $0x1a0] sm:$0xff] %vm1352_vm3, %v10532_v63  ;;  %1380 = vst.msk [vmem:[#allocation2 + $0x1b0] sm:$0xff] %vm1352_vm3, %v10533_v0  ;;  %v1401_v24 = vld [vmem:[#allocation2 + $0x101] sm:$0xff]  ;;  %v1402_v25 = vld [vmem:[#allocation2 + $0x111] sm:$0xff]  ;;  %v1435_v29 = vadd.f32 %v10112_v52, %v1403_v14  ;;  %v1436_v30 = vadd.f32 %v10113_v53, %v1404_v15 }
 0x109   : > { %1377 = vst.msk [vmem:[#allocation2 + $0x180] sm:$0xff] %vm1352_vm3, %v10534_v1  ;;  %1378 = vst.msk [vmem:[#allocation2 + $0x190] sm:$0xff] %vm1352_vm3, %v10535_v2  ;;  %v1433_v31 = vadd.f32 %v10108_v54, %v1401_v24  ;;  %v1434_v7 = vadd.f32 %v10109_v55, %v1402_v25  ;;  %v10536_v22 = vadd.low.f32.bf16 %v1190_v3, %v10379_v8  ;;  %v1483_v44 = vld [vmem:[#allocation2 + $0x21] sm:$0xff]  ;;  %v1482_v46 = vld [vmem:[#allocation2 + $0x11] sm:$0xff]  ;;  %v10136_v55 = vunpack.c.l.bf16 %v11325_v39 }
 0x10a   : > { %v10537_v23 = vadd.high.f32.bf16 %v1191_v4, %v10379_v8  ;;  %v10538_v32 = vadd.low.f32.bf16 %v1188_v5, %v10374_v9  ;;  %v10539_v21 = vadd.high.f32.bf16 %v1189_v12, %v10374_v9  ;;  %1467 = vst.msk [vmem:[#allocation2 + $0x121] sm:$0xff] %vm1127_vm2, %v1435_v29  ;;  %1468 = vst.msk [vmem:[#allocation2 + $0x131] sm:$0xff] %vm1127_vm2, %v1436_v30  ;;  %v1485_v59 = vld [vmem:[#allocation2 + $0x41] sm:$0xff]  ;;  %v1488_v63 = vld [vmem:[#allocation2 + $0x71] sm:$0xff] }
 0x10b   : > { %1465 = vst.msk [vmem:[#allocation2 + $0x101] sm:$0xff] %vm1127_vm2, %v1433_v31  ;;  %1466 = vst.msk [vmem:[#allocation2 + $0x111] sm:$0xff] %vm1127_vm2, %v1434_v7  ;;  %v1407_v27 = vld [vmem:[#allocation2 + $0x161] sm:$0xff]  ;;  %v1408_v28 = vld [vmem:[#allocation2 + $0x171] sm:$0xff] }
 0x10c   : > { %v10389_v41 = vpop.permute.xlu1 %10388  ;;  %v10384_v11 = vpop.permute.xlu0 %10383  ;;  %1383 = vst.msk [vmem:[#allocation2 + $0x1e0] sm:$0xff] %vm1352_vm3, %v10536_v22  ;;  %1384 = vst.msk [vmem:[#allocation2 + $0x1f0] sm:$0xff] %vm1352_vm3, %v10537_v23  ;;  %v1405_v42 = vld [vmem:[#allocation2 + $0x141] sm:$0xff]  ;;  %v1406_v43 = vld [vmem:[#allocation2 + $0x151] sm:$0xff]  ;;  %v1439_v17 = vadd.f32 %v10120_v16, %v1407_v27  ;;  %v1440_v10 = vadd.f32 %v10121_v20, %v1408_v28 }
 0x10d   : > { %1381 = vst.msk [vmem:[#allocation2 + $0x1c0] sm:$0xff] %vm1352_vm3, %v10538_v32  ;;  %1382 = vst.msk [vmem:[#allocation2 + $0x1d0] sm:$0xff] %vm1352_vm3, %v10539_v21  ;;  %v1437_v34 = vadd.f32 %v10116_v18, %v1405_v42  ;;  %v1438_v47 = vadd.f32 %v10117_v19, %v1406_v43  ;;  %v10540_v13 = vadd.low.f32.bf16 %v1483_v44, %v10389_v41  ;;  %v1487_v62 = vld [vmem:[#allocation2 + $0x61] sm:$0xff]  ;;  %v1486_v0 = vld [vmem:[#allocation2 + $0x51] sm:$0xff] }
 0x10e   : > { %v10541_v48 = vadd.high.f32.bf16 %v1484_v45, %v10389_v41  ;;  %v10542_v49 = vadd.low.f32.bf16 %v1481_v40, %v10384_v11  ;;  %v10543_v50 = vadd.high.f32.bf16 %v1482_v46, %v10384_v11  ;;  %1471 = vst.msk [vmem:[#allocation2 + $0x161] sm:$0xff] %vm1127_vm2, %v1439_v17  ;;  %1472 = vst.msk [vmem:[#allocation2 + $0x171] sm:$0xff] %vm1127_vm2, %v1440_v10  ;;  %v1491_v20 = vld [vmem:[#allocation2 + $0xa1] sm:$0xff]  ;;  %v1492_v24 = vld [vmem:[#allocation2 + $0xb1] sm:$0xff] }
 0x10f   : > { %1469 = vst.msk [vmem:[#allocation2 + $0x141] sm:$0xff] %vm1127_vm2, %v1437_v34  ;;  %1470 = vst.msk [vmem:[#allocation2 + $0x151] sm:$0xff] %vm1127_vm2, %v1438_v47  ;;  %v1411_v53 = vld [vmem:[#allocation2 + $0x1a1] sm:$0xff]  ;;  %v1412_v54 = vld [vmem:[#allocation2 + $0x1b1] sm:$0xff] }
 0x110   : > { %v10399_v51 = vpop.permute.xlu1 %10398  ;;  %v10394_v52 = vpop.permute.xlu0 %10393  ;;  %1675 = vst.msk [vmem:[#allocation2 + $0x21] sm:$0xff] %vm1352_vm3, %v10540_v13  ;;  %1676 = vst.msk [vmem:[#allocation2 + $0x31] sm:$0xff] %vm1352_vm3, %v10541_v48  ;;  %v1409_v60 = vld [vmem:[#allocation2 + $0x181] sm:$0xff]  ;;  %v1410_v61 = vld [vmem:[#allocation2 + $0x191] sm:$0xff]  ;;  %v1443_v1 = vadd.f32 %v10128_v35, %v1411_v53  ;;  %v1444_v2 = vadd.f32 %v10129_v36, %v1412_v54 }
 0x111   : > { %1673 = vst.msk [vmem:[#allocation2 + $0x1] sm:$0xff] %vm1352_vm3, %v10542_v49  ;;  %1674 = vst.msk [vmem:[#allocation2 + $0x11] sm:$0xff] %vm1352_vm3, %v10543_v50  ;;  %v1441_v3 = vadd.f32 %v10124_v37, %v1409_v60  ;;  %v1442_v4 = vadd.f32 %v10125_v38, %v1410_v61  ;;  %v10544_v5 = vadd.low.f32.bf16 %v1487_v62, %v10399_v51  ;;  %v1489_v25 = vld [vmem:[#allocation2 + $0x81] sm:$0xff]  ;;  %v1490_v26 = vld [vmem:[#allocation2 + $0x91] sm:$0xff] }
 0x112   : > { %v10545_v6 = vadd.high.f32.bf16 %v1488_v63, %v10399_v51  ;;  %v10546_v8 = vadd.low.f32.bf16 %v1485_v59, %v10394_v52  ;;  %v10547_v9 = vadd.high.f32.bf16 %v1486_v0, %v10394_v52  ;;  %1475 = vst.msk [vmem:[#allocation2 + $0x1a1] sm:$0xff] %vm1127_vm2, %v1443_v1  ;;  %1476 = vst.msk [vmem:[#allocation2 + $0x1b1] sm:$0xff] %vm1127_vm2, %v1444_v2  ;;  %v1495_v11 = vld [vmem:[#allocation2 + $0xe1] sm:$0xff]  ;;  %v1496_v27 = vld [vmem:[#allocation2 + $0xf1] sm:$0xff] }
 0x113   : > { %1473 = vst.msk [vmem:[#allocation2 + $0x181] sm:$0xff] %vm1127_vm2, %v1441_v3  ;;  %1474 = vst.msk [vmem:[#allocation2 + $0x191] sm:$0xff] %vm1127_vm2, %v1442_v4  ;;  %v1415_v15 = vld [vmem:[#allocation2 + $0x1e1] sm:$0xff]  ;;  %v1416_v16 = vld [vmem:[#allocation2 + $0x1f1] sm:$0xff] }
 0x114   : > { %v10409_v12 = vpop.permute.xlu1 %10408  ;;  %v10404_v14 = vpop.permute.xlu0 %10403  ;;  %1679 = vst.msk [vmem:[#allocation2 + $0x61] sm:$0xff] %vm1352_vm3, %v10544_v5  ;;  %1680 = vst.msk [vmem:[#allocation2 + $0x71] sm:$0xff] %vm1352_vm3, %v10545_v6  ;;  %v1413_v18 = vld [vmem:[#allocation2 + $0x1c1] sm:$0xff]  ;;  %v1414_v19 = vld [vmem:[#allocation2 + $0x1d1] sm:$0xff]  ;;  %v1447_v29 = vadd.f32 %v10136_v55, %v1415_v15  ;;  %v1448_v30 = vadd.f32 %v10137_v56, %v1416_v16 }
 0x115   : > { %1677 = vst.msk [vmem:[#allocation2 + $0x41] sm:$0xff] %vm1352_vm3, %v10546_v8  ;;  %1678 = vst.msk [vmem:[#allocation2 + $0x51] sm:$0xff] %vm1352_vm3, %v10547_v9  ;;  %v1445_v31 = vadd.f32 %v10132_v57, %v1413_v18  ;;  %v1446_v7 = vadd.f32 %v10133_v58, %v1414_v19  ;;  %v10548_v22 = vadd.low.f32.bf16 %v1491_v20, %v10409_v12  ;;  %v1493_v28 = vld [vmem:[#allocation2 + $0xc1] sm:$0xff]  ;;  %v1494_v35 = vld [vmem:[#allocation2 + $0xd1] sm:$0xff] }
 0x116   : > { %v10549_v23 = vadd.high.f32.bf16 %v1492_v24, %v10409_v12  ;;  %v10550_v32 = vadd.low.f32.bf16 %v1489_v25, %v10404_v14  ;;  %v10551_v21 = vadd.high.f32.bf16 %v1490_v26, %v10404_v14  ;;  %1479 = vst.msk [vmem:[#allocation2 + $0x1e1] sm:$0xff] %vm1127_vm2, %v1447_v29  ;;  %1480 = vst.msk [vmem:[#allocation2 + $0x1f1] sm:$0xff] %vm1127_vm2, %v1448_v30  ;;  %v1499_v43 = vld [vmem:[#allocation2 + $0x121] sm:$0xff]  ;;  %v1500_v44 = vld [vmem:[#allocation2 + $0x131] sm:$0xff] }
 0x117   : > { %1477 = vst.msk [vmem:[#allocation2 + $0x1c1] sm:$0xff] %vm1127_vm2, %v1445_v31  ;;  %1478 = vst.msk [vmem:[#allocation2 + $0x1d1] sm:$0xff] %vm1127_vm2, %v1446_v7  ;;  %v1497_v45 = vld [vmem:[#allocation2 + $0x101] sm:$0xff]  ;;  %v1498_v46 = vld [vmem:[#allocation2 + $0x111] sm:$0xff] }
 0x118   : > { %v10419_v33 = vpop.permute.xlu1 %10418  ;;  %v10414_v41 = vpop.permute.xlu0 %10413  ;;  %1683 = vst.msk [vmem:[#allocation2 + $0xa1] sm:$0xff] %vm1352_vm3, %v10548_v22  ;;  %1684 = vst.msk [vmem:[#allocation2 + $0xb1] sm:$0xff] %vm1352_vm3, %v10549_v23  ;;  %v1503_v49 = vld [vmem:[#allocation2 + $0x161] sm:$0xff]  ;;  %v1504_v50 = vld [vmem:[#allocation2 + $0x171] sm:$0xff] }
 0x119   : > { %1681 = vst.msk [vmem:[#allocation2 + $0x81] sm:$0xff] %vm1352_vm3, %v10550_v32  ;;  %1682 = vst.msk [vmem:[#allocation2 + $0x91] sm:$0xff] %vm1352_vm3, %v10551_v21  ;;  %v10552_v36 = vadd.low.f32.bf16 %v1495_v11, %v10419_v33  ;;  %v10553_v37 = vadd.high.f32.bf16 %v1496_v27, %v10419_v33  ;;  %v10554_v38 = vadd.low.f32.bf16 %v1493_v28, %v10414_v41  ;;  %v1501_v51 = vld [vmem:[#allocation2 + $0x141] sm:$0xff]  ;;  %v1502_v52 = vld [vmem:[#allocation2 + $0x151] sm:$0xff] }
 0x11a   : > { %v10555_v39 = vadd.high.f32.bf16 %v1494_v35, %v10414_v41  ;;  %v1507_v59 = vld [vmem:[#allocation2 + $0x1a1] sm:$0xff]  ;;  %v1508_v60 = vld [vmem:[#allocation2 + $0x1b1] sm:$0xff] }
 0x11b   : > { %1687 = vst.msk [vmem:[#allocation2 + $0xe1] sm:$0xff] %vm1352_vm3, %v10552_v36  ;;  %1688 = vst.msk [vmem:[#allocation2 + $0xf1] sm:$0xff] %vm1352_vm3, %v10553_v37  ;;  %v1505_v61 = vld [vmem:[#allocation2 + $0x181] sm:$0xff]  ;;  %v1506_v62 = vld [vmem:[#allocation2 + $0x191] sm:$0xff] }
 0x11c   : > { %v10429_v40 = vpop.permute.xlu1 %10428  ;;  %v10424_v42 = vpop.permute.xlu0 %10423  ;;  %1685 = vst.msk [vmem:[#allocation2 + $0xc1] sm:$0xff] %vm1352_vm3, %v10554_v38  ;;  %1686 = vst.msk [vmem:[#allocation2 + $0xd1] sm:$0xff] %vm1352_vm3, %v10555_v39  ;;  %v16249_v38 = vlaneseq  ;;  %v10598_v39 = vmov 1966171168  }
 0x11d   : > { %v10556_v17 = vadd.low.f32.bf16 %v1499_v43, %v10429_v40  ;;  %v10557_v10 = vadd.high.f32.bf16 %v1500_v44, %v10429_v40  ;;  %v10558_v34 = vadd.low.f32.bf16 %v1497_v45, %v10424_v42  ;;  %v10559_v47 = vadd.high.f32.bf16 %v1498_v46, %v10424_v42  ;;  %v1511_v5 = vld [vmem:[#allocation2 + $0x1e1] sm:$0xff]  ;;  %v1512_v6 = vld [vmem:[#allocation2 + $0x1f1] sm:$0xff] }
 0x11e   : > { %v1509_v8 = vld [vmem:[#allocation2 + $0x1c1] sm:$0xff]  ;;  %v1510_v9 = vld [vmem:[#allocation2 + $0x1d1] sm:$0xff]  ;;  %v2062_v40 = vunpack.c.l.s4 %v10598_v39  ;;  %v11432_v46 = vshrl.u32 %v16249_v38, 7 }
 0x11f   : > { %1691 = vst.msk [vmem:[#allocation2 + $0x121] sm:$0xff] %vm1352_vm3, %v10556_v17  ;;  %1692 = vst.msk [vmem:[#allocation2 + $0x131] sm:$0xff] %vm1352_vm3, %v10557_v10  ;;  %v11413_v27 = vld [vmem:[#allocation2 + $0xa1] sm:$0xff]  ;;  %v11427_v44 = vld [vmem:[#allocation2 + $0xb1] sm:$0xff] }
 0x120   : > { %v10439_v13 = vpop.permute.xlu1 %10438  ;;  %v10434_v48 = vpop.permute.xlu0 %10433  ;;  %1689 = vst.msk [vmem:[#allocation2 + $0x101] sm:$0xff] %vm1352_vm3, %v10558_v34  ;;  %1690 = vst.msk [vmem:[#allocation2 + $0x111] sm:$0xff] %vm1352_vm3, %v10559_v47  ;;  %v11405_v21 = vld [vmem:[#allocation2 + $0x81] sm:$0xff]  ;;  %v1898_v35 = vsel %vm1127_vm2, %v11413_v27, 0.0  ;;  %v11419_v36 = vld [vmem:[#allocation2 + $0x91] sm:$0xff]  ;;  %v2063_v17 = vunpack.c.0.s8 %v2062_v40  ;;  %v1901_v10 = vsel %vm1127_vm2, %v11427_v44, 0.0 }
 0x121   : > { %v10560_v53 = vadd.low.f32.bf16 %v1503_v49, %v10439_v13  ;;  %v10561_v54 = vadd.high.f32.bf16 %v1504_v50, %v10439_v13  ;;  %v10562_v55 = vadd.low.f32.bf16 %v1501_v51, %v10434_v48  ;;  %v10563_v56 = vadd.high.f32.bf16 %v1502_v52, %v10434_v48  ;;  %16624 = vst [vmem:[#allocation4_spill] sm:$0xff] %v11432_v46 }
 0x122   : > { %v1892_v41 = vsel %vm1127_vm2, %v11405_v21, 0.0  ;;  %v1895_v42 = vsel %vm1127_vm2, %v11419_v36, 0.0  ;;  %v11429_v45 = vld [vmem:[#allocation2 + $0xe1] sm:$0xff]  ;;  %v2524_v48 = vcombine.high %v11405_v21, %v11405_v21  ;;  %v2622_v49 = vcombine.high %v11413_v27, %v11413_v27 }
 0x123   : > { %1695 = vst.msk [vmem:[#allocation2 + $0x161] sm:$0xff] %vm1352_vm3, %v10560_v53  ;;  %1696 = vst.msk [vmem:[#allocation2 + $0x171] sm:$0xff] %vm1352_vm3, %v10561_v54  ;;  %v11421_v37 = vld [vmem:[#allocation2 + $0xc1] sm:$0xff]  ;;  %v1910_v34 = vsel %vm1127_vm2, %v11429_v45, 0.0  ;;  %v11440_v13 = vld [vmem:[#allocation2 + $0xd1] sm:$0xff]  ;;  %v11447_v50 = vsub.s32 %v2063_v17, %v11432_v46  ;;  %v1969_v40 = vmul.f32 %v11419_v36, %v11419_v36 }
 0x124   : > { %v10449_v57 = vpop.permute.xlu1 %10448  ;;  %v10444_v58 = vpop.permute.xlu0 %10443  ;;  %1693 = vst.msk [vmem:[#allocation2 + $0x141] sm:$0xff] %vm1352_vm3, %v10562_v55  ;;  %1694 = vst.msk [vmem:[#allocation2 + $0x151] sm:$0xff] %vm1352_vm3, %v10563_v56  ;;  %v1904_v43 = vsel %vm1127_vm2, %v11421_v37, 0.0  ;;  %v1907_v51 = vsel %vm1127_vm2, %v11440_v13, 0.0  ;;  %v11454_v54 = vld [vmem:[#allocation2 + $0xf1] sm:$0xff] }
 0x125   : > { %v10564_v63 = vadd.low.f32.bf16 %v1507_v59, %v10449_v57  ;;  %v10565_v0 = vadd.high.f32.bf16 %v1508_v60, %v10449_v57  ;;  %v10566_v1 = vadd.low.f32.bf16 %v1505_v61, %v10444_v58  ;;  %v10567_v2 = vadd.high.f32.bf16 %v1506_v62, %v10444_v58  ;;  %16625 = vst [vmem:[#allocation5_spill] sm:$0xff] %v11447_v50 }
 0x126   : > { %v2531_v55 = vrot.slane %v11405_v21, %v11447_v50  ;;  %v11459_v56 = vrot.slane %v2524_v48, %v11447_v50  ;;  %v2573_v57 = vcombine.high %v11419_v36, %v11419_v36  ;;  %v11465_v58 = vrot.slane %v11413_v27, %v11447_v50 }
 0x127   : > { %1699 = vst.msk [vmem:[#allocation2 + $0x1a1] sm:$0xff] %vm1352_vm3, %v10564_v63  ;;  %1700 = vst.msk [vmem:[#allocation2 + $0x1b1] sm:$0xff] %vm1352_vm3, %v10565_v0  ;;  %v11468_v59 = vrot.slane %v2622_v49, %v11447_v50  ;;  %v1913_v60 = vsel %vm1127_vm2, %v11454_v54, 0.0  ;;  %v11479_v0 = vrot.slane %v11419_v36, %v11447_v50 }
 0x128   : > { %v10459_v3 = vpop.permute.xlu1 %10458  ;;  %v10454_v4 = vpop.permute.xlu0 %10453  ;;  %1697 = vst.msk [vmem:[#allocation2 + $0x181] sm:$0xff] %vm1352_vm3, %v10566_v1  ;;  %1698 = vst.msk [vmem:[#allocation2 + $0x191] sm:$0xff] %vm1352_vm3, %v10567_v2  ;;  %v2539_v1 = vcombine.high %v2531_v55, %v2531_v55  ;;  %v2540_v2 = vcombine.high %v11459_v56, %v11459_v56 }
 0x129   : > { %v10568_v12 = vadd.low.f32.bf16 %v1511_v5, %v10459_v3  ;;  %v10569_v14 = vadd.high.f32.bf16 %v1512_v6, %v10459_v3  ;;  %v10570_v15 = vadd.low.f32.bf16 %v1509_v8, %v10454_v4  ;;  %v10571_v16 = vadd.high.f32.bf16 %v1510_v9, %v10454_v4 }
 0x12a   : > { %v2547_v3 = vrot.slane %v2531_v55, %v11447_v50  ;;  %v11485_v4 = vrot.slane %v2573_v57, %v11447_v50  ;;  %v2637_v6 = vcombine.high %v11465_v58, %v11465_v58  ;;  %v2638_v8 = vcombine.high %v11468_v59, %v11468_v59 }
 0x12b   : > { %1703 = vst.msk [vmem:[#allocation2 + $0x1e1] sm:$0xff] %vm1352_vm3, %v10568_v12  ;;  %1704 = vst.msk [vmem:[#allocation2 + $0x1f1] sm:$0xff] %vm1352_vm3, %v10569_v14  ;;  %v2720_v9 = vcombine.high %v11421_v37, %v11421_v37  ;;  %v1968_v55 = vmul.f32 %v11405_v21, %v11405_v21 }
 0x12c   : > { %1701 = vst.msk [vmem:[#allocation2 + $0x1c1] sm:$0xff] %vm1352_vm3, %v10570_v15  ;;  %1702 = vst.msk [vmem:[#allocation2 + $0x1d1] sm:$0xff] %vm1352_vm3, %v10571_v16  ;;  %vm9789_vm3 = vcmask 130048  }
 0x12e   : > { %v11387_v25 = vld [vmem:[#allocation2 + $0x1a0] sm:$0xff]  ;;  %v11397_v7 = vld [vmem:[#allocation2 + $0x1b0] sm:$0xff] }
 0x12f   : > { %v11379_v20 = vld [vmem:[#allocation2 + $0x190] sm:$0xff]  ;;  %v11381_v18 = vld [vmem:[#allocation2 + $0x180] sm:$0xff]  ;;  %v1720_v30 = vsel %vm1127_vm2, %v11387_v25, 0.0  ;;  %v1723_v23 = vsel %vm1127_vm2, %v11397_v7, 0.0  ;;  %v1802_v53 = vmul.f32 %v11397_v7, %v11397_v7  ;;  %v1801_v15 = vmul.f32 %v11387_v25, %v11387_v25 }
 0x130   : > { %v1717_v19 = vsel %vm1127_vm2, %v11379_v20, 0.0  ;;  %v1714_v24 = vsel %vm1127_vm2, %v11381_v18, 0.0  ;;  %v1800_v47 = vmul.f32 %v11379_v20, %v11379_v20  ;;  %v1799_v62 = vmul.f32 %v11381_v18, %v11381_v18 }
 0x131   : > { %1718 = vadd.xlane.f32.xlu1 %v1717_v19  ;;  %1715 = vadd.xlane.f32.xlu0 %v1714_v24  ;;  %v1816_v61 = vsel %vm1127_vm2, %v1802_v53, 0.0  ;;  %v2067_v5 = vrot.slane %v11381_v18, %v11447_v50  ;;  %v11503_v19 = vrot.slane %v11465_v58, %v11447_v50  ;;  %v2588_v24 = vcombine.high %v11479_v0, %v11479_v0 }
 0x132   : > { %v11395_v31 = vld [vmem:[#allocation2 + $0x1e0] sm:$0xff]  ;;  %v11411_v11 = vld [vmem:[#allocation2 + $0x1f0] sm:$0xff]  ;;  %v1810_v52 = vsel %vm1127_vm2, %v1800_v47, 0.0  ;;  %v1807_v12 = vsel %vm1127_vm2, %v1799_v62, 0.0  ;;  %v2158_v49 = vcombine.high %v11387_v25, %v11387_v25  ;;  %v1971_v53 = vmul.f32 %v11427_v44, %v11427_v44 }
 0x133   : > { %v11389_v26 = vld [vmem:[#allocation2 + $0x1c0] sm:$0xff]  ;;  %v1732_v22 = vsel %vm1127_vm2, %v11395_v31, 0.0  ;;  %v11403_v32 = vld [vmem:[#allocation2 + $0x1d0] sm:$0xff]  ;;  %v1735_v28 = vsel %vm1127_vm2, %v11411_v11, 0.0  ;;  %v1806_v16 = vmul.f32 %v11411_v11, %v11411_v11  ;;  %v1805_v36 = vmul.f32 %v11395_v31, %v11395_v31 }
 0x134   : > { %v1726_v29 = vsel %vm1127_vm2, %v11389_v26, 0.0  ;;  %v1729_v33 = vsel %vm1127_vm2, %v11403_v32, 0.0  ;;  %v1804_v63 = vmul.f32 %v11403_v32, %v11403_v32  ;;  %v1803_v39 = vmul.f32 %v11389_v26, %v11389_v26 }
 0x135   : > { %1727 = vadd.xlane.f32.xlu1 %v1726_v29  ;;  %1721 = vadd.xlane.f32.xlu0 %v1720_v30  ;;  %v11509_v29 = vrot.slane %v11421_v37, %v11447_v50  ;;  %v11512_v30 = vsub.s32 0, %v11432_v46  ;;  %v1828_v17 = vsel %vm1127_vm2, %v1806_v16, 0.0  ;;  %v2083_v57 = vrot.slane %v2067_v5, %v11447_v50 }
 0x136   : > { %v1822_v14 = vsel %vm1127_vm2, %v1804_v63, 0.0  ;;  %v2561_v62 = vrot.slane %v2539_v1, %v11447_v50  ;;  %v1825_v63 = vsel %vm1127_vm2, %v1805_v36, 0.0  ;;  %v1985_v1 = vsel %vm1127_vm2, %v1971_v53, 0.0 }
 0x137   : > { %v1976_v36 = vsel %vm1127_vm2, %v1968_v55, 0.0 }
 0x139   : > { %1733 = vadd.xlane.f32.xlu1 %v1732_v22  ;;  %1724 = vadd.xlane.f32.xlu0 %v1723_v23  ;;  %v11516_v22 = vrot.slane %v11379_v20, %v11447_v50  ;;  %v2060_v23 = vcombine.high %v11381_v18, %v11381_v18  ;;  %v2075_v18 = vcombine.high %v2067_v5, %v2067_v5 }
 0x13a   : > { %v2923_v5 = vrot.slane %v2561_v62, %v11512_v30 }
 0x13b   : > { %v2124_v47 = vcombine.high %v11516_v22, %v11516_v22  ;;  %v2074_v48 = vrot.slane %v2060_v23, %v11447_v50 }
 0x13d   : > { %1730 = vadd.xlane.f32.xlu0 %v1729_v33  ;;  %1893 = vadd.xlane.f32.xlu1 %v1892_v41  ;;  %v2589_v33 = vcombine.high %v11485_v4, %v11485_v4  ;;  %v11524_v41 = vrot.slane %v11479_v0, %v11447_v50  ;;  %v2090_v16 = vrot.slane %v2074_v48, %v11447_v50 }
 0x141   : > { %1736 = vadd.xlane.f32.xlu0 %v1735_v28  ;;  %1899 = vadd.xlane.f32.xlu1 %v1898_v35  ;;  %v11527_v28 = vrot.slane %v2720_v9, %v11447_v50  ;;  %v2671_v35 = vcombine.high %v11427_v44, %v11427_v44  ;;  %v1973_v9 = vmul.f32 %v11440_v13, %v11440_v13 }
 0x145   : > { %1896 = vadd.xlane.f32.xlu0 %v1895_v42  ;;  %1905 = vadd.xlane.f32.xlu1 %v1904_v43  ;;  %v11537_v42 = vrot.slane %v11427_v44, %v11447_v50  ;;  %v1813_v43 = vsel %vm1127_vm2, %v1801_v15, 0.0  ;;  %v2105_v15 = vcombine.high %v2083_v57, %v2083_v57 }
 0x149   : > { %1902 = vadd.xlane.f32.xlu0 %v1901_v10  ;;  %1911 = vadd.xlane.f32.xlu1 %v1910_v34  ;;  %v2109_v10 = vcombine.high %v11379_v20, %v11379_v20  ;;  %v11554_v20 = vrot.slane %v11387_v25, %v11447_v50 }
 0x14d   : > { %1908 = vadd.xlane.f32.xlu0 %v1907_v51  ;;  %1811 = vadd.xlane.f32.xlu1 %v1810_v52  ;;  %v1819_v51 = vsel %vm1127_vm2, %v1803_v39, 0.0  ;;  %v1979_v52 = vsel %vm1127_vm2, %v1969_v40, 0.0  ;;  %v2571_v40 = vcombine.high %v2561_v62, %v2561_v62 }
 0x151   : > { %1914 = vadd.xlane.f32.xlu0 %v1913_v60  ;;  %1817 = vadd.xlane.f32.xlu1 %v1816_v61  ;;  %v2919_v60 = vrot.slane %v2547_v3, %v11512_v30  ;;  %v2097_v61 = vrot.slane %v2075_v18, %v11447_v50 }
 0x153   : > { %v11572_v21 = vsel %vm3236_vm4, %v2083_v57, %v2919_v60  ;;  %v2107_v39 = vcombine.high %v2097_v61, %v2097_v61  ;;  %v11579_v18 = vsel %vm3236_vm4, %v2097_v61, %v2923_v5  ;;  %v2931_v57 = vrot.slane %v2571_v40, %v11512_v30 }
 0x154   : > { %v2106_v60 = vcombine.high %v2090_v16, %v2090_v16  ;;  %v2123_v5 = vrot.slane %v2109_v10, %v11447_v50  ;;  %v1972_v10 = vmul.f32 %v11421_v37, %v11421_v37 }
 0x155   : > { %1808 = vadd.xlane.f32.xlu0 %v1807_v12  ;;  %1823 = vadd.xlane.f32.xlu1 %v1822_v14  ;;  %v2569_v12 = vcombine.high %v2547_v3, %v2547_v3  ;;  %v2554_v14 = vrot.slane %v11459_v56, %v11447_v50  ;;  %v11602_v62 = vsel %vm3236_vm4, %v2107_v39, %v2931_v57 }
 0x156   : > { %v2139_v0 = vrot.slane %v2123_v5, %v11447_v50 }
 0x157   : > { %v2927_v23 = vrot.slane %v2569_v12, %v11512_v30  ;;  %v2935_v3 = vrot.slane %v2554_v14, %v11512_v30  ;;  %v2570_v61 = vcombine.high %v2554_v14, %v2554_v14  ;;  %v2132_v12 = vrot.slane %v11516_v22, %v11447_v50 }
 0x158   : > { %v2146_v22 = vrot.slane %v2124_v47, %v11447_v50  ;;  %v2618_v47 = vcombine.high %v11524_v41, %v11524_v41 }
 0x159   : > { %1814 = vadd.xlane.f32.xlu0 %v1813_v43  ;;  %1829 = vadd.xlane.f32.xlu1 %v1828_v17  ;;  %v2076_v43 = vcombine.high %v2074_v48, %v2074_v48  ;;  %v2568_v17 = vrot.slane %v2540_v2, %v11447_v50  ;;  %v11592_v53 = vsel %vm3236_vm4, %v2105_v15, %v2927_v23  ;;  %v1991_v48 = vsel %vm1127_vm2, %v1973_v9, 0.0 }
 0x15a   : > { %v11597_v56 = vsel %vm3236_vm4, %v2090_v16, %v2935_v3  ;;  %v2951_v9 = vrot.slane %v11524_v41, %v11512_v30  ;;  %v2943_v14 = vrot.slane %v2570_v61, %v11512_v30  ;;  %v2173_v16 = vcombine.high %v11554_v20, %v11554_v20 }
 0x15b   : > { %v2104_v2 = vrot.slane %v2076_v43, %v11447_v50  ;;  %v2939_v55 = vrot.slane %v2568_v17, %v11512_v30  ;;  %v2610_v3 = vrot.slane %v2588_v24, %v11447_v50  ;;  %v2959_v57 = vrot.slane %v2618_v47, %v11512_v30 }
 0x15c   : > { %v11617_v23 = vsel %vm3236_vm4, %v2132_v12, %v2951_v9  ;;  %v11624_v40 = vsel %vm3236_vm4, %v2106_v60, %v2943_v14  ;;  %v2603_v24 = vrot.slane %v11485_v4, %v11447_v50  ;;  %v2617_v60 = vrot.slane %v2589_v33, %v11447_v50 }
 0x15d   : > { %1820 = vadd.xlane.f32.xlu0 %v1819_v51  ;;  %1980 = vadd.xlane.f32.xlu1 %v1979_v52  ;;  %v1970_v51 = vmul.f32 %v11413_v27, %v11413_v27  ;;  %v1975_v52 = vmul.f32 %v11454_v54, %v11454_v54  ;;  %v2572_v27 = vcombine.high %v2568_v17, %v2568_v17  ;;  %v1988_v61 = vsel %vm1127_vm2, %v1972_v10, 0.0 }
 0x15e   : > { %v11610_v15 = vsel %vm3236_vm4, %v2104_v2, %v2939_v55  ;;  %v2955_v37 = vrot.slane %v2610_v3, %v11512_v30  ;;  %v11659_v9 = vrot.slane %v11509_v29, %v11447_v50  ;;  %v2971_v4 = vrot.slane %v2617_v60, %v11512_v30 }
 0x15f   : > { %v1982_v39 = vsel %vm1127_vm2, %v1970_v51, 0.0  ;;  %v1997_v43 = vsel %vm1127_vm2, %v1975_v52, 0.0  ;;  %v2156_v51 = vcombine.high %v2146_v22, %v2146_v22  ;;  %v2125_v52 = vcombine.high %v2123_v5, %v2123_v5 }
 0x160   : > { %v11644_v55 = vsel %vm3236_vm4, %v2146_v22, %v2955_v37  ;;  %v2181_v33 = vrot.slane %v11554_v20, %v11447_v50  ;;  %v2172_v14 = vrot.slane %v2158_v49, %v11447_v50  ;;  %v2155_v22 = vcombine.high %v2139_v0, %v2139_v0 }
 0x161   : > { %1826 = vadd.xlane.f32.xlu0 %v1825_v63  ;;  %1986 = vadd.xlane.f32.xlu1 %v1985_v1  ;;  %v2108_v63 = vcombine.high %v2104_v2, %v2104_v2  ;;  %v2947_v1 = vrot.slane %v2572_v27, %v11512_v30  ;;  %v1974_v2 = vmul.f32 %v11429_v45, %v11429_v45 }
 0x162   : > { %v2195_v25 = vrot.slane %v2173_v16, %v11447_v50  ;;  %v2659_v49 = vrot.slane %v2637_v6, %v11447_v50  ;;  %v2214_v6 = vrot.slane %v11397_v7, %v11447_v50  ;;  %v2188_v44 = vrot.slane %v2172_v14, %v11447_v50 }
 0x163   : > { %v11632_v17 = vsel %vm3236_vm4, %v2108_v63, %v2947_v1  ;;  %v2967_v63 = vrot.slane %v2603_v24, %v11512_v30  ;;  %v1994_v20 = vsel %vm1127_vm2, %v1974_v2, 0.0 }
 0x164   : > { %v2987_v58 = vrot.slane %v2659_v49, %v11512_v30 }
 0x165   : > { %1977 = vadd.xlane.f32.xlu0 %v1976_v36  ;;  %1992 = vadd.xlane.f32.xlu1 %v1991_v48  ;;  %v2154_v36 = vcombine.high %v2132_v12, %v2132_v12  ;;  %v2620_v48 = vcombine.high %v2610_v3, %v2610_v3  ;;  %v2153_v12 = vrot.slane %v2125_v52, %v11447_v50 }
 0x166   : > { %v11672_v1 = vsel %vm3236_vm4, %v2139_v0, %v2967_v63  ;;  %v2685_v52 = vrot.slane %v2671_v35, %v11447_v50  ;;  %v2669_v63 = vcombine.high %v2659_v49, %v2659_v49  ;;  %v2652_v35 = vrot.slane %v11468_v59, %v11447_v50 }
 0x167   : > { %v2963_v41 = vrot.slane %v2620_v48, %v11512_v30  ;;  %v11653_v27 = vsel %vm3236_vm4, %v2154_v36, %v2959_v57  ;;  %v11675_v10 = vsel %vm3236_vm4, %v2153_v12, %v2971_v4  ;;  %v2157_v3 = vcombine.high %v2153_v12, %v2153_v12 }
 0x168   : > { %v2983_v36 = vrot.slane %v11503_v19, %v11512_v30  ;;  %v2203_v48 = vcombine.high %v2181_v33, %v2181_v33  ;;  %v2667_v57 = vcombine.high %v11503_v19, %v11503_v19  ;;  %v2694_v12 = vrot.slane %v11537_v42, %v11447_v50 }
 0x169   : > { %1983 = vadd.xlane.f32.xlu0 %v1982_v39  ;;  %1998 = vadd.xlane.f32.xlu1 %v1997_v43  ;;  %v11662_v5 = vsel %vm3236_vm4, %v2156_v51, %v2963_v41  ;;  %v2619_v39 = vcombine.high %v2603_v24, %v2603_v24  ;;  %v2621_v43 = vcombine.high %v2617_v60, %v2617_v60 }
 0x16a   : > { %v11688_v51 = vsel %vm3236_vm4, %v2181_v33, %v2983_v36  ;;  %v2991_v2 = vrot.slane %v2667_v57, %v11512_v30  ;;  %v2686_v41 = vcombine.high %v11537_v42, %v11537_v42  ;;  %v11713_v60 = vsel %vm3236_vm4, %v2195_v25, %v2987_v58 }
 0x16b   : > { %v2975_v47 = vrot.slane %v2619_v39, %v11512_v30  ;;  %v2979_v37 = vrot.slane %v2621_v43, %v11512_v30  ;;  %v2207_v33 = vcombine.high %v11397_v7, %v11397_v7  ;;  %v2174_v39 = vcombine.high %v2172_v14, %v2172_v14 }
 0x16c   : > { %v11718_v4 = vsel %vm3236_vm4, %v2203_v48, %v2991_v2  ;;  %v2222_v42 = vcombine.high %v2214_v6, %v2214_v6  ;;  %v2999_v43 = vrot.slane %v2652_v35, %v11512_v30  ;;  %v2204_v36 = vcombine.high %v2188_v44, %v2188_v44 }
 0x16d   : > { %1989 = vadd.xlane.f32.xlu0 %v1988_v61  ;;  %v11697_v24 = vsel %vm3236_vm4, %v2155_v22, %v2975_v47  ;;  %v11707_v19 = vsel %vm3236_vm4, %v2157_v3, %v2979_v37  ;;  %v2205_v61 = vcombine.high %v2195_v25, %v2195_v25  ;;  %v2995_v22 = vrot.slane %v2669_v63, %v11512_v30  ;;  %v11738_v37 = vld [vmem:[#allocation2 + $0x100] sm:$0xff] }
 0x16e   : > { %v2666_v3 = vrot.slane %v2638_v8, %v11447_v50  ;;  %v2202_v25 = vrot.slane %v2174_v39, %v11447_v50  ;;  %v11741_v59 = vsel %vm3236_vm4, %v2188_v44, %v2999_v43  ;;  %v2230_v48 = vrot.slane %v2214_v6, %v11447_v50 }
 0x16f   : > { %v11732_v47 = vsel %vm3236_vm4, %v2205_v61, %v2995_v22  ;;  %16626 = vst [vmem:[#allocation6_spill] sm:$0xff] %v11741_v59  ;;  %v2221_v57 = vrot.slane %v2207_v33, %v11447_v50  ;;  %v2687_v63 = vcombine.high %v2685_v52, %v2685_v52  ;;  %v2244_v6 = vrot.slane %v2222_v42, %v11447_v50 }
 0x170   : > { %v3003_v7 = vrot.slane %v2666_v3, %v11512_v30  ;;  %v2670_v49 = vcombine.high %v2666_v3, %v2666_v3  ;;  %v2206_v2 = vcombine.high %v2202_v25, %v2202_v25  ;;  %v2256_v33 = vcombine.high %v11389_v26, %v11389_v26 }
 0x171   : > { %1995 = vadd.xlane.f32.xlu0 %v1994_v20  ;;  %v2668_v20 = vcombine.high %v2652_v35, %v2652_v35  ;;  %v3015_v35 = vrot.slane %v2694_v12, %v11512_v30  ;;  %v2263_v22 = vrot.slane %v11389_v26, %v11447_v50  ;;  %v2708_v3 = vrot.slane %v2686_v41, %v11447_v50 }
 0x172   : > { %v11749_v58 = vsel %vm3236_vm4, %v2202_v25, %v3003_v7  ;;  %v3011_v61 = vrot.slane %v2670_v49, %v11512_v30  ;;  %v2252_v42 = vcombine.high %v2230_v48, %v2230_v48  ;;  %v2716_v25 = vcombine.high %v2694_v12, %v2694_v12 }
 0x173   : > { %v3007_v8 = vrot.slane %v2668_v20, %v11512_v30  ;;  %16627 = vst [vmem:[#allocation7_spill] sm:$0xff] %v11749_v58  ;;  %v11770_v20 = vsel %vm3236_vm4, %v2230_v48, %v3015_v35  ;;  %v3019_v26 = vrot.slane %v2708_v3, %v11512_v30  ;;  %v2254_v7 = vcombine.high %v2244_v6, %v2244_v6 }
 0x174   : > { %v11762_v39 = vsel %vm3236_vm4, %v2206_v2, %v3011_v61  ;;  %16630 = vst [vmem:[#allocation10_spill] sm:$0xff] %v11770_v20  ;;  %v2718_v49 = vcombine.high %v2708_v3, %v2708_v3  ;;  %v3023_v41 = vrot.slane %v2716_v25, %v11512_v30  ;;  %v2701_v2 = vrot.slane %v2685_v52, %v11447_v50  ;;  %v11787_v3 = vld [vmem:[#allocation2 + $0x130] sm:$0xff] }
 0x175   : > { %v11753_v44 = vsel %vm3236_vm4, %v2204_v36, %v3007_v8  ;;  %16629 = vst [vmem:[#allocation9_spill] sm:$0xff] %v11762_v39  ;;  %v11767_v36 = vld [vmem:[#allocation2 + $0x120] sm:$0xff]  ;;  %v2237_v8 = vrot.slane %v2221_v57, %v11447_v50  ;;  %v2223_v61 = vcombine.high %v2221_v57, %v2221_v57  ;;  %v2715_v38 = vrot.slane %v2687_v63, %v11447_v50 }
 0x176   : > { %16628 = vst [vmem:[#allocation8_spill] sm:$0xff] %v11753_v44  ;;  %v2271_v35 = vcombine.high %v2263_v22, %v2263_v22  ;;  %v11781_v12 = vrot.slane %v11395_v31, %v11447_v50  ;;  %v11784_v48 = vsel %vm3236_vm4, %v2244_v6, %v3019_v26  ;;  %v3027_v16 = vrot.slane %v2718_v49, %v11512_v30 }
 0x177   : > { %16631 = vst [vmem:[#allocation11_spill] sm:$0xff] %v11784_v48  ;;  %v11790_v43 = vsel %vm3236_vm4, %v2252_v42, %v3023_v41  ;;  %v3031_v52 = vrot.slane %v2701_v2, %v11512_v30  ;;  %v2251_v57 = vrot.slane %v2223_v61, %v11447_v50  ;;  %v2253_v63 = vcombine.high %v2237_v8, %v2237_v8 }
 0x178   : > { %16632 = vst [vmem:[#allocation12_spill] sm:$0xff] %v11790_v43  ;;  %v11797_v25 = vsel %vm3236_vm4, %v2254_v7, %v3027_v16  ;;  %v3035_v6 = vrot.slane %v2715_v38, %v11512_v30  ;;  %v2717_v26 = vcombine.high %v2701_v2, %v2701_v2  ;;  %v2279_v49 = vrot.slane %v2263_v22, %v11447_v50  ;;  %v11815_v2 = vld [vmem:[#allocation2 + $0x150] sm:$0xff] }
 0x179   : > { %16633 = vst [vmem:[#allocation13_spill] sm:$0xff] %v11797_v25  ;;  %v2312_v42 = vrot.slane %v11403_v32, %v11447_v50  ;;  %v11804_v41 = vsel %vm3236_vm4, %v2237_v8, %v3031_v52  ;;  %v2255_v14 = vcombine.high %v2251_v57, %v2251_v57  ;;  %v2719_v61 = vcombine.high %v2715_v38, %v2715_v38 }
 0x17a   : > { %3318 = vrot.lane.b32.xlu1 %v11738_v37, %s10599_s4  ;;  %16634 = vst [vmem:[#allocation14_spill] sm:$0xff] %v11804_v41  ;;  %v2776_v0 = vrot.slane %v11440_v13, %v11447_v50  ;;  %v11809_v34 = vsel %vm3236_vm4, %v2251_v57, %v3035_v6  ;;  %v3039_v16 = vrot.slane %v2717_v26, %v11512_v30  ;;  %v3303_v57 = vld [vmem:[#allocation2 + $0x110] sm:$0xff] }
 0x17b   : > { %16635 = vst [vmem:[#allocation15_spill] sm:$0xff] %v11809_v34  ;;  %v3047_v7 = vrot.slane %v11659_v9, %v11512_v30  ;;  %v2270_v22 = vrot.slane %v2256_v33, %v11447_v50  ;;  %v3043_v8 = vrot.slane %v2719_v61, %v11512_v30  ;;  %v2293_v52 = vrot.slane %v2271_v35, %v11447_v50 }
 0x17c   : > { %v16636_v38 = vcombine.high %v11509_v29, %v11509_v29  ;;  %v11826_v6 = vsel %vm3236_vm4, %v2253_v63, %v3039_v16  ;;  %v2301_v26 = vcombine.high %v2279_v49, %v2279_v49  ;;  %v2765_v61 = vcombine.high %v11659_v9, %v11659_v9 }
 0x17d   : > { %16637 = vst [vmem:[#allocation16_spill] sm:$0xff] %v11826_v6  ;;  %v11829_v33 = vsel %vm3236_vm4, %v2279_v49, %v3047_v7  ;;  %v2305_v35 = vcombine.high %v11403_v32, %v11403_v32  ;;  %v2320_v34 = vcombine.high %v2312_v42, %v2312_v42  ;;  %v11837_v29 = vsel %vm3236_vm4, %v2255_v14, %v3043_v8  ;;  %v11841_v49 = vld [vmem:[#allocation2 + $0x170] sm:$0xff]  ;;  %v3306_v8 = vld [vmem:[#allocation2 + $0x140] sm:$0xff] }
 0x17e   : > { %3322 = vrot.lane.b32.xlu1 %v11767_v36, %s10599_s4  ;;  %v2757_v41 = vrot.slane %v16636_v38, %v11447_v50  ;;  %16638 = vst [vmem:[#allocation17_spill] sm:$0xff] %v11829_v33  ;;  %16639 = vst [vmem:[#allocation18_spill] sm:$0xff] %v11837_v29  ;;  %v2784_v63 = vcombine.high %v2776_v0, %v2776_v0  ;;  %v3055_v16 = vrot.slane %v2765_v61, %v11512_v30 }
 0x17f   : > { %v2303_v7 = vcombine.high %v2293_v52, %v2293_v52  ;;  %v2286_v32 = vrot.slane %v2270_v22, %v11447_v50  ;;  %v2750_v6 = vrot.slane %v11527_v28, %v11447_v50  ;;  %v2272_v25 = vcombine.high %v2270_v22, %v2270_v22 }
 0x180   : > { %v3051_v38 = vrot.slane %v2757_v41, %v11512_v30  ;;  %v2767_v33 = vcombine.high %v2757_v41, %v2757_v41  ;;  %v2792_v14 = vrot.slane %v2776_v0, %v11447_v50  ;;  %v11853_v61 = vsel %vm3236_vm4, %v2301_v26, %v3055_v16 }
 0x181   : > { %16641 = vst [vmem:[#allocation20_spill] sm:$0xff] %v11853_v61  ;;  %v3063_v22 = vrot.slane %v2750_v6, %v11512_v30  ;;  %v2300_v0 = vrot.slane %v2272_v25, %v11447_v50  ;;  %v2302_v29 = vcombine.high %v2286_v32, %v2286_v32  ;;  %v2766_v16 = vcombine.high %v2750_v6, %v2750_v6 }
 0x182   : > { %3324 = vrot.lane.b32.xlu1 %v11787_v3, %s10599_s4  ;;  %v11844_v9 = vsel %vm3236_vm4, %v2293_v52, %v3051_v38  ;;  %v3059_v41 = vrot.slane %v2767_v33, %v11512_v30  ;;  %v16642_v52 = vcombine.high %v11527_v28, %v11527_v28  ;;  %v2319_v61 = vrot.slane %v2305_v35, %v11447_v50 }
 0x183   : > { %16640 = vst [vmem:[#allocation19_spill] sm:$0xff] %v11844_v9  ;;  %v3419_v9 = vmul.f32 %v3303_v57, %v3303_v57  ;;  %v11869_v28 = vsel %vm3236_vm4, %v2286_v32, %v3063_v22  ;;  %v16645_v25 = vcombine.high %v11440_v13, %v11440_v13  ;;  %v3071_v6 = vrot.slane %v2766_v16, %v11512_v30 }
 0x184   : > { %v2764_v38 = vrot.slane %v16642_v52, %v11447_v50  ;;  %v11864_v43 = vsel %vm3236_vm4, %v2303_v7, %v3059_v41  ;;  %16644 = vst [vmem:[#allocation22_spill] sm:$0xff] %v11869_v28  ;;  %v2304_v52 = vcombine.high %v2300_v0, %v2300_v0  ;;  %v3308_v7 = vld [vmem:[#allocation2 + $0x160] sm:$0xff]  ;;  %v3079_v32 = vrot.slane %v2792_v14, %v11512_v30 }
 0x185   : > { %16643 = vst [vmem:[#allocation21_spill] sm:$0xff] %v11864_v43  ;;  %v2783_v48 = vrot.slane %v16645_v25, %v11447_v50  ;;  %v2342_v13 = vrot.slane %v2320_v34, %v11447_v50  ;;  %v2825_v16 = vrot.slane %v11429_v45, %v11447_v50 }
 0x186   : > { %3328 = vrot.lane.b32.xlu1 %v11815_v2, %s10599_s4  ;;  %v3067_v26 = vrot.slane %v2764_v38, %v11512_v30  ;;  %v2768_v33 = vcombine.high %v2764_v38, %v2764_v38  ;;  %v2806_v38 = vrot.slane %v2784_v63, %v11447_v50 }
 0x187   : > { %3320 = vrot.lane.b32.xlu0 %v3303_v57, %s10599_s4  ;;  %v2328_v57 = vrot.slane %v2312_v42, %v11447_v50  ;;  %v3420_v42 = vmul.f32 %v11767_v36, %v11767_v36  ;;  %v3418_v36 = vmul.f32 %v11738_v37, %v11738_v37  ;;  %v2785_v25 = vcombine.high %v2783_v48, %v2783_v48 }
 0x188   : > { %v11878_v41 = vsel %vm3236_vm4, %v2300_v0, %v3067_v26  ;;  %v3075_v35 = vrot.slane %v2768_v33, %v11512_v30  ;;  %v2814_v26 = vcombine.high %v2792_v14, %v2792_v14  ;;  %v3083_v34 = vrot.slane %v2806_v38, %v11512_v30 }
 0x189   : > { %16646 = vst [vmem:[#allocation23_spill] sm:$0xff] %v11878_v41  ;;  %v2350_v0 = vcombine.high %v2328_v57, %v2328_v57  ;;  %v11899_v33 = vsel %vm3236_vm4, %v2328_v57, %v3079_v32  ;;  %v16651_v14 = vcombine.high %v11429_v45, %v11429_v45  ;;  %v2369_v57 = vcombine.high %v11781_v12, %v11781_v12 }
 0x18a   : > { %3332 = vrot.lane.b32.xlu1 %v11841_v49, %s10599_s4  ;;  %v11892_v22 = vsel %vm3236_vm4, %v2304_v52, %v3075_v35  ;;  %16649 = vst [vmem:[#allocation26_spill] sm:$0xff] %v11899_v33  ;;  %v3087_v37 = vrot.slane %v2814_v26, %v11512_v30  ;;  %v11920_v35 = vsel %vm3236_vm4, %v2342_v13, %v3083_v34 }
 0x18b   : > { %3326 = vrot.lane.b32.xlu0 %v3306_v8, %s10599_s4  ;;  %16648 = vst [vmem:[#allocation25_spill] sm:$0xff] %v11892_v22  ;;  %v2832_v52 = vrot.slane %v16651_v14, %v11447_v50  ;;  %16652 = vst [vmem:[#allocation27_spill] sm:$0xff] %v11920_v35  ;;  %v2352_v32 = vcombine.high %v2342_v13, %v2342_v13  ;;  %v11928_v26 = vrot.slane %v11411_v11, %v11447_v50 }
 0x18c   : > { %v11923_v45 = vsel %vm3236_vm4, %v2350_v0, %v3087_v37  ;;  %v2833_v14 = vcombine.high %v2825_v16, %v2825_v16  ;;  %v2321_v13 = vcombine.high %v2319_v61, %v2319_v61  ;;  %v3424_v34 = vmul.f32 %v3308_v7, %v3308_v7 }
 0x18d   : > { %16653 = vst [vmem:[#allocation28_spill] sm:$0xff] %v11923_v45 }
 0x18e   : > { %3436 = vrot.lane.b32.xlu1 %v3419_v9, %s10599_s4  ;;  %v11889_v9 = vsel %vm3236_vm4, %v2302_v29, %v3071_v6  ;;  %v16650_v29 = vcombine.high %v11395_v31, %v11395_v31  ;;  %v3422_v31 = vmul.f32 %v3306_v8, %v3306_v8  ;;  %v3421_v6 = vmul.f32 %v11787_v3, %v11787_v3 }
 0x18f   : > { %3330 = vrot.lane.b32.xlu0 %v3308_v7, %s10599_s4  ;;  %16647 = vst [vmem:[#allocation24_spill] sm:$0xff] %v11889_v9  ;;  %v2799_v8 = vrot.slane %v2783_v48, %v11447_v50  ;;  %v2349_v48 = vrot.slane %v2321_v13, %v11447_v50  ;;  %v2867_v13 = vcombine.high %v11454_v54, %v11454_v54 }
 0x190   : > { %v11906_v63 = vrot.slane %v16650_v29, %v11447_v50  ;;  %v2816_v29 = vcombine.high %v2806_v38, %v2806_v38  ;;  %v2813_v38 = vrot.slane %v2785_v25, %v11447_v50 }
 0x191   : > { %v3095_v37 = vrot.slane %v2799_v8, %v11512_v30  ;;  %v2815_v35 = vcombine.high %v2799_v8, %v2799_v8  ;;  %v2353_v8 = vcombine.high %v2349_v48, %v2349_v48 }
 0x192   : > { %3438 = vrot.lane.b32.xlu1 %v3420_v42, %s10599_s4  ;;  %v2335_v42 = vrot.slane %v2319_v61, %v11447_v50  ;;  %v3091_v0 = vrot.slane %v2816_v29, %v11512_v30  ;;  %v3423_v61 = vmul.f32 %v11815_v2, %v11815_v2  ;;  %v2834_v2 = vcombine.high %v2832_v52, %v2832_v52 }
 0x193   : > { %3434 = vrot.lane.b32.xlu0 %v3418_v36, %s10599_s4  ;;  %v2841_v36 = vrot.slane %v2825_v16, %v11447_v50  ;;  %v3099_v16 = vrot.slane %v2813_v38, %v11512_v30  ;;  %v3103_v7 = vrot.slane %v2815_v35, %v11512_v30 }
 0x194   : > { %v2351_v45 = vcombine.high %v2335_v42, %v2335_v42  ;;  %v11940_v3 = vsel %vm3236_vm4, %v2352_v32, %v3091_v0  ;;  %v11947_v25 = vsel %vm3236_vm4, %v2335_v42, %v3095_v37  ;;  %v2418_v32 = vcombine.high %v11928_v26, %v11928_v26 }
 0x195   : > { %16654 = vst [vmem:[#allocation29_spill] sm:$0xff] %v11940_v3  ;;  %16655 = vst [vmem:[#allocation30_spill] sm:$0xff] %v11947_v25  ;;  %v11956_v29 = vsel %vm3236_vm4, %v2349_v48, %v3099_v16  ;;  %v3111_v35 = vrot.slane %v2841_v36, %v11512_v30  ;;  %v2855_v37 = vrot.slane %v2833_v14, %v11447_v50 }
 0x196   : > { %3442 = vrot.lane.b32.xlu1 %v3422_v31, %s10599_s4  ;;  %v2817_v31 = vcombine.high %v2813_v38, %v2813_v38  ;;  %16656 = vst [vmem:[#allocation31_spill] sm:$0xff] %v11956_v29  ;;  %v11961_v42 = vsel %vm3236_vm4, %v2351_v45, %v3103_v7  ;;  %v2874_v38 = vrot.slane %v11454_v54, %v11447_v50  ;;  %v16676_v29 = vlaneseq }
 0x197   : > { %3440 = vrot.lane.b32.xlu0 %v3421_v6, %s10599_s4  ;;  %v2377_v6 = vrot.slane %v11781_v12, %v11447_v50  ;;  %16657 = vst [vmem:[#allocation32_spill] sm:$0xff] %v11961_v42  ;;  %v2391_v12 = vrot.slane %v2369_v57, %v11447_v50  ;;  %v3425_v48 = vmul.f32 %v11841_v49, %v11841_v49 }
 0x198   : > { %v3107_v0 = vrot.slane %v2817_v31, %v11512_v30  ;;  %v2863_v31 = vcombine.high %v2841_v36, %v2841_v36  ;;  %v3115_v57 = vrot.slane %v2855_v37, %v11512_v30  ;;  %v2865_v7 = vcombine.high %v2855_v37, %v2855_v37 }
 0x199   : > { %v11976_v45 = vsel %vm3236_vm4, %v2377_v6, %v3111_v35  ;;  %v2399_v16 = vcombine.high %v2377_v6, %v2377_v6  ;;  %v2384_v54 = vrot.slane %v11906_v63, %v11447_v50  ;;  %v2848_v14 = vrot.slane %v2832_v52, %v11447_v50 }
 0x19a   : > { %3446 = vrot.lane.b32.xlu1 %v3424_v34, %s10599_s4  ;;  %v11970_v34 = vsel %vm3236_vm4, %v2353_v8, %v3107_v0  ;;  %16659 = vst [vmem:[#allocation34_spill] sm:$0xff] %v11976_v45  ;;  %v3119_v8 = vrot.slane %v2863_v31, %v11512_v30  ;;  %v2370_v49 = vcombine.high %v11906_v63, %v11906_v63  ;;  %v1747_v25 = vand.u32 127, %v16676_v29 }
 0x19b   : > { %3444 = vrot.lane.b32.xlu0 %v3423_v61, %s10599_s4  ;;  %16658 = vst [vmem:[#allocation33_spill] sm:$0xff] %v11970_v34  ;;  %v2401_v61 = vcombine.high %v2391_v12, %v2391_v12  ;;  %v2862_v0 = vrot.slane %v2834_v2, %v11447_v50  ;;  %v2882_v6 = vcombine.high %v2874_v38, %v2874_v38 }
 0x19c   : > { %v2890_v36 = vrot.slane %v2874_v38, %v11447_v50  ;;  %v11989_v35 = vsel %vm3236_vm4, %v2391_v12, %v3115_v57  ;;  %v3123_v37 = vrot.slane %v2865_v7, %v11512_v30  ;;  %v11993_v45 = vsel %vm3236_vm4, %v2399_v16, %v3119_v8 }
 0x19d   : > { %16660 = vst [vmem:[#allocation35_spill] sm:$0xff] %v11989_v35  ;;  %16661 = vst [vmem:[#allocation36_spill] sm:$0xff] %v11993_v45  ;;  %v2398_v52 = vrot.slane %v2370_v49, %v11447_v50  ;;  %v2400_v31 = vcombine.high %v2384_v54, %v2384_v54  ;;  %v3131_v2 = vrot.slane %v2862_v0, %v11512_v30 }
 0x19e   : > { %v11998_v63 = vsel %vm3236_vm4, %v2401_v61, %v3123_v37  ;;  %v2864_v34 = vcombine.high %v2848_v14, %v2848_v14  ;;  %v2426_v12 = vrot.slane %v11928_v26, %v11447_v50  ;;  %v2881_v38 = vrot.slane %v2867_v13, %v11447_v50 }
 0x19f   : > { %3448 = vrot.lane.b32.xlu0 %v3425_v48, %s10599_s4  ;;  %v3127_v48 = vrot.slane %v2848_v14, %v11512_v30  ;;  %16662 = vst [vmem:[#allocation37_spill] sm:$0xff] %v11998_v63  ;;  %v2402_v16 = vcombine.high %v2398_v52, %v2398_v52  ;;  %v2866_v7 = vcombine.high %v2862_v0, %v2862_v0 }
 0x1a0   : > { %v12008_v8 = vsel %vm3236_vm4, %v2398_v52, %v3131_v2  ;;  %v3135_v49 = vrot.slane %v2864_v34, %v11512_v30  ;;  %v3143_v61 = vrot.slane %v2890_v36, %v11512_v30  ;;  %v16665_v14 = vcombine.high %v11411_v11, %v11411_v11 }
 0x1a1   : > { %v12005_v57 = vsel %vm3236_vm4, %v2384_v54, %v3127_v48  ;;  %16664 = vst [vmem:[#allocation39_spill] sm:$0xff] %v12008_v8  ;;  %v3139_v26 = vrot.slane %v2866_v7, %v11512_v30  ;;  %v2440_v13 = vrot.slane %v2418_v32, %v11447_v50  ;;  %v2904_v54 = vrot.slane %v2882_v6, %v11447_v50 }
 0x1a2   : > { %16663 = vst [vmem:[#allocation38_spill] sm:$0xff] %v12005_v57  ;;  %v2417_v37 = vrot.slane %v16665_v14, %v11447_v50  ;;  %v12020_v0 = vsel %vm3236_vm4, %v2400_v31, %v3135_v49  ;;  %v12023_v48 = vsel %vm3236_vm4, %v2426_v12, %v3143_v61  ;;  %v2883_v34 = vcombine.high %v2881_v38, %v2881_v38 }
 0x1a3   : > { %16666 = vst [vmem:[#allocation40_spill] sm:$0xff] %v12020_v0  ;;  %16667 = vst [vmem:[#allocation41_spill] sm:$0xff] %v12023_v48  ;;  %v12026_v52 = vsel %vm3236_vm4, %v2402_v16, %v3139_v26  ;;  %v3147_v2 = vrot.slane %v2904_v54, %v11512_v30  ;;  %v2448_v11 = vcombine.high %v2426_v12, %v2426_v12 }
 0x1a4   : > { %16668 = vst [vmem:[#allocation42_spill] sm:$0xff] %v12026_v52  ;;  %v2912_v14 = vcombine.high %v2890_v36, %v2890_v36  ;;  %v2450_v32 = vcombine.high %v2440_v13, %v2440_v13  ;;  %v2914_v8 = vcombine.high %v2904_v54, %v2904_v54  ;;  %v2433_v6 = vrot.slane %v2417_v37, %v11447_v50 }
 0x1a5   : > { %v12030_v7 = vsel %vm3236_vm4, %v2440_v13, %v3147_v2  ;;  %v2897_v49 = vrot.slane %v2881_v38, %v11447_v50  ;;  %v2419_v48 = vcombine.high %v2417_v37, %v2417_v37  ;;  %v2911_v16 = vrot.slane %v2883_v34, %v11447_v50 }
 0x1a6   : > { %16669 = vst [vmem:[#allocation43_spill] sm:$0xff] %v12030_v7  ;;  %v3151_v31 = vrot.slane %v2912_v14, %v11512_v30  ;;  %v3155_v61 = vrot.slane %v2914_v8, %v11512_v30  ;;  %v2449_v12 = vcombine.high %v2433_v6, %v2433_v6  ;;  %v12102_v22 = vsub.s32 %v1747_v25, %v11432_v46 }
 0x1a7   : > { %v3159_v36 = vrot.slane %v2897_v49, %v11512_v30  ;;  %v2913_v2 = vcombine.high %v2897_v49, %v2897_v49  ;;  %v2447_v54 = vrot.slane %v2419_v48, %v11447_v50  ;;  %v3163_v14 = vrot.slane %v2911_v16, %v11512_v30 }
 0x1a8   : > { %v12038_v26 = vsel %vm3236_vm4, %v2448_v11, %v3151_v31  ;;  %v12042_v13 = vsel %vm3236_vm4, %v2450_v32, %v3155_v61  ;;  %v2915_v11 = vcombine.high %v2911_v16, %v2911_v16 }
 0x1a9   : > { %16670 = vst [vmem:[#allocation44_spill] sm:$0xff] %v12038_v26  ;;  %16671 = vst [vmem:[#allocation45_spill] sm:$0xff] %v12042_v13  ;;  %v12047_v38 = vsel %vm3236_vm4, %v2433_v6, %v3159_v36  ;;  %v3167_v8 = vrot.slane %v2913_v2, %v11512_v30  ;;  %v12051_v37 = vsel %vm3236_vm4, %v2447_v54, %v3163_v14 }
 0x1aa   : > { %16672 = vst [vmem:[#allocation46_spill] sm:$0xff] %v12047_v38  ;;  %16673 = vst [vmem:[#allocation47_spill] sm:$0xff] %v12051_v37  ;;  %v2451_v34 = vcombine.high %v2447_v54, %v2447_v54  ;;  %v3171_v32 = vrot.slane %v2915_v11, %v11512_v30 }
 0x1ab   : > { %v12054_v31 = vsel %vm3236_vm4, %v2449_v12, %v3167_v8 }
 0x1ac   : > { %16674 = vst [vmem:[#allocation48_spill] sm:$0xff] %v12054_v31  ;;  %v12058_v49 = vsel %vm3236_vm4, %v2451_v34, %v3171_v32 }
 0x1ad   : > { %16675 = vst [vmem:[#allocation49_spill] sm:$0xff] %v12058_v49 }
 0x1be   : > { %v1719_v48 = vpop.xlane.xlu1 %1718  ;;  %v1716_v61 = vpop.xlane.xlu0 %1715 }
 0x1bf   : > { %v1755_v28 = vrot.slane %v1719_v48, %v12102_v22  ;;  %v1751_v43 = vrot.slane %v1716_v61, %v12102_v22 }
 0x1c1   : > { %v1781_v58 = vsel %vm1780_vm5, %v1755_v28, %v1751_v43 }
 0x1c2   : > { %v12060_v50 = vpop.xlane.xlu1 %1727  ;;  %v1722_v6 = vpop.xlane.xlu0 %1721 }
 0x1c3   : > { %v1759_v39 = vrot.slane %v1722_v6, %v12102_v22  ;;  %v1767_v6 = vrot.slane %v12060_v50, %v12102_v22 }
 0x1c5   : > { %v1783_v48 = vsel %vm1782_vm6, %v1759_v39, %v1781_v58 }
 0x1c6   : > { %v12062_v36 = vpop.xlane.xlu1 %1733  ;;  %v1725_v2 = vpop.xlane.xlu0 %1724 }
 0x1c7   : > { %v1763_v29 = vrot.slane %v1725_v2, %v12102_v22 }
 0x1ca   : > { %v12064_v14 = vpop.xlane.xlu0 %1730  ;;  %v12066_v54 = vpop.xlane.xlu1 %1893 }
 0x1cb   : > { %v1771_v2 = vrot.slane %v12064_v14, %v12102_v22 }
 0x1ce   : > { %v12068_v16 = vpop.xlane.xlu0 %1736  ;;  %v12070_v12 = vpop.xlane.xlu1 %1899 }
 0x1d2   : > { %v12072_v8 = vpop.xlane.xlu0 %1896  ;;  %v12074_v34 = vpop.xlane.xlu1 %1905 }
 0x1d3   : > { %v1931_v58 = vrot.slane %v12072_v8, %v12102_v22 }
 0x1d6   : > { %v12076_v11 = vpop.xlane.xlu0 %1902  ;;  %v12078_v32 = vpop.xlane.xlu1 %1911 }
 0x1da   : > { %v12080_v49 = vpop.xlane.xlu0 %1908  ;;  %v1812_v31 = vpop.xlane.xlu1 %1811 }
 0x1db   : > { %v1846_v43 = vrot.slane %v1812_v31, %v12102_v22  ;;  %v1927_v31 = vrot.slane %v12066_v54, %v12102_v22 }
 0x1dd   : > { %v1956_v54 = vsel %vm1780_vm5, %v1931_v58, %v1927_v31 }
 0x1de   : > { %v12082_v37 = vpop.xlane.xlu0 %1914  ;;  %v12084_v38 = vpop.xlane.xlu1 %1817 }
 0x1e2   : > { %v1809_v13 = vpop.xlane.xlu0 %1808  ;;  %v12086_v26 = vpop.xlane.xlu1 %1823 }
 0x1e3   : > { %v1842_v61 = vrot.slane %v1809_v13, %v12102_v22 }
 0x1e6   : > { %v1815_v7 = vpop.xlane.xlu0 %1814  ;;  %v12088_v52 = vpop.xlane.xlu1 %1829 }
 0x1ea   : > { %v12090_v0 = vpop.xlane.xlu0 %1820  ;;  %v1981_v57 = vpop.xlane.xlu1 %1980 }
 0x1eb   : > { %v1858_v8 = vrot.slane %v12090_v0, %v12102_v22 }
 0x1ee   : > { %v12092_v63 = vpop.xlane.xlu0 %1826  ;;  %v12094_v45 = vpop.xlane.xlu1 %1986 }
 0x1f2   : > { %v1978_v35 = vpop.xlane.xlu0 %1977  ;;  %v12096_v42 = vpop.xlane.xlu1 %1992 }
 0x1f3   : > { %v2011_v13 = vrot.slane %v1978_v35, %v12102_v22  ;;  %v1854_v35 = vrot.slane %v12084_v38, %v12102_v22 }
 0x1f6   : > { %v1984_v3 = vpop.xlane.xlu0 %1983  ;;  %v12099_v33 = vpop.xlane.xlu1 %1998 }
 0x1fa   : > { %v12104_v9 = vpop.xlane.xlu0 %1989  ;;  %v3319_v41 = vpop.permute.xlu1 %3318 }
 0x1fb   : > { %v3342_v20 = vsel %vm1127_vm2, %v3319_v41, 0.0  ;;  %v1785_v41 = vsel %vm1784_vm7, %v1763_v29, %v1783_v48  ;;  %v2019_v29 = vrot.slane %v1984_v3, %v12102_v22  ;;  %v1775_v48 = vrot.slane %v12062_v36, %v12102_v22 }
 0x1fc   : > { %3343 = vadd.xlane.f32.xlu0 %v3342_v20  ;;  %v1850_v20 = vrot.slane %v1815_v7, %v12102_v22  ;;  %v1871_v7 = vsel %vm1780_vm5, %v1846_v43, %v1842_v61  ;;  %v1787_v50 = vsel %vm1786_vm8, %v1767_v6, %v1785_v41  ;;  %v2015_v61 = vrot.slane %v1981_v57, %v12102_v22 }
 0x1fd   : > { %v1789_v6 = vsel %vm1788_vm9, %v1771_v2, %v1787_v50  ;;  %v1935_v36 = vrot.slane %v12070_v12, %v12102_v22  ;;  %v1779_v12 = vrot.slane %v12068_v16, %v12102_v22  ;;  %v1947_v50 = vrot.slane %v12080_v49, %v12102_v22 }
 0x1fe   : > { %v12111_v44 = vpop.xlane.xlu0 %1995  ;;  %v3323_v25 = vpop.permute.xlu1 %3322  ;;  %v1872_v14 = vsel %vm1782_vm6, %v1850_v20, %v1871_v7  ;;  %v1939_v20 = vrot.slane %v12076_v11, %v12102_v22  ;;  %v2040_v57 = vsel %vm1780_vm5, %v2015_v61, %v2011_v13  ;;  %v1943_v16 = vrot.slane %v12074_v34, %v12102_v22 }
 0x1ff   : > { %v3348_v59 = vsel %vm1127_vm2, %v3323_v25, 0.0  ;;  %v1873_v38 = vsel %vm1784_vm7, %v1854_v35, %v1872_v14  ;;  %v2041_v11 = vsel %vm1782_vm6, %v2019_v29, %v2040_v57  ;;  %v1957_v58 = vsel %vm1782_vm6, %v1935_v36, %v1956_v54 }
 0x200   : > { %3349 = vadd.xlane.f32.xlu0 %v3348_v59  ;;  %v1874_v2 = vsel %vm1786_vm8, %v1858_v8, %v1873_v38  ;;  %v2035_v8 = vrot.slane %v12111_v44, %v12102_v22  ;;  %v1870_v29 = vrot.slane %v12088_v52, %v12102_v22  ;;  %v2031_v34 = vrot.slane %v12096_v42, %v12102_v22 }
 0x201   : > { %v1955_v52 = vrot.slane %v12082_v37, %v12102_v22  ;;  %v2039_v36 = vrot.slane %v12099_v33, %v12102_v22 }
 0x202   : > { %v3321_v28 = vpop.permute.xlu0 %3320  ;;  %v3325_v25 = vpop.permute.xlu1 %3324 }
 0x203   : > { %v3345_v59 = vsel %vm1127_vm2, %v3321_v28, 0.0  ;;  %v3351_v39 = vsel %vm1127_vm2, %v3325_v25, 0.0  ;;  %v1866_v28 = vrot.slane %v12092_v63, %v12102_v22  ;;  %v2027_v25 = vrot.slane %v12104_v9, %v12102_v22 }
 0x204   : > { %3346 = vadd.xlane.f32.xlu1 %v3345_v59  ;;  %3352 = vadd.xlane.f32.xlu0 %v3351_v39  ;;  %v1862_v59 = vrot.slane %v12086_v26, %v12102_v22  ;;  %v2023_v39 = vrot.slane %v12094_v45, %v12102_v22  ;;  %v1958_v63 = vsel %vm1784_vm7, %v1939_v20, %v1957_v58 }
 0x206   : > { %v3327_v43 = vpop.permute.xlu0 %3326  ;;  %v3329_v41 = vpop.permute.xlu1 %3328  ;;  %v2042_v14 = vsel %vm1784_vm7, %v2023_v39, %v2041_v11  ;;  %v1875_v45 = vsel %vm1788_vm9, %v1862_v59, %v1874_v2 }
 0x207   : > { %v3354_v0 = vsel %vm1127_vm2, %v3327_v43, 0.0  ;;  %v3357_v3 = vsel %vm1127_vm2, %v3329_v41, 0.0  ;;  %v2043_v26 = vsel %vm1786_vm8, %v2027_v25, %v2042_v14  ;;  %v1876_v49 = vsel %vm1790_vm10, %v1866_v28, %v1875_v45  ;;  %v12214_v14 = vld [vmem:[#allocation2 + $0x21] sm:$0xff]  ;;  %v12218_v45 = vld [vmem:[#allocation2 + $0x11] sm:$0xff] }
 0x208   : > { %3355 = vadd.xlane.f32.xlu1 %v3354_v0  ;;  %3358 = vadd.xlane.f32.xlu0 %v3357_v3  ;;  %v1791_v43 = vsel %vm1790_vm10, %v1775_v48, %v1789_v6  ;;  %v1959_v41 = vsel %vm1786_vm8, %v1943_v16, %v1958_v63  ;;  %v1877_v42 = vsel %vm1792_vm11, %v1870_v29, %v1876_v49  ;;  %v12210_v16 = vld [vmem:[#allocation2 + $0x1] sm:$0xff]  ;;  %v12230_v49 = vld [vmem:[#allocation2 + $0x51] sm:$0xff] }
 0x209   : > { %v1793_v44 = vsel %vm1792_vm11, %v1779_v12, %v1791_v43  ;;  %v1960_v0 = vsel %vm1788_vm9, %v1947_v50, %v1959_v41  ;;  %v2044_v3 = vsel %vm1788_vm9, %v2031_v34, %v2043_v26  ;;  %v1951_v48 = vrot.slane %v12078_v32, %v12102_v22  ;;  %v12222_v26 = vld [vmem:[#allocation2 + $0x31] sm:$0xff]  ;;  %v12234_v29 = vld [vmem:[#allocation2 + $0x61] sm:$0xff] }
 0x20a   : > { %v3331_v7 = vpop.permute.xlu0 %3330  ;;  %v3333_v13 = vpop.permute.xlu1 %3332  ;;  %v2045_v6 = vsel %vm1790_vm10, %v2035_v8, %v2044_v3  ;;  %v1795_v38 = vsel %vm1127_vm2, %v1793_v44, 0.0  ;;  %v1879_v57 = vsel %vm1127_vm2, %v1877_v42, 0.0  ;;  %v12226_v8 = vld [vmem:[#allocation2 + $0x41] sm:$0xff]  ;;  %v12238_v34 = vld [vmem:[#allocation2 + $0x71] sm:$0xff] }
 0x20b   : > { %v3360_v9 = vsel %vm1127_vm2, %v3331_v7, 0.0  ;;  %v3363_v31 = vsel %vm1127_vm2, %v3333_v13, 0.0  ;;  %v1961_v37 = vsel %vm1790_vm10, %v1951_v48, %v1960_v0  ;;  %v2046_v25 = vsel %vm1792_vm11, %v2039_v36, %v2045_v6 }
 0x20c   : > { %3361 = vadd.xlane.f32.xlu1 %v3360_v9  ;;  %3364 = vadd.xlane.f32.xlu0 %v3363_v31  ;;  %v1962_v11 = vsel %vm1792_vm11, %v1955_v52, %v1961_v37  ;;  %v2048_v12 = vsel %vm1127_vm2, %v2046_v25, 0.0 }
 0x20d   : > { %v1964_v32 = vsel %vm1127_vm2, %v1962_v11, 0.0 }
 0x20e   : > { %v3435_v35 = vpop.permute.xlu0 %3434  ;;  %v3437_v61 = vpop.permute.xlu1 %3436 }
 0x20f   : > { %v3458_v54 = vsel %vm1127_vm2, %v3435_v35, 0.0  ;;  %v3461_v20 = vsel %vm1127_vm2, %v3437_v61, 0.0 }
 0x210   : > { %3459 = vadd.xlane.f32.xlu1 %v3458_v54  ;;  %3462 = vadd.xlane.f32.xlu0 %v3461_v20 }
 0x212   : > { %v3441_v2 = vpop.permute.xlu0 %3440  ;;  %v3439_v28 = vpop.permute.xlu1 %3438 }
 0x213   : > { %v3467_v59 = vsel %vm1127_vm2, %v3441_v2, 0.0  ;;  %v3464_v39 = vsel %vm1127_vm2, %v3439_v28, 0.0 }
 0x214   : > { %1796 = vadd.xlane.f32.xlu1 %v1795_v38  ;;  %1880 = vadd.xlane.f32.xlu0 %v1879_v57 }
 0x216   : > { %v3445_v33 = vpop.permute.xlu0 %3444  ;;  %v3443_v58 = vpop.permute.xlu1 %3442 }
 0x217   : > { %v3473_v7 = vsel %vm1127_vm2, %v3445_v33, 0.0  ;;  %v3470_v13 = vsel %vm1127_vm2, %v3443_v58, 0.0 }
 0x218   : > { %1965 = vadd.xlane.f32.xlu1 %v1964_v32  ;;  %2049 = vadd.xlane.f32.xlu0 %v2048_v12 }
 0x21a   : > { %v3449_v63 = vpop.permute.xlu0 %3448  ;;  %v3447_v50 = vpop.permute.xlu1 %3446 }
 0x21b   : > { %v3479_v9 = vsel %vm1127_vm2, %v3449_v63, 0.0  ;;  %v3476_v31 = vsel %vm1127_vm2, %v3447_v50, 0.0 }
 0x21c   : > { %3468 = vadd.xlane.f32.xlu1 %v3467_v59  ;;  %3465 = vadd.xlane.f32.xlu0 %v3464_v39 }
 0x220   : > { %3474 = vadd.xlane.f32.xlu1 %v3473_v7  ;;  %3471 = vadd.xlane.f32.xlu0 %v3470_v13 }
 0x224   : > { %3480 = vadd.xlane.f32.xlu1 %v3479_v9  ;;  %3477 = vadd.xlane.f32.xlu0 %v3476_v31 }
 0x235   : > { %3550 = vrot.lane.b32.xlu1 %v12210_v16, %s10599_s4 }
 0x239   : > { %3554 = vrot.lane.b32.xlu1 %v12214_v14, %s10599_s4 }
 0x23a   : > { %3552 = vrot.lane.b32.xlu0 %v12218_v45, %s10599_s4 }
 0x23d   : > { %3556 = vrot.lane.b32.xlu1 %v12222_v26, %s10599_s4 }
 0x23e   : > { %3558 = vrot.lane.b32.xlu0 %v12226_v8, %s10599_s4 }
 0x241   : > { %3560 = vrot.lane.b32.xlu1 %v12230_v49, %s10599_s4 }
 0x242   : > { %3562 = vrot.lane.b32.xlu0 %v12234_v29, %s10599_s4 }
 0x245   : > { %3564 = vrot.lane.b32.xlu1 %v12238_v34, %s10599_s4 }
 0x289   : > { %v3344_v35 = vpop.xlane.xlu0 %3343 }
 0x28d   : > { %v3350_v61 = vpop.xlane.xlu0 %3349 }
 0x291   : > { %v3353_v43 = vpop.xlane.xlu0 %3352  ;;  %v3347_v41 = vpop.xlane.xlu1 %3346 }
 0x295   : > { %v12242_v54 = vpop.xlane.xlu0 %3358  ;;  %v3356_v20 = vpop.xlane.xlu1 %3355 }
 0x299   : > { %v12244_v44 = vpop.xlane.xlu0 %3364  ;;  %v12246_v0 = vpop.xlane.xlu1 %3361 }
 0x29d   : > { %v3463_v52 = vpop.xlane.xlu0 %3462  ;;  %v3460_v42 = vpop.xlane.xlu1 %3459 }
 0x2a1   : > { %v12248_v3 = vpop.xlane.xlu0 %1880  ;;  %v12250_v48 = vpop.xlane.xlu1 %1796 }
 0x2a5   : > { %v12252_v6 = vpop.xlane.xlu0 %2049  ;;  %v12254_v36 = vpop.xlane.xlu1 %1965 }
 0x2a9   : > { %v3466_v38 = vpop.xlane.xlu0 %3465  ;;  %v3469_v57 = vpop.xlane.xlu1 %3468 }
 0x2ad   : > { %v3472_v37 = vpop.xlane.xlu0 %3471  ;;  %v3475_v2 = vpop.xlane.xlu1 %3474 }
 0x2b1   : > { %v3478_v28 = vpop.xlane.xlu0 %3477  ;;  %v3481_v11 = vpop.xlane.xlu1 %3480 }
 0x2b5   : > { %v3553_v25 = vpop.permute.xlu0 %3552  ;;  %v3551_v32 = vpop.permute.xlu1 %3550 }
 0x2b6   : > { %v3577_v12 = vsel %vm1127_vm2, %v3553_v25, 0.0  ;;  %v3574_v33 = vsel %vm1127_vm2, %v3551_v32, 0.0 }
 0x2b7   : > { %3578 = vadd.xlane.f32.xlu1 %v3577_v12  ;;  %3575 = vadd.xlane.f32.xlu0 %v3574_v33  ;;  %v3651_v33 = vmul.f32 %v12218_v45, %v12218_v45 }
 0x2b9   : > { %v3559_v58 = vpop.permute.xlu0 %3558  ;;  %v3555_v59 = vpop.permute.xlu1 %3554 }
 0x2ba   : > { %v3586_v39 = vsel %vm1127_vm2, %v3559_v58, 0.0  ;;  %v3580_v7 = vsel %vm1127_vm2, %v3555_v59, 0.0  ;;  %v3650_v58 = vmul.f32 %v12210_v16, %v12210_v16  ;;  %v3381_v59 = vrot.slane %v3347_v41, %v12102_v22 }
 0x2bb   : > { %3587 = vadd.xlane.f32.xlu1 %v3586_v39  ;;  %3581 = vadd.xlane.f32.xlu0 %v3580_v7  ;;  %v3377_v39 = vrot.slane %v3344_v35, %v12102_v22  ;;  %v3497_v41 = vrot.slane %v3463_v52, %v12102_v22 }
 0x2bd   : > { %v3563_v13 = vpop.permute.xlu0 %3562  ;;  %v3557_v63 = vpop.permute.xlu1 %3556  ;;  %v3406_v7 = vsel %vm1780_vm5, %v3381_v59, %v3377_v39  ;;  %v3517_v39 = vrot.slane %v3478_v28, %v12102_v22  ;;  %v3655_v28 = vmul.f32 %v12230_v49, %v12230_v49 }
 0x2be   : > { %v3592_v50 = vsel %vm1127_vm2, %v3563_v13, 0.0  ;;  %v3583_v9 = vsel %vm1127_vm2, %v3557_v63, 0.0  ;;  %v3385_v13 = vrot.slane %v3350_v61, %v12102_v22  ;;  %v3401_v61 = vrot.slane %v12246_v0, %v12102_v22 }
 0x2bf   : > { %3593 = vadd.xlane.f32.xlu1 %v3592_v50  ;;  %3584 = vadd.xlane.f32.xlu0 %v3583_v9  ;;  %v3389_v50 = vrot.slane %v3353_v43, %v12102_v22  ;;  %v3393_v9 = vrot.slane %v3356_v20, %v12102_v22  ;;  %v3405_v43 = vrot.slane %v12244_v44, %v12102_v22 }
 0x2c0   : > { %v3407_v63 = vsel %vm1782_vm6, %v3385_v13, %v3406_v7  ;;  %v3513_v0 = vrot.slane %v3475_v2, %v12102_v22  ;;  %v3521_v13 = vrot.slane %v3481_v11, %v12102_v22  ;;  %v3653_v2 = vmul.f32 %v12222_v26, %v12222_v26 }
 0x2c1   : > { %v3561_v31 = vpop.permute.xlu1 %3560  ;;  %v3657_v11 = vmul.f32 %v12238_v34, %v12238_v34 }
 0x2c2   : > { %v3589_v25 = vsel %vm1127_vm2, %v3561_v31, 0.0  ;;  %v3408_v31 = vsel %vm1784_vm7, %v3389_v50, %v3407_v63 }
 0x2c3   : > { %3590 = vadd.xlane.f32.xlu0 %v3589_v25  ;;  %v3397_v25 = vrot.slane %v12242_v54, %v12102_v22  ;;  %v3409_v35 = vsel %vm1786_vm8, %v3393_v9, %v3408_v31 }
 0x2c5   : > { %v3565_v32 = vpop.permute.xlu1 %3564  ;;  %v3410_v54 = vsel %vm1788_vm9, %v3397_v25, %v3409_v35 }
 0x2c6   : > { %v3595_v12 = vsel %vm1127_vm2, %v3565_v32, 0.0  ;;  %v3493_v32 = vrot.slane %v3460_v42, %v12102_v22  ;;  %v3509_v42 = vrot.slane %v3472_v37, %v12102_v22 }
 0x2c7   : > { %3596 = vadd.xlane.f32.xlu0 %v3595_v12  ;;  %v3501_v12 = vrot.slane %v3466_v38, %v12102_v22 }
 0x2c8   : > { %v3522_v20 = vsel %vm1780_vm5, %v3497_v41, %v3493_v32 }
 0x2c9   : > { %v3523_v52 = vsel %vm1782_vm6, %v3501_v12, %v3522_v20 }
 0x2d0   : > { %3668 = vrot.lane.b32.xlu1 %v3651_v33, %s10599_s4  ;;  %v3505_v33 = vrot.slane %v3469_v57, %v12102_v22 }
 0x2d2   : > { %v3524_v59 = vsel %vm1784_vm7, %v3505_v33, %v3523_v52 }
 0x2d3   : > { %v3525_v44 = vsel %vm1786_vm8, %v3509_v42, %v3524_v59 }
 0x2d4   : > { %v3526_v7 = vsel %vm1788_vm9, %v3513_v0, %v3525_v44 }
 0x2d5   : > { %v3527_v37 = vsel %vm1790_vm10, %v3517_v39, %v3526_v7 }
 0x2d6   : > { %v3528_v63 = vsel %vm1792_vm11, %v3521_v13, %v3527_v37  ;;  %v3652_v37 = vmul.f32 %v12214_v14, %v12214_v14 }
 0x2d7   : > { %v3530_v50 = vsel %vm1127_vm2, %v3528_v63, 0.0  ;;  %v3654_v63 = vmul.f32 %v12226_v8, %v12226_v8 }
 0x2dd   : > { %3666 = vrot.lane.b32.xlu0 %v3650_v58, %s10599_s4  ;;  %v3411_v58 = vsel %vm1790_vm10, %v3401_v61, %v3410_v54 }
 0x2de   : > { %v3412_v38 = vsel %vm1792_vm11, %v3405_v43, %v3411_v58 }
 0x2df   : > { %v3414_v57 = vsel %vm1127_vm2, %v3412_v38, 0.0 }
 0x2f4   : > { %3415 = vadd.xlane.f32.xlu1 %v3414_v57 }
 0x2fc   : > { %3531 = vadd.xlane.f32.xlu0 %v3530_v50  ;;  %v3656_v50 = vmul.f32 %v12234_v29, %v12234_v29  ;;  %v5001_v29 = vrot.slane %v11572_v21, %v11512_v30 }
 0x312   : > { %3672 = vrot.lane.b32.xlu0 %v3653_v2, %s10599_s4 }
 0x316   : > { %3676 = vrot.lane.b32.xlu0 %v3655_v28, %s10599_s4 }
 0x31a   : > { %3680 = vrot.lane.b32.xlu0 %v3657_v11, %s10599_s4 }
 0x344   : > { %v3576_v9 = vpop.xlane.xlu0 %3575  ;;  %v3579_v31 = vpop.xlane.xlu1 %3578 }
 0x345   : > { %v3609_v32 = vrot.slane %v3576_v9, %v12102_v22  ;;  %v3613_v26 = vrot.slane %v3579_v31, %v12102_v22 }
 0x347   : > { %v3638_v49 = vsel %vm1780_vm5, %v3613_v26, %v3609_v32  ;;  %v5015_v32 = vrot.slane %v11579_v18, %v11512_v30  ;;  %v12351_v26 = vsub.s32 1, %v11432_v46 }
 0x348   : > { %v3582_v25 = vpop.xlane.xlu0 %3581  ;;  %v3588_v41 = vpop.xlane.xlu1 %3587 }
 0x349   : > { %v3617_v35 = vrot.slane %v3582_v25, %v12102_v22  ;;  %v3625_v33 = vrot.slane %v3588_v41, %v12102_v22 }
 0x34b   : > { %v3639_v34 = vsel %vm1782_vm6, %v3617_v35, %v3638_v49  ;;  %v5022_v35 = vrot.slane %v11579_v18, %v12351_v26  ;;  %v5064_v49 = vrot.slane %v11597_v56, %v12351_v26  ;;  %v5092_v18 = vrot.slane %v11624_v40, %v12351_v26 }
 0x34c   : > { %v3585_v61 = vpop.xlane.xlu0 %3584  ;;  %v3594_v12 = vpop.xlane.xlu1 %3593 }
 0x34d   : > { %v3621_v43 = vrot.slane %v3585_v61, %v12102_v22  ;;  %v3633_v38 = vrot.slane %v3594_v12, %v12102_v22  ;;  %v5036_v61 = vrot.slane %v11592_v53, %v12351_v26  ;;  %v5050_v12 = vrot.slane %v11602_v62, %v12351_v26 }
 0x34f   : > { %v3640_v20 = vsel %vm1784_vm7, %v3621_v43, %v3639_v34  ;;  %v5078_v43 = vrot.slane %v11610_v15, %v12351_v26  ;;  %v5106_v34 = vrot.slane %v11632_v17, %v12351_v26 }
 0x350   : > { %v3591_v54 = vpop.xlane.xlu0 %3590  ;;  %v3669_v52 = vpop.permute.xlu1 %3668  ;;  %v3641_v59 = vsel %vm1786_vm8, %v3625_v33, %v3640_v20  ;;  %v5120_v20 = vrot.slane %v11617_v23, %v12351_v26  ;;  %v5134_v33 = vrot.slane %v11644_v55, %v12351_v26 }
 0x351   : > { %v3629_v42 = vrot.slane %v3591_v54, %v12102_v22  ;;  %v3693_v58 = vsel %vm1127_vm2, %v3669_v52, 0.0  ;;  %v5148_v54 = vrot.slane %v11653_v27, %v12351_v26  ;;  %v5162_v52 = vrot.slane %v11662_v5, %v12351_v26 }
 0x352   : > { %3694 = vadd.xlane.f32.xlu0 %v3693_v58  ;;  %v1967_v58 = vadd.f32 %v12254_v36, %v12250_v48  ;;  %v5190_v48 = vrot.slane %v11675_v10, %v12351_v26 }
 0x353   : > { %v3642_v0 = vsel %vm1788_vm9, %v3629_v42, %v3641_v59 }
 0x354   : > { %v3597_v44 = vpop.xlane.xlu0 %3596  ;;  %v3643_v57 = vsel %vm1790_vm10, %v3633_v38, %v3642_v0  ;;  %v5176_v0 = vrot.slane %v11672_v1, %v12351_v26 }
 0x355   : > { %v3637_v39 = vrot.slane %v3597_v44, %v12102_v22 }
 0x357   : > { %v3644_v7 = vsel %vm1792_vm11, %v3637_v39, %v3643_v57  ;;  %v5204_v57 = vrot.slane %v11697_v24, %v12351_v26 }
 0x358   : > { %v3646_v13 = vsel %vm1127_vm2, %v3644_v7, 0.0  ;;  %v3667_v2 = vpop.permute.xlu0 %3666 }
 0x359   : > { %3647 = vadd.xlane.f32.xlu1 %v3646_v13  ;;  %v3690_v9 = vsel %vm1127_vm2, %v3667_v2, 0.0  ;;  %v5232_v2 = vrot.slane %v11688_v51, %v12351_v26 }
 0x36a   : > { %3670 = vrot.lane.b32.xlu1 %v3652_v37, %s10599_s4  ;;  %v5218_v37 = vrot.slane %v11707_v19, %v12351_v26 }
 0x36e   : > { %3674 = vrot.lane.b32.xlu1 %v3654_v63, %s10599_s4 }
 0x372   : > { %3678 = vrot.lane.b32.xlu1 %v3656_v50, %s10599_s4 }
 0x381   : > { %v3416_v42 = vpop.xlane.xlu1 %3415 }
 0x382   : > { %v3417_v59 = vadd.f32 %v3416_v42, %v1967_v58  ;;  %v16685_v42 = vld [vmem:[#allocation14_spill] sm:$0xff] }
 0x383   : > { %v5400_v58 = vrot.slane %v16685_v42, %v12351_v26 }
 0x389   : > { %v12340_v28 = vpop.xlane.xlu0 %3531 }
 0x38d   : > { %v3673_v11 = vpop.permute.xlu0 %3672 }
 0x38e   : > { %v3699_v31 = vsel %vm1127_vm2, %v3673_v11, 0.0  ;;  %v5246_v11 = vrot.slane %v11713_v60, %v12351_v26 }
 0x391   : > { %v3677_v14 = vpop.permute.xlu0 %3676 }
 0x392   : > { %v3705_v8 = vsel %vm1127_vm2, %v3677_v14, 0.0  ;;  %v5274_v14 = vrot.slane %v11732_v47, %v12351_v26 }
 0x395   : > { %v3681_v25 = vpop.permute.xlu0 %3680 }
 0x396   : > { %3691 = vadd.xlane.f32.xlu1 %v3690_v9  ;;  %v3711_v41 = vsel %vm1127_vm2, %v3681_v25, 0.0  ;;  %v5260_v9 = vrot.slane %v11718_v4, %v12351_v26  ;;  %v16678_v25 = vld [vmem:[#allocation7_spill] sm:$0xff] }
 0x39a   : > { %3700 = vadd.xlane.f32.xlu1 %v3699_v31  ;;  %v16677_v31 = vld [vmem:[#allocation6_spill] sm:$0xff] }
 0x39e   : > { %3706 = vadd.xlane.f32.xlu1 %v3705_v8  ;;  %v5288_v8 = vrot.slane %v16677_v31, %v12351_v26 }
 0x3a2   : > { %3712 = vadd.xlane.f32.xlu1 %v3711_v41  ;;  %v5302_v41 = vrot.slane %v16678_v25, %v12351_v26 }
 0x3b3   : > { %5003 = vbcast.lane.b32.xlu1 %v5001_v29, 256  ;;  %v16679_v29 = vld [vmem:[#allocation8_spill] sm:$0xff] }
 0x3b7   : > { %5017 = vbcast.lane.b32.xlu1 %v5015_v32, 256  ;;  %v5316_v32 = vrot.slane %v16679_v29, %v12351_v26 }
 0x3bb   : > { %5024 = vbcast.lane.b32.xlu1 %v5022_v35, 256  ;;  %v16680_v35 = vld [vmem:[#allocation9_spill] sm:$0xff] }
 0x3bf   : > { %5038 = vbcast.lane.b32.xlu1 %v5036_v61, 256  ;;  %v5330_v61 = vrot.slane %v16680_v35, %v12351_v26 }
 0x3c3   : > { %5052 = vbcast.lane.b32.xlu1 %v5050_v12, 256  ;;  %v16681_v12 = vld [vmem:[#allocation10_spill] sm:$0xff] }
 0x3c7   : > { %5066 = vbcast.lane.b32.xlu1 %v5064_v49, 256  ;;  %v5344_v49 = vrot.slane %v16681_v12, %v12351_v26 }
 0x3cb   : > { %5080 = vbcast.lane.b32.xlu1 %v5078_v43, 256  ;;  %v16682_v43 = vld [vmem:[#allocation11_spill] sm:$0xff] }
 0x3cf   : > { %5094 = vbcast.lane.b32.xlu1 %v5092_v18, 256  ;;  %v5358_v18 = vrot.slane %v16682_v43, %v12351_v26 }
 0x3d3   : > { %5108 = vbcast.lane.b32.xlu1 %v5106_v34, 256  ;;  %v16683_v34 = vld [vmem:[#allocation12_spill] sm:$0xff] }
 0x3d7   : > { %5122 = vbcast.lane.b32.xlu1 %v5120_v20, 256  ;;  %v5372_v20 = vrot.slane %v16683_v34, %v12351_v26 }
 0x3db   : > { %5136 = vbcast.lane.b32.xlu1 %v5134_v33, 256  ;;  %v16684_v33 = vld [vmem:[#allocation13_spill] sm:$0xff] }
 0x3df   : > { %5150 = vbcast.lane.b32.xlu1 %v5148_v54, 256  ;;  %v5386_v54 = vrot.slane %v16684_v33, %v12351_v26 }
 0x3e3   : > { %5164 = vbcast.lane.b32.xlu1 %v5162_v52, 256 }
 0x3e6   : > { %v3648_v38 = vpop.xlane.xlu1 %3647 }
 0x3e7   : > { %v3649_v44 = vadd.f32 %v3648_v38, %v3417_v59  ;;  %5178 = vbcast.lane.b32.xlu1 %v5176_v0, 256  ;;  %v16686_v0 = vld [vmem:[#allocation15_spill] sm:$0xff] }
 0x3e8   : > { %v5414_v38 = vrot.slane %v16686_v0, %v12351_v26 }
 0x3e9   : > { %9806 = vst.msk [vmem:[%s736_s8] sm:$0xff] %vm6918_vm12, %v3649_v44 }
 0x3ea   : > { %v3671_v36 = vpop.permute.xlu1 %3670 }
 0x3eb   : > { %5192 = vbcast.lane.b32.xlu1 %v5190_v48, 256  ;;  %v3696_v39 = vsel %vm1127_vm2, %v3671_v36, 0.0  ;;  %v16687_v48 = vld [vmem:[#allocation16_spill] sm:$0xff] }
 0x3ec   : > { %3697 = vadd.xlane.f32.xlu0 %v3696_v39  ;;  %v5428_v36 = vrot.slane %v16687_v48, %v12351_v26 }
 0x3ee   : > { %v3675_v7 = vpop.permute.xlu1 %3674 }
 0x3ef   : > { %5206 = vbcast.lane.b32.xlu1 %v5204_v57, 256  ;;  %v3702_v13 = vsel %vm1127_vm2, %v3675_v7, 0.0  ;;  %v16688_v57 = vld [vmem:[#allocation18_spill] sm:$0xff] }
 0x3f0   : > { %3703 = vadd.xlane.f32.xlu0 %v3702_v13  ;;  %v5442_v7 = vrot.slane %v16688_v57, %v12351_v26 }
 0x3f2   : > { %v3679_v63 = vpop.permute.xlu1 %3678 }
 0x3f3   : > { %5220 = vbcast.lane.b32.xlu1 %v5218_v37, 256  ;;  %v3708_v50 = vsel %vm1127_vm2, %v3679_v63, 0.0  ;;  %v16690_v37 = vld [vmem:[#allocation17_spill] sm:$0xff] }
 0x3f4   : > { %3709 = vadd.xlane.f32.xlu0 %v3708_v50  ;;  %v5456_v63 = vrot.slane %v16690_v37, %v12351_v26 }
 0x3f7   : > { %5234 = vbcast.lane.b32.xlu1 %v5232_v2, 256  ;;  %v16692_v2 = vld [vmem:[#allocation19_spill] sm:$0xff] }
 0x3fb   : > { %5248 = vbcast.lane.b32.xlu1 %v5246_v11, 256  ;;  %v5470_v11 = vrot.slane %v16692_v2, %v12351_v26 }
 0x3ff   : > { %5262 = vbcast.lane.b32.xlu1 %v5260_v9, 256 }
 0x403   : > { %5276 = vbcast.lane.b32.xlu1 %v5274_v14, 256  ;;  %v16694_v14 = vld [vmem:[#allocation20_spill] sm:$0xff] }
 0x407   : > { %5290 = vbcast.lane.b32.xlu1 %v5288_v8, 256  ;;  %v5484_v8 = vrot.slane %v16694_v14, %v12351_v26 }
 0x40b   : > { %5304 = vbcast.lane.b32.xlu1 %v5302_v41, 256 }
 0x40f   : > { %5318 = vbcast.lane.b32.xlu1 %v5316_v32, 256  ;;  %v16696_v32 = vld [vmem:[#allocation21_spill] sm:$0xff] }
 0x413   : > { %5332 = vbcast.lane.b32.xlu1 %v5330_v61, 256  ;;  %v5498_v61 = vrot.slane %v16696_v32, %v12351_v26 }
 0x417   : > { %5346 = vbcast.lane.b32.xlu1 %v5344_v49, 256 }
 0x41b   : > { %5360 = vbcast.lane.b32.xlu1 %v5358_v18, 256  ;;  %v16698_v18 = vld [vmem:[#allocation22_spill] sm:$0xff] }
 0x41f   : > { %5374 = vbcast.lane.b32.xlu1 %v5372_v20, 256  ;;  %v5512_v20 = vrot.slane %v16698_v18, %v12351_v26 }
 0x423   : > { %v12425_v52 = vpop.xlane.xlu1 %3691  ;;  %5388 = vbcast.lane.b32.xlu1 %v5386_v54, 256 }
 0x427   : > { %v12429_v59 = vpop.xlane.xlu1 %3700  ;;  %5402 = vbcast.lane.b32.xlu1 %v5400_v58, 256  ;;  %v16700_v58 = vld [vmem:[#allocation23_spill] sm:$0xff] }
 0x42b   : > { %v12433_v44 = vpop.xlane.xlu1 %3706  ;;  %5416 = vbcast.lane.b32.xlu1 %v5414_v38, 256  ;;  %v5526_v38 = vrot.slane %v16700_v58, %v12351_v26 }
 0x42f   : > { %5430 = vbcast.lane.b32.xlu1 %v5428_v36, 256  ;;  %v12437_v39 = vpop.xlane.xlu1 %3712 }
 0x433   : > { %5444 = vbcast.lane.b32.xlu1 %v5442_v7, 256  ;;  %v12441_v13 = vpop.permute.xlu1 %5003  ;;  %v16702_v7 = vld [vmem:[#allocation24_spill] sm:$0xff] }
 0x434   : > { %16689 = vst [vmem:[#allocation6_spill] sm:$0xff] %v12441_v13 }
 0x437   : > { %5458 = vbcast.lane.b32.xlu1 %v5456_v63, 256  ;;  %v12445_v50 = vpop.permute.xlu1 %5017  ;;  %v5540_v63 = vrot.slane %v16702_v7, %v12351_v26 }
 0x438   : > { %16691 = vst [vmem:[#allocation7_spill] sm:$0xff] %v12445_v50 }
 0x43b   : > { %5472 = vbcast.lane.b32.xlu1 %v5470_v11, 256  ;;  %v12449_v9 = vpop.permute.xlu1 %5024 }
 0x43c   : > { %16693 = vst [vmem:[#allocation8_spill] sm:$0xff] %v12449_v9 }
 0x43f   : > { %5486 = vbcast.lane.b32.xlu1 %v5484_v8, 256  ;;  %v12453_v41 = vpop.permute.xlu1 %5038  ;;  %v16704_v8 = vld [vmem:[#allocation25_spill] sm:$0xff] }
 0x440   : > { %16695 = vst [vmem:[#allocation9_spill] sm:$0xff] %v12453_v41 }
 0x443   : > { %5500 = vbcast.lane.b32.xlu1 %v5498_v61, 256  ;;  %v12457_v49 = vpop.permute.xlu1 %5052  ;;  %v5554_v61 = vrot.slane %v16704_v8, %v12351_v26 }
 0x444   : > { %16697 = vst [vmem:[#allocation10_spill] sm:$0xff] %v12457_v49 }
 0x447   : > { %5514 = vbcast.lane.b32.xlu1 %v5512_v20, 256  ;;  %v12461_v54 = vpop.permute.xlu1 %5066  ;;  %v16706_v20 = vld [vmem:[#allocation26_spill] sm:$0xff] }
 0x448   : > { %16699 = vst [vmem:[#allocation11_spill] sm:$0xff] %v12461_v54  ;;  %v5568_v13 = vrot.slane %v16706_v20, %v12351_v26 }
 0x44b   : > { %5528 = vbcast.lane.b32.xlu1 %v5526_v38, 256  ;;  %v12465_v36 = vpop.permute.xlu1 %5080  ;;  %v16708_v38 = vld [vmem:[#allocation27_spill] sm:$0xff] }
 0x44c   : > { %16701 = vst [vmem:[#allocation12_spill] sm:$0xff] %v12465_v36  ;;  %v5582_v36 = vrot.slane %v16708_v38, %v12351_v26 }
 0x44f   : > { %5542 = vbcast.lane.b32.xlu1 %v5540_v63, 256  ;;  %v12469_v11 = vpop.permute.xlu1 %5094  ;;  %v16710_v63 = vld [vmem:[#allocation28_spill] sm:$0xff] }
 0x450   : > { %16703 = vst [vmem:[#allocation13_spill] sm:$0xff] %v12469_v11  ;;  %v5596_v11 = vrot.slane %v16710_v63, %v12351_v26 }
 0x453   : > { %5556 = vbcast.lane.b32.xlu1 %v5554_v61, 256  ;;  %v12473_v50 = vpop.permute.xlu1 %5108  ;;  %v16712_v61 = vld [vmem:[#allocation29_spill] sm:$0xff] }
 0x454   : > { %16705 = vst [vmem:[#allocation14_spill] sm:$0xff] %v12473_v50  ;;  %v5610_v50 = vrot.slane %v16712_v61, %v12351_v26 }
 0x457   : > { %5570 = vbcast.lane.b32.xlu1 %v5568_v13, 256  ;;  %v12477_v46 = vpop.permute.xlu1 %5122  ;;  %v16714_v13 = vld [vmem:[#allocation30_spill] sm:$0xff] }
 0x458   : > { %16707 = vst [vmem:[#allocation15_spill] sm:$0xff] %v12477_v46  ;;  %v5624_v46 = vrot.slane %v16714_v13, %v12351_v26 }
 0x45b   : > { %5584 = vbcast.lane.b32.xlu1 %v5582_v36, 256  ;;  %v12481_v54 = vpop.permute.xlu1 %5136  ;;  %v16716_v36 = vld [vmem:[#allocation31_spill] sm:$0xff] }
 0x45c   : > { %16709 = vst [vmem:[#allocation16_spill] sm:$0xff] %v12481_v54  ;;  %v5638_v54 = vrot.slane %v16716_v36, %v12351_v26 }
 0x45f   : > { %5598 = vbcast.lane.b32.xlu1 %v5596_v11, 256  ;;  %v12485_v49 = vpop.permute.xlu1 %5150  ;;  %v16718_v11 = vld [vmem:[#allocation32_spill] sm:$0xff] }
 0x460   : > { %16711 = vst [vmem:[#allocation18_spill] sm:$0xff] %v12485_v49  ;;  %v5652_v49 = vrot.slane %v16718_v11, %v12351_v26 }
 0x463   : > { %5612 = vbcast.lane.b32.xlu1 %v5610_v50, 256  ;;  %v12489_v41 = vpop.permute.xlu1 %5164  ;;  %v16720_v50 = vld [vmem:[#allocation33_spill] sm:$0xff] }
 0x464   : > { %16713 = vst [vmem:[#allocation17_spill] sm:$0xff] %v12489_v41  ;;  %v5666_v41 = vrot.slane %v16720_v50, %v12351_v26 }
 0x467   : > { %5626 = vbcast.lane.b32.xlu1 %v5624_v46, 256  ;;  %v12493_v9 = vpop.permute.xlu1 %5178  ;;  %v3695_v46 = vpop.xlane.xlu0 %3694 }
 0x468   : > { %16715 = vst [vmem:[#allocation19_spill] sm:$0xff] %v12493_v9  ;;  %v16722_v9 = vld [vmem:[#allocation34_spill] sm:$0xff] }
 0x469   : > { %v5680_v38 = vrot.slane %v16722_v9, %v12351_v26 }
 0x46b   : > { %5640 = vbcast.lane.b32.xlu1 %v5638_v54, 256  ;;  %v12497_v63 = vpop.permute.xlu1 %5192  ;;  %v3725_v54 = vrot.slane %v12425_v52, %v12102_v22  ;;  %v3737_v52 = vrot.slane %v12429_v59, %v12102_v22 }
 0x46c   : > { %16717 = vst [vmem:[#allocation20_spill] sm:$0xff] %v12497_v63 }
 0x46f   : > { %5654 = vbcast.lane.b32.xlu1 %v5652_v49, 256  ;;  %v12501_v61 = vpop.permute.xlu1 %5206  ;;  %v3729_v49 = vrot.slane %v3695_v46, %v12102_v22 }
 0x470   : > { %16719 = vst [vmem:[#allocation21_spill] sm:$0xff] %v12501_v61  ;;  %v16724_v61 = vld [vmem:[#allocation35_spill] sm:$0xff] }
 0x471   : > { %v5694_v36 = vrot.slane %v16724_v61, %v12351_v26 }
 0x473   : > { %5668 = vbcast.lane.b32.xlu1 %v5666_v41, 256  ;;  %v12505_v13 = vpop.permute.xlu1 %5220 }
 0x474   : > { %16721 = vst [vmem:[#allocation22_spill] sm:$0xff] %v12505_v13  ;;  %v3754_v13 = vsel %vm1780_vm5, %v3729_v49, %v3725_v54  ;;  %v3745_v54 = vrot.slane %v12433_v44, %v12102_v22  ;;  %v16728_v49 = vld [vmem:[#allocation37_spill] sm:$0xff] }
 0x475   : > { %v5722_v59 = vrot.slane %v16728_v49, %v12351_v26 }
 0x477   : > { %5682 = vbcast.lane.b32.xlu1 %v5680_v38, 256  ;;  %v12511_v63 = vpop.permute.xlu1 %5234 }
 0x478   : > { %16723 = vst [vmem:[#allocation23_spill] sm:$0xff] %v12511_v63  ;;  %v16726_v63 = vld [vmem:[#allocation36_spill] sm:$0xff] }
 0x479   : > { %v3698_v11 = vpop.xlane.xlu0 %3697  ;;  %v5708_v46 = vrot.slane %v16726_v63, %v12351_v26 }
 0x47a   : > { %v3733_v41 = vrot.slane %v3698_v11, %v12102_v22 }
 0x47b   : > { %5696 = vbcast.lane.b32.xlu1 %v5694_v36, 256  ;;  %v12518_v50 = vpop.permute.xlu1 %5248 }
 0x47c   : > { %16725 = vst [vmem:[#allocation24_spill] sm:$0xff] %v12518_v50  ;;  %v3755_v9 = vsel %vm1782_vm6, %v3733_v41, %v3754_v13  ;;  %v3753_v50 = vrot.slane %v12437_v39, %v12102_v22 }
 0x47d   : > { %v3704_v38 = vpop.xlane.xlu0 %3703  ;;  %v3756_v61 = vsel %vm1784_vm7, %v3737_v52, %v3755_v9 }
 0x47e   : > { %v3741_v20 = vrot.slane %v3704_v38, %v12102_v22 }
 0x47f   : > { %5710 = vbcast.lane.b32.xlu1 %v5708_v46, 256  ;;  %v12527_v11 = vpop.permute.xlu1 %5262 }
 0x480   : > { %16727 = vst [vmem:[#allocation25_spill] sm:$0xff] %v12527_v11  ;;  %v3757_v36 = vsel %vm1786_vm8, %v3741_v20, %v3756_v61  ;;  %v16730_v20 = vld [vmem:[#allocation38_spill] sm:$0xff] }
 0x481   : > { %v3710_v13 = vpop.xlane.xlu0 %3709  ;;  %v3758_v9 = vsel %vm1788_vm9, %v3745_v54, %v3757_v36  ;;  %v5736_v61 = vrot.slane %v16730_v20, %v12351_v26  ;;  %v16734_v36 = vld [vmem:[#allocation40_spill] sm:$0xff] }
 0x482   : > { %v3749_v41 = vrot.slane %v3710_v13, %v12102_v22  ;;  %v16732_v22 = vld [vmem:[#allocation39_spill] sm:$0xff]  ;;  %v5764_v54 = vrot.slane %v16734_v36, %v12351_v26 }
 0x483   : > { %5724 = vbcast.lane.b32.xlu1 %v5722_v59, 256  ;;  %v12537_v38 = vpop.permute.xlu1 %5276  ;;  %v5750_v39 = vrot.slane %v16732_v22, %v12351_v26 }
 0x484   : > { %16729 = vst [vmem:[#allocation36_spill] sm:$0xff] %v12537_v38  ;;  %v3759_v52 = vsel %vm1790_vm10, %v3749_v41, %v3758_v9  ;;  %v10494_v38 = vld [vmem:[#allocation2 + $0x100] sm:$0xff] }
 0x485   : > { %v3760_v44 = vsel %vm1792_vm11, %v3753_v50, %v3759_v52  ;;  %v16736_v50 = vld [vmem:[#allocation42_spill] sm:$0xff]  ;;  %v16738_v52 = vld [vmem:[#allocation41_spill] sm:$0xff] }
 0x486   : > { %v3762_v46 = vsel %vm1127_vm2, %v3760_v44, 0.0  ;;  %v5778_v41 = vrot.slane %v16736_v50, %v12351_v26 }
 0x487   : > { %5738 = vbcast.lane.b32.xlu1 %v5736_v61, 256  ;;  %v12545_v11 = vpop.permute.xlu1 %5290  ;;  %3763 = vadd.xlane.f32.xlu0 %v3762_v46  ;;  %v5792_v61 = vrot.slane %v16738_v52, %v12351_v26  ;;  %v16740_v46 = vld [vmem:[#allocation43_spill] sm:$0xff] }
 0x488   : > { %16731 = vst [vmem:[#allocation37_spill] sm:$0xff] %v12545_v11 }
 0x48b   : > { %5752 = vbcast.lane.b32.xlu1 %v5750_v39, 256  ;;  %v12549_v13 = vpop.permute.xlu1 %5304  ;;  %v5806_v39 = vrot.slane %v16740_v46, %v12351_v26 }
 0x48c   : > { %16733 = vst [vmem:[#allocation38_spill] sm:$0xff] %v12549_v13 }
 0x48f   : > { %5766 = vbcast.lane.b32.xlu1 %v5764_v54, 256  ;;  %v12553_v59 = vpop.permute.xlu1 %5318  ;;  %v5008_v54 = vrot.slane %v11572_v21, %v12351_v26  ;;  %v5043_v21 = vrot.slane %v11602_v62, %v11512_v30 }
 0x490   : > { %16735 = vst [vmem:[#allocation39_spill] sm:$0xff] %v12553_v59 }
 0x493   : > { %5780 = vbcast.lane.b32.xlu1 %v5778_v41, 256  ;;  %v12557_v9 = vpop.permute.xlu1 %5332  ;;  %v16742_v41 = vld [vmem:[#allocation44_spill] sm:$0xff] }
 0x494   : > { %16737 = vst [vmem:[#allocation40_spill] sm:$0xff] %v12557_v9  ;;  %v5820_v59 = vrot.slane %v16742_v41, %v12351_v26 }
 0x497   : > { %5794 = vbcast.lane.b32.xlu1 %v5792_v61, 256  ;;  %v12561_v44 = vpop.permute.xlu1 %5346  ;;  %v5029_v61 = vrot.slane %v11592_v53, %v11512_v30  ;;  %v5057_v53 = vrot.slane %v11597_v56, %v11512_v30  ;;  %v16751_v56 = vld [vmem:[#allocation48_spill] sm:$0xff] }
 0x498   : > { %16739 = vst [vmem:[#allocation42_spill] sm:$0xff] %v12561_v44  ;;  %v16744_v44 = vld [vmem:[#allocation45_spill] sm:$0xff] }
 0x499   : > { %v5834_v11 = vrot.slane %v16744_v44, %v12351_v26  ;;  %v5876_v44 = vrot.slane %v16751_v56, %v12351_v26 }
 0x49b   : > { %5808 = vbcast.lane.b32.xlu1 %v5806_v39, 256  ;;  %v12565_v13 = vpop.permute.xlu1 %5360 }
 0x49c   : > { %16741 = vst [vmem:[#allocation41_spill] sm:$0xff] %v12565_v13 }
 0x49d   : > { %5010 = vbcast.lane.b32.xlu0 %v5008_v54, 256  ;;  %v16746_v54 = vld [vmem:[#allocation46_spill] sm:$0xff] }
 0x49e   : > { %v5848_v13 = vrot.slane %v16746_v54, %v12351_v26 }
 0x49f   : > { %5822 = vbcast.lane.b32.xlu1 %v5820_v59, 256  ;;  %v12571_v9 = vpop.permute.xlu1 %5374 }
 0x4a0   : > { %16743 = vst [vmem:[#allocation50_spill] sm:$0xff] %v12571_v9 }
 0x4a1   : > { %5031 = vbcast.lane.b32.xlu0 %v5029_v61, 256  ;;  %v16748_v61 = vld [vmem:[#allocation5_spill] sm:$0xff] }
 0x4a2   : > { %v4229_v9 = vrot.slane %v12210_v16, %v16748_v61  ;;  %v3773_v62 = vrot.slane %v10494_v38, %v16748_v61 }
 0x4a3   : > { %5836 = vbcast.lane.b32.xlu1 %v5834_v11, 256  ;;  %v12577_v39 = vpop.permute.xlu1 %5388  ;;  %v16749_v11 = vld [vmem:[#allocation47_spill] sm:$0xff] }
 0x4a4   : > { %16745 = vst [vmem:[#allocation51_spill] sm:$0xff] %v12577_v39  ;;  %v5862_v39 = vrot.slane %v16749_v11, %v12351_v26  ;;  %v4245_v54 = vrot.slane %v4229_v9, %v16748_v61  ;;  %v3789_v41 = vrot.slane %v3773_v62, %v16748_v61 }
 0x4a5   : > { %5045 = vbcast.lane.b32.xlu0 %v5043_v21, 256 }
 0x4a7   : > { %5850 = vbcast.lane.b32.xlu1 %v5848_v13, 256  ;;  %v12583_v59 = vpop.permute.xlu1 %5402  ;;  %v5071_v13 = vrot.slane %v11610_v15, %v11512_v30 }
 0x4a8   : > { %16747 = vst [vmem:[#allocation52_spill] sm:$0xff] %v12583_v59  ;;  %v4237_v59 = vcombine.high %v4229_v9, %v4229_v9  ;;  %v16753_v9 = vld [vmem:[#allocation49_spill] sm:$0xff] }
 0x4a9   : > { %5059 = vbcast.lane.b32.xlu0 %v5057_v53, 256  ;;  %v3781_v53 = vcombine.high %v3773_v62, %v3773_v62  ;;  %v5099_v62 = vrot.slane %v11632_v17, %v11512_v30  ;;  %v5113_v17 = vrot.slane %v11617_v23, %v11512_v30  ;;  %v5127_v23 = vrot.slane %v11644_v55, %v11512_v30 }
 0x4aa   : > { %v4259_v15 = vrot.slane %v4237_v59, %v16748_v61  ;;  %v5141_v55 = vrot.slane %v11653_v27, %v11512_v30 }
 0x4ab   : > { %5864 = vbcast.lane.b32.xlu1 %v5862_v39, 256  ;;  %v12592_v21 = vpop.permute.xlu1 %5416  ;;  %v5085_v39 = vrot.slane %v11624_v40, %v11512_v30  ;;  %v3803_v56 = vrot.slane %v3781_v53, %v16748_v61  ;;  %v4222_v40 = vcombine.high %v12210_v16, %v12210_v16  ;;  %v3811_v53 = vcombine.high %v3789_v41, %v3789_v41 }
 0x4ac   : > { %16750 = vst [vmem:[#allocation5_spill] sm:$0xff] %v12592_v21  ;;  %v4617_v21 = vrot.slane %v4245_v54, %v11512_v30  ;;  %v4621_v59 = vrot.slane %v4259_v15, %v11512_v30 }
 0x4ad   : > { %5073 = vbcast.lane.b32.xlu0 %v5071_v13, 256  ;;  %v5890_v13 = vrot.slane %v16753_v9, %v12351_v26  ;;  %v4236_v16 = vrot.slane %v4222_v40, %v16748_v61 }
 0x4ae   : > { %v12609_v46 = vsel %vm3236_vm4, %v3789_v41, %v4617_v21  ;;  %v3766_v21 = vcombine.high %v10494_v38, %v10494_v38  ;;  %v12622_v9 = vsel %vm3236_vm4, %v3803_v56, %v4621_v59  ;;  %v3813_v41 = vcombine.high %v3803_v56, %v3803_v56 }
 0x4af   : > { %5878 = vbcast.lane.b32.xlu1 %v5876_v44, 256  ;;  %v12600_v11 = vpop.permute.xlu1 %5430  ;;  %v4238_v40 = vcombine.high %v4236_v16, %v4236_v16 }
 0x4b0   : > { %16752 = vst [vmem:[#allocation53_spill] sm:$0xff] %v12600_v11  ;;  %v5905_v11 = vrot.slane %v12609_v46, %v12351_v26  ;;  %v3780_v38 = vrot.slane %v3766_v21, %v16748_v61 }
 0x4b1   : > { %5087 = vbcast.lane.b32.xlu0 %v5085_v39, 256  ;;  %v4267_v39 = vcombine.high %v4245_v54, %v4245_v54  ;;  %v4269_v54 = vcombine.high %v4259_v15, %v4259_v15  ;;  %v4252_v15 = vrot.slane %v4236_v16, %v16748_v61  ;;  %v4266_v16 = vrot.slane %v4238_v40, %v16748_v61 }
 0x4b2   : > { %v3796_v56 = vrot.slane %v3780_v38, %v16748_v61 }
 0x4b3   : > { %5892 = vbcast.lane.b32.xlu1 %v5890_v13, 256  ;;  %v12612_v44 = vpop.permute.xlu1 %5444  ;;  %v4637_v27 = vrot.slane %v4266_v16, %v11512_v30 }
 0x4b4   : > { %16754 = vst [vmem:[#allocation54_spill] sm:$0xff] %v12612_v44  ;;  %v4625_v44 = vrot.slane %v4267_v39, %v11512_v30  ;;  %v4629_v39 = vrot.slane %v4269_v54, %v11512_v30  ;;  %v4633_v54 = vrot.slane %v4252_v15, %v11512_v30 }
 0x4b5   : > { %5101 = vbcast.lane.b32.xlu0 %v5099_v62, 256  ;;  %v5921_v62 = vrot.slane %v12622_v9, %v12351_v26 }
 0x4b6   : > { %v12634_v59 = vsel %vm3236_vm4, %v3811_v53, %v4625_v44  ;;  %v12645_v21 = vsel %vm3236_vm4, %v3813_v41, %v4629_v39  ;;  %v3782_v44 = vcombine.high %v3780_v38, %v3780_v38  ;;  %v12657_v41 = vsel %vm3236_vm4, %v3796_v56, %v4633_v54 }
 0x4b7   : > { %5908 = vbcast.lane.b32.xlu1 %v5905_v11, 257  ;;  %v12624_v13 = vpop.permute.xlu1 %5458  ;;  %v5155_v39 = vrot.slane %v11662_v5, %v11512_v30  ;;  %v5969_v40 = vrot.slane %v12657_v41, %v12351_v26  ;;  %v3812_v54 = vcombine.high %v3796_v56, %v3796_v56  ;;  %v4278_v5 = vrot.slane %v12218_v45, %v16748_v61 }
 0x4b8   : > { %16755 = vst [vmem:[#allocation55_spill] sm:$0xff] %v12624_v13 }
 0x4b9   : > { %5115 = vbcast.lane.b32.xlu0 %v5113_v17, 256  ;;  %v5937_v17 = vrot.slane %v12634_v59, %v12351_v26 }
 0x4bb   : > { %5924 = vbcast.lane.b32.xlu1 %v5921_v62, 257  ;;  %v12636_v11 = vpop.permute.xlu1 %5472  ;;  %v5953_v62 = vrot.slane %v12645_v21, %v12351_v26 }
 0x4bc   : > { %16756 = vst [vmem:[#allocation56_spill] sm:$0xff] %v12636_v11  ;;  %v4286_v11 = vcombine.high %v4278_v5, %v4278_v5 }
 0x4bd   : > { %5129 = vbcast.lane.b32.xlu0 %v5127_v23, 256  ;;  %v3810_v23 = vrot.slane %v3782_v44, %v16748_v61  ;;  %v5169_v44 = vrot.slane %v11672_v1, %v11512_v30  ;;  %v5183_v1 = vrot.slane %v11675_v10, %v11512_v30  ;;  %v5197_v10 = vrot.slane %v11697_v24, %v11512_v30 }
 0x4be   : > { %v4271_v24 = vcombine.high %v12218_v45, %v12218_v45 }
 0x4bf   : > { %5940 = vbcast.lane.b32.xlu1 %v5937_v17, 257  ;;  %v12648_v53 = vpop.permute.xlu1 %5486  ;;  %v4268_v17 = vcombine.high %v4252_v15, %v4252_v15  ;;  %v4270_v15 = vcombine.high %v4266_v16, %v4266_v16  ;;  %v4294_v16 = vrot.slane %v4278_v5, %v16748_v61 }
 0x4c0   : > { %16757 = vst [vmem:[#allocation57_spill] sm:$0xff] %v12648_v53  ;;  %v4285_v45 = vrot.slane %v4271_v24, %v16748_v61 }
 0x4c1   : > { %5143 = vbcast.lane.b32.xlu0 %v5141_v55, 256  ;;  %v12668_v55 = vsel %vm3236_vm4, %v3810_v23, %v4637_v27  ;;  %v4649_v5 = vrot.slane %v4294_v16, %v11512_v30 }
 0x4c2   : > { %v4287_v24 = vcombine.high %v4285_v45, %v4285_v45 }
 0x4c3   : > { %5956 = vbcast.lane.b32.xlu1 %v5953_v62, 257  ;;  %v12660_v38 = vpop.permute.xlu1 %5500  ;;  %v4641_v62 = vrot.slane %v4268_v17, %v11512_v30  ;;  %v4645_v17 = vrot.slane %v4270_v15, %v11512_v30  ;;  %v4308_v15 = vrot.slane %v4286_v11, %v16748_v61 }
 0x4c4   : > { %16758 = vst [vmem:[#allocation58_spill] sm:$0xff] %v12660_v38  ;;  %v10495_v38 = vld [vmem:[#allocation2 + $0x110] sm:$0xff] }
 0x4c5   : > { %5157 = vbcast.lane.b32.xlu0 %v5155_v39, 256  ;;  %v5985_v39 = vrot.slane %v12668_v55, %v12351_v26  ;;  %v3822_v27 = vrot.slane %v10495_v38, %v16748_v61  ;;  %v12681_v56 = vsel %vm3236_vm4, %v3812_v54, %v4641_v62  ;;  %v4653_v11 = vrot.slane %v4308_v15, %v11512_v30 }
 0x4c7   : > { %5972 = vbcast.lane.b32.xlu1 %v5969_v40, 257  ;;  %v12670_v53 = vpop.permute.xlu1 %5514  ;;  %v3814_v40 = vcombine.high %v3810_v23, %v3810_v23  ;;  %v3830_v13 = vcombine.high %v3822_v27, %v3822_v27  ;;  %v3838_v23 = vrot.slane %v3822_v27, %v16748_v61 }
 0x4c8   : > { %16759 = vst [vmem:[#allocation59_spill] sm:$0xff] %v12670_v53 }
 0x4c9   : > { %5171 = vbcast.lane.b32.xlu0 %v5169_v44, 256  ;;  %v6001_v44 = vrot.slane %v12681_v56, %v12351_v26  ;;  %v12692_v54 = vsel %vm3236_vm4, %v3814_v40, %v4645_v17  ;;  %v3852_v40 = vrot.slane %v3830_v13, %v16748_v61  ;;  %v5211_v17 = vrot.slane %v11707_v19, %v11512_v30 }
 0x4ca   : > { %v3860_v13 = vcombine.high %v3838_v23, %v3838_v23  ;;  %v5225_v19 = vrot.slane %v11688_v51, %v11512_v30  ;;  %v5239_v51 = vrot.slane %v11713_v60, %v11512_v30  ;;  %v5253_v60 = vrot.slane %v11718_v4, %v11512_v30 }
 0x4cb   : > { %5988 = vbcast.lane.b32.xlu1 %v5985_v39, 257  ;;  %v12683_v53 = vpop.permute.xlu1 %5528  ;;  %v6017_v39 = vrot.slane %v12692_v54, %v12351_v26 }
 0x4cc   : > { %16760 = vst [vmem:[#allocation60_spill] sm:$0xff] %v12683_v53 }
 0x4cd   : > { %5185 = vbcast.lane.b32.xlu0 %v5183_v1, 256  ;;  %v12704_v1 = vsel %vm3236_vm4, %v3838_v23, %v4649_v5  ;;  %v3815_v5 = vcombine.high %v10495_v38, %v10495_v38  ;;  %v3862_v23 = vcombine.high %v3852_v40, %v3852_v40 }
 0x4cf   : > { %6004 = vbcast.lane.b32.xlu1 %v6001_v44, 257  ;;  %v12695_v62 = vpop.permute.xlu1 %5542  ;;  %v4316_v44 = vcombine.high %v4294_v16, %v4294_v16  ;;  %v4318_v16 = vcombine.high %v4308_v15, %v4308_v15  ;;  %v3829_v38 = vrot.slane %v3815_v5, %v16748_v61  ;;  %v4301_v15 = vrot.slane %v4285_v45, %v16748_v61 }
 0x4d0   : > { %16761 = vst [vmem:[#allocation61_spill] sm:$0xff] %v12695_v62  ;;  %v12717_v62 = vsel %vm3236_vm4, %v3852_v40, %v4653_v11  ;;  %v4315_v45 = vrot.slane %v4287_v24, %v16748_v61 }
 0x4d1   : > { %5199 = vbcast.lane.b32.xlu0 %v5197_v10, 256  ;;  %v6033_v10 = vrot.slane %v12704_v1, %v12351_v26  ;;  %v3845_v40 = vrot.slane %v3829_v38, %v16748_v61 }
 0x4d2   : > { %v4669_v4 = vrot.slane %v4315_v45, %v11512_v30 }
 0x4d3   : > { %6020 = vbcast.lane.b32.xlu1 %v6017_v39, 257  ;;  %v12707_v27 = vpop.permute.xlu1 %5556 }
 0x4d4   : > { %16762 = vst [vmem:[#allocation62_spill] sm:$0xff] %v12707_v27  ;;  %v4657_v27 = vrot.slane %v4316_v44, %v11512_v30  ;;  %v4661_v44 = vrot.slane %v4318_v16, %v11512_v30  ;;  %v4665_v16 = vrot.slane %v4301_v15, %v11512_v30 }
 0x4d5   : > { %5213 = vbcast.lane.b32.xlu0 %v5211_v17, 256  ;;  %v6049_v17 = vrot.slane %v12717_v62, %v12351_v26 }
 0x4d6   : > { %v12729_v11 = vsel %vm3236_vm4, %v3860_v13, %v4657_v27  ;;  %v12740_v5 = vsel %vm3236_vm4, %v3862_v23, %v4661_v44  ;;  %v3831_v27 = vcombine.high %v3829_v38, %v3829_v38  ;;  %v12752_v23 = vsel %vm3236_vm4, %v3845_v40, %v4665_v16 }
 0x4d7   : > { %6036 = vbcast.lane.b32.xlu1 %v6033_v10, 257  ;;  %v12719_v39 = vpop.permute.xlu1 %5570  ;;  %v5267_v44 = vrot.slane %v11732_v47, %v11512_v30  ;;  %v6097_v24 = vrot.slane %v12752_v23, %v12351_v26  ;;  %v3861_v16 = vcombine.high %v3845_v40, %v3845_v40 }
 0x4d8   : > { %16763 = vst [vmem:[#allocation63_spill] sm:$0xff] %v12719_v39 }
 0x4d9   : > { %5227 = vbcast.lane.b32.xlu0 %v5225_v19, 256  ;;  %v6065_v19 = vrot.slane %v12729_v11, %v12351_v26 }
 0x4db   : > { %6052 = vbcast.lane.b32.xlu1 %v6049_v17, 257  ;;  %v12731_v10 = vpop.permute.xlu1 %5584  ;;  %v6081_v17 = vrot.slane %v12740_v5, %v12351_v26 }
 0x4dc   : > { %16764 = vst [vmem:[#allocation64_spill] sm:$0xff] %v12731_v10  ;;  %v10497_v10 = vld [vmem:[#allocation2 + $0x120] sm:$0xff] }
 0x4dd   : > { %5241 = vbcast.lane.b32.xlu0 %v5239_v51, 256  ;;  %v3859_v51 = vrot.slane %v3831_v27, %v16748_v61  ;;  %v5281_v27 = vrot.slane %v16677_v31, %v11512_v30  ;;  %v5295_v31 = vrot.slane %v16678_v25, %v11512_v30  ;;  %v5309_v25 = vrot.slane %v16679_v29, %v11512_v30 }
 0x4df   : > { %6068 = vbcast.lane.b32.xlu1 %v6065_v19, 257  ;;  %v12743_v13 = vpop.permute.xlu1 %5598  ;;  %v4317_v19 = vcombine.high %v4301_v15, %v4301_v15  ;;  %v4319_v15 = vcombine.high %v4315_v45, %v4315_v45 }
 0x4e0   : > { %16765 = vst [vmem:[#allocation65_spill] sm:$0xff] %v12743_v13 }
 0x4e1   : > { %5255 = vbcast.lane.b32.xlu0 %v5253_v60, 256  ;;  %v12763_v60 = vsel %vm3236_vm4, %v3859_v51, %v4669_v4  ;;  %v3871_v4 = vrot.slane %v10497_v10, %v16748_v61 }
 0x4e3   : > { %6084 = vbcast.lane.b32.xlu1 %v6081_v17, 257  ;;  %v12755_v38 = vpop.permute.xlu1 %5612  ;;  %v10496_v17 = vld [vmem:[#allocation2 + $0x21] sm:$0xff]  ;;  %v3879_v53 = vcombine.high %v3871_v4, %v3871_v4 }
 0x4e4   : > { %16766 = vst [vmem:[#allocation66_spill] sm:$0xff] %v12755_v38  ;;  %v4327_v47 = vrot.slane %v10496_v17, %v16748_v61  ;;  %v4673_v38 = vrot.slane %v4317_v19, %v11512_v30  ;;  %v4677_v19 = vrot.slane %v4319_v15, %v11512_v30  ;;  %v4320_v29 = vcombine.high %v10496_v17, %v10496_v17 }
 0x4e5   : > { %5269 = vbcast.lane.b32.xlu0 %v5267_v44, 256  ;;  %v6113_v44 = vrot.slane %v12763_v60, %v12351_v26 }
 0x4e6   : > { %v12775_v40 = vsel %vm3236_vm4, %v3861_v16, %v4673_v38  ;;  %v4335_v39 = vcombine.high %v4327_v47, %v4327_v47  ;;  %v4343_v45 = vrot.slane %v4327_v47, %v16748_v61 }
 0x4e7   : > { %6100 = vbcast.lane.b32.xlu1 %v6097_v24, 257  ;;  %v12765_v13 = vpop.permute.xlu1 %5626  ;;  %v3863_v24 = vcombine.high %v3859_v51, %v3859_v51  ;;  %v3887_v51 = vrot.slane %v3871_v4, %v16748_v61 }
 0x4e8   : > { %16767 = vst [vmem:[#allocation67_spill] sm:$0xff] %v12765_v13  ;;  %v4681_v47 = vrot.slane %v4343_v45, %v11512_v30  ;;  %v4357_v15 = vrot.slane %v4335_v39, %v16748_v61 }
 0x4e9   : > { %5283 = vbcast.lane.b32.xlu0 %v5281_v27, 256  ;;  %v6129_v27 = vrot.slane %v12775_v40, %v12351_v26  ;;  %v12786_v38 = vsel %vm3236_vm4, %v3863_v24, %v4677_v19  ;;  %v3901_v24 = vrot.slane %v3879_v53, %v16748_v61  ;;  %v5323_v19 = vrot.slane %v16680_v35, %v11512_v30 }
 0x4ea   : > { %v4334_v35 = vrot.slane %v4320_v29, %v16748_v61 }
 0x4eb   : > { %6116 = vbcast.lane.b32.xlu1 %v6113_v44, 257  ;;  %v12777_v13 = vpop.permute.xlu1 %5640  ;;  %v6145_v44 = vrot.slane %v12786_v38, %v12351_v26 }
 0x4ec   : > { %16768 = vst [vmem:[#allocation68_spill] sm:$0xff] %v12777_v13  ;;  %v3909_v13 = vcombine.high %v3887_v51, %v3887_v51  ;;  %v4336_v29 = vcombine.high %v4334_v35, %v4334_v35 }
 0x4ed   : > { %5297 = vbcast.lane.b32.xlu0 %v5295_v31, 256  ;;  %v12798_v31 = vsel %vm3236_vm4, %v3887_v51, %v4681_v47  ;;  %v3911_v51 = vcombine.high %v3901_v24, %v3901_v24 }
 0x4ee   : > { %v6161_v39 = vrot.slane %v12798_v31, %v12351_v26 }
 0x4ef   : > { %6132 = vbcast.lane.b32.xlu1 %v6129_v27, 257  ;;  %v12789_v16 = vpop.permute.xlu1 %5654  ;;  %v4685_v27 = vrot.slane %v4357_v15, %v11512_v30 }
 0x4f0   : > { %16769 = vst [vmem:[#allocation69_spill] sm:$0xff] %v12789_v16  ;;  %v4365_v16 = vcombine.high %v4343_v45, %v4343_v45  ;;  %v4367_v45 = vcombine.high %v4357_v15, %v4357_v15  ;;  %v4350_v15 = vrot.slane %v4334_v35, %v16748_v61  ;;  %v4364_v35 = vrot.slane %v4336_v29, %v16748_v61 }
 0x4f1   : > { %5311 = vbcast.lane.b32.xlu0 %v5309_v25, 256  ;;  %v3864_v25 = vcombine.high %v10497_v10, %v10497_v10  ;;  %v12809_v47 = vsel %vm3236_vm4, %v3901_v24, %v4685_v27 }
 0x4f2   : > { %v4689_v17 = vrot.slane %v4365_v16, %v11512_v30  ;;  %v4693_v16 = vrot.slane %v4367_v45, %v11512_v30  ;;  %v4697_v45 = vrot.slane %v4350_v15, %v11512_v30 }
 0x4f3   : > { %6148 = vbcast.lane.b32.xlu1 %v6145_v44, 257  ;;  %v12801_v4 = vpop.permute.xlu1 %5668  ;;  %v5337_v44 = vrot.slane %v16681_v12, %v11512_v30  ;;  %v3878_v10 = vrot.slane %v3864_v25, %v16748_v61  ;;  %v5351_v12 = vrot.slane %v16682_v43, %v11512_v30  ;;  %v5365_v43 = vrot.slane %v16683_v34, %v11512_v30 }
 0x4f4   : > { %16770 = vst [vmem:[#allocation70_spill] sm:$0xff] %v12801_v4  ;;  %v12821_v27 = vsel %vm3236_vm4, %v3909_v13, %v4689_v17  ;;  %v12832_v25 = vsel %vm3236_vm4, %v3911_v51, %v4693_v16  ;;  %v5379_v16 = vrot.slane %v16684_v33, %v11512_v30  ;;  %v4701_v34 = vrot.slane %v4364_v35, %v11512_v30 }
 0x4f5   : > { %5325 = vbcast.lane.b32.xlu0 %v5323_v19, 256  ;;  %v6177_v19 = vrot.slane %v12809_v47, %v12351_v26  ;;  %v3894_v13 = vrot.slane %v3878_v10, %v16748_v61  ;;  %v3880_v24 = vcombine.high %v3878_v10, %v3878_v10 }
 0x4f7   : > { %6164 = vbcast.lane.b32.xlu1 %v6161_v39, 257  ;;  %v12811_v53 = vpop.permute.xlu1 %5682  ;;  %v12844_v51 = vsel %vm3236_vm4, %v3894_v13, %v4697_v45  ;;  %v3910_v45 = vcombine.high %v3894_v13, %v3894_v13 }
 0x4f8   : > { %16771 = vst [vmem:[#allocation71_spill] sm:$0xff] %v12811_v53  ;;  %v6225_v29 = vrot.slane %v12844_v51, %v12351_v26 }
 0x4f9   : > { %5339 = vbcast.lane.b32.xlu0 %v5337_v44, 256  ;;  %v6193_v44 = vrot.slane %v12821_v27, %v12351_v26 }
 0x4fb   : > { %6180 = vbcast.lane.b32.xlu1 %v6177_v19, 257  ;;  %v12823_v39 = vpop.permute.xlu1 %5696  ;;  %v6209_v19 = vrot.slane %v12832_v25, %v12351_v26 }
 0x4fc   : > { %16772 = vst [vmem:[#allocation72_spill] sm:$0xff] %v12823_v39  ;;  %v10499_v39 = vld [vmem:[#allocation2 + $0x130] sm:$0xff] }
 0x4fd   : > { %5353 = vbcast.lane.b32.xlu0 %v5351_v12, 256  ;;  %v3908_v12 = vrot.slane %v3880_v24, %v16748_v61  ;;  %v5393_v24 = vrot.slane %v16685_v42, %v11512_v30  ;;  %v5407_v42 = vrot.slane %v16686_v0, %v11512_v30  ;;  %v5421_v0 = vrot.slane %v16687_v48, %v11512_v30 }
 0x4ff   : > { %6196 = vbcast.lane.b32.xlu1 %v6193_v44, 257  ;;  %v12835_v17 = vpop.permute.xlu1 %5710  ;;  %v4366_v44 = vcombine.high %v4350_v15, %v4350_v15  ;;  %v4368_v15 = vcombine.high %v4364_v35, %v4364_v35 }
 0x500   : > { %16773 = vst [vmem:[#allocation73_spill] sm:$0xff] %v12835_v17 }
 0x501   : > { %5367 = vbcast.lane.b32.xlu0 %v5365_v43, 256  ;;  %v12855_v43 = vsel %vm3236_vm4, %v3908_v12, %v4701_v34  ;;  %v3920_v34 = vrot.slane %v10499_v39, %v16748_v61 }
 0x503   : > { %6212 = vbcast.lane.b32.xlu1 %v6209_v19, 257  ;;  %v12847_v10 = vpop.permute.xlu1 %5724  ;;  %v10498_v19 = vld [vmem:[#allocation2 + $0x31] sm:$0xff]  ;;  %v3928_v4 = vcombine.high %v3920_v34, %v3920_v34 }
 0x504   : > { %16774 = vst [vmem:[#allocation74_spill] sm:$0xff] %v12847_v10  ;;  %v4376_v33 = vrot.slane %v10498_v19, %v16748_v61  ;;  %v4705_v10 = vrot.slane %v4366_v44, %v11512_v30  ;;  %v4709_v44 = vrot.slane %v4368_v15, %v11512_v30 }
 0x505   : > { %5381 = vbcast.lane.b32.xlu0 %v5379_v16, 256  ;;  %v6241_v16 = vrot.slane %v12855_v43, %v12351_v26 }
 0x506   : > { %v12867_v13 = vsel %vm3236_vm4, %v3910_v45, %v4705_v10  ;;  %v4384_v53 = vcombine.high %v4376_v33, %v4376_v33  ;;  %v4392_v35 = vrot.slane %v4376_v33, %v16748_v61 }
 0x507   : > { %6228 = vbcast.lane.b32.xlu1 %v6225_v29, 257  ;;  %v12857_v17 = vpop.permute.xlu1 %5738  ;;  %v3912_v29 = vcombine.high %v3908_v12, %v3908_v12  ;;  %v3936_v12 = vrot.slane %v3920_v34, %v16748_v61 }
 0x508   : > { %16775 = vst [vmem:[#allocation75_spill] sm:$0xff] %v12857_v17  ;;  %v4713_v33 = vrot.slane %v4392_v35, %v11512_v30  ;;  %v4406_v15 = vrot.slane %v4384_v53, %v16748_v61  ;;  %v5435_v53 = vrot.slane %v16688_v57, %v11512_v30 }
 0x509   : > { %5395 = vbcast.lane.b32.xlu0 %v5393_v24, 256  ;;  %v6257_v24 = vrot.slane %v12867_v13, %v12351_v26  ;;  %v12878_v10 = vsel %vm3236_vm4, %v3912_v29, %v4709_v44  ;;  %v3958_v57 = vcombine.high %v3936_v12, %v3936_v12 }
 0x50a   : > { %v6273_v29 = vrot.slane %v12878_v10, %v12351_v26  ;;  %v12892_v34 = vsel %vm3236_vm4, %v3936_v12, %v4713_v33 }
 0x50b   : > { %6244 = vbcast.lane.b32.xlu1 %v6241_v16, 257  ;;  %v12869_v17 = vpop.permute.xlu1 %5752  ;;  %v2051_v16 = vadd.f32 %v12252_v6, %v12248_v3  ;;  %v4717_v6 = vrot.slane %v4406_v15, %v11512_v30 }
 0x50d   : > { %5409 = vbcast.lane.b32.xlu0 %v5407_v42, 256  ;;  %v3950_v42 = vrot.slane %v3928_v4, %v16748_v61  ;;  %v3533_v44 = vadd.f32 %v12340_v28, %v2051_v16  ;;  %v6289_v28 = vrot.slane %v12892_v34, %v12351_v26  ;;  %v3913_v4 = vcombine.high %v10499_v39, %v10499_v39 }
 0x50f   : > { %6260 = vbcast.lane.b32.xlu1 %v6257_v24, 257  ;;  %v12881_v45 = vpop.permute.xlu1 %5766  ;;  %v4369_v24 = vcombine.high %v10498_v19, %v10498_v19  ;;  %v12909_v16 = vsel %vm3236_vm4, %v3950_v42, %v4717_v6  ;;  %v3927_v12 = vrot.slane %v3913_v4, %v16748_v61 }
 0x510   : > { %16776 = vst [vmem:[#allocation76_spill] sm:$0xff] %v12881_v45  ;;  %v6305_v39 = vrot.slane %v12909_v16, %v12351_v26 }
 0x511   : > { %5423 = vbcast.lane.b32.xlu0 %v5421_v0, 256  ;;  %v4414_v0 = vcombine.high %v4392_v35, %v4392_v35  ;;  %v4383_v35 = vrot.slane %v4369_v24, %v16748_v61 }
 0x513   : > { %6276 = vbcast.lane.b32.xlu1 %v6273_v29, 257  ;;  %v12896_v48 = vpop.permute.xlu1 %5780  ;;  %v5449_v29 = vrot.slane %v16690_v37, %v11512_v30  ;;  %v5463_v37 = vrot.slane %v16692_v2, %v11512_v30  ;;  %v4385_v24 = vcombine.high %v4383_v35, %v4383_v35  ;;  %v5477_v2 = vrot.slane %v16694_v14, %v11512_v30 }
 0x514   : > { %16777 = vst [vmem:[#allocation77_spill] sm:$0xff] %v12896_v48  ;;  %v3764_v3 = vpop.xlane.xlu0 %3763  ;;  %v5491_v14 = vrot.slane %v16696_v32, %v11512_v30  ;;  %v10500_v32 = vld [vmem:[#allocation2 + $0x41] sm:$0xff] }
 0x515   : > { %v3765_v33 = vadd.f32 %v3764_v3, %v3533_v44  ;;  %5437 = vbcast.lane.b32.xlu0 %v5435_v53, 256  ;;  %v4721_v53 = vrot.slane %v4414_v0, %v11512_v30  ;;  %v4416_v3 = vcombine.high %v4406_v15, %v4406_v15  ;;  %v4399_v0 = vrot.slane %v4383_v35, %v16748_v61 }
 0x517   : > { %9807 = vst.msk [vmem:[%s740_s11] sm:$0xff] %vm6918_vm12, %v3765_v33  ;;  %6292 = vbcast.lane.b32.xlu1 %v6289_v28, 257  ;;  %v12912_v19 = vpop.permute.xlu1 %5794  ;;  %v12924_v6 = vsel %vm3236_vm4, %v3958_v57, %v4721_v53  ;;  %v3960_v33 = vcombine.high %v3950_v42, %v3950_v42  ;;  %v4725_v15 = vrot.slane %v4416_v3, %v11512_v30 }
 0x518   : > { %16778 = vst [vmem:[#allocation78_spill] sm:$0xff] %v12912_v19  ;;  %v12917_v44 = vpop.permute.xlu0 %5010  ;;  %v6321_v4 = vrot.slane %v12924_v6, %v12351_v26  ;;  %v3943_v42 = vrot.slane %v3927_v12, %v16748_v61  ;;  %v4729_v35 = vrot.slane %v4399_v0, %v11512_v30  ;;  %v4413_v3 = vrot.slane %v4385_v24, %v16748_v61 }
 0x519   : > { %5451 = vbcast.lane.b32.xlu0 %v5449_v29, 256  ;;  %v12937_v57 = vsel %vm3236_vm4, %v3960_v33, %v4725_v15  ;;  %v3929_v29 = vcombine.high %v3927_v12, %v3927_v12  ;;  %v4415_v24 = vcombine.high %v4399_v0, %v4399_v0 }
 0x51a   : > { %v6337_v33 = vrot.slane %v12937_v57, %v12351_v26 }
 0x51b   : > { %6308 = vbcast.lane.b32.xlu1 %v6305_v39, 257  ;;  %v12926_v28 = vpop.permute.xlu1 %5808  ;;  %v3957_v12 = vrot.slane %v3929_v29, %v16748_v61  ;;  %v4737_v0 = vrot.slane %v4415_v24, %v11512_v30 }
 0x51c   : > { %16779 = vst [vmem:[#allocation79_spill] sm:$0xff] %v12926_v28  ;;  %v12930_v19 = vpop.permute.xlu0 %5031 }
 0x51d   : > { %16780 = vst [vmem:[#allocation80_spill] sm:$0xff] %v12930_v19  ;;  %5465 = vbcast.lane.b32.xlu0 %v5463_v37, 256  ;;  %v12951_v37 = vsel %vm3236_vm4, %v3943_v42, %v4729_v35  ;;  %v10501_v19 = vld [vmem:[#allocation2 + $0x140] sm:$0xff] }
 0x51f   : > { %6324 = vbcast.lane.b32.xlu1 %v6321_v4, 257  ;;  %v12940_v53 = vpop.permute.xlu1 %5822 }
 0x520   : > { %16781 = vst [vmem:[#allocation81_spill] sm:$0xff] %v12940_v53  ;;  %v12944_v39 = vpop.permute.xlu0 %5045  ;;  %v4733_v53 = vrot.slane %v4413_v3, %v11512_v30 }
 0x521   : > { %16782 = vst [vmem:[#allocation82_spill] sm:$0xff] %v12944_v39  ;;  %5479 = vbcast.lane.b32.xlu0 %v5477_v2, 256  ;;  %v6353_v2 = vrot.slane %v12951_v37, %v12351_v26  ;;  %v3959_v39 = vcombine.high %v3943_v42, %v3943_v42  ;;  %v3969_v42 = vrot.slane %v10501_v19, %v16748_v61 }
 0x522   : > { %v12964_v35 = vsel %vm3236_vm4, %v3957_v12, %v4733_v53 }
 0x523   : > { %6340 = vbcast.lane.b32.xlu1 %v6337_v33, 257  ;;  %v12954_v15 = vpop.permute.xlu1 %5836  ;;  %v5505_v33 = vrot.slane %v16698_v18, %v11512_v30  ;;  %v6369_v53 = vrot.slane %v12964_v35, %v12351_v26 }
 0x524   : > { %16783 = vst [vmem:[#allocation83_spill] sm:$0xff] %v12954_v15  ;;  %v12958_v4 = vpop.permute.xlu0 %5059 }
 0x525   : > { %16784 = vst [vmem:[#allocation84_spill] sm:$0xff] %v12958_v4  ;;  %5493 = vbcast.lane.b32.xlu0 %v5491_v14, 256  ;;  %v4425_v4 = vrot.slane %v10500_v32, %v16748_v61  ;;  %v4417_v14 = vcombine.high %v4413_v3, %v4413_v3 }
 0x527   : > { %6356 = vbcast.lane.b32.xlu1 %v6353_v2, 257  ;;  %v12966_v29 = vpop.permute.xlu1 %5850  ;;  %v12978_v2 = vsel %vm3236_vm4, %v3959_v39, %v4737_v0  ;;  %v4433_v28 = vcombine.high %v4425_v4, %v4425_v4  ;;  %v4441_v3 = vrot.slane %v4425_v4, %v16748_v61  ;;  %v3977_v39 = vcombine.high %v3969_v42, %v3969_v42 }
 0x528   : > { %16785 = vst [vmem:[#allocation85_spill] sm:$0xff] %v12966_v29  ;;  %v12971_v15 = vpop.permute.xlu0 %5073  ;;  %v3961_v29 = vcombine.high %v3957_v12, %v3957_v12  ;;  %v6385_v48 = vrot.slane %v12978_v2, %v12351_v26  ;;  %v3985_v0 = vrot.slane %v3969_v42, %v16748_v61  ;;  %v4418_v42 = vcombine.high %v10500_v32, %v10500_v32 }
 0x529   : > { %16786 = vst [vmem:[#allocation86_spill] sm:$0xff] %v12971_v15  ;;  %5507 = vbcast.lane.b32.xlu0 %v5505_v33, 256  ;;  %v5519_v15 = vrot.slane %v16700_v58, %v11512_v30  ;;  %v4741_v33 = vrot.slane %v4417_v14, %v11512_v30  ;;  %v5533_v58 = vrot.slane %v16702_v7, %v11512_v30 }
 0x52a   : > { %v4745_v14 = vrot.slane %v4441_v3, %v11512_v30  ;;  %v5547_v7 = vrot.slane %v16704_v8, %v11512_v30  ;;  %v4007_v32 = vcombine.high %v3985_v0, %v3985_v0  ;;  %v16796_v8 = vld [vmem:[#allocation26_spill] sm:$0xff] }
 0x52b   : > { %6372 = vbcast.lane.b32.xlu1 %v6369_v53, 257  ;;  %v12980_v18 = vpop.permute.xlu1 %5864  ;;  %v12991_v12 = vsel %vm3236_vm4, %v3961_v29, %v4741_v33 }
 0x52c   : > { %16787 = vst [vmem:[#allocation87_spill] sm:$0xff] %v12980_v18  ;;  %v12985_v24 = vpop.permute.xlu0 %5087  ;;  %16789 = vst [vmem:[#allocation89_spill] sm:$0xff] %v12991_v12  ;;  %v13005_v29 = vsel %vm3236_vm4, %v3985_v0, %v4745_v14  ;;  %v3962_v14 = vcombine.high %v10501_v19, %v10501_v19 }
 0x52d   : > { %16788 = vst [vmem:[#allocation88_spill] sm:$0xff] %v12985_v24  ;;  %5521 = vbcast.lane.b32.xlu0 %v5519_v15, 256  ;;  %v4455_v15 = vrot.slane %v4433_v28, %v16748_v61  ;;  %v6401_v24 = vrot.slane %v12991_v12, %v12351_v26  ;;  %16792 = vst [vmem:[#allocation92_spill] sm:$0xff] %v13005_v29 }
 0x52f   : > { %6388 = vbcast.lane.b32.xlu1 %v6385_v48, 257  ;;  %v12994_v53 = vpop.permute.xlu1 %5878  ;;  %v3999_v48 = vrot.slane %v3977_v39, %v16748_v61  ;;  %v4749_v28 = vrot.slane %v4455_v15, %v11512_v30 }
 0x530   : > { %16790 = vst [vmem:[#allocation90_spill] sm:$0xff] %v12994_v53  ;;  %v12998_v4 = vpop.permute.xlu0 %5101 }
 0x531   : > { %16791 = vst [vmem:[#allocation91_spill] sm:$0xff] %v12998_v4  ;;  %5535 = vbcast.lane.b32.xlu0 %v5533_v58, 256  ;;  %v4463_v58 = vcombine.high %v4441_v3, %v4441_v3  ;;  %v6417_v4 = vrot.slane %v13005_v29, %v12351_v26  ;;  %v13018_v18 = vsel %vm3236_vm4, %v3999_v48, %v4749_v28 }
 0x532   : > { %16795 = vst [vmem:[#allocation95_spill] sm:$0xff] %v13018_v18  ;;  %v6433_v19 = vrot.slane %v13018_v18, %v12351_v26  ;;  %v3976_v28 = vrot.slane %v3962_v14, %v16748_v61 }
 0x533   : > { %6404 = vbcast.lane.b32.xlu1 %v6401_v24, 257  ;;  %v13008_v33 = vpop.permute.xlu1 %5892  ;;  %v4432_v24 = vrot.slane %v4418_v42, %v16748_v61  ;;  %v4753_v3 = vrot.slane %v4463_v58, %v11512_v30  ;;  %v4009_v42 = vcombine.high %v3999_v48, %v3999_v48 }
 0x534   : > { %16793 = vst [vmem:[#allocation93_spill] sm:$0xff] %v13008_v33  ;;  %v13012_v53 = vpop.permute.xlu0 %5115  ;;  %v5561_v33 = vrot.slane %v16796_v8, %v11512_v30  ;;  %v16799_v8 = vld [vmem:[#allocation27_spill] sm:$0xff] }
 0x535   : > { %16794 = vst [vmem:[#allocation94_spill] sm:$0xff] %v13012_v53  ;;  %5549 = vbcast.lane.b32.xlu0 %v5547_v7, 256  ;;  %v4465_v7 = vcombine.high %v4455_v15, %v4455_v15  ;;  %v13030_v0 = vsel %vm3236_vm4, %v4007_v32, %v4753_v3  ;;  %v5575_v45 = vrot.slane %v16799_v8, %v11512_v30  ;;  %v16801_v15 = vld [vmem:[#allocation8_spill] sm:$0xff] }
 0x536   : > { %16798 = vst [vmem:[#allocation96_spill] sm:$0xff] %v13030_v0  ;;  %v4448_v48 = vrot.slane %v4432_v24, %v16748_v61  ;;  %v6449_v3 = vrot.slane %v13030_v0, %v12351_v26  ;;  %v16805_v8 = vld [vmem:[#allocation28_spill] sm:$0xff]  ;;  %v16811_v0 = vld [vmem:[#allocation10_spill] sm:$0xff] }
 0x537   : > { %6420 = vbcast.lane.b32.xlu1 %v6417_v4, 257  ;;  %v5909_v39 = vpop.permute.xlu1 %5908  ;;  %v4434_v4 = vcombine.high %v4432_v24, %v4432_v24  ;;  %v4757_v14 = vrot.slane %v4465_v7, %v11512_v30  ;;  %v5589_v7 = vrot.slane %v16805_v8, %v11512_v30 }
 0x538   : > { %v13023_v53 = vpop.permute.xlu0 %5129  ;;  %v13036_v58 = vsel %vm6918_vm12, %v12917_v44, %v5909_v39  ;;  %v3992_v39 = vrot.slane %v3976_v28, %v16748_v61  ;;  %v4761_v24 = vrot.slane %v4448_v48, %v11512_v30 }
 0x539   : > { %16797 = vst [vmem:[#allocation26_spill] sm:$0xff] %v13023_v53  ;;  %5563 = vbcast.lane.b32.xlu0 %v5561_v33, 256  ;;  %16800 = vst [vmem:[#allocation27_spill] sm:$0xff] %v13036_v58  ;;  %v13051_v44 = vsel %vm3236_vm4, %v4009_v42, %v4757_v14 }
 0x53a   : > { %16804 = vst [vmem:[#allocation98_spill] sm:$0xff] %v13051_v44  ;;  %v6465_v32 = vrot.slane %v13051_v44, %v12351_v26  ;;  %v13063_v42 = vsel %vm3236_vm4, %v3992_v39, %v4761_v24  ;;  %v4464_v44 = vcombine.high %v4448_v48, %v4448_v48 }
 0x53b   : > { %6436 = vbcast.lane.b32.xlu1 %v6433_v19, 257  ;;  %v5925_v29 = vpop.permute.xlu1 %5924  ;;  %16807 = vst [vmem:[#allocation99_spill] sm:$0xff] %v13063_v42 }
 0x53c   : > { %v13040_v33 = vsel %vm6918_vm12, %v16801_v15, %v5925_v29  ;;  %v13042_v53 = vpop.permute.xlu0 %5143  ;;  %v3978_v29 = vcombine.high %v3976_v28, %v3976_v28 }
 0x53d   : > { %16802 = vst [vmem:[#allocation8_spill] sm:$0xff] %v13040_v33  ;;  %16803 = vst [vmem:[#allocation97_spill] sm:$0xff] %v13042_v53  ;;  %5577 = vbcast.lane.b32.xlu0 %v5575_v45, 256  ;;  %v4462_v45 = vrot.slane %v4434_v4, %v16748_v61  ;;  %v16809_v53 = vld [vmem:[#allocation9_spill] sm:$0xff] }
 0x53e   : > { %v4006_v28 = vrot.slane %v3978_v29, %v16748_v61  ;;  %v6481_v29 = vrot.slane %v13063_v42, %v12351_v26 }
 0x53f   : > { %6452 = vbcast.lane.b32.xlu1 %v6449_v3, 257  ;;  %v5941_v19 = vpop.permute.xlu1 %5940  ;;  %v16808_v3 = vld [vmem:[#allocation29_spill] sm:$0xff]  ;;  %v4765_v24 = vrot.slane %v4462_v45, %v11512_v30 }
 0x540   : > { %v13056_v15 = vpop.permute.xlu0 %5157  ;;  %v5603_v8 = vrot.slane %v16808_v3, %v11512_v30 }
 0x541   : > { %16806 = vst [vmem:[#allocation28_spill] sm:$0xff] %v13056_v15  ;;  %5591 = vbcast.lane.b32.xlu0 %v5589_v7, 256  ;;  %v13070_v15 = vsel %vm6918_vm12, %v16809_v53, %v5941_v19  ;;  %v13084_v3 = vsel %vm3236_vm4, %v4006_v28, %v4765_v24  ;;  %v4008_v53 = vcombine.high %v3992_v39, %v3992_v39  ;;  %v10502_v19 = vld [vmem:[#allocation2 + $0x51] sm:$0xff] }
 0x542   : > { %16810 = vst [vmem:[#allocation29_spill] sm:$0xff] %v13070_v15  ;;  %16814 = vst [vmem:[#allocation100_spill] sm:$0xff] %v13084_v3  ;;  %v6497_v42 = vrot.slane %v13084_v3, %v12351_v26  ;;  %v10503_v24 = vld [vmem:[#allocation2 + $0x150] sm:$0xff]  ;;  %v16821_v3 = vld [vmem:[#allocation12_spill] sm:$0xff] }
 0x543   : > { %6468 = vbcast.lane.b32.xlu1 %v6465_v32, 257  ;;  %v5957_v14 = vpop.permute.xlu1 %5956  ;;  %v4769_v32 = vrot.slane %v4464_v44, %v11512_v30  ;;  %v4018_v39 = vrot.slane %v10503_v24, %v16748_v61 }
 0x544   : > { %v13074_v4 = vsel %vm6918_vm12, %v16811_v0, %v5957_v14  ;;  %v13076_v7 = vpop.permute.xlu0 %5171  ;;  %v4474_v0 = vrot.slane %v10502_v19, %v16748_v61 }
 0x545   : > { %16812 = vst [vmem:[#allocation9_spill] sm:$0xff] %v13074_v4  ;;  %16813 = vst [vmem:[#allocation10_spill] sm:$0xff] %v13076_v7  ;;  %5605 = vbcast.lane.b32.xlu0 %v5603_v8, 256  ;;  %v16815_v7 = vld [vmem:[#allocation30_spill] sm:$0xff]  ;;  %v4466_v8 = vcombine.high %v4462_v45, %v4462_v45  ;;  %v13096_v15 = vsel %vm3236_vm4, %v4008_v53, %v4769_v32  ;;  %v16819_v45 = vld [vmem:[#allocation11_spill] sm:$0xff]  ;;  %v4026_v53 = vcombine.high %v4018_v39, %v4018_v39 }
 0x546   : > { %v5617_v18 = vrot.slane %v16815_v7, %v11512_v30  ;;  %16817 = vst [vmem:[#allocation101_spill] sm:$0xff] %v13096_v15  ;;  %v4482_v4 = vcombine.high %v4474_v0, %v4474_v0  ;;  %v16818_v7 = vld [vmem:[#allocation31_spill] sm:$0xff]  ;;  %v4490_v44 = vrot.slane %v4474_v0, %v16748_v61  ;;  %v6513_v32 = vrot.slane %v13096_v15, %v12351_v26 }
 0x547   : > { %6484 = vbcast.lane.b32.xlu1 %v6481_v29, 257  ;;  %v5973_v14 = vpop.permute.xlu1 %5972  ;;  %v4010_v29 = vcombine.high %v4006_v28, %v4006_v28  ;;  %v4773_v28 = vrot.slane %v4466_v8, %v11512_v30 }
 0x548   : > { %v13089_v48 = vpop.permute.xlu0 %5185  ;;  %v4777_v8 = vrot.slane %v4490_v44, %v11512_v30 }
 0x549   : > { %16816 = vst [vmem:[#allocation30_spill] sm:$0xff] %v13089_v48  ;;  %5619 = vbcast.lane.b32.xlu0 %v5617_v18, 256  ;;  %v5631_v48 = vrot.slane %v16818_v7, %v11512_v30  ;;  %v13103_v18 = vsel %vm6918_vm12, %v16819_v45, %v5973_v14  ;;  %v13117_v0 = vsel %vm3236_vm4, %v4010_v29, %v4773_v28 }
 0x54a   : > { %16820 = vst [vmem:[#allocation31_spill] sm:$0xff] %v13103_v18  ;;  %16823 = vst [vmem:[#allocation12_spill] sm:$0xff] %v13117_v0  ;;  %v4034_v14 = vrot.slane %v4018_v39, %v16748_v61  ;;  %v4048_v39 = vrot.slane %v4026_v53, %v16748_v61  ;;  %v4467_v28 = vcombine.high %v10502_v19, %v10502_v19 }
 0x54b   : > { %6500 = vbcast.lane.b32.xlu1 %v6497_v42, 257  ;;  %v5989_v58 = vpop.permute.xlu1 %5988  ;;  %v6529_v42 = vrot.slane %v13117_v0, %v12351_v26  ;;  %v4512_v18 = vcombine.high %v4490_v44, %v4490_v44  ;;  %v4011_v53 = vcombine.high %v10503_v24, %v10503_v24 }
 0x54c   : > { %v13107_v33 = vsel %vm6918_vm12, %v16821_v3, %v5989_v58  ;;  %v13109_v12 = vpop.permute.xlu0 %5199  ;;  %v16824_v3 = vld [vmem:[#allocation32_spill] sm:$0xff]  ;;  %v13129_v29 = vsel %vm3236_vm4, %v4034_v14, %v4777_v8 }
 0x54d   : > { %16822 = vst [vmem:[#allocation11_spill] sm:$0xff] %v13109_v12  ;;  %5633 = vbcast.lane.b32.xlu0 %v5631_v48, 256  ;;  %v5645_v7 = vrot.slane %v16824_v3, %v11512_v30  ;;  %v4504_v48 = vrot.slane %v4482_v4, %v16748_v61  ;;  %16826 = vst [vmem:[#allocation102_spill] sm:$0xff] %v13129_v29  ;;  %v16827_v3 = vld [vmem:[#allocation33_spill] sm:$0xff]  ;;  %v16830_v4 = vld [vmem:[#allocation14_spill] sm:$0xff]  ;;  %v4785_v19 = vrot.slane %v4512_v18, %v11512_v30 }
 0x54e   : > { %v5659_v12 = vrot.slane %v16827_v3, %v11512_v30 }
 0x54f   : > { %6516 = vbcast.lane.b32.xlu1 %v6513_v32, 257  ;;  %v6005_v58 = vpop.permute.xlu1 %6004  ;;  %v4781_v8 = vrot.slane %v4504_v48, %v11512_v30 }
 0x550   : > { %v13122_v45 = vpop.permute.xlu0 %5213 }
 0x551   : > { %16825 = vst [vmem:[#allocation32_spill] sm:$0xff] %v13122_v45  ;;  %5647 = vbcast.lane.b32.xlu0 %v5645_v7, 256  ;;  %v16828_v45 = vld [vmem:[#allocation13_spill] sm:$0xff] }
 0x552   : > { %v13136_v15 = vsel %vm6918_vm12, %v16828_v45, %v6005_v58  ;;  %v13150_v58 = vsel %vm3236_vm4, %v4048_v39, %v4781_v8  ;;  %v4056_v45 = vcombine.high %v4034_v14, %v4034_v14  ;;  %v4025_v8 = vrot.slane %v4011_v53, %v16748_v61 }
 0x553   : > { %6532 = vbcast.lane.b32.xlu1 %v6529_v42, 257  ;;  %v6021_v32 = vpop.permute.xlu1 %6020  ;;  %16829 = vst [vmem:[#allocation33_spill] sm:$0xff] %v13136_v15  ;;  %v6545_v42 = vrot.slane %v13129_v29, %v12351_v26  ;;  %16832 = vst [vmem:[#allocation14_spill] sm:$0xff] %v13150_v58  ;;  %v6561_v24 = vrot.slane %v13150_v58, %v12351_v26 }
 0x554   : > { %v13140_v7 = vsel %vm6918_vm12, %v16830_v4, %v6021_v32  ;;  %v13142_v0 = vpop.permute.xlu0 %5227  ;;  %v4481_v32 = vrot.slane %v4467_v28, %v16748_v61  ;;  %v16833_v4 = vld [vmem:[#allocation34_spill] sm:$0xff]  ;;  %v13162_v14 = vsel %vm3236_vm4, %v4056_v45, %v4785_v19  ;;  %v4058_v28 = vcombine.high %v4048_v39, %v4048_v39 }
 0x555   : > { %16831 = vst [vmem:[#allocation13_spill] sm:$0xff] %v13142_v0  ;;  %5661 = vbcast.lane.b32.xlu0 %v5659_v12, 256  ;;  %v5673_v0 = vrot.slane %v16833_v4, %v11512_v30  ;;  %v4514_v12 = vcombine.high %v4504_v48, %v4504_v48  ;;  %16835 = vst [vmem:[#allocation103_spill] sm:$0xff] %v13162_v14  ;;  %v16836_v4 = vld [vmem:[#allocation35_spill] sm:$0xff]  ;;  %v6577_v45 = vrot.slane %v13162_v14, %v12351_v26 }
 0x556   : > { %v5687_v15 = vrot.slane %v16836_v4, %v11512_v30  ;;  %v4497_v39 = vrot.slane %v4481_v32, %v16748_v61 }
 0x557   : > { %6548 = vbcast.lane.b32.xlu1 %v6545_v42, 257  ;;  %v6037_v3 = vpop.permute.xlu1 %6036  ;;  %v4483_v42 = vcombine.high %v4481_v32, %v4481_v32  ;;  %v4789_v19 = vrot.slane %v4514_v12, %v11512_v30  ;;  %v5701_v12 = vrot.slane %v16726_v63, %v11512_v30  ;;  %v5715_v63 = vrot.slane %v16728_v49, %v11512_v30 }
 0x558   : > { %v13155_v44 = vpop.permute.xlu0 %5241  ;;  %v4793_v32 = vrot.slane %v4497_v39, %v11512_v30 }
 0x559   : > { %16834 = vst [vmem:[#allocation34_spill] sm:$0xff] %v13155_v44  ;;  %5675 = vbcast.lane.b32.xlu0 %v5673_v0, 256  ;;  %v16837_v44 = vld [vmem:[#allocation15_spill] sm:$0xff]  ;;  %v16838_v0 = vld [vmem:[#allocation16_spill] sm:$0xff] }
 0x55a   : > { %v13168_v18 = vsel %vm6918_vm12, %v16837_v44, %v6037_v3  ;;  %v13183_v3 = vsel %vm3236_vm4, %v4058_v28, %v4789_v19  ;;  %v4041_v44 = vrot.slane %v4025_v8, %v16748_v61 }
 0x55b   : > { %6564 = vbcast.lane.b32.xlu1 %v6561_v24, 257  ;;  %v6053_v29 = vpop.permute.xlu1 %6052  ;;  %16840 = vst [vmem:[#allocation15_spill] sm:$0xff] %v13183_v3 }
 0x55c   : > { %v13172_v48 = vsel %vm6918_vm12, %v16838_v0, %v6053_v29  ;;  %v13174_v58 = vpop.permute.xlu0 %5255  ;;  %v4027_v29 = vcombine.high %v4025_v8, %v4025_v8  ;;  %v6593_v0 = vrot.slane %v13183_v3, %v12351_v26  ;;  %v13195_v28 = vsel %vm3236_vm4, %v4041_v44, %v4793_v32 }
 0x55d   : > { %16839 = vst [vmem:[#allocation35_spill] sm:$0xff] %v13174_v58  ;;  %5689 = vbcast.lane.b32.xlu0 %v5687_v15, 256  ;;  %v4511_v15 = vrot.slane %v4483_v42, %v16748_v61  ;;  %16842 = vst [vmem:[#allocation104_spill] sm:$0xff] %v13195_v28  ;;  %v4513_v58 = vcombine.high %v4497_v39, %v4497_v39  ;;  %v6609_v49 = vrot.slane %v13195_v28, %v12351_v26 }
 0x55e   : > { %v4055_v8 = vrot.slane %v4027_v29, %v16748_v61 }
 0x55f   : > { %6580 = vbcast.lane.b32.xlu1 %v6577_v45, 257  ;;  %v6069_v24 = vpop.permute.xlu1 %6068  ;;  %v16843_v45 = vld [vmem:[#allocation18_spill] sm:$0xff]  ;;  %v4797_v32 = vrot.slane %v4511_v15, %v11512_v30  ;;  %v4801_v29 = vrot.slane %v4513_v58, %v11512_v30 }
 0x560   : > { %v13188_v4 = vpop.permute.xlu0 %5269  ;;  %v13202_v53 = vsel %vm6918_vm12, %v16843_v45, %v6069_v24  ;;  %v4057_v24 = vcombine.high %v4041_v44, %v4041_v44  ;;  %v10504_v45 = vld [vmem:[#allocation2 + $0x61] sm:$0xff] }
 0x561   : > { %16841 = vst [vmem:[#allocation16_spill] sm:$0xff] %v13188_v4  ;;  %5703 = vbcast.lane.b32.xlu0 %v5701_v12, 256  ;;  %16844 = vst [vmem:[#allocation18_spill] sm:$0xff] %v13202_v53  ;;  %v16845_v4 = vld [vmem:[#allocation17_spill] sm:$0xff] }
 0x562   : > { %v13228_v3 = vsel %vm3236_vm4, %v4057_v24, %v4801_v29 }
 0x563   : > { %6596 = vbcast.lane.b32.xlu1 %v6593_v0, 257  ;;  %v6085_v19 = vpop.permute.xlu1 %6084  ;;  %v13216_v0 = vsel %vm3236_vm4, %v4055_v8, %v4797_v32  ;;  %v10505_v32 = vld [vmem:[#allocation2 + $0x160] sm:$0xff]  ;;  %16850 = vst [vmem:[#allocation108_spill] sm:$0xff] %v13228_v3 }
 0x564   : > { %v13206_v42 = vsel %vm6918_vm12, %v16845_v4, %v6085_v19  ;;  %v13208_v12 = vpop.permute.xlu0 %5283  ;;  %16848 = vst [vmem:[#allocation106_spill] sm:$0xff] %v13216_v0  ;;  %v4523_v4 = vrot.slane %v10504_v45, %v16748_v61  ;;  %v6625_v28 = vrot.slane %v13216_v0, %v12351_v26  ;;  %v4067_v44 = vrot.slane %v10505_v32, %v16748_v61 }
 0x565   : > { %16846 = vst [vmem:[#allocation17_spill] sm:$0xff] %v13206_v42  ;;  %16847 = vst [vmem:[#allocation105_spill] sm:$0xff] %v13208_v12  ;;  %5717 = vbcast.lane.b32.xlu0 %v5715_v63, 256  ;;  %v5729_v12 = vrot.slane %v16730_v20, %v11512_v30  ;;  %v4515_v63 = vcombine.high %v4511_v15, %v4511_v15  ;;  %v5743_v20 = vrot.slane %v16732_v22, %v11512_v30  ;;  %v16851_v15 = vld [vmem:[#allocation19_spill] sm:$0xff] }
 0x566   : > { %v4531_v53 = vcombine.high %v4523_v4, %v4523_v4  ;;  %v4539_v58 = vrot.slane %v4523_v4, %v16748_v61  ;;  %v6641_v22 = vrot.slane %v13228_v3, %v12351_v26  ;;  %v4075_v29 = vcombine.high %v4067_v44, %v4067_v44 }
 0x567   : > { %6612 = vbcast.lane.b32.xlu1 %v6609_v49, 257  ;;  %v6101_v19 = vpop.permute.xlu1 %6100  ;;  %v4059_v49 = vcombine.high %v4055_v8, %v4055_v8  ;;  %v4805_v8 = vrot.slane %v4515_v63, %v11512_v30  ;;  %v4083_v4 = vrot.slane %v4067_v44, %v16748_v61 }
 0x568   : > { %v13221_v39 = vpop.permute.xlu0 %5297  ;;  %v4809_v63 = vrot.slane %v4539_v58, %v11512_v30  ;;  %v4097_v44 = vrot.slane %v4075_v29, %v16748_v61  ;;  %v4060_v29 = vcombine.high %v10505_v32, %v10505_v32 }
 0x569   : > { %16849 = vst [vmem:[#allocation107_spill] sm:$0xff] %v13221_v39  ;;  %5731 = vbcast.lane.b32.xlu0 %v5729_v12, 256  ;;  %v13235_v12 = vsel %vm6918_vm12, %v16851_v15, %v6101_v19  ;;  %v16852_v39 = vld [vmem:[#allocation20_spill] sm:$0xff]  ;;  %v13249_v24 = vsel %vm3236_vm4, %v4059_v49, %v4805_v8  ;;  %v5757_v19 = vrot.slane %v16734_v36, %v11512_v30 }
 0x56a   : > { %16854 = vst [vmem:[#allocation20_spill] sm:$0xff] %v13249_v24  ;;  %v6657_v15 = vrot.slane %v13249_v24, %v12351_v26  ;;  %v13261_v49 = vsel %vm3236_vm4, %v4083_v4, %v4809_v63  ;;  %v4516_v8 = vcombine.high %v10504_v45, %v10504_v45  ;;  %v5771_v36 = vrot.slane %v16736_v50, %v11512_v30 }
 0x56b   : > { %6628 = vbcast.lane.b32.xlu1 %v6625_v28, 257  ;;  %v6117_v42 = vpop.permute.xlu1 %6116  ;;  %16856 = vst [vmem:[#allocation110_spill] sm:$0xff] %v13261_v49  ;;  %v16857_v28 = vld [vmem:[#allocation21_spill] sm:$0xff]  ;;  %v4561_v24 = vcombine.high %v4539_v58, %v4539_v58  ;;  %v6673_v50 = vrot.slane %v13261_v49, %v12351_v26 }
 0x56c   : > { %v13239_v0 = vsel %vm6918_vm12, %v16852_v39, %v6117_v42  ;;  %v13241_v14 = vpop.permute.xlu0 %5311 }
 0x56d   : > { %16853 = vst [vmem:[#allocation19_spill] sm:$0xff] %v13241_v14  ;;  %5745 = vbcast.lane.b32.xlu0 %v5743_v20, 256  ;;  %v4553_v20 = vrot.slane %v4531_v53, %v16748_v61  ;;  %v16859_v53 = vld [vmem:[#allocation22_spill] sm:$0xff]  ;;  %v4817_v45 = vrot.slane %v4561_v24, %v11512_v30 }
 0x56f   : > { %6644 = vbcast.lane.b32.xlu1 %v6641_v22, 257  ;;  %v6133_v42 = vpop.permute.xlu1 %6132  ;;  %v4813_v63 = vrot.slane %v4553_v20, %v11512_v30 }
 0x570   : > { %v13254_v39 = vpop.permute.xlu0 %5325 }
 0x571   : > { %16855 = vst [vmem:[#allocation109_spill] sm:$0xff] %v13254_v39  ;;  %5759 = vbcast.lane.b32.xlu0 %v5757_v19, 256  ;;  %v13268_v39 = vsel %vm6918_vm12, %v16857_v28, %v6133_v42  ;;  %v13282_v28 = vsel %vm3236_vm4, %v4097_v44, %v4813_v63  ;;  %v4105_v42 = vcombine.high %v4083_v4, %v4083_v4 }
 0x572   : > { %16858 = vst [vmem:[#allocation21_spill] sm:$0xff] %v13268_v39  ;;  %16861 = vst [vmem:[#allocation111_spill] sm:$0xff] %v13282_v28  ;;  %v6689_v32 = vrot.slane %v13282_v28, %v12351_v26  ;;  %v4074_v63 = vrot.slane %v4060_v29, %v16748_v61 }
 0x573   : > { %6660 = vbcast.lane.b32.xlu1 %v6657_v15, 257  ;;  %v6149_v22 = vpop.permute.xlu1 %6148  ;;  %v4530_v15 = vrot.slane %v4516_v8, %v16748_v61  ;;  %v13294_v4 = vsel %vm3236_vm4, %v4105_v42, %v4817_v45  ;;  %v4107_v8 = vcombine.high %v4097_v44, %v4097_v44 }
 0x574   : > { %v13272_v19 = vsel %vm6918_vm12, %v16859_v53, %v6149_v22  ;;  %v13274_v14 = vpop.permute.xlu0 %5339  ;;  %v5785_v53 = vrot.slane %v16738_v52, %v11512_v30  ;;  %16863 = vst [vmem:[#allocation113_spill] sm:$0xff] %v13294_v4  ;;  %v16864_v52 = vld [vmem:[#allocation43_spill] sm:$0xff]  ;;  %v6705_v42 = vrot.slane %v13294_v4, %v12351_v26  ;;  %v16877_v4 = vld [vmem:[#allocation36_spill] sm:$0xff] }
 0x575   : > { %16860 = vst [vmem:[#allocation22_spill] sm:$0xff] %v13274_v14  ;;  %5773 = vbcast.lane.b32.xlu0 %v5771_v36, 256  ;;  %v4563_v36 = vcombine.high %v4553_v20, %v4553_v20  ;;  %v5799_v49 = vrot.slane %v16864_v52, %v11512_v30  ;;  %v16867_v20 = vld [vmem:[#allocation24_spill] sm:$0xff]  ;;  %v4546_v44 = vrot.slane %v4530_v15, %v16748_v61 }
 0x576   : > { %v16871_v52 = vld [vmem:[#allocation44_spill] sm:$0xff] }
 0x577   : > { %6676 = vbcast.lane.b32.xlu1 %v6673_v50, 257  ;;  %v6165_v22 = vpop.permute.xlu1 %6164  ;;  %v4532_v50 = vcombine.high %v4530_v15, %v4530_v15  ;;  %v4821_v45 = vrot.slane %v4563_v36, %v11512_v30  ;;  %v5813_v36 = vrot.slane %v16871_v52, %v11512_v30  ;;  %v4825_v15 = vrot.slane %v4546_v44, %v11512_v30 }
 0x578   : > { %v13287_v58 = vpop.permute.xlu0 %5353 }
 0x579   : > { %16862 = vst [vmem:[#allocation112_spill] sm:$0xff] %v13287_v58  ;;  %5787 = vbcast.lane.b32.xlu0 %v5785_v53, 256  ;;  %v16865_v58 = vld [vmem:[#allocation23_spill] sm:$0xff] }
 0x57a   : > { %v13300_v24 = vsel %vm6918_vm12, %v16865_v58, %v6165_v22  ;;  %v13315_v22 = vsel %vm3236_vm4, %v4107_v8, %v4821_v45  ;;  %v4090_v58 = vrot.slane %v4074_v63, %v16748_v61 }
 0x57b   : > { %6692 = vbcast.lane.b32.xlu1 %v6689_v32, 257  ;;  %v6181_v14 = vpop.permute.xlu1 %6180  ;;  %16866 = vst [vmem:[#allocation43_spill] sm:$0xff] %v13300_v24  ;;  %16870 = vst [vmem:[#allocation114_spill] sm:$0xff] %v13315_v22  ;;  %v6721_v29 = vrot.slane %v13315_v22, %v12351_v26  ;;  %v4562_v22 = vcombine.high %v4546_v44, %v4546_v44 }
 0x57c   : > { %v13304_v53 = vsel %vm6918_vm12, %v16867_v20, %v6181_v14  ;;  %v13306_v28 = vpop.permute.xlu0 %5367  ;;  %v4076_v14 = vcombine.high %v4074_v63, %v4074_v63  ;;  %v13327_v8 = vsel %vm3236_vm4, %v4090_v58, %v4825_v15 }
 0x57d   : > { %16868 = vst [vmem:[#allocation23_spill] sm:$0xff] %v13304_v53  ;;  %16869 = vst [vmem:[#allocation24_spill] sm:$0xff] %v13306_v28  ;;  %5801 = vbcast.lane.b32.xlu0 %v5799_v49, 256  ;;  %v4560_v49 = vrot.slane %v4532_v50, %v16748_v61  ;;  %v16875_v28 = vld [vmem:[#allocation25_spill] sm:$0xff] }
 0x57e   : > { %16873 = vst [vmem:[#allocation115_spill] sm:$0xff] %v13327_v8  ;;  %v4104_v63 = vrot.slane %v4076_v14, %v16748_v61  ;;  %v6737_v14 = vrot.slane %v13327_v8, %v12351_v26 }
 0x57f   : > { %6708 = vbcast.lane.b32.xlu1 %v6705_v42, 257  ;;  %v6197_v32 = vpop.permute.xlu1 %6196  ;;  %v16874_v42 = vld [vmem:[#allocation45_spill] sm:$0xff]  ;;  %v4829_v15 = vrot.slane %v4560_v49, %v11512_v30 }
 0x580   : > { %v13320_v20 = vpop.permute.xlu0 %5381  ;;  %v5827_v52 = vrot.slane %v16874_v42, %v11512_v30 }
 0x581   : > { %16872 = vst [vmem:[#allocation44_spill] sm:$0xff] %v13320_v20  ;;  %5815 = vbcast.lane.b32.xlu0 %v5813_v36, 256  ;;  %v13334_v20 = vsel %vm6918_vm12, %v16875_v28, %v6197_v32  ;;  %v13348_v42 = vsel %vm3236_vm4, %v4104_v63, %v4829_v15  ;;  %v4106_v28 = vcombine.high %v4090_v58, %v4090_v58  ;;  %v10506_v32 = vld [vmem:[#allocation2 + $0x71] sm:$0xff] }
 0x582   : > { %16876 = vst [vmem:[#allocation45_spill] sm:$0xff] %v13334_v20  ;;  %16880 = vst [vmem:[#allocation116_spill] sm:$0xff] %v13348_v42  ;;  %v6753_v8 = vrot.slane %v13348_v42, %v12351_v26  ;;  %v10507_v15 = vld [vmem:[#allocation2 + $0x170] sm:$0xff] }
 0x583   : > { %6724 = vbcast.lane.b32.xlu1 %v6721_v29, 257  ;;  %v6213_v45 = vpop.permute.xlu1 %6212  ;;  %v4833_v29 = vrot.slane %v4562_v22, %v11512_v30  ;;  %v4116_v58 = vrot.slane %v10507_v15, %v16748_v61  ;;  %v16887_v42 = vld [vmem:[#allocation38_spill] sm:$0xff] }
 0x584   : > { %v13338_v50 = vsel %vm6918_vm12, %v16877_v4, %v6213_v45  ;;  %v13340_v36 = vpop.permute.xlu0 %5395  ;;  %v4572_v4 = vrot.slane %v10506_v32, %v16748_v61 }
 0x585   : > { %16878 = vst [vmem:[#allocation25_spill] sm:$0xff] %v13338_v50  ;;  %16879 = vst [vmem:[#allocation36_spill] sm:$0xff] %v13340_v36  ;;  %5829 = vbcast.lane.b32.xlu0 %v5827_v52, 256  ;;  %v16881_v36 = vld [vmem:[#allocation46_spill] sm:$0xff]  ;;  %v4564_v52 = vcombine.high %v4560_v49, %v4560_v49  ;;  %v13360_v20 = vsel %vm3236_vm4, %v4106_v28, %v4833_v29  ;;  %v16885_v49 = vld [vmem:[#allocation37_spill] sm:$0xff]  ;;  %v4124_v28 = vcombine.high %v4116_v58, %v4116_v58 }
 0x586   : > { %v5841_v24 = vrot.slane %v16881_v36, %v11512_v30  ;;  %16883 = vst [vmem:[#allocation117_spill] sm:$0xff] %v13360_v20  ;;  %v4580_v50 = vcombine.high %v4572_v4, %v4572_v4  ;;  %v16884_v36 = vld [vmem:[#allocation47_spill] sm:$0xff]  ;;  %v4588_v22 = vrot.slane %v4572_v4, %v16748_v61  ;;  %v6769_v29 = vrot.slane %v13360_v20, %v12351_v26 }
 0x587   : > { %6740 = vbcast.lane.b32.xlu1 %v6737_v14, 257  ;;  %v6229_v45 = vpop.permute.xlu1 %6228  ;;  %v4108_v14 = vcombine.high %v4104_v63, %v4104_v63  ;;  %v4837_v63 = vrot.slane %v4564_v52, %v11512_v30 }
 0x588   : > { %v13353_v44 = vpop.permute.xlu0 %5409  ;;  %v4841_v52 = vrot.slane %v4588_v22, %v11512_v30 }
 0x589   : > { %16882 = vst [vmem:[#allocation46_spill] sm:$0xff] %v13353_v44  ;;  %5843 = vbcast.lane.b32.xlu0 %v5841_v24, 256  ;;  %v5855_v44 = vrot.slane %v16884_v36, %v11512_v30  ;;  %v13367_v24 = vsel %vm6918_vm12, %v16885_v49, %v6229_v45  ;;  %v13381_v4 = vsel %vm3236_vm4, %v4108_v14, %v4837_v63 }
 0x58a   : > { %16886 = vst [vmem:[#allocation47_spill] sm:$0xff] %v13367_v24  ;;  %16889 = vst [vmem:[#allocation38_spill] sm:$0xff] %v13381_v4  ;;  %v4132_v45 = vrot.slane %v4116_v58, %v16748_v61  ;;  %v4146_v58 = vrot.slane %v4124_v28, %v16748_v61  ;;  %v4565_v63 = vcombine.high %v10506_v32, %v10506_v32 }
 0x58b   : > { %6756 = vbcast.lane.b32.xlu1 %v6753_v8, 257  ;;  %v6245_v53 = vpop.permute.xlu1 %6244  ;;  %v6785_v8 = vrot.slane %v13381_v4, %v12351_v26  ;;  %v4610_v24 = vcombine.high %v4588_v22, %v4588_v22  ;;  %v4109_v28 = vcombine.high %v10507_v15, %v10507_v15 }
 0x58c   : > { %v13371_v3 = vsel %vm6918_vm12, %v16887_v42, %v6245_v53  ;;  %v13373_v39 = vpop.permute.xlu0 %5423  ;;  %v16890_v42 = vld [vmem:[#allocation48_spill] sm:$0xff]  ;;  %v13393_v14 = vsel %vm3236_vm4, %v4132_v45, %v4841_v52 }
 0x58d   : > { %16888 = vst [vmem:[#allocation37_spill] sm:$0xff] %v13373_v39  ;;  %5857 = vbcast.lane.b32.xlu0 %v5855_v44, 256  ;;  %v5869_v36 = vrot.slane %v16890_v42, %v11512_v30  ;;  %v4602_v44 = vrot.slane %v4580_v50, %v16748_v61  ;;  %v16892_v42 = vld [vmem:[#allocation49_spill] sm:$0xff]  ;;  %v16894_v50 = vld [vmem:[#allocation40_spill] sm:$0xff]  ;;  %v4849_v32 = vrot.slane %v4610_v24, %v11512_v30 }
 0x58e   : > { %v5883_v39 = vrot.slane %v16892_v42, %v11512_v30 }
 0x58f   : > { %6772 = vbcast.lane.b32.xlu1 %v6769_v29, 257  ;;  %v6261_v53 = vpop.permute.xlu1 %6260  ;;  %v4845_v52 = vrot.slane %v4602_v44, %v11512_v30 }
 0x590   : > { %v13386_v49 = vpop.permute.xlu0 %5437 }
 0x591   : > { %16891 = vst [vmem:[#allocation48_spill] sm:$0xff] %v13386_v49  ;;  %5871 = vbcast.lane.b32.xlu0 %v5869_v36, 256  ;;  %v16893_v49 = vld [vmem:[#allocation39_spill] sm:$0xff] }
 0x592   : > { %v13400_v20 = vsel %vm6918_vm12, %v16893_v49, %v6261_v53  ;;  %v13414_v53 = vsel %vm3236_vm4, %v4146_v58, %v4845_v52  ;;  %v4154_v49 = vcombine.high %v4132_v45, %v4132_v45  ;;  %v4123_v52 = vrot.slane %v4109_v28, %v16748_v61 }
 0x593   : > { %6788 = vbcast.lane.b32.xlu1 %v6785_v8, 257  ;;  %v6277_v29 = vpop.permute.xlu1 %6276  ;;  %v6801_v8 = vrot.slane %v13393_v14, %v12351_v26  ;;  %16896 = vst [vmem:[#allocation39_spill] sm:$0xff] %v13414_v53  ;;  %v6817_v15 = vrot.slane %v13414_v53, %v12351_v26 }
 0x594   : > { %v13404_v36 = vsel %vm6918_vm12, %v16894_v50, %v6277_v29  ;;  %v13406_v4 = vpop.permute.xlu0 %5451  ;;  %v4579_v29 = vrot.slane %v4565_v63, %v16748_v61  ;;  %v5897_v50 = vrot.slane %v12609_v46, %v11512_v30  ;;  %v13426_v45 = vsel %vm3236_vm4, %v4154_v49, %v4849_v32 }
 0x595   : > { %16895 = vst [vmem:[#allocation49_spill] sm:$0xff] %v13406_v4  ;;  %5885 = vbcast.lane.b32.xlu0 %v5883_v39, 256  ;;  %v4612_v39 = vcombine.high %v4602_v44, %v4602_v44  ;;  %v4156_v63 = vcombine.high %v4146_v58, %v4146_v58  ;;  %v5913_v46 = vrot.slane %v12622_v9, %v11512_v30  ;;  %v16899_v44 = vld [vmem:[#allocation41_spill] sm:$0xff] }
 0x596   : > { %v4595_v58 = vrot.slane %v4579_v29, %v16748_v61  ;;  %v6833_v9 = vrot.slane %v13426_v45, %v12351_v26 }
 0x597   : > { %6804 = vbcast.lane.b32.xlu1 %v6801_v8, 257  ;;  %v6293_v42 = vpop.permute.xlu1 %6292  ;;  %v4581_v8 = vcombine.high %v4579_v29, %v4579_v29  ;;  %v4853_v32 = vrot.slane %v4612_v39, %v11512_v30  ;;  %v5929_v39 = vrot.slane %v12634_v59, %v11512_v30  ;;  %v5945_v59 = vrot.slane %v12645_v21, %v11512_v30 }
 0x598   : > { %v13419_v22 = vpop.permute.xlu0 %5465  ;;  %v4857_v29 = vrot.slane %v4595_v58, %v11512_v30 }
 0x599   : > { %16897 = vst [vmem:[#allocation40_spill] sm:$0xff] %v13419_v22  ;;  %5900 = vbcast.lane.b32.xlu0 %v5897_v50, 257  ;;  %v16898_v22 = vld [vmem:[#allocation42_spill] sm:$0xff]  ;;  %v13447_v49 = vsel %vm3236_vm4, %v4156_v63, %v4853_v32 }
 0x59a   : > { %v13432_v24 = vsel %vm6918_vm12, %v16898_v22, %v6293_v42  ;;  %v4139_v42 = vrot.slane %v4123_v52, %v16748_v61 }
 0x59b   : > { %6820 = vbcast.lane.b32.xlu1 %v6817_v15, 257  ;;  %v6309_v4 = vpop.permute.xlu1 %6308 }
 0x59c   : > { %v13436_v50 = vsel %vm6918_vm12, %v16899_v44, %v6309_v4  ;;  %v13438_v53 = vpop.permute.xlu0 %5479  ;;  %v4125_v4 = vcombine.high %v4123_v52, %v4123_v52  ;;  %v6849_v44 = vrot.slane %v13447_v49, %v12351_v26  ;;  %v13459_v63 = vsel %vm3236_vm4, %v4139_v42, %v4857_v29 }
 0x59d   : > { %16900 = vst [vmem:[#allocation42_spill] sm:$0xff] %v13438_v53  ;;  %5916 = vbcast.lane.b32.xlu0 %v5913_v46, 257  ;;  %v4609_v46 = vrot.slane %v4581_v8, %v16748_v61  ;;  %v4611_v53 = vcombine.high %v4595_v58, %v4595_v58  ;;  %v6865_v21 = vrot.slane %v13459_v63, %v12351_v26 }
 0x59e   : > { %v4153_v52 = vrot.slane %v4125_v4, %v16748_v61 }
 0x59f   : > { %6836 = vbcast.lane.b32.xlu1 %v6833_v9, 257  ;;  %v6325_v22 = vpop.permute.xlu1 %6324  ;;  %v16902_v9 = vld [vmem:[#allocation50_spill] sm:$0xff]  ;;  %v4861_v29 = vrot.slane %v4609_v46, %v11512_v30  ;;  %v4865_v58 = vrot.slane %v4611_v53, %v11512_v30 }
 0x5a0   : > { %v13452_v15 = vpop.permute.xlu0 %5493  ;;  %v13466_v28 = vsel %vm6918_vm12, %v16902_v9, %v6325_v22  ;;  %v4155_v22 = vcombine.high %v4139_v42, %v4139_v42  ;;  %v4613_v9 = vcombine.high %v4609_v46, %v4609_v46 }
 0x5a1   : > { %16901 = vst [vmem:[#allocation41_spill] sm:$0xff] %v13452_v15  ;;  %5932 = vbcast.lane.b32.xlu0 %v5929_v39, 257  ;;  %v16903_v15 = vld [vmem:[#allocation51_spill] sm:$0xff]  ;;  %v13480_v4 = vsel %vm3236_vm4, %v4153_v52, %v4861_v29  ;;  %v4157_v29 = vcombine.high %v4153_v52, %v4153_v52 }
 0x5a2   : > { %v13490_v61 = vsel %vm3236_vm4, %v4155_v22, %v4865_v58 }
 0x5a3   : > { %6852 = vbcast.lane.b32.xlu1 %v6849_v44, 257  ;;  %v6341_v32 = vpop.permute.xlu1 %6340  ;;  %v6897_v22 = vrot.slane %v13490_v61, %v12351_v26 }
 0x5a4   : > { %v13470_v8 = vsel %vm6918_vm12, %v16903_v15, %v6341_v32  ;;  %v13472_v39 = vpop.permute.xlu0 %5507  ;;  %v5961_v15 = vrot.slane %v12657_v41, %v11512_v30 }
 0x5a5   : > { %16904 = vst [vmem:[#allocation50_spill] sm:$0xff] %v13472_v39  ;;  %5948 = vbcast.lane.b32.xlu0 %v5945_v59, 257  ;;  %v6881_v59 = vrot.slane %v13480_v4, %v12351_v26  ;;  %v16906_v39 = vld [vmem:[#allocation52_spill] sm:$0xff] }
 0x5a7   : > { %6868 = vbcast.lane.b32.xlu1 %v6865_v21, 257  ;;  %v6357_v44 = vpop.permute.xlu1 %6356  ;;  %v5977_v21 = vrot.slane %v12668_v55, %v11512_v30 }
 0x5a8   : > { %v13484_v32 = vpop.permute.xlu0 %5521  ;;  %v13496_v41 = vsel %vm6918_vm12, %v16906_v39, %v6357_v44  ;;  %v5993_v44 = vrot.slane %v12681_v56, %v11512_v30 }
 0x5a9   : > { %16905 = vst [vmem:[#allocation51_spill] sm:$0xff] %v13484_v32  ;;  %5964 = vbcast.lane.b32.xlu0 %v5961_v15, 257  ;;  %v16907_v32 = vld [vmem:[#allocation5_spill] sm:$0xff]  ;;  %v4869_v15 = vrot.slane %v4613_v9, %v11512_v30 }
 0x5ab   : > { %6884 = vbcast.lane.b32.xlu1 %v6881_v59, 257  ;;  %v6373_v42 = vpop.permute.xlu1 %6372  ;;  %v13510_v55 = vsel %vm3236_vm4, %v4157_v29, %v4869_v15  ;;  %v6009_v59 = vrot.slane %v12692_v54, %v11512_v30 }
 0x5ac   : > { %v13500_v53 = vsel %vm6918_vm12, %v16907_v32, %v6373_v42  ;;  %v13502_v46 = vpop.permute.xlu0 %5535  ;;  %v6913_v58 = vrot.slane %v13510_v55, %v12351_v26  ;;  %v16910_v42 = vld [vmem:[#allocation53_spill] sm:$0xff] }
 0x5ad   : > { %16908 = vst [vmem:[#allocation52_spill] sm:$0xff] %v13502_v46  ;;  %5980 = vbcast.lane.b32.xlu0 %v5977_v21, 257  ;;  %v16911_v21 = vld [vmem:[#allocation54_spill] sm:$0xff] }
 0x5af   : > { %6900 = vbcast.lane.b32.xlu1 %v6897_v22, 257  ;;  %v6389_v39 = vpop.permute.xlu1 %6388 }
 0x5b0   : > { %v13514_v32 = vpop.permute.xlu0 %5549  ;;  %v13522_v29 = vsel %vm6918_vm12, %v16910_v42, %v6389_v39  ;;  %v6041_v39 = vrot.slane %v12717_v62, %v11512_v30  ;;  %v16914_v42 = vld [vmem:[#allocation55_spill] sm:$0xff] }
 0x5b1   : > { %16909 = vst [vmem:[#allocation5_spill] sm:$0xff] %v13514_v32  ;;  %5996 = vbcast.lane.b32.xlu0 %v5993_v44, 257  ;;  %v6025_v44 = vrot.slane %v12704_v1, %v11512_v30 }
 0x5b3   : > { %6916 = vbcast.lane.b32.xlu1 %v6913_v58, 257  ;;  %v6405_v9 = vpop.permute.xlu1 %6404 }
 0x5b4   : > { %v13526_v15 = vsel %vm6918_vm12, %v16911_v21, %v6405_v9  ;;  %v13528_v56 = vpop.permute.xlu0 %5563  ;;  %v16915_v21 = vld [vmem:[#allocation56_spill] sm:$0xff] }
 0x5b5   : > { %16912 = vst [vmem:[#allocation53_spill] sm:$0xff] %v13528_v56  ;;  %6012 = vbcast.lane.b32.xlu0 %v6009_v59, 257 }
 0x5b7   : > { %v6421_v26 = vpop.permute.xlu1 %6420 }
 0x5b8   : > { %v13534_v58 = vpop.permute.xlu0 %5577  ;;  %v13540_v9 = vsel %vm6918_vm12, %v16914_v42, %v6421_v26  ;;  %v6073_v26 = vrot.slane %v12740_v5, %v11512_v30  ;;  %v16918_v42 = vld [vmem:[#allocation57_spill] sm:$0xff] }
 0x5b9   : > { %16913 = vst [vmem:[#allocation54_spill] sm:$0xff] %v13534_v58  ;;  %6028 = vbcast.lane.b32.xlu0 %v6025_v44, 257  ;;  %v6057_v44 = vrot.slane %v12729_v11, %v11512_v30 }
 0x5bb   : > { %v6437_v54 = vpop.permute.xlu1 %6436 }
 0x5bc   : > { %v13544_v52 = vsel %vm6918_vm12, %v16915_v21, %v6437_v54  ;;  %v13546_v59 = vpop.permute.xlu0 %5591  ;;  %v16919_v21 = vld [vmem:[#allocation58_spill] sm:$0xff] }
 0x5bd   : > { %16916 = vst [vmem:[#allocation55_spill] sm:$0xff] %v13546_v59  ;;  %6044 = vbcast.lane.b32.xlu0 %v6041_v39, 257 }
 0x5bf   : > { %v6453_v22 = vpop.permute.xlu1 %6452 }
 0x5c0   : > { %v13552_v58 = vpop.permute.xlu0 %5605  ;;  %v13558_v54 = vsel %vm6918_vm12, %v16918_v42, %v6453_v22  ;;  %v6105_v22 = vrot.slane %v12763_v60, %v11512_v30  ;;  %v16922_v42 = vld [vmem:[#allocation59_spill] sm:$0xff] }
 0x5c1   : > { %16917 = vst [vmem:[#allocation56_spill] sm:$0xff] %v13552_v58  ;;  %6060 = vbcast.lane.b32.xlu0 %v6057_v44, 257  ;;  %v6089_v44 = vrot.slane %v12752_v23, %v11512_v30 }
 0x5c3   : > { %v6469_v62 = vpop.permute.xlu1 %6468 }
 0x5c4   : > { %v13562_v59 = vsel %vm6918_vm12, %v16919_v21, %v6469_v62  ;;  %v13564_v39 = vpop.permute.xlu0 %5619  ;;  %v16923_v21 = vld [vmem:[#allocation60_spill] sm:$0xff] }
 0x5c5   : > { %16920 = vst [vmem:[#allocation57_spill] sm:$0xff] %v13564_v39  ;;  %6076 = vbcast.lane.b32.xlu0 %v6073_v26, 257 }
 0x5c7   : > { %v6485_v1 = vpop.permute.xlu1 %6484 }
 0x5c8   : > { %v13570_v58 = vpop.permute.xlu0 %5633  ;;  %v13576_v62 = vsel %vm6918_vm12, %v16922_v42, %v6485_v1  ;;  %v6137_v1 = vrot.slane %v12786_v38, %v11512_v30  ;;  %v16926_v42 = vld [vmem:[#allocation61_spill] sm:$0xff] }
 0x5c9   : > { %16921 = vst [vmem:[#allocation58_spill] sm:$0xff] %v13570_v58  ;;  %6092 = vbcast.lane.b32.xlu0 %v6089_v44, 257  ;;  %v6121_v44 = vrot.slane %v12775_v40, %v11512_v30 }
 0x5cb   : > { %v6501_v5 = vpop.permute.xlu1 %6500 }
 0x5cc   : > { %v13580_v39 = vsel %vm6918_vm12, %v16923_v21, %v6501_v5  ;;  %v13582_v26 = vpop.permute.xlu0 %5647  ;;  %v16928_v21 = vld [vmem:[#allocation62_spill] sm:$0xff] }
 0x5cd   : > { %16924 = vst [vmem:[#allocation59_spill] sm:$0xff] %v13582_v26  ;;  %6108 = vbcast.lane.b32.xlu0 %v6105_v22, 257 }
 0x5cf   : > { %v6517_v11 = vpop.permute.xlu1 %6516 }
 0x5d0   : > { %v13588_v58 = vpop.permute.xlu0 %5661  ;;  %v13594_v5 = vsel %vm6918_vm12, %v16926_v42, %v6517_v11  ;;  %v6169_v11 = vrot.slane %v12809_v47, %v11512_v30  ;;  %v16932_v42 = vld [vmem:[#allocation63_spill] sm:$0xff] }
 0x5d1   : > { %16925 = vst [vmem:[#allocation60_spill] sm:$0xff] %v13588_v58  ;;  %6124 = vbcast.lane.b32.xlu0 %v6121_v44, 257  ;;  %16927 = vst [vmem:[#allocation61_spill] sm:$0xff] %v13594_v5  ;;  %v6153_v44 = vrot.slane %v12798_v31, %v11512_v30 }
 0x5d3   : > { %v6533_v60 = vpop.permute.xlu1 %6532 }
 0x5d4   : > { %v13598_v26 = vsel %vm6918_vm12, %v16928_v21, %v6533_v60  ;;  %v13600_v22 = vpop.permute.xlu0 %5675  ;;  %v16934_v21 = vld [vmem:[#allocation64_spill] sm:$0xff] }
 0x5d5   : > { %16929 = vst [vmem:[#allocation62_spill] sm:$0xff] %v13598_v26  ;;  %16930 = vst [vmem:[#allocation118_spill] sm:$0xff] %v13600_v22  ;;  %6140 = vbcast.lane.b32.xlu0 %v6137_v1, 257 }
 0x5d7   : > { %v6549_v23 = vpop.permute.xlu1 %6548 }
 0x5d8   : > { %v13606_v58 = vpop.permute.xlu0 %5689  ;;  %v13612_v60 = vsel %vm6918_vm12, %v16932_v42, %v6549_v23  ;;  %v6201_v23 = vrot.slane %v12832_v25, %v11512_v30  ;;  %v16938_v42 = vld [vmem:[#allocation65_spill] sm:$0xff] }
 0x5d9   : > { %16931 = vst [vmem:[#allocation119_spill] sm:$0xff] %v13606_v58  ;;  %6156 = vbcast.lane.b32.xlu0 %v6153_v44, 257  ;;  %16933 = vst [vmem:[#allocation63_spill] sm:$0xff] %v13612_v60  ;;  %v6185_v44 = vrot.slane %v12821_v27, %v11512_v30  ;;  %v17011_v60 = vld [vmem:[#allocation100_spill] sm:$0xff] }
 0x5db   : > { %v6565_v38 = vpop.permute.xlu1 %6564 }
 0x5dc   : > { %v13616_v22 = vsel %vm6918_vm12, %v16934_v21, %v6565_v38  ;;  %v13618_v1 = vpop.permute.xlu0 %5703  ;;  %v16940_v21 = vld [vmem:[#allocation66_spill] sm:$0xff] }
 0x5dd   : > { %16935 = vst [vmem:[#allocation64_spill] sm:$0xff] %v13616_v22  ;;  %16936 = vst [vmem:[#allocation120_spill] sm:$0xff] %v13618_v1  ;;  %6172 = vbcast.lane.b32.xlu0 %v6169_v11, 257  ;;  %v6489_v22 = vrot.slane %v17011_v60, %v11512_v30  ;;  %v17019_v60 = vld [vmem:[#allocation88_spill] sm:$0xff] }
 0x5df   : > { %v6581_v40 = vpop.permute.xlu1 %6580 }
 0x5e0   : > { %v13624_v58 = vpop.permute.xlu0 %5717  ;;  %v13630_v38 = vsel %vm6918_vm12, %v16938_v42, %v6581_v40  ;;  %v6233_v40 = vrot.slane %v12855_v43, %v11512_v30  ;;  %v16944_v42 = vld [vmem:[#allocation67_spill] sm:$0xff] }
 0x5e1   : > { %16937 = vst [vmem:[#allocation121_spill] sm:$0xff] %v13624_v58  ;;  %6188 = vbcast.lane.b32.xlu0 %v6185_v44, 257  ;;  %16939 = vst [vmem:[#allocation65_spill] sm:$0xff] %v13630_v38  ;;  %v6217_v44 = vrot.slane %v12844_v51, %v11512_v30  ;;  %v16999_v38 = vld [vmem:[#allocation98_spill] sm:$0xff] }
 0x5e3   : > { %v6597_v47 = vpop.permute.xlu1 %6596 }
 0x5e4   : > { %v13634_v1 = vsel %vm6918_vm12, %v16940_v21, %v6597_v47  ;;  %v13636_v11 = vpop.permute.xlu0 %5731  ;;  %v16946_v21 = vld [vmem:[#allocation68_spill] sm:$0xff] }
 0x5e5   : > { %16941 = vst [vmem:[#allocation66_spill] sm:$0xff] %v13634_v1  ;;  %16942 = vst [vmem:[#allocation122_spill] sm:$0xff] %v13636_v11  ;;  %6204 = vbcast.lane.b32.xlu0 %v6201_v23, 257  ;;  %v6457_v1 = vrot.slane %v16999_v38, %v11512_v30 }
 0x5e7   : > { %v6613_v31 = vpop.permute.xlu1 %6612 }
 0x5e8   : > { %v13642_v58 = vpop.permute.xlu0 %5745  ;;  %v13648_v47 = vsel %vm6918_vm12, %v16944_v42, %v6613_v31  ;;  %v6265_v31 = vrot.slane %v12878_v10, %v11512_v30  ;;  %v16950_v42 = vld [vmem:[#allocation69_spill] sm:$0xff] }
 0x5e9   : > { %16943 = vst [vmem:[#allocation123_spill] sm:$0xff] %v13642_v58  ;;  %6220 = vbcast.lane.b32.xlu0 %v6217_v44, 257  ;;  %16945 = vst [vmem:[#allocation67_spill] sm:$0xff] %v13648_v47  ;;  %v6249_v44 = vrot.slane %v12867_v13, %v11512_v30  ;;  %v16995_v47 = vld [vmem:[#allocation80_spill] sm:$0xff] }
 0x5eb   : > { %v6629_v25 = vpop.permute.xlu1 %6628 }
 0x5ec   : > { %v13652_v11 = vsel %vm6918_vm12, %v16946_v21, %v6629_v25  ;;  %v13654_v23 = vpop.permute.xlu0 %5759  ;;  %v16952_v21 = vld [vmem:[#allocation70_spill] sm:$0xff] }
 0x5ed   : > { %16947 = vst [vmem:[#allocation68_spill] sm:$0xff] %v13652_v11  ;;  %16948 = vst [vmem:[#allocation124_spill] sm:$0xff] %v13654_v23  ;;  %6236 = vbcast.lane.b32.xlu0 %v6233_v40, 257 }
 0x5ef   : > { %v6645_v27 = vpop.permute.xlu1 %6644 }
 0x5f0   : > { %v13660_v58 = vpop.permute.xlu0 %5773  ;;  %v13666_v25 = vsel %vm6918_vm12, %v16950_v42, %v6645_v27  ;;  %v6297_v27 = vrot.slane %v12909_v16, %v11512_v30  ;;  %v16956_v42 = vld [vmem:[#allocation71_spill] sm:$0xff] }
 0x5f1   : > { %16949 = vst [vmem:[#allocation125_spill] sm:$0xff] %v13660_v58  ;;  %6252 = vbcast.lane.b32.xlu0 %v6249_v44, 257  ;;  %16951 = vst [vmem:[#allocation69_spill] sm:$0xff] %v13666_v25  ;;  %v6281_v44 = vrot.slane %v12892_v34, %v11512_v30  ;;  %v16986_v25 = vld [vmem:[#allocation95_spill] sm:$0xff] }
 0x5f3   : > { %v6661_v43 = vpop.permute.xlu1 %6660 }
 0x5f4   : > { %v13670_v23 = vsel %vm6918_vm12, %v16952_v21, %v6661_v43  ;;  %v13672_v40 = vpop.permute.xlu0 %5787  ;;  %v16958_v21 = vld [vmem:[#allocation72_spill] sm:$0xff] }
 0x5f5   : > { %16953 = vst [vmem:[#allocation70_spill] sm:$0xff] %v13670_v23  ;;  %16954 = vst [vmem:[#allocation126_spill] sm:$0xff] %v13672_v40  ;;  %6268 = vbcast.lane.b32.xlu0 %v6265_v31, 257  ;;  %v6425_v23 = vrot.slane %v16986_v25, %v11512_v30 }
 0x5f7   : > { %v6677_v51 = vpop.permute.xlu1 %6676 }
 0x5f8   : > { %v13678_v58 = vpop.permute.xlu0 %5801  ;;  %v13684_v43 = vsel %vm6918_vm12, %v16956_v42, %v6677_v51  ;;  %v6329_v51 = vrot.slane %v12937_v57, %v11512_v30  ;;  %v16962_v42 = vld [vmem:[#allocation73_spill] sm:$0xff] }
 0x5f9   : > { %16955 = vst [vmem:[#allocation127_spill] sm:$0xff] %v13678_v58  ;;  %6284 = vbcast.lane.b32.xlu0 %v6281_v44, 257  ;;  %16957 = vst [vmem:[#allocation71_spill] sm:$0xff] %v13684_v43  ;;  %v6313_v44 = vrot.slane %v12924_v6, %v11512_v30  ;;  %v10600_v6 = vmov 1983009808  }
 0x5fb   : > { %v6693_v10 = vpop.permute.xlu1 %6692 }
 0x5fc   : > { %v13688_v40 = vsel %vm6918_vm12, %v16958_v21, %v6693_v10  ;;  %v13690_v31 = vpop.permute.xlu0 %5815  ;;  %v16964_v21 = vld [vmem:[#allocation74_spill] sm:$0xff] }
 0x5fd   : > { %16959 = vst [vmem:[#allocation72_spill] sm:$0xff] %v13688_v40  ;;  %16960 = vst [vmem:[#allocation128_spill] sm:$0xff] %v13690_v31  ;;  %6300 = vbcast.lane.b32.xlu0 %v6297_v27, 257  ;;  %v16982_v40 = vld [vmem:[#allocation6_spill] sm:$0xff] }
 0x5ff   : > { %v6709_v13 = vpop.permute.xlu1 %6708 }
 0x600   : > { %v13696_v58 = vpop.permute.xlu0 %5829  ;;  %v13702_v10 = vsel %vm6918_vm12, %v16962_v42, %v6709_v13  ;;  %v6361_v13 = vrot.slane %v12964_v35, %v11512_v30  ;;  %v16968_v42 = vld [vmem:[#allocation75_spill] sm:$0xff]  ;;  %v6377_v35 = vrot.slane %v12978_v2, %v11512_v30 }
 0x601   : > { %16961 = vst [vmem:[#allocation129_spill] sm:$0xff] %v13696_v58  ;;  %6316 = vbcast.lane.b32.xlu0 %v6313_v44, 257  ;;  %16963 = vst [vmem:[#allocation73_spill] sm:$0xff] %v13702_v10  ;;  %v6345_v44 = vrot.slane %v12951_v37, %v11512_v30  ;;  %v16974_v10 = vld [vmem:[#allocation76_spill] sm:$0xff]  ;;  %v16976_v37 = vld [vmem:[#allocation77_spill] sm:$0xff] }
 0x603   : > { %v6725_v16 = vpop.permute.xlu1 %6724 }
 0x604   : > { %v13706_v31 = vsel %vm6918_vm12, %v16964_v21, %v6725_v16  ;;  %v13708_v27 = vpop.permute.xlu0 %5843 }
 0x605   : > { %16965 = vst [vmem:[#allocation74_spill] sm:$0xff] %v13706_v31  ;;  %16966 = vst [vmem:[#allocation130_spill] sm:$0xff] %v13708_v27  ;;  %6332 = vbcast.lane.b32.xlu0 %v6329_v51, 257  ;;  %v16981_v31 = vld [vmem:[#allocation92_spill] sm:$0xff] }
 0x607   : > { %v6741_v34 = vpop.permute.xlu1 %6740 }
 0x608   : > { %v13714_v58 = vpop.permute.xlu0 %5857  ;;  %v13720_v16 = vsel %vm6918_vm12, %v16968_v42, %v6741_v34 }
 0x609   : > { %16967 = vst [vmem:[#allocation131_spill] sm:$0xff] %v13714_v58  ;;  %6348 = vbcast.lane.b32.xlu0 %v6345_v44, 257  ;;  %16969 = vst [vmem:[#allocation75_spill] sm:$0xff] %v13720_v16  ;;  %v7050_v44 = vunpack.c.l.s4 %v10600_v6 }
 0x60b   : > { %v6757_v57 = vpop.permute.xlu1 %6756  ;;  %v7051_v34 = vunpack.c.0.s8 %v7050_v44  ;;  %v16979_v44 = vld [vmem:[#allocation8_spill] sm:$0xff] }
 0x60c   : > { %v13724_v21 = vsel %vm6918_vm12, %v12869_v17, %v6757_v57  ;;  %v13726_v51 = vpop.permute.xlu0 %5871  ;;  %v16973_v17 = vld [vmem:[#allocation89_spill] sm:$0xff] }
 0x60d   : > { %16970 = vst [vmem:[#allocation132_spill] sm:$0xff] %v13724_v21  ;;  %16971 = vst [vmem:[#allocation133_spill] sm:$0xff] %v13726_v51  ;;  %6364 = vbcast.lane.b32.xlu0 %v6361_v13, 257  ;;  %v6393_v57 = vrot.slane %v16973_v17, %v11512_v30  ;;  %v16980_v21 = vld [vmem:[#allocation27_spill] sm:$0xff] }
 0x60e   : > { %v7063_v16 = vcombine.low %v16980_v21, %v16979_v44 }
 0x60f   : > { %v6773_v58 = vpop.permute.xlu1 %6772 }
 0x610   : > { %v13732_v27 = vpop.permute.xlu0 %5885  ;;  %v13738_v51 = vsel %vm6918_vm12, %v16974_v10, %v6773_v58  ;;  %v6409_v58 = vrot.slane %v16981_v31, %v11512_v30 }
 0x611   : > { %16972 = vst [vmem:[#allocation134_spill] sm:$0xff] %v13732_v27  ;;  %6380 = vbcast.lane.b32.xlu0 %v6377_v35, 257  ;;  %16975 = vst [vmem:[#allocation89_spill] sm:$0xff] %v13738_v51  ;;  %v16978_v27 = vld [vmem:[#allocation4_spill] sm:$0xff]  ;;  %v16984_v51 = vcombine.high %v16980_v21, %v16979_v44 }
 0x612   : > { %v13747_v35 = vsub.s32 %v7051_v34, %v16978_v27 }
 0x613   : > { %v6789_v42 = vpop.permute.xlu1 %6788 }
 0x614   : > { %v13742_v13 = vsel %vm6918_vm12, %v16976_v37, %v6789_v42  ;;  %v5901_v6 = vpop.permute.xlu0 %5900  ;;  %v16983_v42 = vld [vmem:[#allocation7_spill] sm:$0xff]  ;;  %v13758_v34 = vrot.slane %v7063_v16, %v13747_v35 }
 0x615   : > { %16977 = vst [vmem:[#allocation76_spill] sm:$0xff] %v13742_v13  ;;  %6396 = vbcast.lane.b32.xlu0 %v6393_v57, 257  ;;  %v6919_v37 = vsel %vm6918_vm12, %v16982_v40, %v5901_v6  ;;  %v13764_v13 = vrot.slane %v16984_v51, %v13747_v35  ;;  %v16987_v40 = vld [vmem:[#allocation78_spill] sm:$0xff]  ;;  %v16990_v16 = vld [vmem:[#allocation79_spill] sm:$0xff] }
 0x616   : > { %v16996_v51 = vld [vmem:[#allocation82_spill] sm:$0xff] }
 0x617   : > { %v6805_v17 = vpop.permute.xlu1 %6804  ;;  %16985 = vst [vmem:[#allocation77_spill] sm:$0xff] %v13764_v13 }
 0x618   : > { %v5917_v10 = vpop.permute.xlu0 %5916  ;;  %v13770_v6 = vsel %vm6918_vm12, %v16987_v40, %v6805_v17  ;;  %v16992_v17 = vld [vmem:[#allocation9_spill] sm:$0xff] }
 0x619   : > { %v6921_v43 = vsel %vm6918_vm12, %v16983_v42, %v5917_v10  ;;  %6412 = vbcast.lane.b32.xlu0 %v6409_v58, 257  ;;  %16988 = vst [vmem:[#allocation4_spill] sm:$0xff] %v13770_v6 }
 0x61a   : > { %v7047_v2 = vcombine.low %v6919_v37, %v6921_v43  ;;  %v7048_v57 = vcombine.high %v6919_v37, %v6921_v43  ;;  %v16993_v37 = vld [vmem:[#allocation29_spill] sm:$0xff] }
 0x61b   : > { %v6821_v31 = vpop.permute.xlu1 %6820  ;;  %v7095_v42 = vcombine.low %v16993_v37, %v16992_v17 }
 0x61c   : > { %v13773_v58 = vrot.slane %v7047_v2, %v13747_v35  ;;  %v13776_v43 = vrot.slane %v7048_v57, %v13747_v35  ;;  %v13780_v10 = vsel %vm6918_vm12, %v16990_v16, %v6821_v31  ;;  %v5933_v21 = vpop.permute.xlu0 %5932  ;;  %v16994_v31 = vld [vmem:[#allocation96_spill] sm:$0xff]  ;;  %v16997_v2 = vcombine.high %v16993_v37, %v16992_v17  ;;  %v17008_v17 = vld [vmem:[#allocation86_spill] sm:$0xff] }
 0x61d   : > { %16991 = vst [vmem:[#allocation27_spill] sm:$0xff] %v13780_v10  ;;  %6428 = vbcast.lane.b32.xlu0 %v6425_v23, 257  ;;  %v6441_v40 = vrot.slane %v16994_v31, %v11512_v30  ;;  %v6923_v23 = vsel %vm6918_vm12, %v16995_v47, %v5933_v21  ;;  %v13799_v6 = vrot.slane %v7095_v42, %v13747_v35  ;;  %v17000_v47 = vld [vmem:[#allocation81_spill] sm:$0xff]  ;;  %v17003_v42 = vld [vmem:[#allocation83_spill] sm:$0xff] }
 0x61e   : > { %16989 = vst [vmem:[#allocation8_spill] sm:$0xff] %v13776_v43  ;;  %v13805_v11 = vrot.slane %v16997_v2, %v13747_v35 }
 0x61f   : > { %v6837_v57 = vpop.permute.xlu1 %6836 }
 0x620   : > { %v5949_v16 = vpop.permute.xlu0 %5948  ;;  %16998 = vst [vmem:[#allocation92_spill] sm:$0xff] %v13805_v11  ;;  %v13811_v21 = vsel %vm6918_vm12, %v17000_v47, %v6837_v57 }
 0x621   : > { %v6925_v25 = vsel %vm6918_vm12, %v16996_v51, %v5949_v16  ;;  %6444 = vbcast.lane.b32.xlu0 %v6441_v40, 257  ;;  %17001 = vst [vmem:[#allocation6_spill] sm:$0xff] %v13811_v21 }
 0x622   : > { %v7079_v10 = vcombine.low %v6923_v23, %v6925_v25  ;;  %v7080_v44 = vcombine.high %v6923_v23, %v6925_v25  ;;  %v17006_v23 = vld [vmem:[#allocation99_spill] sm:$0xff] }
 0x623   : > { %v6853_v31 = vpop.permute.xlu1 %6852 }
 0x624   : > { %v13814_v51 = vrot.slane %v7079_v10, %v13747_v35  ;;  %v13817_v25 = vrot.slane %v7080_v44, %v13747_v35  ;;  %v13821_v40 = vsel %vm6918_vm12, %v17003_v42, %v6853_v31  ;;  %v5965_v2 = vpop.permute.xlu0 %5964  ;;  %v17005_v44 = vld [vmem:[#allocation31_spill] sm:$0xff]  ;;  %v6473_v31 = vrot.slane %v17006_v23, %v11512_v30  ;;  %v17007_v42 = vld [vmem:[#allocation84_spill] sm:$0xff] }
 0x625   : > { %17004 = vst [vmem:[#allocation95_spill] sm:$0xff] %v13821_v40  ;;  %6460 = vbcast.lane.b32.xlu0 %v6457_v1, 257  ;;  %v7199_v57 = vcombine.low %v17005_v44, %v13107_v33  ;;  %v6927_v1 = vsel %vm6918_vm12, %v17007_v42, %v5965_v2  ;;  %v17009_v10 = vcombine.high %v17005_v44, %v13107_v33  ;;  %v17012_v2 = vld [vmem:[#allocation85_spill] sm:$0xff] }
 0x626   : > { %17002 = vst [vmem:[#allocation7_spill] sm:$0xff] %v13817_v25 }
 0x627   : > { %v6869_v16 = vpop.permute.xlu1 %6868  ;;  %v13840_v40 = vrot.slane %v7199_v57, %v13747_v35  ;;  %v13846_v56 = vrot.slane %v17009_v10, %v13747_v35  ;;  %v17015_v57 = vld [vmem:[#allocation87_spill] sm:$0xff]  ;;  %v10601_v10 = vmov 1934713408  }
 0x628   : > { %v5981_v47 = vpop.permute.xlu0 %5980  ;;  %v13852_v42 = vsel %vm6918_vm12, %v17012_v2, %v6869_v16  ;;  %v7114_v44 = vunpack.c.l.s4 %v10601_v10  ;;  %v17018_v2 = vld [vmem:[#allocation101_spill] sm:$0xff] }
 0x629   : > { %v6929_v38 = vsel %vm6918_vm12, %v17008_v17, %v5981_v47  ;;  %6476 = vbcast.lane.b32.xlu0 %v6473_v31, 257  ;;  %17010 = vst [vmem:[#allocation78_spill] sm:$0xff] %v13846_v56  ;;  %17013 = vst [vmem:[#allocation79_spill] sm:$0xff] %v13852_v42  ;;  %v17017_v47 = vld [vmem:[#allocation33_spill] sm:$0xff] }
 0x62a   : > { %v7183_v21 = vcombine.low %v6927_v1, %v6929_v38  ;;  %v7184_v37 = vcombine.high %v6927_v1, %v6929_v38  ;;  %v7231_v1 = vcombine.low %v17017_v47, %v13140_v7  ;;  %v7115_v32 = vunpack.c.0.s8 %v7114_v44 }
 0x62b   : > { %v6885_v23 = vpop.permute.xlu1 %6884  ;;  %v17021_v56 = vcombine.high %v17017_v47, %v13140_v7  ;;  %v17027_v7 = vld [vmem:[#allocation93_spill] sm:$0xff] }
 0x62c   : > { %v13855_v17 = vrot.slane %v7183_v21, %v13747_v35  ;;  %v13858_v38 = vrot.slane %v7184_v37, %v13747_v35  ;;  %v13862_v31 = vsel %vm6918_vm12, %v17015_v57, %v6885_v23  ;;  %v5997_v33 = vpop.permute.xlu0 %5996  ;;  %v6505_v57 = vrot.slane %v17018_v2, %v11512_v30 }
 0x62d   : > { %17016 = vst [vmem:[#allocation29_spill] sm:$0xff] %v13862_v31  ;;  %6492 = vbcast.lane.b32.xlu0 %v6489_v22, 257  ;;  %v6931_v22 = vsel %vm6918_vm12, %v17019_v60, %v5997_v33  ;;  %v17020_v31 = vld [vmem:[#allocation91_spill] sm:$0xff]  ;;  %v13881_v37 = vrot.slane %v7231_v1, %v13747_v35  ;;  %v17023_v33 = vld [vmem:[#allocation12_spill] sm:$0xff] }
 0x62e   : > { %17014 = vst [vmem:[#allocation9_spill] sm:$0xff] %v13858_v38  ;;  %v13887_v38 = vrot.slane %v17021_v56, %v13747_v35  ;;  %v7247_v44 = vcombine.low %v13855_v17, %v13840_v40  ;;  %v6521_v60 = vrot.slane %v17023_v33, %v11512_v30  ;;  %v17029_v33 = vld [vmem:[#allocation102_spill] sm:$0xff] }
 0x62f   : > { %v6901_v23 = vpop.permute.xlu1 %6900 }
 0x630   : > { %v6013_v10 = vpop.permute.xlu0 %6012  ;;  %17022 = vst [vmem:[#allocation96_spill] sm:$0xff] %v13887_v38  ;;  %v17034_v38 = vld [vmem:[#allocation14_spill] sm:$0xff] }
 0x631   : > { %v6933_v16 = vsel %vm6918_vm12, %v17020_v31, %v6013_v10  ;;  %6508 = vbcast.lane.b32.xlu0 %v6505_v57, 257  ;;  %v17024_v31 = vld [vmem:[#allocation90_spill] sm:$0xff]  ;;  %v13908_v10 = vsub.s32 %v7115_v32, %v16978_v27  ;;  %v6537_v32 = vrot.slane %v17029_v33, %v11512_v30  ;;  %v7335_v27 = vcombine.low %v13168_v18, %v13172_v48 }
 0x632   : > { %v7215_v21 = vcombine.low %v6931_v22, %v6933_v16  ;;  %v7216_v42 = vcombine.high %v6931_v22, %v6933_v16  ;;  %v13895_v57 = vsel %vm6918_vm12, %v17024_v31, %v6901_v23  ;;  %v17032_v22 = vld [vmem:[#allocation94_spill] sm:$0xff] }
 0x633   : > { %v6917_v2 = vpop.permute.xlu1 %6916  ;;  %17025 = vst [vmem:[#allocation80_spill] sm:$0xff] %v13895_v57 }
 0x634   : > { %v13898_v16 = vrot.slane %v7215_v21, %v13747_v35  ;;  %v13901_v1 = vrot.slane %v7216_v42, %v13747_v35  ;;  %v13905_v56 = vsel %vm6918_vm12, %v17027_v7, %v6917_v2  ;;  %v6029_v47 = vpop.permute.xlu0 %6028  ;;  %v17033_v42 = vld [vmem:[#allocation26_spill] sm:$0xff] }
 0x635   : > { %17028 = vst [vmem:[#allocation98_spill] sm:$0xff] %v13905_v56  ;;  %6524 = vbcast.lane.b32.xlu0 %v6521_v60, 257  ;;  %v13925_v60 = vrot.slane %v7247_v44, %v13908_v10  ;;  %v6935_v21 = vsel %vm6918_vm12, %v17032_v22, %v6029_v47  ;;  %v17035_v47 = vcombine.high %v13168_v18, %v13172_v48  ;;  %v17038_v48 = vld [vmem:[#allocation103_spill] sm:$0xff]  ;;  %v17041_v44 = vld [vmem:[#allocation97_spill] sm:$0xff] }
 0x636   : > { %17026 = vst [vmem:[#allocation82_spill] sm:$0xff] %v13901_v1  ;;  %v7279_v23 = vcombine.low %v13898_v16, %v13881_v37  ;;  %v13941_v1 = vrot.slane %v7335_v27, %v13747_v35  ;;  %v17039_v27 = vld [vmem:[#allocation17_spill] sm:$0xff] }
 0x637   : > { %17030 = vst [vmem:[#allocation81_spill] sm:$0xff] %v13925_v60  ;;  %v13947_v22 = vrot.slane %v17035_v47, %v13747_v35 }
 0x638   : > { %v13928_v31 = vrot.slane %v7279_v23, %v13908_v10  ;;  %v6045_v7 = vpop.permute.xlu0 %6044  ;;  %v6553_v23 = vrot.slane %v17034_v38, %v11512_v30 }
 0x639   : > { %v6937_v57 = vsel %vm6918_vm12, %v17033_v42, %v6045_v7  ;;  %6540 = vbcast.lane.b32.xlu0 %v6537_v32, 257  ;;  %17036 = vst [vmem:[#allocation31_spill] sm:$0xff] %v13947_v22  ;;  %v17043_v32 = vld [vmem:[#allocation15_spill] sm:$0xff] }
 0x63a   : > { %17031 = vst [vmem:[#allocation83_spill] sm:$0xff] %v13928_v31  ;;  %v7319_v2 = vcombine.low %v6935_v21, %v6937_v57  ;;  %v7320_v56 = vcombine.high %v6935_v21, %v6937_v57  ;;  %v7312_v33 = vcombine.high %v13925_v60, %v13928_v31  ;;  %v6585_v46 = vrot.slane %v17043_v32, %v11512_v30  ;;  %v17050_v32 = vld [vmem:[#allocation106_spill] sm:$0xff] }
 0x63c   : > { %v13950_v57 = vrot.slane %v7319_v2, %v13747_v35  ;;  %v13953_v21 = vrot.slane %v7320_v56, %v13747_v35  ;;  %9241 = vrot.lane.b32.xlu1 %v7312_v33, %s10602_s12  ;;  %v6061_v42 = vpop.permute.xlu0 %6060  ;;  %v6569_v2 = vrot.slane %v17038_v48, %v11512_v30  ;;  %v17040_v56 = vld [vmem:[#allocation18_spill] sm:$0xff] }
 0x63d   : > { %6556 = vbcast.lane.b32.xlu0 %v6553_v23, 257  ;;  %v7367_v7 = vcombine.low %v17040_v56, %v17039_v27  ;;  %v6939_v33 = vsel %vm6918_vm12, %v17041_v44, %v6061_v42  ;;  %v17042_v23 = vld [vmem:[#allocation28_spill] sm:$0xff]  ;;  %v17044_v48 = vcombine.high %v17040_v56, %v17039_v27 }
 0x63e   : > { %17037 = vst [vmem:[#allocation99_spill] sm:$0xff] %v13953_v21  ;;  %v17047_v27 = vld [vmem:[#allocation104_spill] sm:$0xff]  ;;  %v6617_v21 = vrot.slane %v17050_v32, %v11512_v30 }
 0x63f   : > { %v13973_v18 = vrot.slane %v7367_v7, %v13747_v35  ;;  %v13979_v22 = vrot.slane %v17044_v48, %v13747_v35  ;;  %v6601_v56 = vrot.slane %v17047_v27, %v11512_v30  ;;  %v17051_v27 = vcombine.high %v13235_v12, %v13239_v0 }
 0x640   : > { %v6077_v47 = vpop.permute.xlu0 %6076 }
 0x641   : > { %v6941_v31 = vsel %vm6918_vm12, %v17042_v23, %v6077_v47  ;;  %6572 = vbcast.lane.b32.xlu0 %v6569_v2, 257  ;;  %17045 = vst [vmem:[#allocation84_spill] sm:$0xff] %v13979_v22  ;;  %v14010_v22 = vrot.slane %v17051_v27, %v13747_v35 }
 0x642   : > { %v7351_v38 = vcombine.low %v6939_v33, %v6941_v31  ;;  %v7352_v60 = vcombine.high %v6939_v33, %v6941_v31 }
 0x643   : > { %17052 = vst [vmem:[#allocation100_spill] sm:$0xff] %v14010_v22 }
 0x644   : > { %v13982_v44 = vrot.slane %v7351_v38, %v13747_v35  ;;  %v13985_v42 = vrot.slane %v7352_v60, %v13747_v35  ;;  %v6093_v2 = vpop.permute.xlu0 %6092  ;;  %v7471_v38 = vcombine.low %v13235_v12, %v13239_v0  ;;  %v17048_v60 = vld [vmem:[#allocation10_spill] sm:$0xff]  ;;  %v17054_v0 = vld [vmem:[#allocation21_spill] sm:$0xff] }
 0x645   : > { %6588 = vbcast.lane.b32.xlu0 %v6585_v46, 257  ;;  %v6943_v33 = vsel %vm6918_vm12, %v17048_v60, %v6093_v2  ;;  %v17049_v46 = vld [vmem:[#allocation30_spill] sm:$0xff]  ;;  %v7503_v12 = vcombine.low %v17054_v0, %v13272_v19  ;;  %v17058_v60 = vld [vmem:[#allocation20_spill] sm:$0xff] }
 0x646   : > { %17046 = vst [vmem:[#allocation86_spill] sm:$0xff] %v13985_v42  ;;  %v14004_v7 = vrot.slane %v7471_v38, %v13747_v35  ;;  %v6649_v22 = vrot.slane %v17058_v60, %v11512_v30 }
 0x647   : > { %v14033_v38 = vrot.slane %v7503_v12, %v13747_v35 }
 0x648   : > { %v6109_v47 = vpop.permute.xlu0 %6108 }
 0x649   : > { %v6945_v23 = vsel %vm6918_vm12, %v17049_v46, %v6109_v47  ;;  %6604 = vbcast.lane.b32.xlu0 %v6601_v56, 257 }
 0x64a   : > { %v7455_v48 = vcombine.low %v6943_v33, %v6945_v23  ;;  %v7456_v31 = vcombine.high %v6943_v33, %v6945_v23  ;;  %v17055_v33 = vld [vmem:[#allocation108_spill] sm:$0xff] }
 0x64b   : > { %v6633_v46 = vrot.slane %v17055_v33, %v11512_v30  ;;  %v17059_v33 = vcombine.high %v17054_v0, %v13272_v19  ;;  %v17068_v19 = vld [vmem:[#allocation34_spill] sm:$0xff] }
 0x64c   : > { %v14013_v2 = vrot.slane %v7455_v48, %v13747_v35  ;;  %v14016_v47 = vrot.slane %v7456_v31, %v13747_v35  ;;  %v6125_v56 = vpop.permute.xlu0 %6124  ;;  %v17056_v31 = vld [vmem:[#allocation11_spill] sm:$0xff] }
 0x64d   : > { %6620 = vbcast.lane.b32.xlu0 %v6617_v21, 257  ;;  %v6947_v48 = vsel %vm6918_vm12, %v17056_v31, %v6125_v56  ;;  %v17057_v21 = vld [vmem:[#allocation32_spill] sm:$0xff]  ;;  %v17067_v31 = vld [vmem:[#allocation13_spill] sm:$0xff] }
 0x64e   : > { %17053 = vst [vmem:[#allocation85_spill] sm:$0xff] %v14016_v47  ;;  %v14041_v47 = vrot.slane %v17059_v33, %v13747_v35  ;;  %v7519_v56 = vcombine.low %v14013_v2, %v14004_v7 }
 0x650   : > { %v6141_v23 = vpop.permute.xlu0 %6140  ;;  %17060 = vst [vmem:[#allocation87_spill] sm:$0xff] %v14041_v47 }
 0x651   : > { %v6949_v27 = vsel %vm6918_vm12, %v17057_v21, %v6141_v23  ;;  %6636 = vbcast.lane.b32.xlu0 %v6633_v46, 257  ;;  %v17063_v21 = vld [vmem:[#allocation23_spill] sm:$0xff] }
 0x652   : > { %v7487_v32 = vcombine.low %v6947_v48, %v6949_v27  ;;  %v7488_v42 = vcombine.high %v6947_v48, %v6949_v27 }
 0x654   : > { %v14046_v23 = vrot.slane %v7487_v32, %v13747_v35  ;;  %v14049_v46 = vrot.slane %v7488_v42, %v13747_v35  ;;  %v6157_v12 = vpop.permute.xlu0 %6156  ;;  %v17062_v32 = vld [vmem:[#allocation110_spill] sm:$0xff]  ;;  %v17064_v42 = vld [vmem:[#allocation43_spill] sm:$0xff] }
 0x655   : > { %6652 = vbcast.lane.b32.xlu0 %v6649_v22, 257  ;;  %v6665_v48 = vrot.slane %v17062_v32, %v11512_v30  ;;  %v7607_v27 = vcombine.low %v17064_v42, %v17063_v21  ;;  %v14064_v22 = vrot.slane %v7519_v56, %v13908_v10  ;;  %v6951_v26 = vsel %vm6918_vm12, %v17067_v31, %v6157_v12  ;;  %v17076_v56 = vld [vmem:[#allocation35_spill] sm:$0xff] }
 0x656   : > { %17061 = vst [vmem:[#allocation33_spill] sm:$0xff] %v14049_v46  ;;  %v7551_v60 = vcombine.low %v14046_v23, %v14033_v38  ;;  %v17069_v46 = vld [vmem:[#allocation111_spill] sm:$0xff]  ;;  %v17070_v12 = vcombine.high %v17064_v42, %v17063_v21  ;;  %v17073_v21 = vld [vmem:[#allocation113_spill] sm:$0xff] }
 0x657   : > { %17065 = vst [vmem:[#allocation101_spill] sm:$0xff] %v14064_v22  ;;  %v14080_v43 = vrot.slane %v7607_v27, %v13747_v35  ;;  %v17074_v42 = vld [vmem:[#allocation25_spill] sm:$0xff] }
 0x658   : > { %v14067_v33 = vrot.slane %v7551_v60, %v13908_v10  ;;  %v6173_v5 = vpop.permute.xlu0 %6172  ;;  %v6681_v60 = vrot.slane %v17069_v46, %v11512_v30  ;;  %v17075_v27 = vld [vmem:[#allocation45_spill] sm:$0xff] }
 0x659   : > { %v6953_v13 = vsel %vm6918_vm12, %v17068_v19, %v6173_v5  ;;  %6668 = vbcast.lane.b32.xlu0 %v6665_v48, 257  ;;  %v14086_v5 = vrot.slane %v17070_v12, %v13747_v35  ;;  %v17078_v19 = vld [vmem:[#allocation114_spill] sm:$0xff] }
 0x65a   : > { %17066 = vst [vmem:[#allocation88_spill] sm:$0xff] %v14067_v33  ;;  %v7591_v0 = vcombine.low %v6951_v26, %v6953_v13  ;;  %v7592_v47 = vcombine.high %v6951_v26, %v6953_v13  ;;  %v7584_v32 = vcombine.high %v14064_v22, %v14067_v33  ;;  %v6713_v11 = vrot.slane %v17078_v19, %v11512_v30  ;;  %v17086_v19 = vld [vmem:[#allocation116_spill] sm:$0xff] }
 0x65b   : > { %17071 = vst [vmem:[#allocation91_spill] sm:$0xff] %v14086_v5  ;;  %v6745_v25 = vrot.slane %v17086_v19, %v11512_v30 }
 0x65c   : > { %v14089_v26 = vrot.slane %v7591_v0, %v13747_v35  ;;  %v14092_v13 = vrot.slane %v7592_v47, %v13747_v35  ;;  %9245 = vrot.lane.b32.xlu1 %v7584_v32, %s10602_s12  ;;  %v6189_v31 = vpop.permute.xlu0 %6188  ;;  %v6697_v0 = vrot.slane %v17073_v21, %v11512_v30  ;;  %v7639_v47 = vcombine.low %v17075_v27, %v17074_v42 }
 0x65d   : > { %6684 = vbcast.lane.b32.xlu0 %v6681_v60, 257  ;;  %v6955_v32 = vsel %vm6918_vm12, %v17076_v56, %v6189_v31  ;;  %v17077_v60 = vld [vmem:[#allocation16_spill] sm:$0xff]  ;;  %v17079_v21 = vcombine.high %v17075_v27, %v17074_v42  ;;  %v17082_v42 = vld [vmem:[#allocation115_spill] sm:$0xff] }
 0x65e   : > { %17072 = vst [vmem:[#allocation12_spill] sm:$0xff] %v14092_v13  ;;  %v14112_v48 = vrot.slane %v7639_v47, %v13747_v35  ;;  %v6729_v27 = vrot.slane %v17082_v42, %v11512_v30 }
 0x65f   : > { %v14118_v5 = vrot.slane %v17079_v21, %v13747_v35 }
 0x660   : > { %v6205_v12 = vpop.permute.xlu0 %6204 }
 0x661   : > { %v6957_v33 = vsel %vm6918_vm12, %v17077_v60, %v6205_v12  ;;  %6700 = vbcast.lane.b32.xlu0 %v6697_v0, 257  ;;  %17080 = vst [vmem:[#allocation90_spill] sm:$0xff] %v14118_v5 }
 0x662   : > { %v7623_v46 = vcombine.low %v6955_v32, %v6957_v33  ;;  %v7624_v22 = vcombine.high %v6955_v32, %v6957_v33 }
 0x664   : > { %v14121_v56 = vrot.slane %v7623_v46, %v13747_v35  ;;  %v14124_v31 = vrot.slane %v7624_v22, %v13747_v35  ;;  %v6221_v0 = vpop.permute.xlu0 %6220  ;;  %v17083_v46 = vld [vmem:[#allocation47_spill] sm:$0xff]  ;;  %v17084_v22 = vld [vmem:[#allocation105_spill] sm:$0xff] }
 0x665   : > { %6716 = vbcast.lane.b32.xlu0 %v6713_v11, 257  ;;  %v7743_v12 = vcombine.low %v17083_v46, %v13371_v3  ;;  %v6959_v60 = vsel %vm6918_vm12, %v17084_v22, %v6221_v0  ;;  %v17085_v11 = vld [vmem:[#allocation107_spill] sm:$0xff]  ;;  %v17087_v42 = vcombine.high %v17083_v46, %v13371_v3  ;;  %v7775_v3 = vcombine.low %v13400_v20, %v13404_v36  ;;  %v17093_v22 = vld [vmem:[#allocation38_spill] sm:$0xff] }
 0x666   : > { %17081 = vst [vmem:[#allocation93_spill] sm:$0xff] %v14124_v31 }
 0x667   : > { %v14143_v47 = vrot.slane %v7743_v12, %v13747_v35  ;;  %v14149_v5 = vrot.slane %v17087_v42, %v13747_v35  ;;  %v14172_v12 = vrot.slane %v7775_v3, %v13747_v35 }
 0x668   : > { %v6237_v32 = vpop.permute.xlu0 %6236 }
 0x669   : > { %v6961_v21 = vsel %vm6918_vm12, %v17085_v11, %v6237_v32  ;;  %6732 = vbcast.lane.b32.xlu0 %v6729_v27, 257  ;;  %17088 = vst [vmem:[#allocation102_spill] sm:$0xff] %v14149_v5  ;;  %v6777_v5 = vrot.slane %v17093_v22, %v11512_v30 }
 0x66a   : > { %v7727_v33 = vcombine.low %v6959_v60, %v6961_v21  ;;  %v7728_v13 = vcombine.high %v6959_v60, %v6961_v21 }
 0x66c   : > { %v14152_v0 = vrot.slane %v7727_v33, %v13747_v35  ;;  %v14155_v32 = vrot.slane %v7728_v13, %v13747_v35  ;;  %v6253_v27 = vpop.permute.xlu0 %6252  ;;  %v17090_v33 = vld [vmem:[#allocation117_spill] sm:$0xff]  ;;  %v17091_v13 = vld [vmem:[#allocation19_spill] sm:$0xff] }
 0x66d   : > { %6748 = vbcast.lane.b32.xlu0 %v6745_v25, 257  ;;  %v6761_v46 = vrot.slane %v17090_v33, %v11512_v30  ;;  %v6963_v11 = vsel %vm6918_vm12, %v17091_v13, %v6253_v27  ;;  %v17092_v25 = vld [vmem:[#allocation109_spill] sm:$0xff]  ;;  %v17094_v33 = vcombine.high %v13400_v20, %v13404_v36  ;;  %v17100_v20 = vld [vmem:[#allocation112_spill] sm:$0xff] }
 0x66e   : > { %17089 = vst [vmem:[#allocation94_spill] sm:$0xff] %v14155_v32  ;;  %v7791_v27 = vcombine.low %v14152_v0, %v14143_v47 }
 0x66f   : > { %v14180_v32 = vrot.slane %v17094_v33, %v13747_v35 }
 0x670   : > { %v6269_v60 = vpop.permute.xlu0 %6268 }
 0x671   : > { %v6965_v21 = vsel %vm6918_vm12, %v17092_v25, %v6269_v60  ;;  %6764 = vbcast.lane.b32.xlu0 %v6761_v46, 257  ;;  %17095 = vst [vmem:[#allocation26_spill] sm:$0xff] %v14180_v32 }
 0x672   : > { %v7759_v42 = vcombine.low %v6963_v11, %v6965_v21  ;;  %v7760_v19 = vcombine.high %v6963_v11, %v6965_v21  ;;  %v6793_v11 = vrot.slane %v13393_v14, %v11512_v30 }
 0x674   : > { %v14185_v60 = vrot.slane %v7759_v42, %v13747_v35  ;;  %v14188_v46 = vrot.slane %v7760_v19, %v13747_v35  ;;  %v6285_v3 = vpop.permute.xlu0 %6284  ;;  %v7879_v19 = vcombine.low %v13432_v24, %v13436_v50  ;;  %v17099_v42 = vld [vmem:[#allocation22_spill] sm:$0xff] }
 0x675   : > { %6780 = vbcast.lane.b32.xlu0 %v6777_v5, 257  ;;  %v14203_v5 = vrot.slane %v7791_v27, %v13908_v10  ;;  %v6967_v33 = vsel %vm6918_vm12, %v17099_v42, %v6285_v3  ;;  %v17102_v3 = vcombine.high %v13432_v24, %v13436_v50  ;;  %v6825_v50 = vrot.slane %v13426_v45, %v11512_v30  ;;  %v17103_v42 = vld [vmem:[#allocation24_spill] sm:$0xff] }
 0x676   : > { %17096 = vst [vmem:[#allocation14_spill] sm:$0xff] %v14188_v46  ;;  %v7823_v22 = vcombine.low %v14185_v60, %v14172_v12  ;;  %v17101_v46 = vld [vmem:[#allocation39_spill] sm:$0xff]  ;;  %v14219_v31 = vrot.slane %v7879_v19, %v13747_v35  ;;  %v6841_v19 = vrot.slane %v13447_v49, %v11512_v30  ;;  %v17105_v45 = vcombine.high %v13466_v28, %v13470_v8 }
 0x677   : > { %17097 = vst [vmem:[#allocation103_spill] sm:$0xff] %v14203_v5 }
 0x678   : > { %v14206_v25 = vrot.slane %v7823_v22, %v13908_v10  ;;  %v6301_v21 = vpop.permute.xlu0 %6300  ;;  %v6809_v22 = vrot.slane %v17101_v46, %v11512_v30  ;;  %v14257_v46 = vrot.slane %v17105_v45, %v13747_v35 }
 0x679   : > { %v6969_v13 = vsel %vm6918_vm12, %v17100_v20, %v6301_v21  ;;  %6796 = vbcast.lane.b32.xlu0 %v6793_v11, 257  ;;  %v14225_v20 = vrot.slane %v17102_v3, %v13747_v35 }
 0x67a   : > { %17098 = vst [vmem:[#allocation17_spill] sm:$0xff] %v14206_v25  ;;  %v7863_v36 = vcombine.low %v6967_v33, %v6969_v13  ;;  %v7864_v32 = vcombine.high %v6967_v33, %v6969_v13  ;;  %v7856_v14 = vcombine.high %v14203_v5, %v14206_v25  ;;  %v6873_v25 = vrot.slane %v13480_v4, %v11512_v30 }
 0x67b   : > { %v17109_v4 = vcombine.high %v13814_v51, %v13799_v6 }
 0x67c   : > { %v14228_v13 = vrot.slane %v7863_v36, %v13747_v35  ;;  %v14231_v11 = vrot.slane %v7864_v32, %v13747_v35  ;;  %9249 = vrot.lane.b32.xlu1 %v7856_v14, %s10602_s12  ;;  %v6317_v21 = vpop.permute.xlu0 %6316  ;;  %v7911_v32 = vcombine.low %v13466_v28, %v13470_v8  ;;  %v17104_v14 = vld [vmem:[#allocation44_spill] sm:$0xff]  ;;  %v8015_v28 = vcombine.low %v13496_v41, %v13500_v53 }
 0x67d   : > { %6812 = vbcast.lane.b32.xlu0 %v6809_v22, 257  ;;  %v6971_v33 = vsel %vm6918_vm12, %v17103_v42, %v6317_v21  ;;  %v6857_v8 = vrot.slane %v13459_v63, %v11512_v30  ;;  %v7143_v42 = vcombine.low %v13814_v51, %v13799_v6  ;;  %v17108_v63 = vcombine.high %v13496_v41, %v13500_v53 }
 0x67e   : > { %v14251_v24 = vrot.slane %v7911_v32, %v13747_v35  ;;  %v14280_v32 = vrot.slane %v8015_v28, %v13747_v35  ;;  %v8047_v41 = vcombine.low %v13522_v29, %v13526_v15 }
 0x67f   : > { %v14321_v51 = vrot.slane %v7143_v42, %v13908_v10 }
 0x680   : > { %v6333_v36 = vpop.permute.xlu0 %6332 }
 0x681   : > { %v6973_v22 = vsel %vm6918_vm12, %v17104_v14, %v6333_v36  ;;  %6828 = vbcast.lane.b32.xlu0 %v6825_v50, 257  ;;  %17111 = vst [vmem:[#allocation18_spill] sm:$0xff] %v14321_v51 }
 0x682   : > { %v7895_v3 = vcombine.low %v6971_v33, %v6973_v22  ;;  %v7896_v27 = vcombine.high %v6971_v33, %v6973_v22 }
 0x684   : > { %v14260_v21 = vrot.slane %v7895_v3, %v13747_v35  ;;  %v14263_v36 = vrot.slane %v7896_v27, %v13747_v35  ;;  %v6349_v50 = vpop.permute.xlu0 %6348  ;;  %v17106_v27 = vld [vmem:[#allocation36_spill] sm:$0xff] }
 0x685   : > { %6844 = vbcast.lane.b32.xlu0 %v6841_v19, 257  ;;  %v6975_v14 = vsel %vm6918_vm12, %v17106_v27, %v6349_v50  ;;  %v17107_v19 = vld [vmem:[#allocation46_spill] sm:$0xff]  ;;  %v14290_v50 = vrot.slane %v17108_v63, %v13747_v35  ;;  %v7383_v63 = vcombine.low %v13950_v57, %v13941_v1 }
 0x686   : > { %v7960_v49 = vcombine.high %v14260_v21, %v14251_v24 }
 0x688   : > { %v6365_v33 = vpop.permute.xlu0 %6364 }
 0x689   : > { %v6977_v22 = vsel %vm6918_vm12, %v17107_v19, %v6365_v33  ;;  %6860 = vbcast.lane.b32.xlu0 %v6857_v8, 257  ;;  %v7111_v8 = vcombine.low %v13773_v58, %v13758_v34 }
 0x68a   : > { %v7999_v3 = vcombine.low %v6975_v14, %v6977_v22  ;;  %v8000_v45 = vcombine.high %v6975_v14, %v6977_v22  ;;  %v14304_v14 = vrot.slane %v17109_v4, %v13908_v10  ;;  %v6905_v22 = vrot.slane %v13510_v55, %v11512_v30 }
 0x68c   : > { %v14295_v33 = vrot.slane %v7999_v3, %v13747_v35  ;;  %v14298_v28 = vrot.slane %v8000_v45, %v13747_v35  ;;  %v6381_v27 = vpop.permute.xlu0 %6380  ;;  %v17110_v3 = vcombine.high %v13773_v58, %v13758_v34  ;;  %v14326_v45 = vrot.slane %v7111_v8, %v13908_v10  ;;  %v17113_v58 = vld [vmem:[#allocation37_spill] sm:$0xff] }
 0x68d   : > { %6876 = vbcast.lane.b32.xlu0 %v6873_v25, 257  ;;  %v6889_v25 = vrot.slane %v13490_v61, %v11512_v30  ;;  %v7415_v34 = vcombine.low %v13982_v44, %v13973_v18  ;;  %v6979_v42 = vsel %vm6918_vm12, %v17113_v58, %v6381_v27  ;;  %v14341_v8 = vrot.slane %v8047_v41, %v13747_v35 }
 0x68e   : > { %v14318_v6 = vrot.slane %v17110_v3, %v13908_v10  ;;  %17112 = vst [vmem:[#allocation97_spill] sm:$0xff] %v14326_v45  ;;  %v17114_v3 = vld [vmem:[#allocation48_spill] sm:$0xff]  ;;  %v17115_v30 = vcombine.high %v13522_v29, %v13526_v15  ;;  %v8151_v27 = vcombine.low %v13540_v9, %v13544_v52  ;;  %v7176_v41 = vcombine.high %v14326_v45, %v14321_v51 }
 0x68f   : > { %v14358_v58 = vrot.slane %v7383_v63, %v13908_v10  ;;  %v8063_v29 = vcombine.low %v14295_v33, %v14280_v32  ;;  %v14375_v61 = vrot.slane %v7415_v34, %v13908_v10  ;;  %v17119_v63 = vcombine.high %v13982_v44, %v13973_v18 }
 0x690   : > { %v6397_v4 = vpop.permute.xlu0 %6396  ;;  %v14347_v55 = vrot.slane %v17115_v30, %v13747_v35 }
 0x691   : > { %v6981_v19 = vsel %vm6918_vm12, %v17114_v3, %v6397_v4  ;;  %6892 = vbcast.lane.b32.xlu0 %v6889_v25, 257  ;;  %v7655_v25 = vcombine.low %v14089_v26, %v14080_v43  ;;  %v7687_v4 = vcombine.low %v14121_v56, %v14112_v48  ;;  %17116 = vst [vmem:[#allocation28_spill] sm:$0xff] %v14358_v58  ;;  %17118 = vst [vmem:[#allocation15_spill] sm:$0xff] %v14375_v61 }
 0x692   : > { %v8031_v53 = vcombine.low %v6979_v42, %v6981_v19  ;;  %v8032_v5 = vcombine.high %v6979_v42, %v6981_v19  ;;  %v17117_v3 = vcombine.high %v13950_v57, %v13941_v1  ;;  %v14381_v45 = vrot.slane %v17119_v63, %v13908_v10 }
 0x693   : > { %v14398_v44 = vrot.slane %v7655_v25, %v13908_v10  ;;  %v17125_v63 = vcombine.high %v14228_v13, %v14219_v31  ;;  %v7959_v25 = vcombine.low %v14260_v21, %v14251_v24  ;;  %v14421_v18 = vrot.slane %v8063_v29, %v13908_v10 }
 0x694   : > { %v14363_v15 = vrot.slane %v8031_v53, %v13747_v35  ;;  %v14366_v19 = vrot.slane %v8032_v5, %v13747_v35  ;;  %v6413_v42 = vpop.permute.xlu0 %6412  ;;  %v14372_v30 = vrot.slane %v17117_v3, %v13908_v10  ;;  %v17120_v5 = vcombine.high %v14121_v56, %v14112_v48 }
 0x695   : > { %6908 = vbcast.lane.b32.xlu0 %v6905_v22, 257  ;;  %17121 = vst [vmem:[#allocation104_spill] sm:$0xff] %v14398_v44  ;;  %v17122_v48 = vcombine.high %v14089_v26, %v14080_v43  ;;  %v14407_v22 = vrot.slane %v7687_v4, %v13908_v10  ;;  %v14410_v3 = vrot.slane %v7960_v49, %v13908_v10  ;;  %17126 = vst [vmem:[#allocation106_spill] sm:$0xff] %v14421_v18  ;;  %v17128_v4 = vld [vmem:[#allocation49_spill] sm:$0xff] }
 0x696   : > { %v14387_v53 = vrot.slane %v17120_v5, %v13908_v10  ;;  %v8095_v1 = vcombine.low %v14363_v15, %v14341_v8  ;;  %v14416_v5 = vrot.slane %v17125_v63, %v13908_v10  ;;  %v6983_v49 = vsel %vm6918_vm12, %v17128_v4, %v6413_v42  ;;  %v17142_v63 = vld [vmem:[#allocation41_spill] sm:$0xff] }
 0x697   : > { %v14404_v56 = vrot.slane %v17122_v48, %v13908_v10  ;;  %17123 = vst [vmem:[#allocation10_spill] sm:$0xff] %v14407_v22  ;;  %17124 = vst [vmem:[#allocation30_spill] sm:$0xff] %v14410_v3  ;;  %v17129_v48 = vld [vmem:[#allocation40_spill] sm:$0xff]  ;;  %v8159_v42 = vrot.slane %v8151_v27, %v13747_v35  ;;  %v17133_v27 = vcombine.high %v13898_v16, %v13881_v37 }
 0x698   : > { %v14424_v43 = vrot.slane %v8095_v1, %v13908_v10  ;;  %v6429_v26 = vpop.permute.xlu0 %6428  ;;  %v17136_v37 = vcombine.high %v13855_v17, %v13840_v40 }
 0x699   : > { %v6985_v34 = vsel %vm6918_vm12, %v17129_v48, %v6429_v26  ;;  %9239 = vrot.lane.b32.xlu0 %v7176_v41, %s10602_s12  ;;  %v7927_v26 = vcombine.low %v14228_v13, %v14219_v31  ;;  %v7448_v41 = vcombine.high %v14358_v58, %v14375_v61  ;;  %v14463_v4 = vrot.slane %v17133_v27, %v13908_v10 }
 0x69a   : > { %17127 = vst [vmem:[#allocation21_spill] sm:$0xff] %v14424_v43  ;;  %v8135_v21 = vcombine.low %v6983_v49, %v6985_v34  ;;  %v8136_v29 = vcombine.high %v6983_v49, %v6985_v34  ;;  %v8128_v1 = vcombine.high %v14421_v18, %v14424_v43  ;;  %v17130_v34 = vcombine.high %v13540_v9, %v13544_v52 }
 0x69b   : > { %17134 = vst [vmem:[#allocation32_spill] sm:$0xff] %v14463_v4  ;;  %v14466_v52 = vrot.slane %v7959_v25, %v13908_v10  ;;  %v14479_v16 = vrot.slane %v17136_v37, %v13908_v10  ;;  %v14482_v25 = vrot.slane %v7927_v26, %v13908_v10 }
 0x69c   : > { %v14450_v49 = vrot.slane %v17130_v34, %v13747_v35  ;;  %v8143_v48 = vrot.slane %v8135_v21, %v13747_v35  ;;  %v14454_v57 = vrot.slane %v8136_v29, %v13747_v35  ;;  %9253 = vrot.lane.b32.xlu1 %v8128_v1, %s10602_s12  ;;  %v6445_v31 = vpop.permute.xlu0 %6444  ;;  %v8183_v1 = vcombine.low %v13558_v54, %v13562_v59  ;;  %v17141_v29 = vld [vmem:[#allocation42_spill] sm:$0xff] }
 0x69d   : > { %17135 = vst [vmem:[#allocation20_spill] sm:$0xff] %v14466_v52  ;;  %9243 = vrot.lane.b32.xlu0 %v7448_v41, %s10602_s12  ;;  %17137 = vst [vmem:[#allocation110_spill] sm:$0xff] %v14479_v16  ;;  %v7720_v41 = vcombine.high %v14398_v44, %v14407_v22  ;;  %v17139_v34 = vcombine.high %v14046_v23, %v14033_v38  ;;  %v6987_v24 = vsel %vm6918_vm12, %v17141_v29, %v6445_v31 }
 0x69e   : > { %17131 = vst [vmem:[#allocation108_spill] sm:$0xff] %v14450_v49  ;;  %17132 = vst [vmem:[#allocation11_spill] sm:$0xff] %v14454_v57  ;;  %v8200_v9 = vcombine.high %v8143_v48, %v8159_v42  ;;  %v17143_v38 = vcombine.high %v14013_v2, %v14004_v7  ;;  %v8191_v31 = vrot.slane %v8183_v1, %v13747_v35 }
 0x69f   : > { %17138 = vst [vmem:[#allocation23_spill] sm:$0xff] %v14482_v25  ;;  %v14490_v27 = vrot.slane %v17139_v34, %v13908_v10  ;;  %v7992_v29 = vcombine.high %v14482_v25, %v14466_v52  ;;  %v17146_v1 = vcombine.high %v14185_v60, %v14172_v12  ;;  %v17152_v60 = vcombine.high %v14152_v0, %v14143_v47  ;;  %v17191_v52 = vld [vmem:[#allocation78_spill] sm:$0xff] }
 0x6a0   : > { %v6461_v13 = vpop.permute.xlu0 %6460  ;;  %v14505_v23 = vrot.slane %v17143_v38, %v13908_v10  ;;  %v8287_v38 = vcombine.low %v13576_v62, %v13580_v39  ;;  %v17160_v0 = vcombine.high %v14295_v33, %v14280_v32  ;;  %v17164_v33 = vld [vmem:[#allocation8_spill] sm:$0xff] }
 0x6a1   : > { %17140 = vst [vmem:[#allocation43_spill] sm:$0xff] %v14490_v27  ;;  %v6989_v40 = vsel %vm6918_vm12, %v17142_v63, %v6461_v13  ;;  %9247 = vrot.lane.b32.xlu0 %v7720_v41, %s10602_s12  ;;  %v17145_v63 = vcombine.high %v13558_v54, %v13562_v59  ;;  %v8199_v41 = vcombine.low %v8143_v48, %v8159_v42  ;;  %v17176_v42 = vld [vmem:[#allocation5_spill] sm:$0xff]  ;;  %v17233_v27 = vld [vmem:[#allocation90_spill] sm:$0xff] }
 0x6a2   : > { %17144 = vst [vmem:[#allocation13_spill] sm:$0xff] %v14505_v23  ;;  %v8167_v37 = vcombine.low %v6987_v24, %v6989_v40  ;;  %v8168_v34 = vcombine.high %v6987_v24, %v6989_v40  ;;  %v14526_v59 = vrot.slane %v17146_v1, %v13908_v10  ;;  %v14557_v24 = vrot.slane %v8200_v9, %v13908_v10 }
 0x6a3   : > { %v14512_v13 = vrot.slane %v17145_v63, %v13747_v35  ;;  %v14554_v1 = vrot.slane %v8199_v41, %v13908_v10  ;;  %v8295_v32 = vrot.slane %v8287_v38, %v13747_v35 }
 0x6a4   : > { %v8175_v26 = vrot.slane %v8167_v37, %v13747_v35  ;;  %v14518_v7 = vrot.slane %v8168_v34, %v13747_v35  ;;  %v6477_v2 = vpop.permute.xlu0 %6476  ;;  %17147 = vst [vmem:[#allocation34_spill] sm:$0xff] %v14526_v59  ;;  %v17148_v37 = vld [vmem:[#allocation7_spill] sm:$0xff]  ;;  %v17149_v34 = vld [vmem:[#allocation92_spill] sm:$0xff]  ;;  %17157 = vst [vmem:[#allocation35_spill] sm:$0xff] %v14557_v24 }
 0x6a5   : > { %9251 = vrot.lane.b32.xlu0 %v7992_v29, %s10602_s12  ;;  %v17150_v63 = vcombine.low %v17148_v37, %v17149_v34  ;;  %17156 = vst [vmem:[#allocation45_spill] sm:$0xff] %v14554_v1 }
 0x6a6   : > { %v8231_v54 = vcombine.low %v8175_v26, %v8191_v31  ;;  %v8232_v40 = vcombine.high %v8175_v26, %v8191_v31  ;;  %v14545_v26 = vrot.slane %v17152_v60, %v13908_v10  ;;  %v17154_v31 = vcombine.high %v14363_v15, %v14341_v8  ;;  %v17162_v15 = vld [vmem:[#allocation50_spill] sm:$0xff]  ;;  %v17163_v60 = vld [vmem:[#allocation51_spill] sm:$0xff] }
 0x6a7   : > { %v14539_v12 = vrot.slane %v17150_v63, %v13908_v10  ;;  %v14569_v8 = vrot.slane %v17160_v0, %v13908_v10  ;;  %v6991_v41 = vsel %vm6918_vm12, %v17162_v15, %v6477_v2  ;;  %v17165_v0 = vld [vmem:[#allocation77_spill] sm:$0xff] }
 0x6a8   : > { %17153 = vst [vmem:[#allocation113_spill] sm:$0xff] %v14545_v26  ;;  %v14551_v29 = vrot.slane %v17154_v31, %v13908_v10  ;;  %v14560_v63 = vrot.slane %v8231_v54, %v13908_v10  ;;  %v14563_v17 = vrot.slane %v8232_v40, %v13908_v10  ;;  %v6493_v47 = vpop.permute.xlu0 %6492  ;;  %v17166_v2 = vcombine.low %v17164_v33, %v17165_v0 }
 0x6a9   : > { %17151 = vst [vmem:[#allocation111_spill] sm:$0xff] %v14539_v12  ;;  %17161 = vst [vmem:[#allocation115_spill] sm:$0xff] %v14569_v8  ;;  %v6993_v9 = vsel %vm6918_vm12, %v17163_v60, %v6493_v47  ;;  %v17168_v47 = vcombine.high %v17148_v37, %v17149_v34  ;;  %v17171_v34 = vcombine.high %v17164_v33, %v17165_v0  ;;  %v17174_v33 = vld [vmem:[#allocation61_spill] sm:$0xff]  ;;  %v17175_v37 = vld [vmem:[#allocation52_spill] sm:$0xff] }
 0x6aa   : > { %17155 = vst [vmem:[#allocation25_spill] sm:$0xff] %v14551_v29  ;;  %17158 = vst [vmem:[#allocation16_spill] sm:$0xff] %v14560_v63  ;;  %v8271_v31 = vcombine.low %v6991_v41, %v6993_v9  ;;  %v8272_v48 = vcombine.high %v6991_v41, %v6993_v9  ;;  %v8264_v40 = vcombine.high %v14554_v1, %v14560_v63  ;;  %v17173_v41 = vld [vmem:[#allocation62_spill] sm:$0xff]  ;;  %v17238_v29 = vld [vmem:[#allocation12_spill] sm:$0xff] }
 0x6ab   : > { %17159 = vst [vmem:[#allocation114_spill] sm:$0xff] %v14563_v17  ;;  %v14586_v15 = vrot.slane %v17166_v2, %v13908_v10  ;;  %v14592_v60 = vrot.slane %v17168_v47, %v13908_v10  ;;  %v17170_v9 = vcombine.high %v13576_v62, %v13580_v39  ;;  %v14613_v47 = vrot.slane %v17171_v34, %v13908_v10  ;;  %v17189_v1 = vld [vmem:[#allocation54_spill] sm:$0xff]  ;;  %v17239_v8 = vld [vmem:[#allocation91_spill] sm:$0xff] }
 0x6ac   : > { %v8279_v54 = vrot.slane %v8271_v31, %v13747_v35  ;;  %v14604_v2 = vrot.slane %v8272_v48, %v13747_v35  ;;  %9255 = vrot.lane.b32.xlu0 %v8264_v40, %s10602_s12  ;;  %v6509_v21 = vpop.permute.xlu0 %6508  ;;  %v8319_v0 = vcombine.low %v17174_v33, %v17173_v41  ;;  %v17177_v34 = vcombine.high %v17174_v33, %v17173_v41  ;;  %v17178_v33 = vld [vmem:[#allocation64_spill] sm:$0xff] }
 0x6ad   : > { %17167 = vst [vmem:[#allocation47_spill] sm:$0xff] %v14586_v15  ;;  %17169 = vst [vmem:[#allocation105_spill] sm:$0xff] %v14592_v60  ;;  %v14600_v38 = vrot.slane %v17170_v9, %v13747_v35  ;;  %v6995_v48 = vsel %vm6918_vm12, %v17175_v37, %v6509_v21 }
 0x6ae   : > { %17172 = vst [vmem:[#allocation107_spill] sm:$0xff] %v14613_v47  ;;  %v8336_v31 = vcombine.high %v8279_v54, %v8295_v32  ;;  %v8327_v51 = vrot.slane %v8319_v0, %v13747_v35  ;;  %v14642_v43 = vrot.slane %v17177_v34, %v13747_v35  ;;  %v8335_v39 = vcombine.low %v8279_v54, %v8295_v32  ;;  %v17179_v0 = vld [vmem:[#allocation63_spill] sm:$0xff]  ;;  %v17180_v32 = vld [vmem:[#allocation82_spill] sm:$0xff] }
 0x6af   : > { %v8423_v54 = vcombine.low %v17179_v0, %v17178_v33 }
 0x6b0   : > { %v6525_v62 = vpop.permute.xlu0 %6524  ;;  %v14663_v40 = vrot.slane %v8335_v39, %v13908_v10  ;;  %v14672_v41 = vrot.slane %v8336_v31, %v13908_v10  ;;  %v17190_v31 = vld [vmem:[#allocation9_spill] sm:$0xff]  ;;  %v17203_v39 = vld [vmem:[#allocation55_spill] sm:$0xff] }
 0x6b1   : > { %v6997_v58 = vsel %vm6918_vm12, %v17176_v42, %v6525_v62  ;;  %v17192_v25 = vcombine.low %v17190_v31, %v17191_v52 }
 0x6b2   : > { %v8303_v9 = vcombine.low %v6995_v48, %v6997_v58  ;;  %v8304_v61 = vcombine.high %v6995_v48, %v6997_v58  ;;  %17184 = vst [vmem:[#allocation117_spill] sm:$0xff] %v14663_v40  ;;  %17187 = vst [vmem:[#allocation38_spill] sm:$0xff] %v14672_v41  ;;  %v17188_v48 = vld [vmem:[#allocation53_spill] sm:$0xff] }
 0x6b3   : > { %v14688_v22 = vrot.slane %v17192_v25, %v13908_v10 }
 0x6b4   : > { %v8311_v18 = vrot.slane %v8303_v9, %v13747_v35  ;;  %v14646_v21 = vrot.slane %v8304_v61, %v13747_v35  ;;  %v6541_v42 = vpop.permute.xlu0 %6540  ;;  %v17181_v9 = vld [vmem:[#allocation96_spill] sm:$0xff] }
 0x6b5   : > { %v17182_v61 = vcombine.low %v17180_v32, %v17181_v9  ;;  %v6999_v63 = vsel %vm6918_vm12, %v17188_v48, %v6541_v42  ;;  %17193 = vst [vmem:[#allocation22_spill] sm:$0xff] %v14688_v22  ;;  %v17196_v48 = vcombine.high %v17179_v0, %v17178_v33  ;;  %v17204_v0 = vld [vmem:[#allocation56_spill] sm:$0xff]  ;;  %v17208_v22 = vld [vmem:[#allocation67_spill] sm:$0xff] }
 0x6b6   : > { %v8367_v62 = vcombine.low %v8311_v18, %v8327_v51  ;;  %v8368_v58 = vcombine.high %v8311_v18, %v8327_v51 }
 0x6b7   : > { %v14660_v34 = vrot.slane %v17182_v61, %v13908_v10 }
 0x6b8   : > { %v14666_v51 = vrot.slane %v8367_v62, %v13908_v10  ;;  %v14669_v18 = vrot.slane %v8368_v58, %v13908_v10  ;;  %v6557_v37 = vpop.permute.xlu0 %6556 }
 0x6b9   : > { %17183 = vst [vmem:[#allocation116_spill] sm:$0xff] %v14660_v34  ;;  %v7001_v61 = vsel %vm6918_vm12, %v17189_v1, %v6557_v37  ;;  %v17194_v1 = vcombine.high %v17180_v32, %v17181_v9  ;;  %v8431_v37 = vrot.slane %v8423_v54, %v13747_v35  ;;  %v17199_v9 = vcombine.high %v17190_v31, %v17191_v52  ;;  %v17202_v52 = vld [vmem:[#allocation65_spill] sm:$0xff]  ;;  %v17207_v54 = vld [vmem:[#allocation68_spill] sm:$0xff] }
 0x6ba   : > { %17185 = vst [vmem:[#allocation19_spill] sm:$0xff] %v14666_v51  ;;  %17186 = vst [vmem:[#allocation109_spill] sm:$0xff] %v14669_v18  ;;  %v8407_v60 = vcombine.low %v6999_v63, %v7001_v61  ;;  %v8408_v47 = vcombine.high %v6999_v63, %v7001_v61  ;;  %v8400_v62 = vcombine.high %v14663_v40, %v14666_v51 }
 0x6bb   : > { %v14694_v42 = vrot.slane %v17194_v1, %v13908_v10  ;;  %v14703_v61 = vrot.slane %v17196_v48, %v13747_v35  ;;  %v14714_v1 = vrot.slane %v17199_v9, %v13908_v10  ;;  %v17201_v48 = vld [vmem:[#allocation66_spill] sm:$0xff]  ;;  %v8559_v33 = vcombine.low %v17208_v22, %v17207_v54 }
 0x6bc   : > { %v8415_v25 = vrot.slane %v8407_v60, %v13747_v35  ;;  %v14707_v58 = vrot.slane %v8408_v47, %v13747_v35  ;;  %9257 = vrot.lane.b32.xlu1 %v8400_v62, %s10602_s12  ;;  %v6573_v32 = vpop.permute.xlu0 %6572  ;;  %v8455_v31 = vcombine.low %v17202_v52, %v17201_v48  ;;  %v17205_v9 = vcombine.high %v17202_v52, %v17201_v48 }
 0x6bd   : > { %17195 = vst [vmem:[#allocation112_spill] sm:$0xff] %v14694_v42  ;;  %17197 = vst [vmem:[#allocation39_spill] sm:$0xff] %v14703_v61  ;;  %v7003_v63 = vsel %vm6918_vm12, %v17203_v39, %v6573_v32  ;;  %v8567_v52 = vrot.slane %v8559_v33, %v13747_v35 }
 0x6be   : > { %17198 = vst [vmem:[#allocation24_spill] sm:$0xff] %v14707_v58  ;;  %17200 = vst [vmem:[#allocation44_spill] sm:$0xff] %v14714_v1  ;;  %v8472_v47 = vcombine.high %v8415_v25, %v8431_v37  ;;  %v8463_v44 = vrot.slane %v8455_v31, %v13747_v35  ;;  %v14743_v34 = vrot.slane %v17205_v9, %v13747_v35 }
 0x6bf   : > { %v8471_v42 = vcombine.low %v8415_v25, %v8431_v37  ;;  %v17210_v37 = vld [vmem:[#allocation86_spill] sm:$0xff]  ;;  %v17211_v25 = vld [vmem:[#allocation84_spill] sm:$0xff] }
 0x6c0   : > { %v6589_v60 = vpop.permute.xlu0 %6588  ;;  %17206 = vst [vmem:[#allocation36_spill] sm:$0xff] %v14743_v34  ;;  %v14768_v9 = vrot.slane %v8472_v47, %v13908_v10  ;;  %v17218_v33 = vcombine.high %v17210_v37, %v17211_v25 }
 0x6c1   : > { %v7005_v51 = vsel %vm6918_vm12, %v17204_v0, %v6589_v60  ;;  %v14765_v31 = vrot.slane %v8471_v42, %v13908_v10  ;;  %v17221_v0 = vld [vmem:[#allocation58_spill] sm:$0xff] }
 0x6c2   : > { %v8439_v62 = vcombine.low %v7003_v63, %v7005_v51  ;;  %v8440_v40 = vcombine.high %v7003_v63, %v7005_v51  ;;  %17215 = vst [vmem:[#allocation49_spill] sm:$0xff] %v14768_v9  ;;  %v14780_v48 = vrot.slane %v17218_v33, %v13908_v10  ;;  %v17260_v9 = vld [vmem:[#allocation85_spill] sm:$0xff] }
 0x6c3   : > { %17214 = vst [vmem:[#allocation48_spill] sm:$0xff] %v14765_v31 }
 0x6c4   : > { %v8447_v1 = vrot.slane %v8439_v62, %v13747_v35  ;;  %v14749_v39 = vrot.slane %v8440_v40, %v13747_v35  ;;  %v6605_v32 = vpop.permute.xlu0 %6604  ;;  %v17212_v62 = vcombine.low %v17210_v37, %v17211_v25  ;;  %17219 = vst [vmem:[#allocation41_spill] sm:$0xff] %v14780_v48  ;;  %v17222_v37 = vld [vmem:[#allocation99_spill] sm:$0xff] }
 0x6c5   : > { %v17223_v25 = vld [vmem:[#allocation31_spill] sm:$0xff] }
 0x6c6   : > { %17209 = vst [vmem:[#allocation46_spill] sm:$0xff] %v14749_v39  ;;  %v8503_v63 = vcombine.low %v8447_v1, %v8463_v44  ;;  %v8504_v60 = vcombine.high %v8447_v1, %v8463_v44  ;;  %v14762_v40 = vrot.slane %v17212_v62, %v13908_v10  ;;  %v17220_v62 = vld [vmem:[#allocation57_spill] sm:$0xff]  ;;  %v17224_v33 = vcombine.low %v17222_v37, %v17223_v25 }
 0x6c7   : > { %v7007_v42 = vsel %vm6918_vm12, %v17220_v62, %v6605_v32  ;;  %v17226_v32 = vcombine.high %v17222_v37, %v17223_v25  ;;  %v17240_v25 = vcombine.low %v17238_v29, %v17239_v8 }
 0x6c8   : > { %17213 = vst [vmem:[#allocation37_spill] sm:$0xff] %v14762_v40  ;;  %v14771_v44 = vrot.slane %v8503_v63, %v13908_v10  ;;  %v14774_v1 = vrot.slane %v8504_v60, %v13908_v10  ;;  %v6621_v51 = vpop.permute.xlu0 %6620  ;;  %v14796_v23 = vrot.slane %v17224_v33, %v13908_v10 }
 0x6c9   : > { %v7009_v47 = vsel %vm6918_vm12, %v17221_v0, %v6621_v51  ;;  %v14802_v51 = vrot.slane %v17226_v32, %v13908_v10  ;;  %v17232_v32 = vld [vmem:[#allocation93_spill] sm:$0xff]  ;;  %v14851_v48 = vrot.slane %v17240_v25, %v13908_v10  ;;  %v17250_v25 = vcombine.low %v14231_v11, %v14225_v20 }
 0x6ca   : > { %17216 = vst [vmem:[#allocation40_spill] sm:$0xff] %v14771_v44  ;;  %17217 = vst [vmem:[#allocation42_spill] sm:$0xff] %v14774_v1  ;;  %v8543_v12 = vcombine.low %v7007_v42, %v7009_v47  ;;  %v8544_v15 = vcombine.high %v7007_v42, %v7009_v47  ;;  %v8536_v60 = vcombine.high %v14765_v31, %v14771_v44  ;;  %v17236_v31 = vld [vmem:[#allocation59_spill] sm:$0xff] }
 0x6cb   : > { %17225 = vst [vmem:[#allocation7_spill] sm:$0xff] %v14796_v23  ;;  %17227 = vst [vmem:[#allocation92_spill] sm:$0xff] %v14802_v51  ;;  %v17228_v42 = vcombine.high %v17208_v22, %v17207_v54  ;;  %v17234_v0 = vcombine.low %v17232_v32, %v17233_v27  ;;  %v17259_v1 = vld [vmem:[#allocation119_spill] sm:$0xff] }
 0x6cc   : > { %v8551_v33 = vrot.slane %v8543_v12, %v13747_v35  ;;  %v14816_v63 = vrot.slane %v8544_v15, %v13747_v35  ;;  %9259 = vrot.lane.b32.xlu0 %v8536_v60, %s10602_s12  ;;  %v6637_v37 = vpop.permute.xlu0 %6636  ;;  %v17230_v60 = vld [vmem:[#allocation70_spill] sm:$0xff]  ;;  %v17237_v12 = vld [vmem:[#allocation60_spill] sm:$0xff]  ;;  %17241 = vst [vmem:[#allocation8_spill] sm:$0xff] %v14851_v48 }
 0x6cd   : > { %v14812_v47 = vrot.slane %v17228_v42, %v13747_v35  ;;  %v17231_v42 = vld [vmem:[#allocation69_spill] sm:$0xff]  ;;  %v14839_v44 = vrot.slane %v17234_v0, %v13908_v10  ;;  %v7011_v40 = vsel %vm6918_vm12, %v17236_v31, %v6637_v37 }
 0x6ce   : > { %v8608_v54 = vcombine.high %v8551_v33, %v8567_v52  ;;  %v8591_v62 = vcombine.low %v17231_v42, %v17230_v60  ;;  %v17242_v31 = vcombine.high %v17231_v42, %v17230_v60 }
 0x6cf   : > { %17229 = vst [vmem:[#allocation50_spill] sm:$0xff] %v14812_v47  ;;  %17235 = vst [vmem:[#allocation51_spill] sm:$0xff] %v14839_v44 }
 0x6d0   : > { %v6653_v22 = vpop.permute.xlu0 %6652  ;;  %v8599_v0 = vrot.slane %v8591_v62, %v13747_v35  ;;  %v14858_v37 = vrot.slane %v17242_v31, %v13747_v35 }
 0x6d1   : > { %v7013_v23 = vsel %vm6918_vm12, %v17237_v12, %v6653_v22  ;;  %v8607_v22 = vcombine.low %v8551_v33, %v8567_v52  ;;  %v17247_v33 = vld [vmem:[#allocation87_spill] sm:$0xff] }
 0x6d2   : > { %v8575_v51 = vcombine.low %v7011_v40, %v7013_v23  ;;  %v8576_v59 = vcombine.high %v7011_v40, %v7013_v23  ;;  %17243 = vst [vmem:[#allocation77_spill] sm:$0xff] %v14858_v37  ;;  %v17244_v23 = vcombine.low %v14263_v36, %v14257_v46 }
 0x6d4   : > { %v8583_v12 = vrot.slane %v8575_v51, %v13747_v35  ;;  %v14862_v15 = vrot.slane %v8576_v59, %v13747_v35  ;;  %v6669_v18 = vpop.permute.xlu0 %6668  ;;  %v14870_v40 = vrot.slane %v17244_v23, %v13908_v10  ;;  %v17246_v59 = vld [vmem:[#allocation33_spill] sm:$0xff]  ;;  %v14886_v23 = vrot.slane %v17250_v25, %v13908_v10  ;;  %v17258_v25 = vld [vmem:[#allocation118_spill] sm:$0xff] }
 0x6d5   : > { %v17248_v42 = vcombine.low %v17246_v59, %v17247_v33  ;;  %v17256_v41 = vcombine.high %v17246_v59, %v17247_v33  ;;  %v17266_v33 = vcombine.low %v14518_v7, %v14512_v13  ;;  %v17268_v59 = vld [vmem:[#allocation72_spill] sm:$0xff] }
 0x6d6   : > { %17245 = vst [vmem:[#allocation62_spill] sm:$0xff] %v14870_v40  ;;  %v8639_v62 = vcombine.low %v8583_v12, %v8599_v0  ;;  %v8640_v60 = vcombine.high %v8583_v12, %v8599_v0  ;;  %17251 = vst [vmem:[#allocation52_spill] sm:$0xff] %v14886_v23  ;;  %v14889_v0 = vrot.slane %v8607_v22, %v13908_v10 }
 0x6d7   : > { %v14880_v31 = vrot.slane %v17248_v42, %v13908_v10  ;;  %v14892_v12 = vrot.slane %v8608_v54, %v13908_v10  ;;  %v14904_v26 = vrot.slane %v17256_v41, %v13908_v10  ;;  %v7015_v22 = vsel %vm6918_vm12, %v17258_v25, %v6669_v18 }
 0x6d8   : > { %17252 = vst [vmem:[#allocation5_spill] sm:$0xff] %v14889_v0  ;;  %v14895_v51 = vrot.slane %v8639_v62, %v13908_v10  ;;  %v14898_v52 = vrot.slane %v8640_v60, %v13908_v10  ;;  %v6685_v42 = vpop.permute.xlu0 %6684  ;;  %v17261_v60 = vld [vmem:[#allocation100_spill] sm:$0xff]  ;;  %v17267_v62 = vld [vmem:[#allocation71_spill] sm:$0xff]  ;;  %v17273_v25 = vcombine.low %v14749_v39, %v14743_v34 }
 0x6d9   : > { %17249 = vst [vmem:[#allocation61_spill] sm:$0xff] %v14880_v31  ;;  %17253 = vst [vmem:[#allocation64_spill] sm:$0xff] %v14892_v12  ;;  %v7017_v54 = vsel %vm6918_vm12, %v17259_v1, %v6685_v42  ;;  %v17262_v4 = vcombine.low %v17260_v9, %v17261_v60  ;;  %v17264_v18 = vcombine.high %v17260_v9, %v17261_v60  ;;  %v17281_v12 = vld [vmem:[#allocation121_spill] sm:$0xff]  ;;  %v17305_v34 = vld [vmem:[#allocation123_spill] sm:$0xff] }
 0x6da   : > { %17254 = vst [vmem:[#allocation63_spill] sm:$0xff] %v14895_v51  ;;  %17255 = vst [vmem:[#allocation82_spill] sm:$0xff] %v14898_v52  ;;  %v8680_v17 = vcombine.high %v7015_v22, %v7017_v54  ;;  %v8672_v41 = vcombine.high %v14889_v0, %v14895_v51  ;;  %v14932_v42 = vrot.slane %v17266_v33, %v13908_v10  ;;  %v17276_v0 = vld [vmem:[#allocation73_spill] sm:$0xff] }
 0x6db   : > { %17257 = vst [vmem:[#allocation96_spill] sm:$0xff] %v14904_v26  ;;  %v14916_v16 = vrot.slane %v17262_v4, %v13908_v10  ;;  %v14926_v1 = vrot.slane %v17264_v18, %v13908_v10  ;;  %v17269_v24 = vcombine.high %v17267_v62, %v17268_v59  ;;  %v17271_v9 = vcombine.low %v14454_v57, %v14450_v49 }
 0x6dc   : > { %v8679_v18 = vcombine.low %v7015_v22, %v7017_v54  ;;  %v14951_v33 = vrot.slane %v8680_v17, %v13747_v35  ;;  %9261 = vrot.lane.b32.xlu1 %v8672_v41, %s10602_s12  ;;  %v6701_v4 = vpop.permute.xlu0 %6700  ;;  %v14958_v51 = vrot.slane %v17273_v25, %v13908_v10  ;;  %v8695_v17 = vcombine.low %v17267_v62, %v17268_v59  ;;  %v17275_v25 = vld [vmem:[#allocation74_spill] sm:$0xff]  ;;  %v17280_v41 = vld [vmem:[#allocation120_spill] sm:$0xff] }
 0x6dd   : > { %17263 = vst [vmem:[#allocation53_spill] sm:$0xff] %v14916_v16  ;;  %17265 = vst [vmem:[#allocation54_spill] sm:$0xff] %v14926_v1  ;;  %v14942_v3 = vrot.slane %v17269_v24, %v13747_v35  ;;  %v14948_v60 = vrot.slane %v17271_v9, %v13908_v10  ;;  %v8727_v52 = vcombine.low %v17276_v0, %v17275_v25  ;;  %v17295_v1 = vld [vmem:[#allocation102_spill] sm:$0xff] }
 0x6de   : > { %17272 = vst [vmem:[#allocation78_spill] sm:$0xff] %v14951_v33  ;;  %17274 = vst [vmem:[#allocation66_spill] sm:$0xff] %v14958_v51  ;;  %v17277_v24 = vcombine.low %v14707_v58, %v14703_v61  ;;  %v14985_v59 = vrot.slane %v8679_v18, %v13747_v35  ;;  %v7019_v16 = vsel %vm6918_vm12, %v17280_v41, %v6701_v4 }
 0x6df   : > { %17270 = vst [vmem:[#allocation9_spill] sm:$0xff] %v14942_v3  ;;  %v8759_v54 = vcombine.low %v14951_v33, %v14942_v3  ;;  %v14994_v33 = vrot.slane %v8695_v17, %v13747_v35  ;;  %v14997_v62 = vrot.slane %v8727_v52, %v13747_v35  ;;  %v17284_v18 = vcombine.high %v17276_v0, %v17275_v25 }
 0x6e0   : > { %v14978_v9 = vrot.slane %v17277_v24, %v13908_v10  ;;  %17279 = vst [vmem:[#allocation55_spill] sm:$0xff] %v14985_v59  ;;  %v6717_v31 = vpop.permute.xlu0 %6716  ;;  %v17294_v24 = vld [vmem:[#allocation94_spill] sm:$0xff]  ;;  %v17353_v51 = vcombine.high %v14231_v11, %v14225_v20 }
 0x6e1   : > { %v7021_v3 = vsel %vm6918_vm12, %v17281_v12, %v6717_v31  ;;  %17282 = vst [vmem:[#allocation56_spill] sm:$0xff] %v14994_v33  ;;  %17283 = vst [vmem:[#allocation68_spill] sm:$0xff] %v14997_v62  ;;  %v15003_v26 = vrot.slane %v17284_v18, %v13747_v35  ;;  %v8743_v31 = vcombine.low %v14985_v59, %v14994_v33 }
 0x6e2   : > { %17278 = vst [vmem:[#allocation65_spill] sm:$0xff] %v14978_v9  ;;  %v8711_v22 = vcombine.low %v7019_v16, %v7021_v3  ;;  %v8712_v61 = vcombine.high %v7019_v16, %v7021_v3  ;;  %v17288_v3 = vld [vmem:[#allocation14_spill] sm:$0xff]  ;;  %v17298_v59 = vcombine.low %v14366_v19, %v14347_v55 }
 0x6e3   : > { %17285 = vst [vmem:[#allocation67_spill] sm:$0xff] %v15003_v26  ;;  %v17289_v16 = vld [vmem:[#allocation26_spill] sm:$0xff] }
 0x6e4   : > { %v15008_v12 = vrot.slane %v8711_v22, %v13747_v35  ;;  %v15011_v4 = vrot.slane %v8712_v61, %v13747_v35  ;;  %v6733_v17 = vpop.permute.xlu0 %6732  ;;  %v17290_v52 = vcombine.low %v17288_v3, %v17289_v16  ;;  %v17292_v61 = vcombine.high %v17232_v32, %v17233_v27 }
 0x6e5   : > { %v15041_v33 = vrot.slane %v17298_v59, %v13908_v10  ;;  %v15044_v22 = vrot.slane %v8743_v31, %v13908_v10  ;;  %v17310_v31 = vld [vmem:[#allocation75_spill] sm:$0xff] }
 0x6e6   : > { %17286 = vst [vmem:[#allocation86_spill] sm:$0xff] %v15008_v12  ;;  %17287 = vst [vmem:[#allocation84_spill] sm:$0xff] %v15011_v4  ;;  %v15017_v41 = vrot.slane %v17290_v52, %v13908_v10  ;;  %v8775_v0 = vcombine.low %v15008_v12, %v14997_v62  ;;  %v8791_v25 = vcombine.low %v15011_v4, %v15003_v26 }
 0x6e7   : > { %v15029_v18 = vrot.slane %v17292_v61, %v13908_v10  ;;  %v17296_v52 = vcombine.low %v17294_v24, %v17295_v1  ;;  %17299 = vst [vmem:[#allocation31_spill] sm:$0xff] %v15041_v33  ;;  %17300 = vst [vmem:[#allocation70_spill] sm:$0xff] %v15044_v22  ;;  %v15053_v61 = vrot.slane %v8759_v54, %v13908_v10 }
 0x6e8   : > { %17291 = vst [vmem:[#allocation57_spill] sm:$0xff] %v15017_v41  ;;  %v15047_v26 = vrot.slane %v8775_v0, %v13908_v10  ;;  %v15050_v27 = vrot.slane %v8791_v25, %v13908_v10  ;;  %v6749_v32 = vpop.permute.xlu0 %6748  ;;  %v17306_v0 = vcombine.low %v14298_v28, %v14290_v50 }
 0x6e9   : > { %17293 = vst [vmem:[#allocation58_spill] sm:$0xff] %v15029_v18  ;;  %v15035_v58 = vrot.slane %v17296_v52, %v13908_v10  ;;  %17303 = vst [vmem:[#allocation90_spill] sm:$0xff] %v15053_v61  ;;  %v17304_v52 = vld [vmem:[#allocation122_spill] sm:$0xff]  ;;  %v7025_v59 = vsel %vm6918_vm12, %v17305_v34, %v6749_v32  ;;  %v17318_v32 = vld [vmem:[#allocation89_spill] sm:$0xff] }
 0x6ea   : > { %17301 = vst [vmem:[#allocation69_spill] sm:$0xff] %v15047_v26  ;;  %17302 = vst [vmem:[#allocation93_spill] sm:$0xff] %v15050_v27  ;;  %v7023_v4 = vsel %vm6918_vm12, %v17304_v52, %v6733_v17  ;;  %v15065_v39 = vrot.slane %v17306_v0, %v13908_v10  ;;  %v8808_v54 = vcombine.high %v15044_v22, %v15047_v26  ;;  %v17311_v0 = vld [vmem:[#allocation132_spill] sm:$0xff]  ;;  %v17352_v27 = vld [vmem:[#allocation131_spill] sm:$0xff] }
 0x6eb   : > { %17297 = vst [vmem:[#allocation99_spill] sm:$0xff] %v15035_v58  ;;  %v8816_v25 = vcombine.high %v7023_v4, %v7025_v59  ;;  %v17308_v17 = vcombine.high %v17238_v29, %v17239_v8  ;;  %v17312_v12 = vcombine.high %v17310_v31, %v17311_v0  ;;  %v8815_v49 = vcombine.low %v7023_v4, %v7025_v59  ;;  %v17322_v8 = vld [vmem:[#allocation124_spill] sm:$0xff] }
 0x6ec   : > { %17307 = vst [vmem:[#allocation59_spill] sm:$0xff] %v15065_v39  ;;  %9263 = vrot.lane.b32.xlu0 %v8808_v54, %s10602_s12  ;;  %v6765_v29 = vpop.permute.xlu0 %6764  ;;  %v17320_v59 = vcombine.low %v14862_v15, %v14858_v37 }
 0x6ed   : > { %v15073_v52 = vrot.slane %v17308_v17, %v13908_v10  ;;  %v15083_v62 = vrot.slane %v17312_v12, %v13747_v35  ;;  %v15086_v57 = vrot.slane %v8816_v25, %v13747_v35  ;;  %v17315_v17 = vcombine.low %v14646_v21, %v14642_v43 }
 0x6ee   : > { %v8831_v25 = vcombine.low %v17310_v31, %v17311_v0  ;;  %v17319_v12 = vcombine.low %v14604_v2, %v14600_v38  ;;  %v15121_v31 = vrot.slane %v17320_v59, %v13908_v10  ;;  %v15124_v0 = vrot.slane %v8815_v49, %v13747_v35 }
 0x6ef   : > { %17309 = vst [vmem:[#allocation60_spill] sm:$0xff] %v15073_v52  ;;  %17313 = vst [vmem:[#allocation12_spill] sm:$0xff] %v15083_v62  ;;  %v15095_v34 = vrot.slane %v17315_v17, %v13908_v10  ;;  %v8895_v54 = vcombine.low %v15086_v57, %v15083_v62  ;;  %v17317_v17 = vld [vmem:[#allocation76_spill] sm:$0xff]  ;;  %v7027_v18 = vsel %vm6918_vm12, %v17322_v8, %v6765_v29  ;;  %v17323_v52 = vld [vmem:[#allocation125_spill] sm:$0xff] }
 0x6f0   : > { %17314 = vst [vmem:[#allocation91_spill] sm:$0xff] %v15086_v57  ;;  %v8863_v26 = vcombine.low %v17318_v32, %v17317_v17  ;;  %v15115_v4 = vrot.slane %v17319_v12, %v13908_v10  ;;  %17321 = vst [vmem:[#allocation87_spill] sm:$0xff] %v15121_v31  ;;  %v6781_v22 = vpop.permute.xlu0 %6780  ;;  %v15133_v48 = vrot.slane %v8831_v25, %v13747_v35 }
 0x6f1   : > { %17316 = vst [vmem:[#allocation33_spill] sm:$0xff] %v15095_v34  ;;  %v7029_v44 = vsel %vm6918_vm12, %v17323_v52, %v6781_v22  ;;  %v17324_v59 = vcombine.low %v14816_v63, %v14812_v47  ;;  %v17326_v22 = vcombine.high %v17318_v32, %v17317_v17  ;;  %v17329_v17 = vcombine.high %v17288_v3, %v17289_v16  ;;  %v17335_v32 = vld [vmem:[#allocation126_spill] sm:$0xff] }
 0x6f2   : > { %v8847_v49 = vcombine.low %v7027_v18, %v7029_v44  ;;  %v8848_v57 = vcombine.high %v7027_v18, %v7029_v44  ;;  %v15142_v37 = vrot.slane %v8863_v26, %v13747_v35  ;;  %v8879_v29 = vcombine.low %v15124_v0, %v15133_v48 }
 0x6f3   : > { %v15139_v62 = vrot.slane %v17324_v59, %v13908_v10  ;;  %v15148_v52 = vrot.slane %v17326_v22, %v13747_v35  ;;  %v15182_v47 = vrot.slane %v8895_v54, %v13908_v10  ;;  %v17344_v54 = vld [vmem:[#allocation128_spill] sm:$0xff] }
 0x6f4   : > { %v15153_v8 = vrot.slane %v8847_v49, %v13747_v35  ;;  %v15156_v25 = vrot.slane %v8848_v57, %v13747_v35  ;;  %v6797_v59 = vpop.permute.xlu0 %6796  ;;  %v15170_v49 = vrot.slane %v17329_v17, %v13908_v10  ;;  %v15173_v57 = vrot.slane %v8879_v29, %v13908_v10 }
 0x6f5   : > { %17325 = vst [vmem:[#allocation118_spill] sm:$0xff] %v15139_v62  ;;  %17327 = vst [vmem:[#allocation119_spill] sm:$0xff] %v15148_v52 }
 0x6f6   : > { %17328 = vst [vmem:[#allocation85_spill] sm:$0xff] %v15156_v25  ;;  %v8911_v44 = vcombine.low %v15153_v8, %v15142_v37  ;;  %v8927_v18 = vcombine.low %v15156_v25, %v15148_v52  ;;  %17330 = vst [vmem:[#allocation100_spill] sm:$0xff] %v15170_v49  ;;  %v7031_v52 = vsel %vm6918_vm12, %v17335_v32, %v6797_v59  ;;  %v17336_v25 = vld [vmem:[#allocation127_spill] sm:$0xff] }
 0x6f7   : > { %17331 = vst [vmem:[#allocation71_spill] sm:$0xff] %v15173_v57  ;;  %17334 = vst [vmem:[#allocation73_spill] sm:$0xff] %v15182_v47 }
 0x6f8   : > { %v15176_v22 = vrot.slane %v8911_v44, %v13908_v10  ;;  %v15179_v26 = vrot.slane %v8927_v18, %v13908_v10  ;;  %v6813_v12 = vpop.permute.xlu0 %6812  ;;  %v17337_v18 = vcombine.high %v17294_v24, %v17295_v1 }
 0x6f9   : > { %v7033_v3 = vsel %vm6918_vm12, %v17336_v25, %v6813_v12  ;;  %v17339_v12 = vld [vmem:[#allocation4_spill] sm:$0xff]  ;;  %v17340_v25 = vld [vmem:[#allocation27_spill] sm:$0xff] }
 0x6fa   : > { %17332 = vst [vmem:[#allocation72_spill] sm:$0xff] %v15176_v22  ;;  %17333 = vst [vmem:[#allocation74_spill] sm:$0xff] %v15179_v26  ;;  %v8952_v29 = vcombine.high %v7031_v52, %v7033_v3  ;;  %v8944_v44 = vcombine.high %v15173_v57, %v15176_v22  ;;  %v15196_v17 = vrot.slane %v17337_v18, %v13908_v10 }
 0x6fb   : > { %v17341_v32 = vcombine.high %v17339_v12, %v17340_v25  ;;  %v8951_v40 = vcombine.low %v7031_v52, %v7033_v3 }
 0x6fc   : > { %17338 = vst [vmem:[#allocation120_spill] sm:$0xff] %v15196_v17  ;;  %v15209_v23 = vrot.slane %v8952_v29, %v13747_v35  ;;  %9265 = vrot.lane.b32.xlu1 %v8944_v44, %s10602_s12  ;;  %v6829_v1 = vpop.permute.xlu0 %6828  ;;  %v17342_v29 = vld [vmem:[#allocation95_spill] sm:$0xff]  ;;  %v17343_v44 = vld [vmem:[#allocation6_spill] sm:$0xff] }
 0x6fd   : > { %v15206_v16 = vrot.slane %v17341_v32, %v13747_v35  ;;  %v8967_v32 = vcombine.low %v17339_v12, %v17340_v25  ;;  %v8999_v59 = vcombine.low %v17343_v44, %v17342_v29  ;;  %v15229_v18 = vrot.slane %v8951_v40, %v13747_v35  ;;  %v17345_v12 = vld [vmem:[#allocation129_spill] sm:$0xff] }
 0x6fe   : > { %v7035_v57 = vsel %vm6918_vm12, %v17344_v54, %v6829_v1  ;;  %v17346_v40 = vcombine.high %v17343_v44, %v17342_v29  ;;  %v17351_v44 = vld [vmem:[#allocation130_spill] sm:$0xff] }
 0x6ff   : > { %v9031_v52 = vcombine.low %v15209_v23, %v15206_v16  ;;  %v15236_v49 = vrot.slane %v8967_v32, %v13747_v35  ;;  %v15239_v41 = vrot.slane %v8999_v59, %v13747_v35 }
 0x700   : > { %v6845_v22 = vpop.permute.xlu0 %6844  ;;  %v15247_v58 = vrot.slane %v17346_v40, %v13747_v35  ;;  %v17349_v40 = vcombine.high %v14263_v36, %v14257_v46  ;;  %v15293_v46 = vrot.slane %v17353_v51, %v13908_v10 }
 0x701   : > { %v7037_v25 = vsel %vm6918_vm12, %v17345_v12, %v6845_v22  ;;  %v9015_v22 = vcombine.low %v15229_v18, %v15236_v49  ;;  %v15281_v29 = vrot.slane %v9031_v52, %v13908_v10 }
 0x702   : > { %v8983_v3 = vcombine.low %v7035_v57, %v7037_v25  ;;  %v8984_v17 = vcombine.high %v7035_v57, %v7037_v25  ;;  %v15278_v24 = vrot.slane %v17349_v40, %v13908_v10  ;;  %17354 = vst [vmem:[#allocation94_spill] sm:$0xff] %v15293_v46 }
 0x703   : > { %v15266_v12 = vrot.slane %v9015_v22, %v13908_v10 }
 0x704   : > { %v15252_v54 = vrot.slane %v8983_v3, %v13747_v35  ;;  %v15255_v57 = vrot.slane %v8984_v17, %v13747_v35  ;;  %v6861_v59 = vpop.permute.xlu0 %6860  ;;  %17350 = vst [vmem:[#allocation26_spill] sm:$0xff] %v15278_v24  ;;  %v17362_v24 = vld [vmem:[#allocation134_spill] sm:$0xff] }
 0x705   : > { %17347 = vst [vmem:[#allocation121_spill] sm:$0xff] %v15266_v12  ;;  %v7039_v22 = vsel %vm6918_vm12, %v17351_v44, %v6861_v59  ;;  %v17356_v44 = vld [vmem:[#allocation29_spill] sm:$0xff]  ;;  %v17360_v59 = vcombine.low %v14318_v6, %v14304_v14 }
 0x706   : > { %v9047_v1 = vcombine.low %v15252_v54, %v15239_v41  ;;  %v9063_v32 = vcombine.low %v15255_v57, %v15247_v58 }
 0x708   : > { %v15269_v3 = vrot.slane %v9047_v1, %v13908_v10  ;;  %v15272_v17 = vrot.slane %v9063_v32, %v13908_v10  ;;  %v6877_v25 = vpop.permute.xlu0 %6876 }
 0x709   : > { %v7041_v1 = vsel %vm6918_vm12, %v17352_v27, %v6877_v25  ;;  %v17355_v27 = vld [vmem:[#allocation79_spill] sm:$0xff] }
 0x70a   : > { %17348 = vst [vmem:[#allocation14_spill] sm:$0xff] %v15269_v3  ;;  %v9088_v61 = vcombine.high %v7039_v22, %v7041_v1  ;;  %v9080_v32 = vcombine.high %v15266_v12, %v15269_v3  ;;  %v17357_v25 = vcombine.high %v17355_v27, %v17356_v44  ;;  %v9087_v9 = vcombine.low %v7039_v22, %v7041_v1  ;;  %v17358_v1 = vld [vmem:[#allocation98_spill] sm:$0xff] }
 0x70c   : > { %v15305_v40 = vrot.slane %v17357_v25, %v13747_v35  ;;  %v15308_v20 = vrot.slane %v9088_v61, %v13747_v35  ;;  %9267 = vrot.lane.b32.xlu0 %v9080_v32, %s10602_s12  ;;  %v6893_v11 = vpop.permute.xlu0 %6892  ;;  %v9103_v25 = vcombine.low %v17355_v27, %v17356_v44  ;;  %v17359_v32 = vld [vmem:[#allocation80_spill] sm:$0xff]  ;;  %v15326_v51 = vrot.slane %v9087_v9, %v13747_v35  ;;  %v17361_v27 = vld [vmem:[#allocation133_spill] sm:$0xff] }
 0x70d   : > { %v9135_v36 = vcombine.low %v17359_v32, %v17358_v1  ;;  %v7043_v44 = vsel %vm6918_vm12, %v17361_v27, %v6893_v11 }
 0x70e   : > { %v9167_v22 = vcombine.low %v15308_v20, %v15305_v40  ;;  %v15339_v3 = vrot.slane %v9103_v25, %v13747_v35 }
 0x70f   : > { %v15342_v33 = vrot.slane %v9135_v36, %v13747_v35 }
 0x710   : > { %9303 = vrot.lane.b32.xlu0 %v17360_v59, %s10603_s14  ;;  %v6909_v52 = vpop.permute.xlu0 %6908  ;;  %v17363_v59 = vcombine.high %v17359_v32, %v17358_v1  ;;  %v17383_v32 = vld [vmem:[#allocation36_spill] sm:$0xff] }
 0x711   : > { %v7045_v46 = vsel %vm6918_vm12, %v17362_v24, %v6909_v52  ;;  %v9151_v24 = vcombine.low %v15326_v51, %v15339_v3 }
 0x712   : > { %v9119_v9 = vcombine.low %v7043_v44, %v7045_v46  ;;  %v9120_v12 = vcombine.high %v7043_v44, %v7045_v46  ;;  %v15348_v39 = vrot.slane %v17363_v59, %v13747_v35  ;;  %v17364_v46 = vcombine.low %v14372_v30, %v14381_v45 }
 0x713   : > { %v17370_v59 = vcombine.high %v14366_v19, %v14347_v55  ;;  %v17374_v55 = vcombine.high %v14518_v7, %v14512_v13  ;;  %v17387_v7 = vld [vmem:[#allocation35_spill] sm:$0xff] }
 0x714   : > { %v15353_v52 = vrot.slane %v9119_v9, %v13747_v35  ;;  %v15356_v11 = vrot.slane %v9120_v12, %v13747_v35  ;;  %9307 = vrot.lane.b32.xlu0 %v17364_v46, %s10603_s14  ;;  %v15371_v35 = vrot.slane %v9151_v24, %v13908_v10  ;;  %v15374_v12 = vrot.slane %v9167_v22, %v13908_v10  ;;  %v17375_v22 = vld [vmem:[#allocation30_spill] sm:$0xff] }
 0x715   : > { %v17369_v9 = vcombine.low %v14404_v56, %v14387_v53  ;;  %v15390_v24 = vrot.slane %v17370_v59, %v13908_v10  ;;  %v15408_v19 = vrot.slane %v17374_v55, %v13908_v10  ;;  %v17376_v36 = vcombine.low %v14416_v5, %v17375_v22  ;;  %v17380_v59 = vld [vmem:[#allocation68_spill] sm:$0xff]  ;;  %v17390_v55 = vld [vmem:[#allocation110_spill] sm:$0xff] }
 0x716   : > { %v9183_v25 = vcombine.low %v15353_v52, %v15342_v33  ;;  %v9199_v1 = vcombine.low %v15356_v11, %v15348_v39  ;;  %17365 = vst [vmem:[#allocation102_spill] sm:$0xff] %v15371_v35  ;;  %17366 = vst [vmem:[#allocation122_spill] sm:$0xff] %v15374_v12 }
 0x717   : > { %17371 = vst [vmem:[#allocation132_spill] sm:$0xff] %v15390_v24 }
 0x718   : > { %v15377_v27 = vrot.slane %v9183_v25, %v13908_v10  ;;  %v15380_v44 = vrot.slane %v9199_v1, %v13908_v10  ;;  %9311 = vrot.lane.b32.xlu0 %v17369_v9, %s10603_s14  ;;  %v17372_v1 = vcombine.high %v14298_v28, %v14290_v50  ;;  %v17377_v28 = vld [vmem:[#allocation11_spill] sm:$0xff]  ;;  %v17381_v25 = vld [vmem:[#allocation86_spill] sm:$0xff] }
 0x71a   : > { %17367 = vst [vmem:[#allocation123_spill] sm:$0xff] %v15377_v27  ;;  %17368 = vst [vmem:[#allocation75_spill] sm:$0xff] %v15380_v44  ;;  %v9216_v46 = vcombine.high %v15371_v35, %v15377_v27  ;;  %v15402_v9 = vrot.slane %v17372_v1, %v13908_v10  ;;  %v17378_v1 = vld [vmem:[#allocation108_spill] sm:$0xff]  ;;  %v17388_v44 = vld [vmem:[#allocation114_spill] sm:$0xff] }
 0x71b   : > { %v17379_v61 = vcombine.high %v17377_v28, %v17378_v1  ;;  %v17386_v1 = vld [vmem:[#allocation55_spill] sm:$0xff]  ;;  %v17389_v12 = vcombine.low %v17387_v7, %v17388_v44 }
 0x71c   : > { %17373 = vst [vmem:[#allocation76_spill] sm:$0xff] %v15402_v9  ;;  %9315 = vrot.lane.b32.xlu0 %v17376_v36, %s10603_s14  ;;  %9269 = vrot.lane.b32.xlu1 %v9216_v46, %s10602_s12  ;;  %v8776_v36 = vcombine.high %v17381_v25, %v17380_v59  ;;  %v17382_v46 = vld [vmem:[#allocation46_spill] sm:$0xff]  ;;  %v17391_v25 = vld [vmem:[#allocation32_spill] sm:$0xff]  ;;  %v17397_v9 = vld [vmem:[#allocation67_spill] sm:$0xff] }
 0x71d   : > { %v15423_v13 = vrot.slane %v17379_v61, %v13908_v10  ;;  %v17384_v27 = vcombine.high %v17382_v46, %v17383_v32  ;;  %v17385_v61 = vld [vmem:[#allocation56_spill] sm:$0xff]  ;;  %v17392_v59 = vcombine.low %v17390_v55, %v17391_v25 }
 0x71e   : > { %v8744_v35 = vcombine.high %v17386_v1, %v17385_v61  ;;  %v17393_v32 = vld [vmem:[#allocation24_spill] sm:$0xff]  ;;  %v8790_v28 = vrot.slane %v8776_v36, %v13908_v10  ;;  %v9048_v61 = vcombine.high %v15252_v54, %v15239_v41  ;;  %v17400_v36 = vld [vmem:[#allocation42_spill] sm:$0xff]  ;;  %v17402_v41 = vld [vmem:[#allocation13_spill] sm:$0xff] }
 0x71f   : > { %v15435_v50 = vrot.slane %v17384_v27, %v13908_v10  ;;  %v17394_v27 = vld [vmem:[#allocation39_spill] sm:$0xff]  ;;  %v17396_v1 = vld [vmem:[#allocation84_spill] sm:$0xff] }
 0x720   : > { %9319 = vrot.lane.b32.xlu0 %v17389_v12, %s10603_s14  ;;  %9305 = vrot.lane.b32.xlu1 %v17392_v59, %s10603_s14  ;;  %v17395_v46 = vcombine.high %v17393_v32, %v17394_v27  ;;  %v17398_v12 = vcombine.high %v17396_v1, %v17397_v9  ;;  %v8758_v47 = vrot.slane %v8744_v35, %v13908_v10  ;;  %v17399_v27 = vld [vmem:[#allocation49_spill] sm:$0xff]  ;;  %v17403_v54 = vld [vmem:[#allocation43_spill] sm:$0xff]  ;;  %v17405_v9 = vld [vmem:[#allocation78_spill] sm:$0xff] }
 0x721   : > { %v9016_v32 = vcombine.high %v15229_v18, %v15236_v49  ;;  %v17404_v31 = vcombine.low %v17402_v41, %v17403_v54  ;;  %v17406_v1 = vld [vmem:[#allocation9_spill] sm:$0xff]  ;;  %v9062_v35 = vrot.slane %v9048_v61, %v13908_v10  ;;  %v17408_v49 = vcombine.high %v15255_v57, %v15247_v58 }
 0x722   : > { %v15453_v24 = vrot.slane %v17395_v46, %v13908_v10  ;;  %v15462_v26 = vrot.slane %v17398_v12, %v13908_v10  ;;  %v17401_v46 = vcombine.low %v17399_v27, %v17400_v36  ;;  %v17407_v12 = vcombine.high %v17405_v9, %v17406_v1  ;;  %v17409_v9 = vld [vmem:[#allocation113_spill] sm:$0xff]  ;;  %v17410_v1 = vld [vmem:[#allocation34_spill] sm:$0xff] }
 0x723   : > { %v8809_v62 = vcombine.low %v8758_v47, %v8790_v28  ;;  %v15488_v18 = vrot.slane %v17408_v49, %v13908_v10  ;;  %v17412_v61 = vcombine.high %v15209_v23, %v15206_v16  ;;  %v17413_v57 = vcombine.high %v14646_v21, %v14642_v43 }
 0x724   : > { %9323 = vrot.lane.b32.xlu0 %v17401_v46, %s10603_s14  ;;  %9309 = vrot.lane.b32.xlu1 %v17404_v31, %s10603_s14  ;;  %v15481_v59 = vrot.slane %v17407_v12, %v13908_v10  ;;  %v9030_v31 = vrot.slane %v9016_v32, %v13908_v10  ;;  %v17411_v12 = vcombine.low %v17409_v9, %v17410_v1  ;;  %v17414_v32 = vld [vmem:[#allocation115_spill] sm:$0xff] }
 0x725   : > { %v15502_v34 = vrot.slane %v17412_v61, %v13908_v10  ;;  %v15508_v49 = vrot.slane %v17413_v57, %v13908_v10  ;;  %v17417_v23 = vcombine.high %v14604_v2, %v14600_v38  ;;  %v8912_v21 = vcombine.high %v15153_v8, %v15142_v37  ;;  %v17418_v61 = vld [vmem:[#allocation77_spill] sm:$0xff]  ;;  %v17421_v37 = vld [vmem:[#allocation38_spill] sm:$0xff] }
 0x726   : > { %v9081_v58 = vcombine.low %v9030_v31, %v9062_v35  ;;  %v8880_v38 = vcombine.high %v15124_v0, %v15133_v48  ;;  %v17420_v2 = vcombine.high %v14318_v6, %v14304_v14  ;;  %v17422_v8 = vld [vmem:[#allocation109_spill] sm:$0xff]  ;;  %v9184_v48 = vcombine.high %v15353_v52, %v15342_v33  ;;  %v17427_v14 = vld [vmem:[#allocation119_spill] sm:$0xff]  ;;  %v17430_v33 = vld [vmem:[#allocation64_spill] sm:$0xff] }
 0x727   : > { %v15521_v16 = vrot.slane %v17417_v23, %v13908_v10  ;;  %v17423_v23 = vcombine.low %v17421_v37, %v17422_v8  ;;  %v8926_v43 = vrot.slane %v8912_v21, %v13908_v10  ;;  %v17426_v0 = vld [vmem:[#allocation85_spill] sm:$0xff]  ;;  %v17429_v21 = vcombine.high %v14372_v30, %v14381_v45  ;;  %v17431_v52 = vld [vmem:[#allocation82_spill] sm:$0xff] }
 0x728   : > { %9327 = vrot.lane.b32.xlu0 %v8809_v62, %s10603_s14  ;;  %9313 = vrot.lane.b32.xlu1 %v17411_v12, %s10603_s14  ;;  %v9085_v62 = vcombine.low %v15502_v34, %v15488_v18  ;;  %v17415_v12 = vld [vmem:[#allocation25_spill] sm:$0xff]  ;;  %v17428_v6 = vcombine.high %v17426_v0, %v17427_v14  ;;  %v17434_v0 = vld [vmem:[#allocation12_spill] sm:$0xff] }
 0x729   : > { %v17416_v46 = vcombine.low %v17414_v32, %v17415_v12 }
 0x72c   : > { %9331 = vrot.lane.b32.xlu0 %v9081_v58, %s10603_s14  ;;  %9317 = vrot.lane.b32.xlu1 %v17416_v46, %s10603_s14  ;;  %v17419_v58 = vcombine.high %v14862_v15, %v17418_v61  ;;  %v17424_v15 = vld [vmem:[#allocation50_spill] sm:$0xff]  ;;  %v8894_v46 = vrot.slane %v8880_v38, %v13908_v10  ;;  %v9198_v38 = vrot.slane %v9184_v48, %v13908_v10 }
 0x72d   : > { %v17425_v61 = vcombine.high %v14816_v63, %v17424_v15  ;;  %v9152_v63 = vcombine.high %v15326_v51, %v15339_v3  ;;  %v17432_v15 = vcombine.low %v17430_v33, %v17431_v52  ;;  %v17436_v3 = vcombine.high %v15356_v11, %v15348_v39 }
 0x72e   : > { %v15531_v57 = vrot.slane %v17419_v58, %v13908_v10  ;;  %v17438_v48 = vcombine.high %v15308_v20, %v15305_v40  ;;  %v17443_v40 = vcombine.high %v17402_v41, %v17403_v54  ;;  %v17449_v41 = vcombine.high %v17421_v37, %v17422_v8  ;;  %v17454_v37 = vld [vmem:[#allocation8_spill] sm:$0xff]  ;;  %v17455_v8 = vld [vmem:[#allocation51_spill] sm:$0xff] }
 0x72f   : > { %v15549_v58 = vrot.slane %v17425_v61, %v13908_v10  ;;  %v17433_v61 = vld [vmem:[#allocation91_spill] sm:$0xff]  ;;  %v15584_v45 = vrot.slane %v17436_v3, %v13908_v10  ;;  %v9166_v51 = vrot.slane %v9152_v63, %v13908_v10  ;;  %v17439_v63 = vcombine.high %v14416_v5, %v17375_v22 }
 0x730   : > { %9367 = vrot.lane.b32.xlu0 %v17420_v2, %s10604_s17  ;;  %9321 = vrot.lane.b32.xlu1 %v17423_v23, %s10603_s14  ;;  %v15558_v2 = vrot.slane %v17428_v6, %v13908_v10  ;;  %v17435_v14 = vcombine.high %v17433_v61, %v17434_v0  ;;  %v8945_v23 = vcombine.low %v8894_v46, %v8926_v43  ;;  %v15666_v61 = vpop.permute.xlu0 %9239 }
 0x731   : > { %v9217_v39 = vcombine.low %v9166_v51, %v9198_v38  ;;  %v17442_v5 = vcombine.high %v17399_v27, %v17400_v36  ;;  %v17444_v22 = vcombine.high %v17409_v9, %v17410_v1  ;;  %v17447_v27 = vld [vmem:[#allocation111_spill] sm:$0xff]  ;;  %v17453_v1 = vcombine.high %v17430_v33, %v17431_v52  ;;  %v17457_v33 = vld [vmem:[#allocation52_spill] sm:$0xff]  ;;  %v17458_v52 = vld [vmem:[#allocation62_spill] sm:$0xff] }
 0x732   : > { %v15577_v6 = vrot.slane %v17435_v14, %v13908_v10  ;;  %v9218_v0 = vcombine.high %v9166_v51, %v9198_v38  ;;  %v17460_v3 = vcombine.low %v14948_v60, %v14932_v42  ;;  %v17462_v38 = vld [vmem:[#allocation116_spill] sm:$0xff]  ;;  %v17498_v20 = vcombine.high %v14948_v60, %v14932_v42 }
 0x734   : > { %9371 = vrot.lane.b32.xlu0 %v17429_v21, %s10604_s17  ;;  %9325 = vrot.lane.b32.xlu1 %v17432_v15, %s10603_s14  ;;  %v8949_v30 = vcombine.low %v15577_v6, %v15558_v2  ;;  %v17437_v21 = vcombine.high %v14404_v56, %v14387_v53  ;;  %v15598_v15 = vrot.slane %v17438_v48, %v13908_v10  ;;  %v17464_v48 = vld [vmem:[#allocation65_spill] sm:$0xff] }
 0x735   : > { %v17440_v56 = vcombine.high %v17387_v7, %v17388_v44  ;;  %v17441_v10 = vcombine.high %v17390_v55, %v17391_v25  ;;  %v8810_v44 = vcombine.high %v8758_v47, %v8790_v28  ;;  %v9082_v55 = vcombine.high %v9030_v31, %v9062_v35  ;;  %v17446_v28 = vld [vmem:[#allocation47_spill] sm:$0xff]  ;;  %v17451_v31 = vld [vmem:[#allocation37_spill] sm:$0xff]  ;;  %v17496_v47 = vld [vmem:[#allocation14_spill] sm:$0xff] }
 0x736   : > { %v9221_v11 = vcombine.low %v15598_v15, %v15584_v45  ;;  %v17445_v25 = vcombine.high %v17414_v32, %v17415_v12  ;;  %v17448_v36 = vcombine.low %v17446_v28, %v17447_v27  ;;  %v17450_v35 = vld [vmem:[#allocation7_spill] sm:$0xff]  ;;  %v8946_v32 = vcombine.high %v8894_v46, %v8926_v43  ;;  %v15675_v46 = vpop.permute.xlu0 %9243 }
 0x737   : > { %v17452_v9 = vcombine.low %v17450_v35, %v17451_v31  ;;  %v17459_v43 = vcombine.low %v17457_v33, %v17458_v52 }
 0x738   : > { %9375 = vrot.lane.b32.xlu0 %v17437_v21, %s10604_s17  ;;  %9329 = vrot.lane.b32.xlu1 %v8945_v23, %s10603_s14  ;;  %v17456_v23 = vcombine.low %v17454_v37, %v17455_v8  ;;  %v17461_v21 = vld [vmem:[#allocation22_spill] sm:$0xff] }
 0x739   : > { %v17463_v51 = vcombine.low %v17461_v21, %v17462_v38 }
 0x73c   : > { %9379 = vrot.lane.b32.xlu0 %v17439_v63, %s10604_s17  ;;  %9333 = vrot.lane.b32.xlu1 %v9217_v39, %s10603_s14  ;;  %v17465_v39 = vld [vmem:[#allocation66_spill] sm:$0xff] }
 0x73d   : > { %v17466_v63 = vcombine.low %v17464_v48, %v17465_v39 }
 0x740   : > { %9383 = vrot.lane.b32.xlu0 %v17440_v56, %s10604_s17  ;;  %9369 = vrot.lane.b32.xlu1 %v17441_v10, %s10604_s17  ;;  %v17467_v56 = vld [vmem:[#allocation53_spill] sm:$0xff] }
 0x741   : > { %v17468_v10 = vld [vmem:[#allocation61_spill] sm:$0xff] }
 0x744   : > { %9387 = vrot.lane.b32.xlu0 %v17442_v5, %s10604_s17  ;;  %9373 = vrot.lane.b32.xlu1 %v17443_v40, %s10604_s17  ;;  %v17469_v5 = vcombine.low %v17467_v56, %v17468_v10  ;;  %v9248_v40 = vpop.permute.xlu0 %9247 }
 0x748   : > { %9391 = vrot.lane.b32.xlu0 %v8810_v44, %s10604_s17  ;;  %9377 = vrot.lane.b32.xlu1 %v17444_v22, %s10604_s17  ;;  %v17470_v44 = vld [vmem:[#allocation90_spill] sm:$0xff]  ;;  %v17471_v22 = vld [vmem:[#allocation93_spill] sm:$0xff] }
 0x749   : > { %v17502_v60 = vcombine.high %v17470_v44, %v17471_v22 }
 0x74c   : > { %9395 = vrot.lane.b32.xlu0 %v9082_v55, %s10604_s17  ;;  %9381 = vrot.lane.b32.xlu1 %v17445_v25, %s10604_s17  ;;  %v17472_v55 = vcombine.low %v17470_v44, %v17471_v22  ;;  %v17473_v25 = vld [vmem:[#allocation99_spill] sm:$0xff]  ;;  %v17507_v44 = vcombine.high %v15281_v29, %v15272_v17 }
 0x750   : > { %9431 = vrot.lane.b32.xlu0 %v17448_v36, %s10605_s18  ;;  %9385 = vrot.lane.b32.xlu1 %v17449_v41, %s10604_s17  ;;  %v17474_v36 = vld [vmem:[#allocation57_spill] sm:$0xff] }
 0x751   : > { %v17475_v41 = vcombine.low %v17473_v25, %v17474_v36 }
 0x754   : > { %9435 = vrot.lane.b32.xlu0 %v17452_v9, %s10605_s18  ;;  %9389 = vrot.lane.b32.xlu1 %v17453_v1, %s10604_s17  ;;  %v9252_v9 = vpop.permute.xlu0 %9251  ;;  %v17476_v1 = vcombine.low %v15281_v29, %v15272_v17  ;;  %v17515_v17 = vld [vmem:[#allocation107_spill] sm:$0xff] }
 0x758   : > { %9439 = vrot.lane.b32.xlu0 %v17456_v23, %s10605_s18  ;;  %9393 = vrot.lane.b32.xlu1 %v8946_v32, %s10604_s17  ;;  %v17477_v32 = vld [vmem:[#allocation59_spill] sm:$0xff] }
 0x759   : > { %v17478_v23 = vld [vmem:[#allocation31_spill] sm:$0xff] }
 0x75a   : > { %v17508_v22 = vcombine.high %v17477_v32, %v17478_v23 }
 0x75c   : > { %9443 = vrot.lane.b32.xlu0 %v17459_v43, %s10605_s18  ;;  %9397 = vrot.lane.b32.xlu1 %v9218_v0, %s10604_s17  ;;  %v17479_v0 = vcombine.low %v17477_v32, %v17478_v23  ;;  %v17480_v43 = vcombine.high %v17446_v28, %v17447_v27  ;;  %v17487_v27 = vcombine.high %v17454_v37, %v17455_v8  ;;  %v17516_v32 = vld [vmem:[#allocation105_spill] sm:$0xff] }
 0x75d   : > { %v17517_v23 = vcombine.low %v17515_v17, %v17516_v32 }
 0x760   : > { %9447 = vrot.lane.b32.xlu0 %v17460_v3, %s10605_s18  ;;  %9433 = vrot.lane.b32.xlu1 %v17463_v51, %s10605_s18  ;;  %v17481_v3 = vld [vmem:[#allocation33_spill] sm:$0xff] }
 0x761   : > { %v17482_v51 = vcombine.low %v15115_v4, %v17481_v3 }
 0x764   : > { %9451 = vrot.lane.b32.xlu0 %v17466_v63, %s10605_s18  ;;  %9437 = vrot.lane.b32.xlu1 %v17469_v5, %s10605_s18  ;;  %v9242_v63 = vpop.permute.xlu1 %9241  ;;  %v9256_v5 = vpop.permute.xlu0 %9255 }
 0x768   : > { %9455 = vrot.lane.b32.xlu0 %v17472_v55, %s10605_s18  ;;  %9441 = vrot.lane.b32.xlu1 %v17475_v41, %s10605_s18  ;;  %v17483_v55 = vcombine.high %v17450_v35, %v17451_v31  ;;  %v17484_v41 = vld [vmem:[#allocation118_spill] sm:$0xff]  ;;  %v9246_v14 = vpop.permute.xlu1 %9245  ;;  %v9260_v28 = vpop.permute.xlu0 %9259  ;;  %v17491_v31 = vcombine.high %v17457_v33, %v17458_v52  ;;  %v17499_v33 = vcombine.high %v17461_v21, %v17462_v38  ;;  %v17504_v21 = vld [vmem:[#allocation104_spill] sm:$0xff] }
 0x769   : > { %v17505_v38 = vld [vmem:[#allocation10_spill] sm:$0xff] }
 0x76c   : > { %9459 = vrot.lane.b32.xlu0 %v17476_v1, %s10605_s18  ;;  %9445 = vrot.lane.b32.xlu1 %v17479_v0, %s10605_s18  ;;  %v17485_v1 = vld [vmem:[#allocation87_spill] sm:$0xff]  ;;  %v9250_v54 = vpop.permute.xlu1 %9249  ;;  %v9264_v35 = vpop.permute.xlu0 %9263 }
 0x76d   : > { %v17486_v0 = vcombine.low %v17484_v41, %v17485_v1 }
 0x770   : > { %9495 = vrot.lane.b32.xlu0 %v17480_v43, %s10606_s20  ;;  %9449 = vrot.lane.b32.xlu1 %v17482_v51, %s10605_s18  ;;  %v17488_v43 = vld [vmem:[#allocation73_spill] sm:$0xff]  ;;  %v17489_v51 = vld [vmem:[#allocation74_spill] sm:$0xff]  ;;  %v9254_v37 = vpop.permute.xlu1 %9253 }
 0x771   : > { %v17490_v12 = vcombine.low %v17488_v43, %v17489_v51 }
 0x774   : > { %9499 = vrot.lane.b32.xlu0 %v17483_v55, %s10606_s20  ;;  %9453 = vrot.lane.b32.xlu1 %v17486_v0, %s10605_s18  ;;  %v17492_v55 = vld [vmem:[#allocation122_spill] sm:$0xff]  ;;  %v17493_v0 = vld [vmem:[#allocation75_spill] sm:$0xff]  ;;  %v9258_v52 = vpop.permute.xlu1 %9257 }
 0x775   : > { %v17494_v53 = vcombine.low %v17492_v55, %v17493_v0 }
 0x778   : > { %9503 = vrot.lane.b32.xlu0 %v17487_v27, %s10606_s20  ;;  %9457 = vrot.lane.b32.xlu1 %v17490_v12, %s10605_s18  ;;  %v17495_v27 = vld [vmem:[#allocation121_spill] sm:$0xff] }
 0x779   : > { %v17497_v7 = vcombine.low %v17495_v27, %v17496_v47  ;;  %v15761_v47 = vpop.permute.xlu1 %9261 }
 0x77c   : > { %9507 = vrot.lane.b32.xlu0 %v17491_v31, %s10606_s20  ;;  %9461 = vrot.lane.b32.xlu1 %v17494_v53, %s10605_s18  ;;  %v17500_v31 = vcombine.high %v17464_v48, %v17465_v39  ;;  %v17506_v48 = vcombine.low %v17504_v21, %v17505_v38  ;;  %v17519_v38 = vld [vmem:[#allocation81_spill] sm:$0xff] }
 0x77e   : > { %v9268_v8 = vpop.permute.xlu0 %9267  ;;  %v9676_v39 = vsel %vm9671_vm13, %v17506_v48, %v9248_v40  ;;  %v17520_v48 = vld [vmem:[#allocation83_spill] sm:$0xff] }
 0x77f   : > { %v9686_v12 = vsel %vm9671_vm13, %v17497_v7, %v9268_v8  ;;  %v17501_v7 = vcombine.high %v17467_v56, %v17468_v10  ;;  %v15777_v56 = vpop.permute.xlu1 %9265 }
 0x780   : > { %9511 = vrot.lane.b32.xlu0 %v17498_v20, %s10606_s20  ;;  %9497 = vrot.lane.b32.xlu1 %v17499_v33, %s10606_s20  ;;  %v17503_v20 = vcombine.high %v17473_v25, %v17474_v36  ;;  %v17509_v25 = vld [vmem:[#allocation23_spill] sm:$0xff]  ;;  %v17510_v36 = vld [vmem:[#allocation20_spill] sm:$0xff] }
 0x781   : > { %v17511_v40 = vcombine.low %v17509_v25, %v17510_v36 }
 0x782   : > { %v9304_v53 = vpop.permute.xlu0 %9303 }
 0x783   : > { %v9678_v27 = vsel %vm9671_vm13, %v17511_v40, %v9252_v9  ;;  %v17518_v9 = vcombine.high %v15115_v4, %v17481_v3  ;;  %v17525_v4 = vld [vmem:[#allocation92_spill] sm:$0xff]  ;;  %v17526_v3 = vld [vmem:[#allocation41_spill] sm:$0xff] }
 0x784   : > { %9515 = vrot.lane.b32.xlu0 %v17500_v31, %s10606_s20  ;;  %9501 = vrot.lane.b32.xlu1 %v17501_v7, %s10606_s20  ;;  %v17512_v7 = vld [vmem:[#allocation102_spill] sm:$0xff] }
 0x786   : > { %v15763_v42 = vpop.permute.xlu0 %9307 }
 0x788   : > { %9519 = vrot.lane.b32.xlu0 %v17502_v60, %s10606_s20  ;;  %9505 = vrot.lane.b32.xlu1 %v17503_v20, %s10606_s20  ;;  %v17513_v60 = vld [vmem:[#allocation123_spill] sm:$0xff] }
 0x789   : > { %v17514_v20 = vcombine.low %v17512_v7, %v17513_v60  ;;  %v17527_v7 = vcombine.low %v17525_v4, %v17526_v3  ;;  %v17529_v60 = vld [vmem:[#allocation101_spill] sm:$0xff] }
 0x78a   : > { %v9312_v10 = vpop.permute.xlu0 %9311 }
 0x78b   : > { %v15780_v8 = vsel %vm9688_vm14, %v9676_v39, %v9312_v10  ;;  %v17521_v39 = vcombine.low %v17519_v38, %v17520_v48  ;;  %v17533_v38 = vld [vmem:[#allocation40_spill] sm:$0xff] }
 0x78c   : > { %9523 = vrot.lane.b32.xlu0 %v17507_v44, %s10606_s20  ;;  %9509 = vrot.lane.b32.xlu1 %v17508_v22, %s10606_s20  ;;  %v17522_v44 = vld [vmem:[#allocation45_spill] sm:$0xff]  ;;  %v17523_v22 = vld [vmem:[#allocation16_spill] sm:$0xff] }
 0x78d   : > { %v9673_v10 = vsel %vm9671_vm13, %v17521_v39, %v9242_v63  ;;  %v17524_v25 = vcombine.low %v17522_v44, %v17523_v22  ;;  %v17528_v63 = vcombine.high %v17484_v41, %v17485_v1  ;;  %v17535_v41 = vld [vmem:[#allocation60_spill] sm:$0xff]  ;;  %v17536_v1 = vld [vmem:[#allocation58_spill] sm:$0xff] }
 0x78e   : > { %v9270_v33 = vpop.permute.xlu1 %9269  ;;  %v9316_v31 = vpop.permute.xlu0 %9315 }
 0x78f   : > { %v15798_v21 = vsel %vm9671_vm13, %v17514_v20, %v9270_v33  ;;  %v15801_v29 = vsel %vm9688_vm14, %v9678_v27, %v9316_v31  ;;  %v9680_v36 = vsel %vm9671_vm13, %v17524_v25, %v9256_v5  ;;  %v17530_v5 = vld [vmem:[#allocation88_spill] sm:$0xff] }
 0x790   : > { %9559 = vrot.lane.b32.xlu0 %v17517_v23, %s10607_s21  ;;  %9513 = vrot.lane.b32.xlu1 %v17518_v9, %s10606_s20  ;;  %v17531_v20 = vcombine.low %v17529_v60, %v17530_v5  ;;  %v17532_v9 = vld [vmem:[#allocation48_spill] sm:$0xff]  ;;  %v17543_v60 = vld [vmem:[#allocation69_spill] sm:$0xff] }
 0x791   : > { %v17534_v48 = vcombine.low %v17532_v9, %v17533_v38 }
 0x792   : > { %v9306_v40 = vpop.permute.xlu1 %9305  ;;  %v9320_v27 = vpop.permute.xlu0 %9319  ;;  %v9675_v23 = vsel %vm9671_vm13, %v17531_v20, %v9246_v14  ;;  %v17538_v14 = vcombine.high %v17488_v43, %v17489_v51  ;;  %v17546_v43 = vld [vmem:[#allocation26_spill] sm:$0xff] }
 0x793   : > { %v15820_v33 = vsel %vm9688_vm14, %v9673_v10, %v9306_v40  ;;  %v15823_v31 = vsel %vm9688_vm14, %v9680_v36, %v9320_v27  ;;  %v9682_v39 = vsel %vm9671_vm13, %v17534_v48, %v9260_v28  ;;  %v17537_v36 = vcombine.low %v17535_v41, %v17536_v1  ;;  %v17539_v40 = vld [vmem:[#allocation103_spill] sm:$0xff]  ;;  %v17540_v28 = vld [vmem:[#allocation17_spill] sm:$0xff] }
 0x794   : > { %9563 = vrot.lane.b32.xlu0 %v17527_v7, %s10607_s21  ;;  %9517 = vrot.lane.b32.xlu1 %v17528_v63, %s10606_s20  ;;  %v17541_v27 = vcombine.low %v17539_v40, %v17540_v28  ;;  %v17542_v63 = vld [vmem:[#allocation70_spill] sm:$0xff] }
 0x795   : > { %v17544_v5 = vcombine.low %v17542_v63, %v17543_v60  ;;  %v17552_v28 = vld [vmem:[#allocation18_spill] sm:$0xff] }
 0x796   : > { %v9310_v10 = vpop.permute.xlu1 %9309  ;;  %v9324_v44 = vpop.permute.xlu0 %9323  ;;  %v9677_v7 = vsel %vm9671_vm13, %v17541_v27, %v9250_v54  ;;  %v17548_v54 = vcombine.high %v17492_v55, %v17493_v0  ;;  %v17553_v27 = vld [vmem:[#allocation97_spill] sm:$0xff]  ;;  %v17555_v55 = vld [vmem:[#allocation44_spill] sm:$0xff] }
 0x797   : > { %v15842_v22 = vsel %vm9688_vm14, %v9675_v23, %v9310_v10  ;;  %v15845_v25 = vsel %vm9688_vm14, %v9682_v39, %v9324_v44  ;;  %v9684_v20 = vsel %vm9671_vm13, %v17544_v5, %v9264_v35  ;;  %v17545_v39 = vld [vmem:[#allocation94_spill] sm:$0xff]  ;;  %v17550_v44 = vld [vmem:[#allocation21_spill] sm:$0xff]  ;;  %v17554_v5 = vcombine.low %v15423_v13, %v15408_v19  ;;  %v17556_v0 = vld [vmem:[#allocation112_spill] sm:$0xff] }
 0x798   : > { %9567 = vrot.lane.b32.xlu0 %v17537_v36, %s10607_s21  ;;  %9521 = vrot.lane.b32.xlu1 %v17538_v14, %s10606_s20  ;;  %v17547_v51 = vcombine.low %v17545_v39, %v17546_v43  ;;  %v17549_v10 = vld [vmem:[#allocation106_spill] sm:$0xff] }
 0x799   : > { %v17551_v36 = vcombine.low %v17549_v10, %v17550_v44 }
 0x79a   : > { %v9314_v23 = vpop.permute.xlu1 %9313  ;;  %v9328_v9 = vpop.permute.xlu0 %9327 }
 0x79b   : > { %v9694_v38 = vsel %vm9688_vm14, %v9677_v7, %v9314_v23  ;;  %v9701_v48 = vsel %vm9688_vm14, %v9684_v20, %v9328_v9  ;;  %v9679_v35 = vsel %vm9671_vm13, %v17551_v36, %v9254_v37  ;;  %v7175_v7 = vcombine.low %v17553_v27, %v17552_v28  ;;  %v17558_v23 = vld [vmem:[#allocation117_spill] sm:$0xff]  ;;  %v17559_v9 = vld [vmem:[#allocation19_spill] sm:$0xff]  ;;  %v17564_v27 = vld [vmem:[#allocation54_spill] sm:$0xff] }
 0x79c   : > { %9571 = vrot.lane.b32.xlu0 %v17547_v51, %s10607_s21  ;;  %9525 = vrot.lane.b32.xlu1 %v17548_v54, %s10606_s20  ;;  %v17557_v20 = vcombine.low %v17555_v55, %v17556_v0  ;;  %v17560_v51 = vcombine.low %v17558_v23, %v17559_v9  ;;  %v17561_v36 = vld [vmem:[#allocation15_spill] sm:$0xff] }
 0x79d   : > { %v9672_v37 = vsel %vm9671_vm13, %v7175_v7, %v15666_v61  ;;  %v17563_v61 = vcombine.low %v15453_v24, %v15435_v50  ;;  %v17565_v7 = vld [vmem:[#allocation96_spill] sm:$0xff] }
 0x79e   : > { %v9318_v14 = vpop.permute.xlu1 %9317  ;;  %v9332_v40 = vpop.permute.xlu0 %9331  ;;  %v9681_v54 = vsel %vm9671_vm13, %v17560_v51, %v9258_v52  ;;  %v17566_v52 = vcombine.low %v17564_v27, %v17565_v7 }
 0x79f   : > { %v9696_v63 = vsel %vm9688_vm14, %v9679_v35, %v9318_v14  ;;  %v9703_v60 = vsel %vm9688_vm14, %v9686_v12, %v9332_v40  ;;  %v9689_v12 = vsel %vm9688_vm14, %v9672_v37, %v9304_v53  ;;  %v17562_v35 = vld [vmem:[#allocation28_spill] sm:$0xff] }
 0x7a0   : > { %9575 = vrot.lane.b32.xlu0 %v17554_v5, %s10607_s21  ;;  %9561 = vrot.lane.b32.xlu1 %v17557_v20, %s10607_s21  ;;  %v7447_v14 = vcombine.low %v17562_v35, %v17561_v36  ;;  %v17567_v5 = vld [vmem:[#allocation5_spill] sm:$0xff]  ;;  %v17568_v20 = vld [vmem:[#allocation63_spill] sm:$0xff]  ;;  %v17572_v36 = vld [vmem:[#allocation100_spill] sm:$0xff] }
 0x7a1   : > { %v17569_v37 = vcombine.low %v17567_v5, %v17568_v20 }
 0x7a2   : > { %v9322_v10 = vpop.permute.xlu1 %9321  ;;  %v9368_v44 = vpop.permute.xlu0 %9367  ;;  %v9674_v53 = vsel %vm9671_vm13, %v7447_v14, %v15675_v46  ;;  %v17571_v46 = vld [vmem:[#allocation120_spill] sm:$0xff] }
 0x7a3   : > { %v9698_v40 = vsel %vm9688_vm14, %v9681_v54, %v9322_v10  ;;  %v9706_v28 = vsel %vm9705_vm15, %v9689_v12, %v9368_v44  ;;  %v9683_v23 = vsel %vm9671_vm13, %v17569_v37, %v15761_v47  ;;  %v9691_v9 = vsel %vm9688_vm14, %v9674_v53, %v15763_v42  ;;  %v17574_v47 = vld [vmem:[#allocation71_spill] sm:$0xff]  ;;  %v17575_v14 = vld [vmem:[#allocation72_spill] sm:$0xff] }
 0x7a4   : > { %9579 = vrot.lane.b32.xlu0 %v17563_v61, %s10607_s21  ;;  %9565 = vrot.lane.b32.xlu1 %v17566_v52, %s10607_s21  ;;  %v17570_v44 = vcombine.low %v15481_v59, %v15462_v26  ;;  %v17573_v35 = vcombine.low %v17571_v46, %v17572_v36  ;;  %v17576_v42 = vcombine.low %v17574_v47, %v17575_v14  ;;  %v17577_v37 = vld [vmem:[#allocation76_spill] sm:$0xff] }
 0x7a6   : > { %v9326_v51 = vpop.permute.xlu1 %9325  ;;  %v9372_v54 = vpop.permute.xlu0 %9371  ;;  %v9685_v61 = vsel %vm9671_vm13, %v17576_v42, %v15777_v56  ;;  %v17583_v42 = vcombine.high %v17525_v4, %v17526_v3 }
 0x7a7   : > { %v9700_v12 = vsel %vm9688_vm14, %v9683_v23, %v9326_v51  ;;  %v9708_v10 = vsel %vm9705_vm15, %v9691_v9, %v9372_v54  ;;  %v17578_v23 = vld [vmem:[#allocation132_spill] sm:$0xff] }
 0x7a8   : > { %9583 = vrot.lane.b32.xlu0 %v17570_v44, %s10607_s21  ;;  %9569 = vrot.lane.b32.xlu1 %v17573_v35, %s10607_s21  ;;  %v17579_v9 = vcombine.low %v17577_v37, %v17578_v23 }
 0x7aa   : > { %v9330_v52 = vpop.permute.xlu1 %9329  ;;  %v9376_v53 = vpop.permute.xlu0 %9375 }
 0x7ab   : > { %v9702_v5 = vsel %vm9688_vm14, %v9685_v61, %v9330_v52  ;;  %v9710_v20 = vsel %vm9705_vm15, %v15780_v8, %v9376_v53  ;;  %v17580_v8 = vcombine.low %v15521_v16, %v15508_v49 }
 0x7ac   : > { %9587 = vrot.lane.b32.xlu0 %v9085_v62, %s10607_s21  ;;  %9573 = vrot.lane.b32.xlu1 %v17579_v9, %s10607_s21  ;;  %v17581_v62 = vcombine.high %v17515_v17, %v17516_v32 }
 0x7ae   : > { %v9334_v51 = vpop.permute.xlu1 %9333  ;;  %v9380_v54 = vpop.permute.xlu0 %9379 }
 0x7af   : > { %v9704_v56 = vsel %vm9688_vm14, %v15798_v21, %v9334_v51  ;;  %v9712_v44 = vsel %vm9705_vm15, %v15801_v29, %v9380_v54  ;;  %v17582_v29 = vcombine.low %v15549_v58, %v15531_v57 }
 0x7b0   : > { %9577 = vrot.lane.b32.xlu1 %v17580_v8, %s10607_s21  ;;  %9623 = vrot.lane.b32.xlu0 %v17581_v62, %s10608_s22 }
 0x7b2   : > { %v9370_v35 = vpop.permute.xlu1 %9369  ;;  %v9384_v47 = vpop.permute.xlu0 %9383 }
 0x7b3   : > { %v9707_v14 = vsel %vm9705_vm15, %v15820_v33, %v9370_v35  ;;  %v9714_v21 = vsel %vm9705_vm15, %v15823_v31, %v9384_v47  ;;  %v17584_v31 = vcombine.high %v17535_v41, %v17536_v1 }
 0x7b4   : > { %9581 = vrot.lane.b32.xlu1 %v17582_v29, %s10607_s21  ;;  %9627 = vrot.lane.b32.xlu0 %v17583_v42, %s10608_s22 }
 0x7b6   : > { %v9374_v17 = vpop.permute.xlu1 %9373  ;;  %v9388_v32 = vpop.permute.xlu0 %9387 }
 0x7b7   : > { %v9709_v61 = vsel %vm9705_vm15, %v15842_v22, %v9374_v17  ;;  %v9716_v33 = vsel %vm9705_vm15, %v15845_v25, %v9388_v32 }
 0x7b8   : > { %9585 = vrot.lane.b32.xlu1 %v8949_v30, %s10607_s21  ;;  %9631 = vrot.lane.b32.xlu0 %v17584_v31, %s10608_s22  ;;  %v17585_v30 = vcombine.high %v17545_v39, %v17546_v43 }
 0x7ba   : > { %v9378_v4 = vpop.permute.xlu1 %9377  ;;  %v9392_v3 = vpop.permute.xlu0 %9391 }
 0x7bb   : > { %v9711_v52 = vsel %vm9705_vm15, %v9694_v38, %v9378_v4  ;;  %v9718_v53 = vsel %vm9705_vm15, %v9701_v48, %v9392_v3  ;;  %v17586_v38 = vcombine.high %v17555_v55, %v17556_v0 }
 0x7bc   : > { %9589 = vrot.lane.b32.xlu1 %v9221_v11, %s10607_s21  ;;  %9635 = vrot.lane.b32.xlu0 %v17585_v30, %s10608_s22  ;;  %v17587_v11 = vcombine.high %v15423_v13, %v15408_v19 }
 0x7be   : > { %v9382_v22 = vpop.permute.xlu1 %9381  ;;  %v9396_v25 = vpop.permute.xlu0 %9395 }
 0x7bf   : > { %v9713_v41 = vsel %vm9705_vm15, %v9696_v63, %v9382_v22  ;;  %v9720_v1 = vsel %vm9705_vm15, %v9703_v60, %v9396_v25  ;;  %v17588_v63 = vcombine.high %v17564_v27, %v17565_v7  ;;  %v17589_v60 = vcombine.high %v15453_v24, %v15435_v50 }
 0x7c0   : > { %9625 = vrot.lane.b32.xlu1 %v17586_v38, %s10608_s22  ;;  %9639 = vrot.lane.b32.xlu0 %v17587_v11, %s10608_s22 }
 0x7c2   : > { %v9386_v48 = vpop.permute.xlu1 %9385  ;;  %v9432_v9 = vpop.permute.xlu0 %9431 }
 0x7c3   : > { %v9715_v39 = vsel %vm9705_vm15, %v9698_v40, %v9386_v48  ;;  %v16001_v43 = vsel %vm1127_vm2, %v9706_v28, %v9432_v9  ;;  %v17590_v40 = vcombine.high %v17571_v46, %v17572_v36  ;;  %v17591_v28 = vcombine.high %v15481_v59, %v15462_v26 }
 0x7c4   : > { %9629 = vrot.lane.b32.xlu1 %v17588_v63, %s10608_s22  ;;  %9643 = vrot.lane.b32.xlu0 %v17589_v60, %s10608_s22 }
 0x7c6   : > { %v9390_v55 = vpop.permute.xlu1 %9389  ;;  %v9436_v19 = vpop.permute.xlu0 %9435 }
 0x7c7   : > { %v9717_v13 = vsel %vm9705_vm15, %v9700_v12, %v9390_v55  ;;  %v16013_v0 = vsel %vm1127_vm2, %v9708_v10, %v9436_v19  ;;  %v17592_v12 = vcombine.high %v17577_v37, %v17578_v23  ;;  %v17593_v10 = vcombine.high %v15502_v34, %v15488_v18 }
 0x7c8   : > { %9633 = vrot.lane.b32.xlu1 %v17590_v40, %s10608_s22  ;;  %9647 = vrot.lane.b32.xlu0 %v17591_v28, %s10608_s22  ;;  %v17595_v18 = vcombine.high %v15549_v58, %v15531_v57  ;;  %v17597_v58 = vcombine.high %v15598_v15, %v15584_v45 }
 0x7ca   : > { %v9394_v27 = vpop.permute.xlu1 %9393  ;;  %v9440_v24 = vpop.permute.xlu0 %9439 }
 0x7cb   : > { %v9719_v50 = vsel %vm9705_vm15, %v9702_v5, %v9394_v27  ;;  %v16025_v7 = vsel %vm1127_vm2, %v9710_v20, %v9440_v24  ;;  %v17594_v5 = vcombine.high %v15521_v16, %v15508_v49  ;;  %v17596_v16 = vcombine.high %v15577_v6, %v15558_v2 }
 0x7cc   : > { %9637 = vrot.lane.b32.xlu1 %v17592_v12, %s10608_s22  ;;  %9651 = vrot.lane.b32.xlu0 %v17593_v10, %s10608_s22 }
 0x7ce   : > { %v9398_v46 = vpop.permute.xlu1 %9397  ;;  %v9444_v26 = vpop.permute.xlu0 %9443 }
 0x7cf   : > { %v9721_v59 = vsel %vm9705_vm15, %v9704_v56, %v9398_v46  ;;  %v16037_v36 = vsel %vm1127_vm2, %v9712_v44, %v9444_v26 }
 0x7d0   : > { %9641 = vrot.lane.b32.xlu1 %v17594_v5, %s10608_s22 }
 0x7d2   : > { %v9434_v20 = vpop.permute.xlu1 %9433  ;;  %v9448_v37 = vpop.permute.xlu0 %9447 }
 0x7d3   : > { %v16044_v23 = vsel %vm1127_vm2, %v9707_v14, %v9434_v20  ;;  %v16047_v34 = vsel %vm1127_vm2, %v9714_v21, %v9448_v37 }
 0x7d4   : > { %9645 = vrot.lane.b32.xlu1 %v17595_v18, %s10608_s22 }
 0x7d6   : > { %v9438_v51 = vpop.permute.xlu1 %9437  ;;  %v9452_v54 = vpop.permute.xlu0 %9451 }
 0x7d7   : > { %v16054_v56 = vsel %vm1127_vm2, %v9709_v61, %v9438_v51  ;;  %v16057_v49 = vsel %vm1127_vm2, %v9716_v33, %v9452_v54 }
 0x7d8   : > { %9649 = vrot.lane.b32.xlu1 %v17596_v16, %s10608_s22 }
 0x7da   : > { %v9442_v44 = vpop.permute.xlu1 %9441  ;;  %v9456_v8 = vpop.permute.xlu0 %9455 }
 0x7db   : > { %v16064_v62 = vsel %vm1127_vm2, %v9711_v52, %v9442_v44  ;;  %v16067_v57 = vsel %vm1127_vm2, %v9718_v53, %v9456_v8 }
 0x7dc   : > { %9653 = vrot.lane.b32.xlu1 %v17597_v58, %s10608_s22 }
 0x7de   : > { %v9446_v35 = vpop.permute.xlu1 %9445  ;;  %v9460_v47 = vpop.permute.xlu0 %9459 }
 0x7df   : > { %v16074_v14 = vsel %vm1127_vm2, %v9713_v41, %v9446_v35  ;;  %v16077_v2 = vsel %vm1127_vm2, %v9720_v1, %v9460_v47 }
 0x7e2   : > { %v9450_v6 = vpop.permute.xlu1 %9449  ;;  %v9496_v21 = vpop.permute.xlu0 %9495 }
 0x7e3   : > { %v16080_v29 = vsel %vm1127_vm2, %v9715_v39, %v9450_v6  ;;  %v9739_v10 = vsel %vm9738_vm0, %v16001_v43, %v9496_v21 }
 0x7e6   : > { %v9454_v42 = vpop.permute.xlu1 %9453  ;;  %v9500_v17 = vpop.permute.xlu0 %9499 }
 0x7e7   : > { %v16083_v32 = vsel %vm1127_vm2, %v9717_v13, %v9454_v42  ;;  %v9741_v20 = vsel %vm9738_vm0, %v16013_v0, %v9500_v17 }
 0x7ea   : > { %v9458_v45 = vpop.permute.xlu1 %9457  ;;  %v9504_v15 = vpop.permute.xlu0 %9503 }
 0x7eb   : > { %v16086_v61 = vsel %vm1127_vm2, %v9719_v50, %v9458_v45  ;;  %v9743_v54 = vsel %vm9738_vm0, %v16025_v7, %v9504_v15 }
 0x7ee   : > { %v9462_v33 = vpop.permute.xlu1 %9461  ;;  %v9508_v31 = vpop.permute.xlu0 %9507 }
 0x7ef   : > { %v16089_v4 = vsel %vm1127_vm2, %v9721_v59, %v9462_v33  ;;  %vm9772_vm2 = vcmask 113664   ;;  %v9745_v0 = vsel %vm9738_vm0, %v16037_v36, %v9508_v31 }
 0x7f2   : > { %v9498_v3 = vpop.permute.xlu1 %9497  ;;  %v9512_v52 = vpop.permute.xlu0 %9511 }
 0x7f3   : > { %v9740_v7 = vsel %vm9738_vm0, %v16044_v23, %v9498_v3  ;;  %v9747_v42 = vsel %vm9738_vm0, %v16047_v34, %v9512_v52 }
 0x7f6   : > { %v16091_v53 = vpop.permute.xlu1 %9501  ;;  %v16093_v30 = vpop.permute.xlu0 %9515 }
 0x7f7   : > { %v9742_v23 = vsel %vm9738_vm0, %v16054_v56, %v16091_v53  ;;  %v9749_v34 = vsel %vm9738_vm0, %v16057_v49, %v16093_v30 }
 0x7fa   : > { %v16095_v22 = vpop.permute.xlu1 %9505  ;;  %v16097_v25 = vpop.permute.xlu0 %9519 }
 0x7fb   : > { %v9744_v56 = vsel %vm9738_vm0, %v16064_v62, %v16095_v22  ;;  %v9751_v49 = vsel %vm9738_vm0, %v16067_v57, %v16097_v25 }
 0x7fe   : > { %v16099_v41 = vpop.permute.xlu1 %9509  ;;  %v16101_v1 = vpop.permute.xlu0 %9523 }
 0x7ff   : > { %v9746_v62 = vsel %vm9738_vm0, %v16074_v14, %v16099_v41  ;;  %v9753_v57 = vsel %vm9738_vm0, %v16077_v2, %v16101_v1 }
 0x802   : > { %v16103_v38 = vpop.permute.xlu1 %9513  ;;  %v9560_v11 = vpop.permute.xlu0 %9559 }
 0x803   : > { %v9756_v46 = vsel %vm9755_vm1, %v9739_v10, %v9560_v11  ;;  %v9748_v14 = vsel %vm9738_vm0, %v16080_v29, %v16103_v38 }
 0x806   : > { %v16105_v48 = vpop.permute.xlu1 %9517  ;;  %v9564_v9 = vpop.permute.xlu0 %9563 }
 0x807   : > { %v9758_v37 = vsel %vm9755_vm1, %v9741_v20, %v9564_v9 }
 0x80a   : > { %v16107_v39 = vpop.permute.xlu1 %9521  ;;  %v9568_v63 = vpop.permute.xlu0 %9567 }
 0x80b   : > { %v9760_v16 = vsel %vm9755_vm1, %v9743_v54, %v9568_v63  ;;  %v9752_v29 = vsel %vm9738_vm0, %v16086_v61, %v16107_v39 }
 0x80e   : > { %v16109_v60 = vpop.permute.xlu1 %9525  ;;  %v9572_v55 = vpop.permute.xlu0 %9571 }
 0x80f   : > { %v9762_v35 = vsel %vm9755_vm1, %v9745_v0, %v9572_v55 }
 0x812   : > { %v9562_v19 = vpop.permute.xlu1 %9561  ;;  %v9576_v13 = vpop.permute.xlu0 %9575 }
 0x813   : > { %v9757_v17 = vsel %vm9755_vm1, %v9740_v7, %v9562_v19  ;;  %v9764_v45 = vsel %vm9755_vm1, %v9747_v42, %v9576_v13 }
 0x816   : > { %v9566_v40 = vpop.permute.xlu1 %9565  ;;  %v9580_v28 = vpop.permute.xlu0 %9579 }
 0x817   : > { %v9759_v3 = vsel %vm9755_vm1, %v9742_v23, %v9566_v40  ;;  %v9766_v52 = vsel %vm9755_vm1, %v9749_v34, %v9580_v28 }
 0x81a   : > { %v9570_v27 = vpop.permute.xlu1 %9569  ;;  %v9584_v24 = vpop.permute.xlu0 %9583 }
 0x81b   : > { %v9761_v53 = vsel %vm9755_vm1, %v9744_v56, %v9570_v27  ;;  %v9768_v30 = vsel %vm9755_vm1, %v9751_v49, %v9584_v24 }
 0x81e   : > { %v16112_v50 = vpop.permute.xlu1 %9573  ;;  %v16114_v12 = vpop.permute.xlu0 %9587 }
 0x81f   : > { %v9763_v22 = vsel %vm9755_vm1, %v9746_v62, %v16112_v50  ;;  %v9770_v25 = vsel %vm9755_vm1, %v9753_v57, %v16114_v12  ;;  %v9750_v50 = vsel %vm9738_vm0, %v16083_v32, %v16105_v48  ;;  %v9754_v32 = vsel %vm9738_vm0, %v16089_v4, %v16109_v60 }
 0x822   : > { %v16124_v26 = vpop.permute.xlu1 %9577  ;;  %v9624_v59 = vpop.permute.xlu0 %9623 }
 0x823   : > { %v9773_v5 = vsel %vm9772_vm2, %v9756_v46, %v9624_v59  ;;  %v9765_v2 = vsel %vm9755_vm1, %v9748_v14, %v16124_v26 }
 0x824   : > { %9790 = vst.msk [vmem:[%s16119_s26] sm:$0xff] %vm9789_vm3, %v9773_v5 }
 0x826   : > { %v16132_v18 = vpop.permute.xlu1 %9581  ;;  %v9628_v43 = vpop.permute.xlu0 %9627 }
 0x827   : > { %v9775_v51 = vsel %vm9772_vm2, %v9758_v37, %v9628_v43  ;;  %v9767_v12 = vsel %vm9755_vm1, %v9750_v50, %v16132_v18 }
 0x828   : > { %9792 = vst.msk [vmem:[%s16119_s26 + $0x10] sm:$0xff] %vm9789_vm3, %v9775_v51 }
 0x82a   : > { %v9586_v44 = vpop.permute.xlu1 %9585  ;;  %v9632_v8 = vpop.permute.xlu0 %9631 }
 0x82b   : > { %v9777_v58 = vsel %vm9772_vm2, %v9760_v16, %v9632_v8  ;;  %v9769_v38 = vsel %vm9755_vm1, %v9752_v29, %v9586_v44 }
 0x82c   : > { %9794 = vst.msk [vmem:[%s16119_s26 + $0x20] sm:$0xff] %vm9789_vm3, %v9777_v58 }
 0x82e   : > { %v9590_v47 = vpop.permute.xlu1 %9589  ;;  %v9636_v6 = vpop.permute.xlu0 %9635 }
 0x82f   : > { %v9779_v21 = vsel %vm9772_vm2, %v9762_v35, %v9636_v6  ;;  %v9771_v48 = vsel %vm9755_vm1, %v9754_v32, %v9590_v47 }
 0x830   : > { %9796 = vst.msk [vmem:[%s16119_s26 + $0x30] sm:$0xff] %vm9789_vm3, %v9779_v21 }
 0x832   : > { %v9626_v36 = vpop.permute.xlu1 %9625  ;;  %v9640_v15 = vpop.permute.xlu0 %9639 }
 0x833   : > { %v9774_v33 = vsel %vm9772_vm2, %v9757_v17, %v9626_v36  ;;  %v9781_v31 = vsel %vm9772_vm2, %v9764_v45, %v9640_v15 }
 0x834   : > { %9791 = vst.msk [vmem:[%s16119_s26 + $0x8] sm:$0xff] %vm9789_vm3, %v9774_v33  ;;  %9798 = vst.msk [vmem:[%s16119_s26 + $0x40] sm:$0xff] %vm9789_vm3, %v9781_v31 }
 0x836   : > { %v9630_v11 = vpop.permute.xlu1 %9629  ;;  %v9644_v9 = vpop.permute.xlu0 %9643 }
 0x837   : > { %v9776_v63 = vsel %vm9772_vm2, %v9759_v3, %v9630_v11  ;;  %v9783_v55 = vsel %vm9772_vm2, %v9766_v52, %v9644_v9 }
 0x838   : > { %9793 = vst.msk [vmem:[%s16119_s26 + $0x18] sm:$0xff] %vm9789_vm3, %v9776_v63  ;;  %9800 = vst.msk [vmem:[%s16119_s26 + $0x50] sm:$0xff] %vm9789_vm3, %v9783_v55 }
 0x83a   : > { %v9634_v19 = vpop.permute.xlu1 %9633  ;;  %v9648_v13 = vpop.permute.xlu0 %9647 }
 0x83b   : > { %v9778_v40 = vsel %vm9772_vm2, %v9761_v53, %v9634_v19  ;;  %v9785_v28 = vsel %vm9772_vm2, %v9768_v30, %v9648_v13 }
 0x83c   : > { %9795 = vst.msk [vmem:[%s16119_s26 + $0x28] sm:$0xff] %vm9789_vm3, %v9778_v40  ;;  %9802 = vst.msk [vmem:[%s16119_s26 + $0x60] sm:$0xff] %vm9789_vm3, %v9785_v28 }
 0x83e   : > { %v9638_v27 = vpop.permute.xlu1 %9637  ;;  %v9652_v24 = vpop.permute.xlu0 %9651 }
 0x83f   : > { %v9780_v10 = vsel %vm9772_vm2, %v9763_v22, %v9638_v27  ;;  %v9787_v46 = vsel %vm9772_vm2, %v9770_v25, %v9652_v24 }
 0x840   : > { %9797 = vst.msk [vmem:[%s16119_s26 + $0x38] sm:$0xff] %vm9789_vm3, %v9780_v10  ;;  %9804 = vst.msk [vmem:[%s16119_s26 + $0x70] sm:$0xff] %vm9789_vm3, %v9787_v46 }
 0x842   : > { %v9642_v41 = vpop.permute.xlu1 %9641 }
 0x843   : > { %v9782_v1 = vsel %vm9772_vm2, %v9765_v2, %v9642_v41 }
 0x844   : > { %9799 = vst.msk [vmem:[%s16119_s26 + $0x48] sm:$0xff] %vm9789_vm3, %v9782_v1 }
 0x846   : > { %v9646_v59 = vpop.permute.xlu1 %9645 }
 0x847   : > { %v9784_v5 = vsel %vm9772_vm2, %v9767_v12, %v9646_v59 }
 0x848   : > { %9801 = vst.msk [vmem:[%s16119_s26 + $0x58] sm:$0xff] %vm9789_vm3, %v9784_v5 }
 0x84a   : > { %v9650_v26 = vpop.permute.xlu1 %9649 }
 0x84b   : > { %v9786_v20 = vsel %vm9772_vm2, %v9769_v38, %v9650_v26 }
 0x84c   : > { %9803 = vst.msk [vmem:[%s16119_s26 + $0x68] sm:$0xff] %vm9789_vm3, %v9786_v20 }
 0x84e   : > { %v9654_v37 = vpop.permute.xlu1 %9653 }
 0x84f   : > { %v9788_v18 = vsel %vm9772_vm2, %v9771_v48, %v9654_v37 }
 0x850   : > { %9805 = vst.msk [vmem:[%s16119_s26 + $0x78] sm:$0xff] %vm9789_vm3, %v9788_v18 }
 0x851 PF: > { %p11_p9 = scmp.ge.s32.totalorder %s10646_s16, 4   ;;  %s17598_s12 = smov %s10590_s13 }
 0x852   : > { %s17599_s13 = smov %s10655_s19  ;;  %s17600_s14 = smov %s10646_s16 }
 0x853   :  { %13 = sbr.rel (!%p11_p9) target bundleno = 2 (0x2), region = 127 }

</bundles_post_ra>
